<compile_context>
chip_gen: v7x
topology: tpu7x:2x2x1
jax: 0.10.0
libtpu: 0.0.40
codegen_flags: <defaults>
</compile_context>

<pallas_src>
import functools

import numpy as np
import jax
import jax.numpy as jnp
from jax.experimental import pallas as pl
from jax.experimental.pallas import tpu as pltpu


# --------------------------------------------------------------------------------------
# In-kernel helpers
# --------------------------------------------------------------------------------------

def _causal_shift(x, s):
    """out[:, t] = x[:, t - s] (zeros for t < s) — pure lane shift, no matmul."""
    c, t = x.shape
    if s == 0:
        return x
    if s >= t:
        return jnp.zeros_like(x)
    pad = jnp.zeros((c, s), x.dtype)
    return jnp.concatenate([pad, x[:, : t - s]], axis=1)


# --------------------------------------------------------------------------------------
# Fused SingleStageModel kernel
#   (softmax?) -> (input AvgPool?) -> (conv_1x1?) -> L dilated residual layers
#   -> (hier AvgPool?) -> conv_out_classes
# --------------------------------------------------------------------------------------

def _make_stage_kernel(num_layers, use_output, in_softmax, has_prepool, has_hier):
    def kernel(*refs):
        it = iter(refs)
        x_ref = next(it)
        if use_output:
            w_in_ref, b_in_ref = next(it), next(it)
        wd_ref, bd_ref, w1_ref, b1_ref = next(it), next(it), next(it), next(it)
        prepool_ref = next(it) if has_prepool else None
        hier_ref = next(it) if has_hier else None
        w_out_ref, b_out_ref = next(it), next(it)
        f_ref, cls_ref = next(it), next(it)

        out = x_ref[0]                                            # (Cin, T)

        if in_softmax:                                            # F.softmax(dim=1)
            m = jnp.max(out, axis=0, keepdims=True)
            e = jnp.exp(out - m)
            out = e * pl.reciprocal(jnp.sum(e, axis=0, keepdims=True), approx=True)

        if has_prepool:                                           # AvgPool1d(16, 16) on input
            out = jnp.dot(out, prepool_ref[...], preferred_element_type=jnp.float32)

        if use_output:                                            # conv_1x1: Cin -> C
            out = (jnp.dot(w_in_ref[...], out, preferred_element_type=jnp.float32)
                   + b_in_ref[...])

        # Dilated residual layers (causal, kernel_size=3), unrolled: dilations are static.
        for i in range(num_layers):
            d = 2 ** i
            x_d = _causal_shift(out, d)
            x_2d = _causal_shift(out, 2 * d)
            acc = (jnp.dot(wd_ref[3 * i + 2], out,  preferred_element_type=jnp.float32)
                   + jnp.dot(wd_ref[3 * i + 1], x_d,  preferred_element_type=jnp.float32)
                   + jnp.dot(wd_ref[3 * i + 0], x_2d, preferred_element_type=jnp.float32)
                   + bd_ref[i])
            h = jnp.maximum(acc, 0.0)                             # ReLU
            out = (out                                            # residual (dropout = identity)
                   + jnp.dot(w1_ref[i], h, preferred_element_type=jnp.float32)
                   + b1_ref[i])

        if has_hier:                                              # hier AvgPool1d(k, k)
            out = jnp.dot(out, hier_ref[...], preferred_element_type=jnp.float32)

        f_ref[0] = out
        cls_ref[0] = (jnp.dot(w_out_ref[...], out, preferred_element_type=jnp.float32)
                      + b_out_ref[...])
    return kernel


def _rep_spec(arr):
    """Full-extent, grid-invariant BlockSpec (weights / constant matrices)."""
    nd = arr.ndim
    return pl.BlockSpec(arr.shape, lambda n, _nd=nd: (0,) * _nd)


def stage_forward(sp, x, *, use_output, in_softmax=False, prepool_k=None, hier_k=None):
    """One fused SingleStageModel1.forward.  Returns (f, out_classes)."""
    N, Cin, T = x.shape
    L, _, C, _ = sp['wd'].shape
    K = sp['w_out'].shape[0]
    wd_flat = sp['wd'].reshape(3 * L, C, C)

    inputs = [x]
    specs = [pl.BlockSpec((1, Cin, T), lambda n: (n, 0, 0))]
    if use_output:
        inputs += [sp['w_in'], sp['b_in']]
        specs += [_rep_spec(sp['w_in']), _rep_spec(sp['b_in'])]
    for a in (wd_flat, sp['bd'], sp['w1'], sp['b1']):
        inputs.append(a)
        specs.append(_rep_spec(a))

    t_work = T
    if prepool_k is not None:
        m = jnp.asarray(avgpool_matrix(t_work, prepool_k))
        t_work //= prepool_k
        inputs.append(m)
        specs.append(_rep_spec(m))
    t_out = t_work
    if hier_k is not None:
        m = jnp.asarray(avgpool_matrix(t_work, hier_k))
        t_out //= hier_k
        inputs.append(m)
        specs.append(_rep_spec(m))

    inputs += [sp['w_out'], sp['b_out']]
    specs += [_rep_spec(sp['w_out']), _rep_spec(sp['b_out'])]

    kernel = _make_stage_kernel(L, use_output, in_softmax,
                                prepool_k is not None, hier_k is not None)
    f, cls = pl.pallas_call(
        kernel,
        out_shape=(jax.ShapeDtypeStruct((N, C, t_out), jnp.float32),
                   jax.ShapeDtypeStruct((N, K, t_out), jnp.float32)),
        grid=(N,),
        in_specs=specs,
        out_specs=(pl.BlockSpec((1, C, t_out), lambda n: (n, 0, 0)),
                   pl.BlockSpec((1, K, t_out), lambda n: (n, 0, 0))),
        compiler_params=pltpu.CompilerParams(dimension_semantics=("parallel",)),
    )(*inputs)
    return f, cls


# --------------------------------------------------------------------------------------
# Fused FPN kernel: 3x (linear-interp upsample + latlayer1) + 4x conv_out heads
# --------------------------------------------------------------------------------------

def _fpn_kernel(c1_ref, c2_ref, c3_ref, p4_ref, lw_ref, lb_ref,
                m43_ref, m32_ref, m21_ref, ow_ref, ob_ref,
                p1_ref, p2_ref, p3_ref, o1_ref, o2_ref, o3_ref, o4_ref):
    lw, lb = lw_ref[...], lb_ref[...]
    ow, ob = ow_ref[...], ob_ref[...]
    p4 = p4_ref[0]
    # p_k = interpolate(p_{k+1}, size=T(c_k), mode='linear') + latlayer1(c_k)
    p3 = (jnp.dot(p4, m43_ref[...], preferred_element_type=jnp.float32)
          + jnp.dot(lw, c3_ref[0], preferred_element_type=jnp.float32) + lb)
    p2 = (jnp.dot(p3, m32_ref[...], preferred_element_type=jnp.float32)
          + jnp.dot(lw, c2_ref[0], preferred_element_type=jnp.float32) + lb)
    p1 = (jnp.dot(p2, m21_ref[...], preferred_element_type=jnp.float32)
          + jnp.dot(lw, c1_ref[0], preferred_element_type=jnp.float32) + lb)
    p1_ref[0], p2_ref[0], p3_ref[0] = p1, p2, p3
    o1_ref[0] = jnp.dot(ow, p1, preferred_element_type=jnp.float32) + ob
    o2_ref[0] = jnp.dot(ow, p2, preferred_element_type=jnp.float32) + ob
    o3_ref[0] = jnp.dot(ow, p3, preferred_element_type=jnp.float32) + ob
    o4_ref[0] = jnp.dot(ow, p4, preferred_element_type=jnp.float32) + ob


def fpn_and_heads(fpn_p, conv_out_p, f_list):
    c1, c2, c3, p4 = f_list
    N, C, T1 = c1.shape
    T2, T3, T4 = c2.shape[-1], c3.shape[-1], p4.shape[-1]
    lw, lb = fpn_p['latlayer1']
    ow, ob = conv_out_p
    K = ow.shape[0]
    m43 = jnp.asarray(linear_interp_matrix(T4, T3))
    m32 = jnp.asarray(linear_interp_matrix(T3, T2))
    m21 = jnp.asarray(linear_interp_matrix(T2, T1))

    def samp_spec(arr):
        c, t = arr.shape[1], arr.shape[2]
        return pl.BlockSpec((1, c, t), lambda n: (n, 0, 0))

    inputs = [c1, c2, c3, p4, lw, lb, m43, m32, m21, ow, ob]
    specs = [samp_spec(c1), samp_spec(c2), samp_spec(c3), samp_spec(p4),
             _rep_spec(lw), _rep_spec(lb), _rep_spec(m43), _rep_spec(m32),
             _rep_spec(m21), _rep_spec(ow), _rep_spec(ob)]
    out_shape = (jax.ShapeDtypeStruct((N, C, T1), jnp.float32),
                 jax.ShapeDtypeStruct((N, C, T2), jnp.float32),
                 jax.ShapeDtypeStruct((N, C, T3), jnp.float32),
                 jax.ShapeDtypeStruct((N, K, T1), jnp.float32),
                 jax.ShapeDtypeStruct((N, K, T2), jnp.float32),
                 jax.ShapeDtypeStruct((N, K, T3), jnp.float32),
                 jax.ShapeDtypeStruct((N, K, T4), jnp.float32))
    out_specs = tuple(pl.BlockSpec((1, s.shape[1], s.shape[2]), lambda n: (n, 0, 0))
                      for s in out_shape)

    p1, p2, p3, o1, o2, o3, o4 = pl.pallas_call(
        _fpn_kernel, out_shape=out_shape, grid=(N,),
        in_specs=specs, out_specs=out_specs,
        compiler_params=pltpu.CompilerParams(dimension_semantics=("parallel",)),
    )(*inputs)
    return [p1, p2, p3, p4], [o1, o2, o3, o4]


# --------------------------------------------------------------------------------------
# Cached resampling matrices (trace-time constants under jit)
# --------------------------------------------------------------------------------------

@functools.lru_cache(maxsize=None)
def avgpool_matrix(t_in, k):
    """(x @ M) == AvgPool1d(kernel_size=k, stride=k)(x) on the time axis."""
    t_out = t_in // k
    M = np.zeros((t_in, t_out), np.float32)
    for j in range(t_out):
        M[j * k:(j + 1) * k, j] = 1.0 / k
    return M


@functools.lru_cache(maxsize=None)
def linear_interp_matrix(t_in, t_out):
    """(x @ M) == F.interpolate(x, size=t_out, mode='linear', align_corners=False)."""
    M = np.zeros((t_in, t_out), np.float32)
    scale = t_in / t_out
    for j in range(t_out):
        src = max((j + 0.5) * scale - 0.5, 0.0)
        i0 = min(int(np.floor(src)), t_in - 1)
        i1 = min(i0 + 1, t_in - 1)
        frac = src - i0
        M[i0, j] += 1.0 - frac
        M[i1, j] += frac
    return M


# --------------------------------------------------------------------------------------
# Parameter init (deterministic, PyTorch-like uniform)
# --------------------------------------------------------------------------------------

def _init_conv(key, cout, cin, ksize):
    kw, kb = jax.random.split(key)
    bound = 1.0 / np.sqrt(cin * ksize)
    if ksize == 1:
        w = jax.random.uniform(kw, (cout, cin), jnp.float32, -bound, bound)
    else:
        w = jax.random.uniform(kw, (ksize, cout, cin), jnp.float32, -bound, bound)
    b = jax.random.uniform(kb, (cout, 1), jnp.float32, -bound, bound)
    return w, b


def init_single_stage(key, num_layers, num_f_maps, dim, num_classes, use_output):
    keys = jax.random.split(key, num_layers + 2)
    p = {}
    if use_output:
        p['w_in'], p['b_in'] = _init_conv(keys[0], num_f_maps, dim, 1)
    wd, bd, w1, b1 = [], [], [], []
    for i in range(num_layers):
        k1, k2 = jax.random.split(keys[1 + i])
        w3, b3 = _init_conv(k1, num_f_maps, num_f_maps, 3)
        wl, bl = _init_conv(k2, num_f_maps, num_f_maps, 1)
        wd.append(w3); bd.append(b3); w1.append(wl); b1.append(bl)
    p['wd'] = jnp.stack(wd)      # (L, 3, C, C)
    p['bd'] = jnp.stack(bd)      # (L, C, 1)
    p['w1'] = jnp.stack(w1)      # (L, C, C)
    p['b1'] = jnp.stack(b1)      # (L, C, 1)
    p['w_out'], p['b_out'] = _init_conv(keys[-1], num_classes, num_f_maps, 1)
    return p


def init_mstr(key, num_layers_Basic, num_layers_R, num_R,
              num_f_maps, num_f_dim, num_classes):
    keys = jax.random.split(key, 2 * num_R + 5)
    p = {}
    p['TCN'] = init_single_stage(keys[0], num_layers_Basic, num_f_maps,
                                 num_f_dim, num_classes, use_output=True)
    p['Rs'] = [init_single_stage(keys[1 + r], num_layers_R, num_f_maps,
                                 num_classes, num_classes, use_output=False)
               for r in range(num_R)]
    # TODO(synk): FPN.latlayer2 / latlayer3 exist in the PyTorch module but are never
    # used by its forward, so they are not materialized here.
    p['fpn'] = {'latlayer1': _init_conv(keys[num_R + 1], num_f_maps, num_f_maps, 1)}
    p['conv_out'] = _init_conv(keys[num_R + 2], num_classes, num_f_maps, 1)
    p['fast_stage1'] = init_single_stage(keys[num_R + 3], num_layers_Basic, num_f_maps,
                                         num_f_dim, num_classes, use_output=True)
    p['fast_Rs'] = [init_single_stage(keys[num_R + 4 + r], num_layers_R, num_f_maps,
                                      num_classes, num_classes, use_output=True)
                    for r in range(num_R)]
    return p


# --------------------------------------------------------------------------------------
# Model forward (functional, composing the fused Pallas kernels)
# --------------------------------------------------------------------------------------

def mstr_forward(params, x, *, train_k):
    xx = jnp.transpose(x, (0, 2, 1))                  # (N, T, D) -> (N, D, T)

    f, _ = stage_forward(params['TCN'], xx, use_output=True)
    f_list = [f]
    for rp in params['Rs']:
        f, _ = stage_forward(rp, f, use_output=False, hier_k=train_k)
        f_list.append(f)

    f_list, out_list = fpn_and_heads(params['fpn'], params['conv_out'], f_list)

    fast_f, fast_out = stage_forward(params['fast_stage1'], xx,
                                     use_output=True, prepool_k=16)   # AvgPool1d(16,16) fused
    f_list.append(fast_f)
    out_list.append(fast_out)
    for rp in params['fast_Rs']:
        fast_f, fast_out = stage_forward(rp, fast_out, use_output=True, in_softmax=True)
        f_list.append(fast_f)
        out_list.append(fast_out)

    return out_list, f_list


# --------------------------------------------------------------------------------------
# Demo
# --------------------------------------------------------------------------------------

if __name__ == "__main__":
    # batch=2, seq T=128, input feature dim=64, num_f_maps=32, num_classes=8
    # num_layers_Basic=2, num_layers_R=2, num_R=3 (FPN needs 4 pyramid levels)
    # args.train (hier pool kernel of each R stage) = 2
    N, T, num_f_dim = 2, 128, 64
    num_f_maps, num_classes = 32, 8
    num_layers_Basic, num_layers_R, num_R = 2, 2, 3
    train_k = 2

    key = jax.random.PRNGKey(0)
    kparam, kx = jax.random.split(key)
    params = init_mstr(kparam, num_layers_Basic, num_layers_R, num_R,
                       num_f_maps, num_f_dim, num_classes)
    x = jax.random.normal(kx, (N, T, num_f_dim), jnp.float32)

    fwd = jax.jit(functools.partial(mstr_forward, train_k=train_k))
    out_list, f_list = fwd(params, x)
    for a in out_list + f_list:
        a.block_until_ready()
    print("KERNEL_OK")
</pallas_src>

<mosaic_0001>
module attributes {stable_mosaic.version = 11 : i64} {
  func.func @kernel(%arg0: i32, %arg1: memref<1x64x128xf32, #tpu.memory_space<vmem>>, %arg2: memref<32x64xf32, #tpu.memory_space<vmem>>, %arg3: memref<32x1xf32, #tpu.memory_space<vmem>>, %arg4: memref<6x32x32xf32, #tpu.memory_space<vmem>>, %arg5: memref<2x32x1xf32, #tpu.memory_space<vmem>>, %arg6: memref<2x32x32xf32, #tpu.memory_space<vmem>>, %arg7: memref<2x32x1xf32, #tpu.memory_space<vmem>>, %arg8: memref<8x32xf32, #tpu.memory_space<vmem>>, %arg9: memref<8x1xf32, #tpu.memory_space<vmem>>, %arg10: memref<1x32x128xf32, #tpu.memory_space<vmem>>, %arg11: memref<1x8x128xf32, #tpu.memory_space<vmem>>) attributes {dimension_semantics = [#tpu.dimension_semantics<parallel>], iteration_bounds = array<i64: 2>, scalar_prefetch = 0 : i64, scratch_operands = 0 : i64, tpu.core_type = #tpu.core_type<tc>, window_params = [{transform_indices = @transform_0, window_bounds = array<i64: 1, 64, 128>}, {pipeline_mode = #tpu.pipeline_mode<synchronous>, transform_indices = @transform_1, window_bounds = array<i64: 32, 64>}, {pipeline_mode = #tpu.pipeline_mode<synchronous>, transform_indices = @transform_2, window_bounds = array<i64: 32, 1>}, {pipeline_mode = #tpu.pipeline_mode<synchronous>, transform_indices = @transform_3, window_bounds = array<i64: 6, 32, 32>}, {pipeline_mode = #tpu.pipeline_mode<synchronous>, transform_indices = @transform_4, window_bounds = array<i64: 2, 32, 1>}, {pipeline_mode = #tpu.pipeline_mode<synchronous>, transform_indices = @transform_5, window_bounds = array<i64: 2, 32, 32>}, {pipeline_mode = #tpu.pipeline_mode<synchronous>, transform_indices = @transform_6, window_bounds = array<i64: 2, 32, 1>}, {pipeline_mode = #tpu.pipeline_mode<synchronous>, transform_indices = @transform_7, window_bounds = array<i64: 8, 32>}, {pipeline_mode = #tpu.pipeline_mode<synchronous>, transform_indices = @transform_8, window_bounds = array<i64: 8, 1>}, {transform_indices = @transform_9, window_bounds = array<i64: 1, 32, 128>}, {transform_indices = @transform_10, window_bounds = array<i64: 1, 8, 128>}]} {
    %c0 = arith.constant 0 : index
    %c0_0 = arith.constant 0 : index
    %c0_1 = arith.constant 0 : index
    %0 = vector.load %arg1[%c0, %c0_0, %c0_1] : memref<1x64x128xf32, #tpu.memory_space<vmem>>, vector<1x64x128xf32>
    %1 = vector.shape_cast %0 : vector<1x64x128xf32> to vector<64x128xf32>
    %c0_2 = arith.constant 0 : index
    %c0_3 = arith.constant 0 : index
    %2 = vector.load %arg2[%c0_2, %c0_3] : memref<32x64xf32, #tpu.memory_space<vmem>>, vector<32x64xf32>
    %cst = arith.constant dense<0.000000e+00> : vector<32x128xf32>
    %3 = tpu.matmul %2, %1, %cst {dimension_numbers = #tpu.dot_dimension_numbers<[1], [0], [0], [1], [0, 0, 1, 1], [], []>} : vector<32x64xf32>, vector<64x128xf32>, vector<32x128xf32> -> vector<32x128xf32>
    %c0_4 = arith.constant 0 : index
    %c0_5 = arith.constant 0 : index
    %4 = vector.load %arg3[%c0_4, %c0_5] : memref<32x1xf32, #tpu.memory_space<vmem>>, vector<32x1xf32>
    %5 = vector.broadcast %4 : vector<32x1xf32> to vector<32x128xf32>
    %6 = arith.addf %3, %5 : vector<32x128xf32>
    %cst_6 = arith.constant 0.000000e+00 : f32
    %7 = vector.broadcast %cst_6 : f32 to vector<32x1xf32>
    %8 = vector.extract_strided_slice %6 {offsets = [0, 0], sizes = [32, 127], strides = [1, 1]} : vector<32x128xf32> to vector<32x127xf32>
    %9 = tpu.concatenate %7, %8 in 1 : vector<32x1xf32>, vector<32x127xf32> -> vector<32x128xf32>
    %cst_7 = arith.constant 0.000000e+00 : f32
    %10 = vector.broadcast %cst_7 : f32 to vector<32x2xf32>
    %11 = vector.extract_strided_slice %6 {offsets = [0, 0], sizes = [32, 126], strides = [1, 1]} : vector<32x128xf32> to vector<32x126xf32>
    %12 = tpu.concatenate %10, %11 in 1 : vector<32x2xf32>, vector<32x126xf32> -> vector<32x128xf32>
    %c2 = arith.constant 2 : index
    %c0_8 = arith.constant 0 : index
    %c0_9 = arith.constant 0 : index
    %13 = vector.load %arg4[%c2, %c0_8, %c0_9] : memref<6x32x32xf32, #tpu.memory_space<vmem>>, vector<1x32x32xf32>
    %14 = vector.shape_cast %13 : vector<1x32x32xf32> to vector<32x32xf32>
    %cst_10 = arith.constant dense<0.000000e+00> : vector<32x128xf32>
    %15 = tpu.matmul %14, %6, %cst_10 {dimension_numbers = #tpu.dot_dimension_numbers<[1], [0], [0], [1], [0, 0, 1, 1], [], []>} : vector<32x32xf32>, vector<32x128xf32>, vector<32x128xf32> -> vector<32x128xf32>
    %c1 = arith.constant 1 : index
    %c0_11 = arith.constant 0 : index
    %c0_12 = arith.constant 0 : index
    %16 = vector.load %arg4[%c1, %c0_11, %c0_12] : memref<6x32x32xf32, #tpu.memory_space<vmem>>, vector<1x32x32xf32>
    %17 = vector.shape_cast %16 : vector<1x32x32xf32> to vector<32x32xf32>
    %cst_13 = arith.constant dense<0.000000e+00> : vector<32x128xf32>
    %18 = tpu.matmul %17, %9, %cst_13 {dimension_numbers = #tpu.dot_dimension_numbers<[1], [0], [0], [1], [0, 0, 1, 1], [], []>} : vector<32x32xf32>, vector<32x128xf32>, vector<32x128xf32> -> vector<32x128xf32>
    %19 = arith.addf %15, %18 : vector<32x128xf32>
    %c0_14 = arith.constant 0 : index
    %c0_15 = arith.constant 0 : index
    %c0_16 = arith.constant 0 : index
    %20 = vector.load %arg4[%c0_14, %c0_15, %c0_16] : memref<6x32x32xf32, #tpu.memory_space<vmem>>, vector<1x32x32xf32>
    %21 = vector.shape_cast %20 : vector<1x32x32xf32> to vector<32x32xf32>
    %cst_17 = arith.constant dense<0.000000e+00> : vector<32x128xf32>
    %22 = tpu.matmul %21, %12, %cst_17 {dimension_numbers = #tpu.dot_dimension_numbers<[1], [0], [0], [1], [0, 0, 1, 1], [], []>} : vector<32x32xf32>, vector<32x128xf32>, vector<32x128xf32> -> vector<32x128xf32>
    %23 = arith.addf %19, %22 : vector<32x128xf32>
    %c0_18 = arith.constant 0 : index
    %c0_19 = arith.constant 0 : index
    %c0_20 = arith.constant 0 : index
    %24 = vector.load %arg5[%c0_18, %c0_19, %c0_20] : memref<2x32x1xf32, #tpu.memory_space<vmem>>, vector<1x32x1xf32>
    %25 = vector.shape_cast %24 : vector<1x32x1xf32> to vector<32x1xf32>
    %26 = vector.broadcast %25 : vector<32x1xf32> to vector<32x128xf32>
    %27 = arith.addf %23, %26 : vector<32x128xf32>
    %cst_21 = arith.constant 0.000000e+00 : f32
    %28 = vector.broadcast %cst_21 : f32 to vector<32x128xf32>
    %29 = arith.maximumf %27, %28 : vector<32x128xf32>
    %c0_22 = arith.constant 0 : index
    %c0_23 = arith.constant 0 : index
    %c0_24 = arith.constant 0 : index
    %30 = vector.load %arg6[%c0_22, %c0_23, %c0_24] : memref<2x32x32xf32, #tpu.memory_space<vmem>>, vector<1x32x32xf32>
    %31 = vector.shape_cast %30 : vector<1x32x32xf32> to vector<32x32xf32>
    %cst_25 = arith.constant dense<0.000000e+00> : vector<32x128xf32>
    %32 = tpu.matmul %31, %29, %cst_25 {dimension_numbers = #tpu.dot_dimension_numbers<[1], [0], [0], [1], [0, 0, 1, 1], [], []>} : vector<32x32xf32>, vector<32x128xf32>, vector<32x128xf32> -> vector<32x128xf32>
    %33 = arith.addf %6, %32 : vector<32x128xf32>
    %c0_26 = arith.constant 0 : index
    %c0_27 = arith.constant 0 : index
    %c0_28 = arith.constant 0 : index
    %34 = vector.load %arg7[%c0_26, %c0_27, %c0_28] : memref<2x32x1xf32, #tpu.memory_space<vmem>>, vector<1x32x1xf32>
    %35 = vector.shape_cast %34 : vector<1x32x1xf32> to vector<32x1xf32>
    %36 = vector.broadcast %35 : vector<32x1xf32> to vector<32x128xf32>
    %37 = arith.addf %33, %36 : vector<32x128xf32>
    %cst_29 = arith.constant 0.000000e+00 : f32
    %38 = vector.broadcast %cst_29 : f32 to vector<32x2xf32>
    %39 = vector.extract_strided_slice %37 {offsets = [0, 0], sizes = [32, 126], strides = [1, 1]} : vector<32x128xf32> to vector<32x126xf32>
    %40 = tpu.concatenate %38, %39 in 1 : vector<32x2xf32>, vector<32x126xf32> -> vector<32x128xf32>
    %cst_30 = arith.constant 0.000000e+00 : f32
    %41 = vector.broadcast %cst_30 : f32 to vector<32x4xf32>
    %42 = vector.extract_strided_slice %37 {offsets = [0, 0], sizes = [32, 124], strides = [1, 1]} : vector<32x128xf32> to vector<32x124xf32>
    %43 = tpu.concatenate %41, %42 in 1 : vector<32x4xf32>, vector<32x124xf32> -> vector<32x128xf32>
    %c5 = arith.constant 5 : index
    %c0_31 = arith.constant 0 : index
    %c0_32 = arith.constant 0 : index
    %44 = vector.load %arg4[%c5, %c0_31, %c0_32] : memref<6x32x32xf32, #tpu.memory_space<vmem>>, vector<1x32x32xf32>
    %45 = vector.shape_cast %44 : vector<1x32x32xf32> to vector<32x32xf32>
    %cst_33 = arith.constant dense<0.000000e+00> : vector<32x128xf32>
    %46 = tpu.matmul %45, %37, %cst_33 {dimension_numbers = #tpu.dot_dimension_numbers<[1], [0], [0], [1], [0, 0, 1, 1], [], []>} : vector<32x32xf32>, vector<32x128xf32>, vector<32x128xf32> -> vector<32x128xf32>
    %c4 = arith.constant 4 : index
    %c0_34 = arith.constant 0 : index
    %c0_35 = arith.constant 0 : index
    %47 = vector.load %arg4[%c4, %c0_34, %c0_35] : memref<6x32x32xf32, #tpu.memory_space<vmem>>, vector<1x32x32xf32>
    %48 = vector.shape_cast %47 : vector<1x32x32xf32> to vector<32x32xf32>
    %cst_36 = arith.constant dense<0.000000e+00> : vector<32x128xf32>
    %49 = tpu.matmul %48, %40, %cst_36 {dimension_numbers = #tpu.dot_dimension_numbers<[1], [0], [0], [1], [0, 0, 1, 1], [], []>} : vector<32x32xf32>, vector<32x128xf32>, vector<32x128xf32> -> vector<32x128xf32>
    %50 = arith.addf %46, %49 : vector<32x128xf32>
    %c3 = arith.constant 3 : index
    %c0_37 = arith.constant 0 : index
    %c0_38 = arith.constant 0 : index
    %51 = vector.load %arg4[%c3, %c0_37, %c0_38] : memref<6x32x32xf32, #tpu.memory_space<vmem>>, vector<1x32x32xf32>
    %52 = vector.shape_cast %51 : vector<1x32x32xf32> to vector<32x32xf32>
    %cst_39 = arith.constant dense<0.000000e+00> : vector<32x128xf32>
    %53 = tpu.matmul %52, %43, %cst_39 {dimension_numbers = #tpu.dot_dimension_numbers<[1], [0], [0], [1], [0, 0, 1, 1], [], []>} : vector<32x32xf32>, vector<32x128xf32>, vector<32x128xf32> -> vector<32x128xf32>
    %54 = arith.addf %50, %53 : vector<32x128xf32>
    %c1_40 = arith.constant 1 : index
    %c0_41 = arith.constant 0 : index
    %c0_42 = arith.constant 0 : index
    %55 = vector.load %arg5[%c1_40, %c0_41, %c0_42] : memref<2x32x1xf32, #tpu.memory_space<vmem>>, vector<1x32x1xf32>
    %56 = vector.shape_cast %55 : vector<1x32x1xf32> to vector<32x1xf32>
    %57 = vector.broadcast %56 : vector<32x1xf32> to vector<32x128xf32>
    %58 = arith.addf %54, %57 : vector<32x128xf32>
    %cst_43 = arith.constant 0.000000e+00 : f32
    %59 = vector.broadcast %cst_43 : f32 to vector<32x128xf32>
    %60 = arith.maximumf %58, %59 : vector<32x128xf32>
    %c1_44 = arith.constant 1 : index
    %c0_45 = arith.constant 0 : index
    %c0_46 = arith.constant 0 : index
    %61 = vector.load %arg6[%c1_44, %c0_45, %c0_46] : memref<2x32x32xf32, #tpu.memory_space<vmem>>, vector<1x32x32xf32>
    %62 = vector.shape_cast %61 : vector<1x32x32xf32> to vector<32x32xf32>
    %cst_47 = arith.constant dense<0.000000e+00> : vector<32x128xf32>
    %63 = tpu.matmul %62, %60, %cst_47 {dimension_numbers = #tpu.dot_dimension_numbers<[1], [0], [0], [1], [0, 0, 1, 1], [], []>} : vector<32x32xf32>, vector<32x128xf32>, vector<32x128xf32> -> vector<32x128xf32>
    %64 = arith.addf %37, %63 : vector<32x128xf32>
    %c1_48 = arith.constant 1 : index
    %c0_49 = arith.constant 0 : index
    %c0_50 = arith.constant 0 : index
    %65 = vector.load %arg7[%c1_48, %c0_49, %c0_50] : memref<2x32x1xf32, #tpu.memory_space<vmem>>, vector<1x32x1xf32>
    %66 = vector.shape_cast %65 : vector<1x32x1xf32> to vector<32x1xf32>
    %67 = vector.broadcast %66 : vector<32x1xf32> to vector<32x128xf32>
    %68 = arith.addf %64, %67 : vector<32x128xf32>
    %c0_51 = arith.constant 0 : index
    %c0_52 = arith.constant 0 : index
    %c0_53 = arith.constant 0 : index
    %69 = vector.load %arg10[%c0_51, %c0_52, %c0_53] : memref<1x32x128xf32, #tpu.memory_space<vmem>>, vector<1x32x128xf32>
    %70 = vector.shape_cast %69 : vector<1x32x128xf32> to vector<32x128xf32>
    %71 = vector.shape_cast %68 : vector<32x128xf32> to vector<1x32x128xf32>
    tpu.vector_store %arg10[%c0_51, %c0_52, %c0_53], %71 {strides = array<i32>} : memref<1x32x128xf32, #tpu.memory_space<vmem>>, vector<1x32x128xf32>,
    %c0_54 = arith.constant 0 : index
    %c0_55 = arith.constant 0 : index
    %72 = vector.load %arg8[%c0_54, %c0_55] : memref<8x32xf32, #tpu.memory_space<vmem>>, vector<8x32xf32>
    %cst_56 = arith.constant dense<0.000000e+00> : vector<8x128xf32>
    %73 = tpu.matmul %72, %68, %cst_56 {dimension_numbers = #tpu.dot_dimension_numbers<[1], [0], [0], [1], [0, 0, 1, 1], [], []>} : vector<8x32xf32>, vector<32x128xf32>, vector<8x128xf32> -> vector<8x128xf32>
    %c0_57 = arith.constant 0 : index
    %c0_58 = arith.constant 0 : index
    %74 = vector.load %arg9[%c0_57, %c0_58] : memref<8x1xf32, #tpu.memory_space<vmem>>, vector<8x1xf32>
    %75 = vector.broadcast %74 : vector<8x1xf32> to vector<8x128xf32>
    %76 = arith.addf %73, %75 : vector<8x128xf32>
    %c0_59 = arith.constant 0 : index
    %c0_60 = arith.constant 0 : index
    %c0_61 = arith.constant 0 : index
    %77 = vector.load %arg11[%c0_59, %c0_60, %c0_61] : memref<1x8x128xf32, #tpu.memory_space<vmem>>, vector<1x8x128xf32>
    %78 = vector.shape_cast %77 : vector<1x8x128xf32> to vector<8x128xf32>
    %79 = vector.shape_cast %76 : vector<8x128xf32> to vector<1x8x128xf32>
    tpu.vector_store %arg11[%c0_59, %c0_60, %c0_61], %79 {strides = array<i32>} : memref<1x8x128xf32, #tpu.memory_space<vmem>>, vector<1x8x128xf32>,
    return
  }
  func.func @transform_0(%arg0: i32) -> (i32, i32, i32) {
    %c0_i32 = arith.constant 0 : i32
    %c0_i32_0 = arith.constant 0 : i32
    %c0_i32_1 = arith.constant 0 : i32
    return %arg0, %c0_i32, %c0_i32_0 : i32, i32, i32
  }
  func.func @transform_1(%arg0: i32) -> (i32, i32) {
    %c0_i32 = arith.constant 0 : i32
    %c0_i32_0 = arith.constant 0 : i32
    %c0_i32_1 = arith.constant 0 : i32
    return %c0_i32, %c0_i32_0 : i32, i32
  }
  func.func @transform_2(%arg0: i32) -> (i32, i32) {
    %c0_i32 = arith.constant 0 : i32
    %c0_i32_0 = arith.constant 0 : i32
    %c0_i32_1 = arith.constant 0 : i32
    return %c0_i32, %c0_i32_0 : i32, i32
  }
  func.func @transform_3(%arg0: i32) -> (i32, i32, i32) {
    %c0_i32 = arith.constant 0 : i32
    %c0_i32_0 = arith.constant 0 : i32
    %c0_i32_1 = arith.constant 0 : i32
    %c0_i32_2 = arith.constant 0 : i32
    return %c0_i32, %c0_i32_0, %c0_i32_1 : i32, i32, i32
  }
  func.func @transform_4(%arg0: i32) -> (i32, i32, i32) {
    %c0_i32 = arith.constant 0 : i32
    %c0_i32_0 = arith.constant 0 : i32
    %c0_i32_1 = arith.constant 0 : i32
    %c0_i32_2 = arith.constant 0 : i32
    return %c0_i32, %c0_i32_0, %c0_i32_1 : i32, i32, i32
  }
  func.func @transform_5(%arg0: i32) -> (i32, i32, i32) {
    %c0_i32 = arith.constant 0 : i32
    %c0_i32_0 = arith.constant 0 : i32
    %c0_i32_1 = arith.constant 0 : i32
    %c0_i32_2 = arith.constant 0 : i32
    return %c0_i32, %c0_i32_0, %c0_i32_1 : i32, i32, i32
  }
  func.func @transform_6(%arg0: i32) -> (i32, i32, i32) {
    %c0_i32 = arith.constant 0 : i32
    %c0_i32_0 = arith.constant 0 : i32
    %c0_i32_1 = arith.constant 0 : i32
    %c0_i32_2 = arith.constant 0 : i32
    return %c0_i32, %c0_i32_0, %c0_i32_1 : i32, i32, i32
  }
  func.func @transform_7(%arg0: i32) -> (i32, i32) {
    %c0_i32 = arith.constant 0 : i32
    %c0_i32_0 = arith.constant 0 : i32
    %c0_i32_1 = arith.constant 0 : i32
    return %c0_i32, %c0_i32_0 : i32, i32
  }
  func.func @transform_8(%arg0: i32) -> (i32, i32) {
    %c0_i32 = arith.constant 0 : i32
    %c0_i32_0 = arith.constant 0 : i32
    %c0_i32_1 = arith.constant 0 : i32
    return %c0_i32, %c0_i32_0 : i32, i32
  }
  func.func @transform_9(%arg0: i32) -> (i32, i32, i32) {
    %c0_i32 = arith.constant 0 : i32
    %c0_i32_0 = arith.constant 0 : i32
    %c0_i32_1 = arith.constant 0 : i32
    return %arg0, %c0_i32, %c0_i32_0 : i32, i32, i32
  }
  func.func @transform_10(%arg0: i32) -> (i32, i32, i32) {
    %c0_i32 = arith.constant 0 : i32
    %c0_i32_0 = arith.constant 0 : i32
    %c0_i32_1 = arith.constant 0 : i32
    return %arg0, %c0_i32, %c0_i32_0 : i32, i32, i32
  }
}

module attributes {stable_mosaic.version = 11 : i64} {
  func.func @kernel(%arg0: i32, %arg1: memref<1x32x128xf32, #tpu.memory_space<vmem>>, %arg2: memref<6x32x32xf32, #tpu.memory_space<vmem>>, %arg3: memref<2x32x1xf32, #tpu.memory_space<vmem>>, %arg4: memref<2x32x32xf32, #tpu.memory_space<vmem>>, %arg5: memref<2x32x1xf32, #tpu.memory_space<vmem>>, %arg6: memref<128x64xf32, #tpu.memory_space<vmem>>, %arg7: memref<8x32xf32, #tpu.memory_space<vmem>>, %arg8: memref<8x1xf32, #tpu.memory_space<vmem>>, %arg9: memref<1x32x64xf32, #tpu.memory_space<vmem>>, %arg10: memref<1x8x64xf32, #tpu.memory_space<vmem>>) attributes {dimension_semantics = [#tpu.dimension_semantics<parallel>], iteration_bounds = array<i64: 2>, scalar_prefetch = 0 : i64, scratch_operands = 0 : i64, tpu.core_type = #tpu.core_type<tc>, window_params = [{transform_indices = @transform_0, window_bounds = array<i64: 1, 32, 128>}, {pipeline_mode = #tpu.pipeline_mode<synchronous>, transform_indices = @transform_1, window_bounds = array<i64: 6, 32, 32>}, {pipeline_mode = #tpu.pipeline_mode<synchronous>, transform_indices = @transform_2, window_bounds = array<i64: 2, 32, 1>}, {pipeline_mode = #tpu.pipeline_mode<synchronous>, transform_indices = @transform_3, window_bounds = array<i64: 2, 32, 32>}, {pipeline_mode = #tpu.pipeline_mode<synchronous>, transform_indices = @transform_4, window_bounds = array<i64: 2, 32, 1>}, {pipeline_mode = #tpu.pipeline_mode<synchronous>, transform_indices = @transform_5, window_bounds = array<i64: 128, 64>}, {pipeline_mode = #tpu.pipeline_mode<synchronous>, transform_indices = @transform_6, window_bounds = array<i64: 8, 32>}, {pipeline_mode = #tpu.pipeline_mode<synchronous>, transform_indices = @transform_7, window_bounds = array<i64: 8, 1>}, {transform_indices = @transform_8, window_bounds = array<i64: 1, 32, 64>}, {transform_indices = @transform_9, window_bounds = array<i64: 1, 8, 64>}]} {
    %c0 = arith.constant 0 : index
    %c0_0 = arith.constant 0 : index
    %c0_1 = arith.constant 0 : index
    %0 = vector.load %arg1[%c0, %c0_0, %c0_1] : memref<1x32x128xf32, #tpu.memory_space<vmem>>, vector<1x32x128xf32>
    %1 = vector.shape_cast %0 : vector<1x32x128xf32> to vector<32x128xf32>
    %cst = arith.constant 0.000000e+00 : f32
    %2 = vector.broadcast %cst : f32 to vector<32x1xf32>
    %3 = vector.extract_strided_slice %1 {offsets = [0, 0], sizes = [32, 127], strides = [1, 1]} : vector<32x128xf32> to vector<32x127xf32>
    %4 = tpu.concatenate %2, %3 in 1 : vector<32x1xf32>, vector<32x127xf32> -> vector<32x128xf32>
    %cst_2 = arith.constant 0.000000e+00 : f32
    %5 = vector.broadcast %cst_2 : f32 to vector<32x2xf32>
    %6 = vector.extract_strided_slice %1 {offsets = [0, 0], sizes = [32, 126], strides = [1, 1]} : vector<32x128xf32> to vector<32x126xf32>
    %7 = tpu.concatenate %5, %6 in 1 : vector<32x2xf32>, vector<32x126xf32> -> vector<32x128xf32>
    %c2 = arith.constant 2 : index
    %c0_3 = arith.constant 0 : index
    %c0_4 = arith.constant 0 : index
    %8 = vector.load %arg2[%c2, %c0_3, %c0_4] : memref<6x32x32xf32, #tpu.memory_space<vmem>>, vector<1x32x32xf32>
    %9 = vector.shape_cast %8 : vector<1x32x32xf32> to vector<32x32xf32>
    %cst_5 = arith.constant dense<0.000000e+00> : vector<32x128xf32>
    %10 = tpu.matmul %9, %1, %cst_5 {dimension_numbers = #tpu.dot_dimension_numbers<[1], [0], [0], [1], [0, 0, 1, 1], [], []>} : vector<32x32xf32>, vector<32x128xf32>, vector<32x128xf32> -> vector<32x128xf32>
    %c1 = arith.constant 1 : index
    %c0_6 = arith.constant 0 : index
    %c0_7 = arith.constant 0 : index
    %11 = vector.load %arg2[%c1, %c0_6, %c0_7] : memref<6x32x32xf32, #tpu.memory_space<vmem>>, vector<1x32x32xf32>
    %12 = vector.shape_cast %11 : vector<1x32x32xf32> to vector<32x32xf32>
    %cst_8 = arith.constant dense<0.000000e+00> : vector<32x128xf32>
    %13 = tpu.matmul %12, %4, %cst_8 {dimension_numbers = #tpu.dot_dimension_numbers<[1], [0], [0], [1], [0, 0, 1, 1], [], []>} : vector<32x32xf32>, vector<32x128xf32>, vector<32x128xf32> -> vector<32x128xf32>
    %14 = arith.addf %10, %13 : vector<32x128xf32>
    %c0_9 = arith.constant 0 : index
    %c0_10 = arith.constant 0 : index
    %c0_11 = arith.constant 0 : index
    %15 = vector.load %arg2[%c0_9, %c0_10, %c0_11] : memref<6x32x32xf32, #tpu.memory_space<vmem>>, vector<1x32x32xf32>
    %16 = vector.shape_cast %15 : vector<1x32x32xf32> to vector<32x32xf32>
    %cst_12 = arith.constant dense<0.000000e+00> : vector<32x128xf32>
    %17 = tpu.matmul %16, %7, %cst_12 {dimension_numbers = #tpu.dot_dimension_numbers<[1], [0], [0], [1], [0, 0, 1, 1], [], []>} : vector<32x32xf32>, vector<32x128xf32>, vector<32x128xf32> -> vector<32x128xf32>
    %18 = arith.addf %14, %17 : vector<32x128xf32>
    %c0_13 = arith.constant 0 : index
    %c0_14 = arith.constant 0 : index
    %c0_15 = arith.constant 0 : index
    %19 = vector.load %arg3[%c0_13, %c0_14, %c0_15] : memref<2x32x1xf32, #tpu.memory_space<vmem>>, vector<1x32x1xf32>
    %20 = vector.shape_cast %19 : vector<1x32x1xf32> to vector<32x1xf32>
    %21 = vector.broadcast %20 : vector<32x1xf32> to vector<32x128xf32>
    %22 = arith.addf %18, %21 : vector<32x128xf32>
    %cst_16 = arith.constant 0.000000e+00 : f32
    %23 = vector.broadcast %cst_16 : f32 to vector<32x128xf32>
    %24 = arith.maximumf %22, %23 : vector<32x128xf32>
    %c0_17 = arith.constant 0 : index
    %c0_18 = arith.constant 0 : index
    %c0_19 = arith.constant 0 : index
    %25 = vector.load %arg4[%c0_17, %c0_18, %c0_19] : memref<2x32x32xf32, #tpu.memory_space<vmem>>, vector<1x32x32xf32>
    %26 = vector.shape_cast %25 : vector<1x32x32xf32> to vector<32x32xf32>
    %cst_20 = arith.constant dense<0.000000e+00> : vector<32x128xf32>
    %27 = tpu.matmul %26, %24, %cst_20 {dimension_numbers = #tpu.dot_dimension_numbers<[1], [0], [0], [1], [0, 0, 1, 1], [], []>} : vector<32x32xf32>, vector<32x128xf32>, vector<32x128xf32> -> vector<32x128xf32>
    %28 = arith.addf %1, %27 : vector<32x128xf32>
    %c0_21 = arith.constant 0 : index
    %c0_22 = arith.constant 0 : index
    %c0_23 = arith.constant 0 : index
    %29 = vector.load %arg5[%c0_21, %c0_22, %c0_23] : memref<2x32x1xf32, #tpu.memory_space<vmem>>, vector<1x32x1xf32>
    %30 = vector.shape_cast %29 : vector<1x32x1xf32> to vector<32x1xf32>
    %31 = vector.broadcast %30 : vector<32x1xf32> to vector<32x128xf32>
    %32 = arith.addf %28, %31 : vector<32x128xf32>
    %cst_24 = arith.constant 0.000000e+00 : f32
    %33 = vector.broadcast %cst_24 : f32 to vector<32x2xf32>
    %34 = vector.extract_strided_slice %32 {offsets = [0, 0], sizes = [32, 126], strides = [1, 1]} : vector<32x128xf32> to vector<32x126xf32>
    %35 = tpu.concatenate %33, %34 in 1 : vector<32x2xf32>, vector<32x126xf32> -> vector<32x128xf32>
    %cst_25 = arith.constant 0.000000e+00 : f32
    %36 = vector.broadcast %cst_25 : f32 to vector<32x4xf32>
    %37 = vector.extract_strided_slice %32 {offsets = [0, 0], sizes = [32, 124], strides = [1, 1]} : vector<32x128xf32> to vector<32x124xf32>
    %38 = tpu.concatenate %36, %37 in 1 : vector<32x4xf32>, vector<32x124xf32> -> vector<32x128xf32>
    %c5 = arith.constant 5 : index
    %c0_26 = arith.constant 0 : index
    %c0_27 = arith.constant 0 : index
    %39 = vector.load %arg2[%c5, %c0_26, %c0_27] : memref<6x32x32xf32, #tpu.memory_space<vmem>>, vector<1x32x32xf32>
    %40 = vector.shape_cast %39 : vector<1x32x32xf32> to vector<32x32xf32>
    %cst_28 = arith.constant dense<0.000000e+00> : vector<32x128xf32>
    %41 = tpu.matmul %40, %32, %cst_28 {dimension_numbers = #tpu.dot_dimension_numbers<[1], [0], [0], [1], [0, 0, 1, 1], [], []>} : vector<32x32xf32>, vector<32x128xf32>, vector<32x128xf32> -> vector<32x128xf32>
    %c4 = arith.constant 4 : index
    %c0_29 = arith.constant 0 : index
    %c0_30 = arith.constant 0 : index
    %42 = vector.load %arg2[%c4, %c0_29, %c0_30] : memref<6x32x32xf32, #tpu.memory_space<vmem>>, vector<1x32x32xf32>
    %43 = vector.shape_cast %42 : vector<1x32x32xf32> to vector<32x32xf32>
    %cst_31 = arith.constant dense<0.000000e+00> : vector<32x128xf32>
    %44 = tpu.matmul %43, %35, %cst_31 {dimension_numbers = #tpu.dot_dimension_numbers<[1], [0], [0], [1], [0, 0, 1, 1], [], []>} : vector<32x32xf32>, vector<32x128xf32>, vector<32x128xf32> -> vector<32x128xf32>
    %45 = arith.addf %41, %44 : vector<32x128xf32>
    %c3 = arith.constant 3 : index
    %c0_32 = arith.constant 0 : index
    %c0_33 = arith.constant 0 : index
    %46 = vector.load %arg2[%c3, %c0_32, %c0_33] : memref<6x32x32xf32, #tpu.memory_space<vmem>>, vector<1x32x32xf32>
    %47 = vector.shape_cast %46 : vector<1x32x32xf32> to vector<32x32xf32>
    %cst_34 = arith.constant dense<0.000000e+00> : vector<32x128xf32>
    %48 = tpu.matmul %47, %38, %cst_34 {dimension_numbers = #tpu.dot_dimension_numbers<[1], [0], [0], [1], [0, 0, 1, 1], [], []>} : vector<32x32xf32>, vector<32x128xf32>, vector<32x128xf32> -> vector<32x128xf32>
    %49 = arith.addf %45, %48 : vector<32x128xf32>
    %c1_35 = arith.constant 1 : index
    %c0_36 = arith.constant 0 : index
    %c0_37 = arith.constant 0 : index
    %50 = vector.load %arg3[%c1_35, %c0_36, %c0_37] : memref<2x32x1xf32, #tpu.memory_space<vmem>>, vector<1x32x1xf32>
    %51 = vector.shape_cast %50 : vector<1x32x1xf32> to vector<32x1xf32>
    %52 = vector.broadcast %51 : vector<32x1xf32> to vector<32x128xf32>
    %53 = arith.addf %49, %52 : vector<32x128xf32>
    %cst_38 = arith.constant 0.000000e+00 : f32
    %54 = vector.broadcast %cst_38 : f32 to vector<32x128xf32>
    %55 = arith.maximumf %53, %54 : vector<32x128xf32>
    %c1_39 = arith.constant 1 : index
    %c0_40 = arith.constant 0 : index
    %c0_41 = arith.constant 0 : index
    %56 = vector.load %arg4[%c1_39, %c0_40, %c0_41] : memref<2x32x32xf32, #tpu.memory_space<vmem>>, vector<1x32x32xf32>
    %57 = vector.shape_cast %56 : vector<1x32x32xf32> to vector<32x32xf32>
    %cst_42 = arith.constant dense<0.000000e+00> : vector<32x128xf32>
    %58 = tpu.matmul %57, %55, %cst_42 {dimension_numbers = #tpu.dot_dimension_numbers<[1], [0], [0], [1], [0, 0, 1, 1], [], []>} : vector<32x32xf32>, vector<32x128xf32>, vector<32x128xf32> -> vector<32x128xf32>
    %59 = arith.addf %32, %58 : vector<32x128xf32>
    %c1_43 = arith.constant 1 : index
    %c0_44 = arith.constant 0 : index
    %c0_45 = arith.constant 0 : index
    %60 = vector.load %arg5[%c1_43, %c0_44, %c0_45] : memref<2x32x1xf32, #tpu.memory_space<vmem>>, vector<1x32x1xf32>
    %61 = vector.shape_cast %60 : vector<1x32x1xf32> to vector<32x1xf32>
    %62 = vector.broadcast %61 : vector<32x1xf32> to vector<32x128xf32>
    %63 = arith.addf %59, %62 : vector<32x128xf32>
    %c0_46 = arith.constant 0 : index
    %c0_47 = arith.constant 0 : index
    %64 = vector.load %arg6[%c0_46, %c0_47] : memref<128x64xf32, #tpu.memory_space<vmem>>, vector<128x64xf32>
    %cst_48 = arith.constant dense<0.000000e+00> : vector<32x64xf32>
    %65 = tpu.matmul %63, %64, %cst_48 {dimension_numbers = #tpu.dot_dimension_numbers<[1], [0], [0], [1], [0, 0, 1, 1], [], []>} : vector<32x128xf32>, vector<128x64xf32>, vector<32x64xf32> -> vector<32x64xf32>
    %c0_49 = arith.constant 0 : index
    %c0_50 = arith.constant 0 : index
    %c0_51 = arith.constant 0 : index
    %66 = vector.load %arg9[%c0_49, %c0_50, %c0_51] : memref<1x32x64xf32, #tpu.memory_space<vmem>>, vector<1x32x64xf32>
    %67 = vector.shape_cast %66 : vector<1x32x64xf32> to vector<32x64xf32>
    %68 = vector.shape_cast %65 : vector<32x64xf32> to vector<1x32x64xf32>
    tpu.vector_store %arg9[%c0_49, %c0_50, %c0_51], %68 {strides = array<i32>} : memref<1x32x64xf32, #tpu.memory_space<vmem>>, vector<1x32x64xf32>,
    %c0_52 = arith.constant 0 : index
    %c0_53 = arith.constant 0 : index
    %69 = vector.load %arg7[%c0_52, %c0_53] : memref<8x32xf32, #tpu.memory_space<vmem>>, vector<8x32xf32>
    %cst_54 = arith.constant dense<0.000000e+00> : vector<8x64xf32>
    %70 = tpu.matmul %69, %65, %cst_54 {dimension_numbers = #tpu.dot_dimension_numbers<[1], [0], [0], [1], [0, 0, 1, 1], [], []>} : vector<8x32xf32>, vector<32x64xf32>, vector<8x64xf32> -> vector<8x64xf32>
    %c0_55 = arith.constant 0 : index
    %c0_56 = arith.constant 0 : index
    %71 = vector.load %arg8[%c0_55, %c0_56] : memref<8x1xf32, #tpu.memory_space<vmem>>, vector<8x1xf32>
    %72 = vector.broadcast %71 : vector<8x1xf32> to vector<8x64xf32>
    %73 = arith.addf %70, %72 : vector<8x64xf32>
    %c0_57 = arith.constant 0 : index
    %c0_58 = arith.constant 0 : index
    %c0_59 = arith.constant 0 : index
    %74 = vector.load %arg10[%c0_57, %c0_58, %c0_59] : memref<1x8x64xf32, #tpu.memory_space<vmem>>, vector<1x8x64xf32>
    %75 = vector.shape_cast %74 : vector<1x8x64xf32> to vector<8x64xf32>
    %76 = vector.shape_cast %73 : vector<8x64xf32> to vector<1x8x64xf32>
    tpu.vector_store %arg10[%c0_57, %c0_58, %c0_59], %76 {strides = array<i32>} : memref<1x8x64xf32, #tpu.memory_space<vmem>>, vector<1x8x64xf32>,
    return
  }
  func.func @transform_0(%arg0: i32) -> (i32, i32, i32) {
    %c0_i32 = arith.constant 0 : i32
    %c0_i32_0 = arith.constant 0 : i32
    %c0_i32_1 = arith.constant 0 : i32
    return %arg0, %c0_i32, %c0_i32_0 : i32, i32, i32
  }
  func.func @transform_1(%arg0: i32) -> (i32, i32, i32) {
    %c0_i32 = arith.constant 0 : i32
    %c0_i32_0 = arith.constant 0 : i32
    %c0_i32_1 = arith.constant 0 : i32
    %c0_i32_2 = arith.constant 0 : i32
    return %c0_i32, %c0_i32_0, %c0_i32_1 : i32, i32, i32
  }
  func.func @transform_2(%arg0: i32) -> (i32, i32, i32) {
    %c0_i32 = arith.constant 0 : i32
    %c0_i32_0 = arith.constant 0 : i32
    %c0_i32_1 = arith.constant 0 : i32
    %c0_i32_2 = arith.constant 0 : i32
    return %c0_i32, %c0_i32_0, %c0_i32_1 : i32, i32, i32
  }
  func.func @transform_3(%arg0: i32) -> (i32, i32, i32) {
    %c0_i32 = arith.constant 0 : i32
    %c0_i32_0 = arith.constant 0 : i32
    %c0_i32_1 = arith.constant 0 : i32
    %c0_i32_2 = arith.constant 0 : i32
    return %c0_i32, %c0_i32_0, %c0_i32_1 : i32, i32, i32
  }
  func.func @transform_4(%arg0: i32) -> (i32, i32, i32) {
    %c0_i32 = arith.constant 0 : i32
    %c0_i32_0 = arith.constant 0 : i32
    %c0_i32_1 = arith.constant 0 : i32
    %c0_i32_2 = arith.constant 0 : i32
    return %c0_i32, %c0_i32_0, %c0_i32_1 : i32, i32, i32
  }
  func.func @transform_5(%arg0: i32) -> (i32, i32) {
    %c0_i32 = arith.constant 0 : i32
    %c0_i32_0 = arith.constant 0 : i32
    %c0_i32_1 = arith.constant 0 : i32
    return %c0_i32, %c0_i32_0 : i32, i32
  }
  func.func @transform_6(%arg0: i32) -> (i32, i32) {
    %c0_i32 = arith.constant 0 : i32
    %c0_i32_0 = arith.constant 0 : i32
    %c0_i32_1 = arith.constant 0 : i32
    return %c0_i32, %c0_i32_0 : i32, i32
  }
  func.func @transform_7(%arg0: i32) -> (i32, i32) {
    %c0_i32 = arith.constant 0 : i32
    %c0_i32_0 = arith.constant 0 : i32
    %c0_i32_1 = arith.constant 0 : i32
    return %c0_i32, %c0_i32_0 : i32, i32
  }
  func.func @transform_8(%arg0: i32) -> (i32, i32, i32) {
    %c0_i32 = arith.constant 0 : i32
    %c0_i32_0 = arith.constant 0 : i32
    %c0_i32_1 = arith.constant 0 : i32
    return %arg0, %c0_i32, %c0_i32_0 : i32, i32, i32
  }
  func.func @transform_9(%arg0: i32) -> (i32, i32, i32) {
    %c0_i32 = arith.constant 0 : i32
    %c0_i32_0 = arith.constant 0 : i32
    %c0_i32_1 = arith.constant 0 : i32
    return %arg0, %c0_i32, %c0_i32_0 : i32, i32, i32
  }
}

module attributes {stable_mosaic.version = 11 : i64} {
  func.func @kernel(%arg0: i32, %arg1: memref<1x32x64xf32, #tpu.memory_space<vmem>>, %arg2: memref<6x32x32xf32, #tpu.memory_space<vmem>>, %arg3: memref<2x32x1xf32, #tpu.memory_space<vmem>>, %arg4: memref<2x32x32xf32, #tpu.memory_space<vmem>>, %arg5: memref<2x32x1xf32, #tpu.memory_space<vmem>>, %arg6: memref<64x32xf32, #tpu.memory_space<vmem>>, %arg7: memref<8x32xf32, #tpu.memory_space<vmem>>, %arg8: memref<8x1xf32, #tpu.memory_space<vmem>>, %arg9: memref<1x32x32xf32, #tpu.memory_space<vmem>>, %arg10: memref<1x8x32xf32, #tpu.memory_space<vmem>>) attributes {dimension_semantics = [#tpu.dimension_semantics<parallel>], iteration_bounds = array<i64: 2>, scalar_prefetch = 0 : i64, scratch_operands = 0 : i64, tpu.core_type = #tpu.core_type<tc>, window_params = [{transform_indices = @transform_0, window_bounds = array<i64: 1, 32, 64>}, {pipeline_mode = #tpu.pipeline_mode<synchronous>, transform_indices = @transform_1, window_bounds = array<i64: 6, 32, 32>}, {pipeline_mode = #tpu.pipeline_mode<synchronous>, transform_indices = @transform_2, window_bounds = array<i64: 2, 32, 1>}, {pipeline_mode = #tpu.pipeline_mode<synchronous>, transform_indices = @transform_3, window_bounds = array<i64: 2, 32, 32>}, {pipeline_mode = #tpu.pipeline_mode<synchronous>, transform_indices = @transform_4, window_bounds = array<i64: 2, 32, 1>}, {pipeline_mode = #tpu.pipeline_mode<synchronous>, transform_indices = @transform_5, window_bounds = array<i64: 64, 32>}, {pipeline_mode = #tpu.pipeline_mode<synchronous>, transform_indices = @transform_6, window_bounds = array<i64: 8, 32>}, {pipeline_mode = #tpu.pipeline_mode<synchronous>, transform_indices = @transform_7, window_bounds = array<i64: 8, 1>}, {transform_indices = @transform_8, window_bounds = array<i64: 1, 32, 32>}, {transform_indices = @transform_9, window_bounds = array<i64: 1, 8, 32>}]} {
    %c0 = arith.constant 0 : index
    %c0_0 = arith.constant 0 : index
    %c0_1 = arith.constant 0 : index
    %0 = vector.load %arg1[%c0, %c0_0, %c0_1] : memref<1x32x64xf32, #tpu.memory_space<vmem>>, vector<1x32x64xf32>
    %1 = vector.shape_cast %0 : vector<1x32x64xf32> to vector<32x64xf32>
    %cst = arith.constant 0.000000e+00 : f32
    %2 = vector.broadcast %cst : f32 to vector<32x1xf32>
    %3 = vector.extract_strided_slice %1 {offsets = [0, 0], sizes = [32, 63], strides = [1, 1]} : vector<32x64xf32> to vector<32x63xf32>
    %4 = tpu.concatenate %2, %3 in 1 : vector<32x1xf32>, vector<32x63xf32> -> vector<32x64xf32>
    %cst_2 = arith.constant 0.000000e+00 : f32
    %5 = vector.broadcast %cst_2 : f32 to vector<32x2xf32>
    %6 = vector.extract_strided_slice %1 {offsets = [0, 0], sizes = [32, 62], strides = [1, 1]} : vector<32x64xf32> to vector<32x62xf32>
    %7 = tpu.concatenate %5, %6 in 1 : vector<32x2xf32>, vector<32x62xf32> -> vector<32x64xf32>
    %c2 = arith.constant 2 : index
    %c0_3 = arith.constant 0 : index
    %c0_4 = arith.constant 0 : index
    %8 = vector.load %arg2[%c2, %c0_3, %c0_4] : memref<6x32x32xf32, #tpu.memory_space<vmem>>, vector<1x32x32xf32>
    %9 = vector.shape_cast %8 : vector<1x32x32xf32> to vector<32x32xf32>
    %cst_5 = arith.constant dense<0.000000e+00> : vector<32x64xf32>
    %10 = tpu.matmul %9, %1, %cst_5 {dimension_numbers = #tpu.dot_dimension_numbers<[1], [0], [0], [1], [0, 0, 1, 1], [], []>} : vector<32x32xf32>, vector<32x64xf32>, vector<32x64xf32> -> vector<32x64xf32>
    %c1 = arith.constant 1 : index
    %c0_6 = arith.constant 0 : index
    %c0_7 = arith.constant 0 : index
    %11 = vector.load %arg2[%c1, %c0_6, %c0_7] : memref<6x32x32xf32, #tpu.memory_space<vmem>>, vector<1x32x32xf32>
    %12 = vector.shape_cast %11 : vector<1x32x32xf32> to vector<32x32xf32>
    %cst_8 = arith.constant dense<0.000000e+00> : vector<32x64xf32>
    %13 = tpu.matmul %12, %4, %cst_8 {dimension_numbers = #tpu.dot_dimension_numbers<[1], [0], [0], [1], [0, 0, 1, 1], [], []>} : vector<32x32xf32>, vector<32x64xf32>, vector<32x64xf32> -> vector<32x64xf32>
    %14 = arith.addf %10, %13 : vector<32x64xf32>
    %c0_9 = arith.constant 0 : index
    %c0_10 = arith.constant 0 : index
    %c0_11 = arith.constant 0 : index
    %15 = vector.load %arg2[%c0_9, %c0_10, %c0_11] : memref<6x32x32xf32, #tpu.memory_space<vmem>>, vector<1x32x32xf32>
    %16 = vector.shape_cast %15 : vector<1x32x32xf32> to vector<32x32xf32>
    %cst_12 = arith.constant dense<0.000000e+00> : vector<32x64xf32>
    %17 = tpu.matmul %16, %7, %cst_12 {dimension_numbers = #tpu.dot_dimension_numbers<[1], [0], [0], [1], [0, 0, 1, 1], [], []>} : vector<32x32xf32>, vector<32x64xf32>, vector<32x64xf32> -> vector<32x64xf32>
    %18 = arith.addf %14, %17 : vector<32x64xf32>
    %c0_13 = arith.constant 0 : index
    %c0_14 = arith.constant 0 : index
    %c0_15 = arith.constant 0 : index
    %19 = vector.load %arg3[%c0_13, %c0_14, %c0_15] : memref<2x32x1xf32, #tpu.memory_space<vmem>>, vector<1x32x1xf32>
    %20 = vector.shape_cast %19 : vector<1x32x1xf32> to vector<32x1xf32>
    %21 = vector.broadcast %20 : vector<32x1xf32> to vector<32x64xf32>
    %22 = arith.addf %18, %21 : vector<32x64xf32>
    %cst_16 = arith.constant 0.000000e+00 : f32
    %23 = vector.broadcast %cst_16 : f32 to vector<32x64xf32>
    %24 = arith.maximumf %22, %23 : vector<32x64xf32>
    %c0_17 = arith.constant 0 : index
    %c0_18 = arith.constant 0 : index
    %c0_19 = arith.constant 0 : index
    %25 = vector.load %arg4[%c0_17, %c0_18, %c0_19] : memref<2x32x32xf32, #tpu.memory_space<vmem>>, vector<1x32x32xf32>
    %26 = vector.shape_cast %25 : vector<1x32x32xf32> to vector<32x32xf32>
    %cst_20 = arith.constant dense<0.000000e+00> : vector<32x64xf32>
    %27 = tpu.matmul %26, %24, %cst_20 {dimension_numbers = #tpu.dot_dimension_numbers<[1], [0], [0], [1], [0, 0, 1, 1], [], []>} : vector<32x32xf32>, vector<32x64xf32>, vector<32x64xf32> -> vector<32x64xf32>
    %28 = arith.addf %1, %27 : vector<32x64xf32>
    %c0_21 = arith.constant 0 : index
    %c0_22 = arith.constant 0 : index
    %c0_23 = arith.constant 0 : index
    %29 = vector.load %arg5[%c0_21, %c0_22, %c0_23] : memref<2x32x1xf32, #tpu.memory_space<vmem>>, vector<1x32x1xf32>
    %30 = vector.shape_cast %29 : vector<1x32x1xf32> to vector<32x1xf32>
    %31 = vector.broadcast %30 : vector<32x1xf32> to vector<32x64xf32>
    %32 = arith.addf %28, %31 : vector<32x64xf32>
    %cst_24 = arith.constant 0.000000e+00 : f32
    %33 = vector.broadcast %cst_24 : f32 to vector<32x2xf32>
    %34 = vector.extract_strided_slice %32 {offsets = [0, 0], sizes = [32, 62], strides = [1, 1]} : vector<32x64xf32> to vector<32x62xf32>
    %35 = tpu.concatenate %33, %34 in 1 : vector<32x2xf32>, vector<32x62xf32> -> vector<32x64xf32>
    %cst_25 = arith.constant 0.000000e+00 : f32
    %36 = vector.broadcast %cst_25 : f32 to vector<32x4xf32>
    %37 = vector.extract_strided_slice %32 {offsets = [0, 0], sizes = [32, 60], strides = [1, 1]} : vector<32x64xf32> to vector<32x60xf32>
    %38 = tpu.concatenate %36, %37 in 1 : vector<32x4xf32>, vector<32x60xf32> -> vector<32x64xf32>
    %c5 = arith.constant 5 : index
    %c0_26 = arith.constant 0 : index
    %c0_27 = arith.constant 0 : index
    %39 = vector.load %arg2[%c5, %c0_26, %c0_27] : memref<6x32x32xf32, #tpu.memory_space<vmem>>, vector<1x32x32xf32>
    %40 = vector.shape_cast %39 : vector<1x32x32xf32> to vector<32x32xf32>
    %cst_28 = arith.constant dense<0.000000e+00> : vector<32x64xf32>
    %41 = tpu.matmul %40, %32, %cst_28 {dimension_numbers = #tpu.dot_dimension_numbers<[1], [0], [0], [1], [0, 0, 1, 1], [], []>} : vector<32x32xf32>, vector<32x64xf32>, vector<32x64xf32> -> vector<32x64xf32>
    %c4 = arith.constant 4 : index
    %c0_29 = arith.constant 0 : index
    %c0_30 = arith.constant 0 : index
    %42 = vector.load %arg2[%c4, %c0_29, %c0_30] : memref<6x32x32xf32, #tpu.memory_space<vmem>>, vector<1x32x32xf32>
    %43 = vector.shape_cast %42 : vector<1x32x32xf32> to vector<32x32xf32>
    %cst_31 = arith.constant dense<0.000000e+00> : vector<32x64xf32>
    %44 = tpu.matmul %43, %35, %cst_31 {dimension_numbers = #tpu.dot_dimension_numbers<[1], [0], [0], [1], [0, 0, 1, 1], [], []>} : vector<32x32xf32>, vector<32x64xf32>, vector<32x64xf32> -> vector<32x64xf32>
    %45 = arith.addf %41, %44 : vector<32x64xf32>
    %c3 = arith.constant 3 : index
    %c0_32 = arith.constant 0 : index
    %c0_33 = arith.constant 0 : index
    %46 = vector.load %arg2[%c3, %c0_32, %c0_33] : memref<6x32x32xf32, #tpu.memory_space<vmem>>, vector<1x32x32xf32>
    %47 = vector.shape_cast %46 : vector<1x32x32xf32> to vector<32x32xf32>
    %cst_34 = arith.constant dense<0.000000e+00> : vector<32x64xf32>
    %48 = tpu.matmul %47, %38, %cst_34 {dimension_numbers = #tpu.dot_dimension_numbers<[1], [0], [0], [1], [0, 0, 1, 1], [], []>} : vector<32x32xf32>, vector<32x64xf32>, vector<32x64xf32> -> vector<32x64xf32>
    %49 = arith.addf %45, %48 : vector<32x64xf32>
    %c1_35 = arith.constant 1 : index
    %c0_36 = arith.constant 0 : index
    %c0_37 = arith.constant 0 : index
    %50 = vector.load %arg3[%c1_35, %c0_36, %c0_37] : memref<2x32x1xf32, #tpu.memory_space<vmem>>, vector<1x32x1xf32>
    %51 = vector.shape_cast %50 : vector<1x32x1xf32> to vector<32x1xf32>
    %52 = vector.broadcast %51 : vector<32x1xf32> to vector<32x64xf32>
    %53 = arith.addf %49, %52 : vector<32x64xf32>
    %cst_38 = arith.constant 0.000000e+00 : f32
    %54 = vector.broadcast %cst_38 : f32 to vector<32x64xf32>
    %55 = arith.maximumf %53, %54 : vector<32x64xf32>
    %c1_39 = arith.constant 1 : index
    %c0_40 = arith.constant 0 : index
    %c0_41 = arith.constant 0 : index
    %56 = vector.load %arg4[%c1_39, %c0_40, %c0_41] : memref<2x32x32xf32, #tpu.memory_space<vmem>>, vector<1x32x32xf32>
    %57 = vector.shape_cast %56 : vector<1x32x32xf32> to vector<32x32xf32>
    %cst_42 = arith.constant dense<0.000000e+00> : vector<32x64xf32>
    %58 = tpu.matmul %57, %55, %cst_42 {dimension_numbers = #tpu.dot_dimension_numbers<[1], [0], [0], [1], [0, 0, 1, 1], [], []>} : vector<32x32xf32>, vector<32x64xf32>, vector<32x64xf32> -> vector<32x64xf32>
    %59 = arith.addf %32, %58 : vector<32x64xf32>
    %c1_43 = arith.constant 1 : index
    %c0_44 = arith.constant 0 : index
    %c0_45 = arith.constant 0 : index
    %60 = vector.load %arg5[%c1_43, %c0_44, %c0_45] : memref<2x32x1xf32, #tpu.memory_space<vmem>>, vector<1x32x1xf32>
    %61 = vector.shape_cast %60 : vector<1x32x1xf32> to vector<32x1xf32>
    %62 = vector.broadcast %61 : vector<32x1xf32> to vector<32x64xf32>
    %63 = arith.addf %59, %62 : vector<32x64xf32>
    %c0_46 = arith.constant 0 : index
    %c0_47 = arith.constant 0 : index
    %64 = vector.load %arg6[%c0_46, %c0_47] : memref<64x32xf32, #tpu.memory_space<vmem>>, vector<64x32xf32>
    %cst_48 = arith.constant dense<0.000000e+00> : vector<32x32xf32>
    %65 = tpu.matmul %63, %64, %cst_48 {dimension_numbers = #tpu.dot_dimension_numbers<[1], [0], [0], [1], [0, 0, 1, 1], [], []>} : vector<32x64xf32>, vector<64x32xf32>, vector<32x32xf32> -> vector<32x32xf32>
    %c0_49 = arith.constant 0 : index
    %c0_50 = arith.constant 0 : index
    %c0_51 = arith.constant 0 : index
    %66 = vector.load %arg9[%c0_49, %c0_50, %c0_51] : memref<1x32x32xf32, #tpu.memory_space<vmem>>, vector<1x32x32xf32>
    %67 = vector.shape_cast %66 : vector<1x32x32xf32> to vector<32x32xf32>
    %68 = vector.shape_cast %65 : vector<32x32xf32> to vector<1x32x32xf32>
    tpu.vector_store %arg9[%c0_49, %c0_50, %c0_51], %68 {strides = array<i32>} : memref<1x32x32xf32, #tpu.memory_space<vmem>>, vector<1x32x32xf32>,
    %c0_52 = arith.constant 0 : index
    %c0_53 = arith.constant 0 : index
    %69 = vector.load %arg7[%c0_52, %c0_53] : memref<8x32xf32, #tpu.memory_space<vmem>>, vector<8x32xf32>
    %cst_54 = arith.constant dense<0.000000e+00> : vector<8x32xf32>
    %70 = tpu.matmul %69, %65, %cst_54 {dimension_numbers = #tpu.dot_dimension_numbers<[1], [0], [0], [1], [0, 0, 1, 1], [], []>} : vector<8x32xf32>, vector<32x32xf32>, vector<8x32xf32> -> vector<8x32xf32>
    %c0_55 = arith.constant 0 : index
    %c0_56 = arith.constant 0 : index
    %71 = vector.load %arg8[%c0_55, %c0_56] : memref<8x1xf32, #tpu.memory_space<vmem>>, vector<8x1xf32>
    %72 = vector.broadcast %71 : vector<8x1xf32> to vector<8x32xf32>
    %73 = arith.addf %70, %72 : vector<8x32xf32>
    %c0_57 = arith.constant 0 : index
    %c0_58 = arith.constant 0 : index
    %c0_59 = arith.constant 0 : index
    %74 = vector.load %arg10[%c0_57, %c0_58, %c0_59] : memref<1x8x32xf32, #tpu.memory_space<vmem>>, vector<1x8x32xf32>
    %75 = vector.shape_cast %74 : vector<1x8x32xf32> to vector<8x32xf32>
    %76 = vector.shape_cast %73 : vector<8x32xf32> to vector<1x8x32xf32>
    tpu.vector_store %arg10[%c0_57, %c0_58, %c0_59], %76 {strides = array<i32>} : memref<1x8x32xf32, #tpu.memory_space<vmem>>, vector<1x8x32xf32>,
    return
  }
  func.func @transform_0(%arg0: i32) -> (i32, i32, i32) {
    %c0_i32 = arith.constant 0 : i32
    %c0_i32_0 = arith.constant 0 : i32
    %c0_i32_1 = arith.constant 0 : i32
    return %arg0, %c0_i32, %c0_i32_0 : i32, i32, i32
  }
  func.func @transform_1(%arg0: i32) -> (i32, i32, i32) {
    %c0_i32 = arith.constant 0 : i32
    %c0_i32_0 = arith.constant 0 : i32
    %c0_i32_1 = arith.constant 0 : i32
    %c0_i32_2 = arith.constant 0 : i32
    return %c0_i32, %c0_i32_0, %c0_i32_1 : i32, i32, i32
  }
  func.func @transform_2(%arg0: i32) -> (i32, i32, i32) {
    %c0_i32 = arith.constant 0 : i32
    %c0_i32_0 = arith.constant 0 : i32
    %c0_i32_1 = arith.constant 0 : i32
    %c0_i32_2 = arith.constant 0 : i32
    return %c0_i32, %c0_i32_0, %c0_i32_1 : i32, i32, i32
  }
  func.func @transform_3(%arg0: i32) -> (i32, i32, i32) {
    %c0_i32 = arith.constant 0 : i32
    %c0_i32_0 = arith.constant 0 : i32
    %c0_i32_1 = arith.constant 0 : i32
    %c0_i32_2 = arith.constant 0 : i32
    return %c0_i32, %c0_i32_0, %c0_i32_1 : i32, i32, i32
  }
  func.func @transform_4(%arg0: i32) -> (i32, i32, i32) {
    %c0_i32 = arith.constant 0 : i32
    %c0_i32_0 = arith.constant 0 : i32
    %c0_i32_1 = arith.constant 0 : i32
    %c0_i32_2 = arith.constant 0 : i32
    return %c0_i32, %c0_i32_0, %c0_i32_1 : i32, i32, i32
  }
  func.func @transform_5(%arg0: i32) -> (i32, i32) {
    %c0_i32 = arith.constant 0 : i32
    %c0_i32_0 = arith.constant 0 : i32
    %c0_i32_1 = arith.constant 0 : i32
    return %c0_i32, %c0_i32_0 : i32, i32
  }
  func.func @transform_6(%arg0: i32) -> (i32, i32) {
    %c0_i32 = arith.constant 0 : i32
    %c0_i32_0 = arith.constant 0 : i32
    %c0_i32_1 = arith.constant 0 : i32
    return %c0_i32, %c0_i32_0 : i32, i32
  }
  func.func @transform_7(%arg0: i32) -> (i32, i32) {
    %c0_i32 = arith.constant 0 : i32
    %c0_i32_0 = arith.constant 0 : i32
    %c0_i32_1 = arith.constant 0 : i32
    return %c0_i32, %c0_i32_0 : i32, i32
  }
  func.func @transform_8(%arg0: i32) -> (i32, i32, i32) {
    %c0_i32 = arith.constant 0 : i32
    %c0_i32_0 = arith.constant 0 : i32
    %c0_i32_1 = arith.constant 0 : i32
    return %arg0, %c0_i32, %c0_i32_0 : i32, i32, i32
  }
  func.func @transform_9(%arg0: i32) -> (i32, i32, i32) {
    %c0_i32 = arith.constant 0 : i32
    %c0_i32_0 = arith.constant 0 : i32
    %c0_i32_1 = arith.constant 0 : i32
    return %arg0, %c0_i32, %c0_i32_0 : i32, i32, i32
  }
}

module attributes {stable_mosaic.version = 11 : i64} {
  func.func @kernel(%arg0: i32, %arg1: memref<1x32x32xf32, #tpu.memory_space<vmem>>, %arg2: memref<6x32x32xf32, #tpu.memory_space<vmem>>, %arg3: memref<2x32x1xf32, #tpu.memory_space<vmem>>, %arg4: memref<2x32x32xf32, #tpu.memory_space<vmem>>, %arg5: memref<2x32x1xf32, #tpu.memory_space<vmem>>, %arg6: memref<32x16xf32, #tpu.memory_space<vmem>>, %arg7: memref<8x32xf32, #tpu.memory_space<vmem>>, %arg8: memref<8x1xf32, #tpu.memory_space<vmem>>, %arg9: memref<1x32x16xf32, #tpu.memory_space<vmem>>, %arg10: memref<1x8x16xf32, #tpu.memory_space<vmem>>) attributes {dimension_semantics = [#tpu.dimension_semantics<parallel>], iteration_bounds = array<i64: 2>, scalar_prefetch = 0 : i64, scratch_operands = 0 : i64, tpu.core_type = #tpu.core_type<tc>, window_params = [{transform_indices = @transform_0, window_bounds = array<i64: 1, 32, 32>}, {pipeline_mode = #tpu.pipeline_mode<synchronous>, transform_indices = @transform_1, window_bounds = array<i64: 6, 32, 32>}, {pipeline_mode = #tpu.pipeline_mode<synchronous>, transform_indices = @transform_2, window_bounds = array<i64: 2, 32, 1>}, {pipeline_mode = #tpu.pipeline_mode<synchronous>, transform_indices = @transform_3, window_bounds = array<i64: 2, 32, 32>}, {pipeline_mode = #tpu.pipeline_mode<synchronous>, transform_indices = @transform_4, window_bounds = array<i64: 2, 32, 1>}, {pipeline_mode = #tpu.pipeline_mode<synchronous>, transform_indices = @transform_5, window_bounds = array<i64: 32, 16>}, {pipeline_mode = #tpu.pipeline_mode<synchronous>, transform_indices = @transform_6, window_bounds = array<i64: 8, 32>}, {pipeline_mode = #tpu.pipeline_mode<synchronous>, transform_indices = @transform_7, window_bounds = array<i64: 8, 1>}, {transform_indices = @transform_8, window_bounds = array<i64: 1, 32, 16>}, {transform_indices = @transform_9, window_bounds = array<i64: 1, 8, 16>}]} {
    %c0 = arith.constant 0 : index
    %c0_0 = arith.constant 0 : index
    %c0_1 = arith.constant 0 : index
    %0 = vector.load %arg1[%c0, %c0_0, %c0_1] : memref<1x32x32xf32, #tpu.memory_space<vmem>>, vector<1x32x32xf32>
    %1 = vector.shape_cast %0 : vector<1x32x32xf32> to vector<32x32xf32>
    %cst = arith.constant 0.000000e+00 : f32
    %2 = vector.broadcast %cst : f32 to vector<32x1xf32>
    %3 = vector.extract_strided_slice %1 {offsets = [0, 0], sizes = [32, 31], strides = [1, 1]} : vector<32x32xf32> to vector<32x31xf32>
    %4 = tpu.concatenate %2, %3 in 1 : vector<32x1xf32>, vector<32x31xf32> -> vector<32x32xf32>
    %cst_2 = arith.constant 0.000000e+00 : f32
    %5 = vector.broadcast %cst_2 : f32 to vector<32x2xf32>
    %6 = vector.extract_strided_slice %1 {offsets = [0, 0], sizes = [32, 30], strides = [1, 1]} : vector<32x32xf32> to vector<32x30xf32>
    %7 = tpu.concatenate %5, %6 in 1 : vector<32x2xf32>, vector<32x30xf32> -> vector<32x32xf32>
    %c2 = arith.constant 2 : index
    %c0_3 = arith.constant 0 : index
    %c0_4 = arith.constant 0 : index
    %8 = vector.load %arg2[%c2, %c0_3, %c0_4] : memref<6x32x32xf32, #tpu.memory_space<vmem>>, vector<1x32x32xf32>
    %9 = vector.shape_cast %8 : vector<1x32x32xf32> to vector<32x32xf32>
    %cst_5 = arith.constant dense<0.000000e+00> : vector<32x32xf32>
    %10 = tpu.matmul %9, %1, %cst_5 {dimension_numbers = #tpu.dot_dimension_numbers<[1], [0], [0], [1], [0, 0, 1, 1], [], []>} : vector<32x32xf32>, vector<32x32xf32>, vector<32x32xf32> -> vector<32x32xf32>
    %c1 = arith.constant 1 : index
    %c0_6 = arith.constant 0 : index
    %c0_7 = arith.constant 0 : index
    %11 = vector.load %arg2[%c1, %c0_6, %c0_7] : memref<6x32x32xf32, #tpu.memory_space<vmem>>, vector<1x32x32xf32>
    %12 = vector.shape_cast %11 : vector<1x32x32xf32> to vector<32x32xf32>
    %cst_8 = arith.constant dense<0.000000e+00> : vector<32x32xf32>
    %13 = tpu.matmul %12, %4, %cst_8 {dimension_numbers = #tpu.dot_dimension_numbers<[1], [0], [0], [1], [0, 0, 1, 1], [], []>} : vector<32x32xf32>, vector<32x32xf32>, vector<32x32xf32> -> vector<32x32xf32>
    %14 = arith.addf %10, %13 : vector<32x32xf32>
    %c0_9 = arith.constant 0 : index
    %c0_10 = arith.constant 0 : index
    %c0_11 = arith.constant 0 : index
    %15 = vector.load %arg2[%c0_9, %c0_10, %c0_11] : memref<6x32x32xf32, #tpu.memory_space<vmem>>, vector<1x32x32xf32>
    %16 = vector.shape_cast %15 : vector<1x32x32xf32> to vector<32x32xf32>
    %cst_12 = arith.constant dense<0.000000e+00> : vector<32x32xf32>
    %17 = tpu.matmul %16, %7, %cst_12 {dimension_numbers = #tpu.dot_dimension_numbers<[1], [0], [0], [1], [0, 0, 1, 1], [], []>} : vector<32x32xf32>, vector<32x32xf32>, vector<32x32xf32> -> vector<32x32xf32>
    %18 = arith.addf %14, %17 : vector<32x32xf32>
    %c0_13 = arith.constant 0 : index
    %c0_14 = arith.constant 0 : index
    %c0_15 = arith.constant 0 : index
    %19 = vector.load %arg3[%c0_13, %c0_14, %c0_15] : memref<2x32x1xf32, #tpu.memory_space<vmem>>, vector<1x32x1xf32>
    %20 = vector.shape_cast %19 : vector<1x32x1xf32> to vector<32x1xf32>
    %21 = vector.broadcast %20 : vector<32x1xf32> to vector<32x32xf32>
    %22 = arith.addf %18, %21 : vector<32x32xf32>
    %cst_16 = arith.constant 0.000000e+00 : f32
    %23 = vector.broadcast %cst_16 : f32 to vector<32x32xf32>
    %24 = arith.maximumf %22, %23 : vector<32x32xf32>
    %c0_17 = arith.constant 0 : index
    %c0_18 = arith.constant 0 : index
    %c0_19 = arith.constant 0 : index
    %25 = vector.load %arg4[%c0_17, %c0_18, %c0_19] : memref<2x32x32xf32, #tpu.memory_space<vmem>>, vector<1x32x32xf32>
    %26 = vector.shape_cast %25 : vector<1x32x32xf32> to vector<32x32xf32>
    %cst_20 = arith.constant dense<0.000000e+00> : vector<32x32xf32>
    %27 = tpu.matmul %26, %24, %cst_20 {dimension_numbers = #tpu.dot_dimension_numbers<[1], [0], [0], [1], [0, 0, 1, 1], [], []>} : vector<32x32xf32>, vector<32x32xf32>, vector<32x32xf32> -> vector<32x32xf32>
    %28 = arith.addf %1, %27 : vector<32x32xf32>
    %c0_21 = arith.constant 0 : index
    %c0_22 = arith.constant 0 : index
    %c0_23 = arith.constant 0 : index
    %29 = vector.load %arg5[%c0_21, %c0_22, %c0_23] : memref<2x32x1xf32, #tpu.memory_space<vmem>>, vector<1x32x1xf32>
    %30 = vector.shape_cast %29 : vector<1x32x1xf32> to vector<32x1xf32>
    %31 = vector.broadcast %30 : vector<32x1xf32> to vector<32x32xf32>
    %32 = arith.addf %28, %31 : vector<32x32xf32>
    %cst_24 = arith.constant 0.000000e+00 : f32
    %33 = vector.broadcast %cst_24 : f32 to vector<32x2xf32>
    %34 = vector.extract_strided_slice %32 {offsets = [0, 0], sizes = [32, 30], strides = [1, 1]} : vector<32x32xf32> to vector<32x30xf32>
    %35 = tpu.concatenate %33, %34 in 1 : vector<32x2xf32>, vector<32x30xf32> -> vector<32x32xf32>
    %cst_25 = arith.constant 0.000000e+00 : f32
    %36 = vector.broadcast %cst_25 : f32 to vector<32x4xf32>
    %37 = vector.extract_strided_slice %32 {offsets = [0, 0], sizes = [32, 28], strides = [1, 1]} : vector<32x32xf32> to vector<32x28xf32>
    %38 = tpu.concatenate %36, %37 in 1 : vector<32x4xf32>, vector<32x28xf32> -> vector<32x32xf32>
    %c5 = arith.constant 5 : index
    %c0_26 = arith.constant 0 : index
    %c0_27 = arith.constant 0 : index
    %39 = vector.load %arg2[%c5, %c0_26, %c0_27] : memref<6x32x32xf32, #tpu.memory_space<vmem>>, vector<1x32x32xf32>
    %40 = vector.shape_cast %39 : vector<1x32x32xf32> to vector<32x32xf32>
    %cst_28 = arith.constant dense<0.000000e+00> : vector<32x32xf32>
    %41 = tpu.matmul %40, %32, %cst_28 {dimension_numbers = #tpu.dot_dimension_numbers<[1], [0], [0], [1], [0, 0, 1, 1], [], []>} : vector<32x32xf32>, vector<32x32xf32>, vector<32x32xf32> -> vector<32x32xf32>
    %c4 = arith.constant 4 : index
    %c0_29 = arith.constant 0 : index
    %c0_30 = arith.constant 0 : index
    %42 = vector.load %arg2[%c4, %c0_29, %c0_30] : memref<6x32x32xf32, #tpu.memory_space<vmem>>, vector<1x32x32xf32>
    %43 = vector.shape_cast %42 : vector<1x32x32xf32> to vector<32x32xf32>
    %cst_31 = arith.constant dense<0.000000e+00> : vector<32x32xf32>
    %44 = tpu.matmul %43, %35, %cst_31 {dimension_numbers = #tpu.dot_dimension_numbers<[1], [0], [0], [1], [0, 0, 1, 1], [], []>} : vector<32x32xf32>, vector<32x32xf32>, vector<32x32xf32> -> vector<32x32xf32>
    %45 = arith.addf %41, %44 : vector<32x32xf32>
    %c3 = arith.constant 3 : index
    %c0_32 = arith.constant 0 : index
    %c0_33 = arith.constant 0 : index
    %46 = vector.load %arg2[%c3, %c0_32, %c0_33] : memref<6x32x32xf32, #tpu.memory_space<vmem>>, vector<1x32x32xf32>
    %47 = vector.shape_cast %46 : vector<1x32x32xf32> to vector<32x32xf32>
    %cst_34 = arith.constant dense<0.000000e+00> : vector<32x32xf32>
    %48 = tpu.matmul %47, %38, %cst_34 {dimension_numbers = #tpu.dot_dimension_numbers<[1], [0], [0], [1], [0, 0, 1, 1], [], []>} : vector<32x32xf32>, vector<32x32xf32>, vector<32x32xf32> -> vector<32x32xf32>
    %49 = arith.addf %45, %48 : vector<32x32xf32>
    %c1_35 = arith.constant 1 : index
    %c0_36 = arith.constant 0 : index
    %c0_37 = arith.constant 0 : index
    %50 = vector.load %arg3[%c1_35, %c0_36, %c0_37] : memref<2x32x1xf32, #tpu.memory_space<vmem>>, vector<1x32x1xf32>
    %51 = vector.shape_cast %50 : vector<1x32x1xf32> to vector<32x1xf32>
    %52 = vector.broadcast %51 : vector<32x1xf32> to vector<32x32xf32>
    %53 = arith.addf %49, %52 : vector<32x32xf32>
    %cst_38 = arith.constant 0.000000e+00 : f32
    %54 = vector.broadcast %cst_38 : f32 to vector<32x32xf32>
    %55 = arith.maximumf %53, %54 : vector<32x32xf32>
    %c1_39 = arith.constant 1 : index
    %c0_40 = arith.constant 0 : index
    %c0_41 = arith.constant 0 : index
    %56 = vector.load %arg4[%c1_39, %c0_40, %c0_41] : memref<2x32x32xf32, #tpu.memory_space<vmem>>, vector<1x32x32xf32>
    %57 = vector.shape_cast %56 : vector<1x32x32xf32> to vector<32x32xf32>
    %cst_42 = arith.constant dense<0.000000e+00> : vector<32x32xf32>
    %58 = tpu.matmul %57, %55, %cst_42 {dimension_numbers = #tpu.dot_dimension_numbers<[1], [0], [0], [1], [0, 0, 1, 1], [], []>} : vector<32x32xf32>, vector<32x32xf32>, vector<32x32xf32> -> vector<32x32xf32>
    %59 = arith.addf %32, %58 : vector<32x32xf32>
    %c1_43 = arith.constant 1 : index
    %c0_44 = arith.constant 0 : index
    %c0_45 = arith.constant 0 : index
    %60 = vector.load %arg5[%c1_43, %c0_44, %c0_45] : memref<2x32x1xf32, #tpu.memory_space<vmem>>, vector<1x32x1xf32>
    %61 = vector.shape_cast %60 : vector<1x32x1xf32> to vector<32x1xf32>
    %62 = vector.broadcast %61 : vector<32x1xf32> to vector<32x32xf32>
    %63 = arith.addf %59, %62 : vector<32x32xf32>
    %c0_46 = arith.constant 0 : index
    %c0_47 = arith.constant 0 : index
    %64 = vector.load %arg6[%c0_46, %c0_47] : memref<32x16xf32, #tpu.memory_space<vmem>>, vector<32x16xf32>
    %cst_48 = arith.constant dense<0.000000e+00> : vector<32x16xf32>
    %65 = tpu.matmul %63, %64, %cst_48 {dimension_numbers = #tpu.dot_dimension_numbers<[1], [0], [0], [1], [0, 0, 1, 1], [], []>} : vector<32x32xf32>, vector<32x16xf32>, vector<32x16xf32> -> vector<32x16xf32>
    %c0_49 = arith.constant 0 : index
    %c0_50 = arith.constant 0 : index
    %c0_51 = arith.constant 0 : index
    %66 = vector.load %arg9[%c0_49, %c0_50, %c0_51] : memref<1x32x16xf32, #tpu.memory_space<vmem>>, vector<1x32x16xf32>
    %67 = vector.shape_cast %66 : vector<1x32x16xf32> to vector<32x16xf32>
    %68 = vector.shape_cast %65 : vector<32x16xf32> to vector<1x32x16xf32>
    tpu.vector_store %arg9[%c0_49, %c0_50, %c0_51], %68 {strides = array<i32>} : memref<1x32x16xf32, #tpu.memory_space<vmem>>, vector<1x32x16xf32>,
    %c0_52 = arith.constant 0 : index
    %c0_53 = arith.constant 0 : index
    %69 = vector.load %arg7[%c0_52, %c0_53] : memref<8x32xf32, #tpu.memory_space<vmem>>, vector<8x32xf32>
    %cst_54 = arith.constant dense<0.000000e+00> : vector<8x16xf32>
    %70 = tpu.matmul %69, %65, %cst_54 {dimension_numbers = #tpu.dot_dimension_numbers<[1], [0], [0], [1], [0, 0, 1, 1], [], []>} : vector<8x32xf32>, vector<32x16xf32>, vector<8x16xf32> -> vector<8x16xf32>
    %c0_55 = arith.constant 0 : index
    %c0_56 = arith.constant 0 : index
    %71 = vector.load %arg8[%c0_55, %c0_56] : memref<8x1xf32, #tpu.memory_space<vmem>>, vector<8x1xf32>
    %72 = vector.broadcast %71 : vector<8x1xf32> to vector<8x16xf32>
    %73 = arith.addf %70, %72 : vector<8x16xf32>
    %c0_57 = arith.constant 0 : index
    %c0_58 = arith.constant 0 : index
    %c0_59 = arith.constant 0 : index
    %74 = vector.load %arg10[%c0_57, %c0_58, %c0_59] : memref<1x8x16xf32, #tpu.memory_space<vmem>>, vector<1x8x16xf32>
    %75 = vector.shape_cast %74 : vector<1x8x16xf32> to vector<8x16xf32>
    %76 = vector.shape_cast %73 : vector<8x16xf32> to vector<1x8x16xf32>
    tpu.vector_store %arg10[%c0_57, %c0_58, %c0_59], %76 {strides = array<i32>} : memref<1x8x16xf32, #tpu.memory_space<vmem>>, vector<1x8x16xf32>,
    return
  }
  func.func @transform_0(%arg0: i32) -> (i32, i32, i32) {
    %c0_i32 = arith.constant 0 : i32
    %c0_i32_0 = arith.constant 0 : i32
    %c0_i32_1 = arith.constant 0 : i32
    return %arg0, %c0_i32, %c0_i32_0 : i32, i32, i32
  }
  func.func @transform_1(%arg0: i32) -> (i32, i32, i32) {
    %c0_i32 = arith.constant 0 : i32
    %c0_i32_0 = arith.constant 0 : i32
    %c0_i32_1 = arith.constant 0 : i32
    %c0_i32_2 = arith.constant 0 : i32
    return %c0_i32, %c0_i32_0, %c0_i32_1 : i32, i32, i32
  }
  func.func @transform_2(%arg0: i32) -> (i32, i32, i32) {
    %c0_i32 = arith.constant 0 : i32
    %c0_i32_0 = arith.constant 0 : i32
    %c0_i32_1 = arith.constant 0 : i32
    %c0_i32_2 = arith.constant 0 : i32
    return %c0_i32, %c0_i32_0, %c0_i32_1 : i32, i32, i32
  }
  func.func @transform_3(%arg0: i32) -> (i32, i32, i32) {
    %c0_i32 = arith.constant 0 : i32
    %c0_i32_0 = arith.constant 0 : i32
    %c0_i32_1 = arith.constant 0 : i32
    %c0_i32_2 = arith.constant 0 : i32
    return %c0_i32, %c0_i32_0, %c0_i32_1 : i32, i32, i32
  }
  func.func @transform_4(%arg0: i32) -> (i32, i32, i32) {
    %c0_i32 = arith.constant 0 : i32
    %c0_i32_0 = arith.constant 0 : i32
    %c0_i32_1 = arith.constant 0 : i32
    %c0_i32_2 = arith.constant 0 : i32
    return %c0_i32, %c0_i32_0, %c0_i32_1 : i32, i32, i32
  }
  func.func @transform_5(%arg0: i32) -> (i32, i32) {
    %c0_i32 = arith.constant 0 : i32
    %c0_i32_0 = arith.constant 0 : i32
    %c0_i32_1 = arith.constant 0 : i32
    return %c0_i32, %c0_i32_0 : i32, i32
  }
  func.func @transform_6(%arg0: i32) -> (i32, i32) {
    %c0_i32 = arith.constant 0 : i32
    %c0_i32_0 = arith.constant 0 : i32
    %c0_i32_1 = arith.constant 0 : i32
    return %c0_i32, %c0_i32_0 : i32, i32
  }
  func.func @transform_7(%arg0: i32) -> (i32, i32) {
    %c0_i32 = arith.constant 0 : i32
    %c0_i32_0 = arith.constant 0 : i32
    %c0_i32_1 = arith.constant 0 : i32
    return %c0_i32, %c0_i32_0 : i32, i32
  }
  func.func @transform_8(%arg0: i32) -> (i32, i32, i32) {
    %c0_i32 = arith.constant 0 : i32
    %c0_i32_0 = arith.constant 0 : i32
    %c0_i32_1 = arith.constant 0 : i32
    return %arg0, %c0_i32, %c0_i32_0 : i32, i32, i32
  }
  func.func @transform_9(%arg0: i32) -> (i32, i32, i32) {
    %c0_i32 = arith.constant 0 : i32
    %c0_i32_0 = arith.constant 0 : i32
    %c0_i32_1 = arith.constant 0 : i32
    return %arg0, %c0_i32, %c0_i32_0 : i32, i32, i32
  }
}

module attributes {stable_mosaic.version = 11 : i64} {
  func.func @kernel(%arg0: i32, %arg1: memref<1x64x128xf32, #tpu.memory_space<vmem>>, %arg2: memref<32x64xf32, #tpu.memory_space<vmem>>, %arg3: memref<32x1xf32, #tpu.memory_space<vmem>>, %arg4: memref<6x32x32xf32, #tpu.memory_space<vmem>>, %arg5: memref<2x32x1xf32, #tpu.memory_space<vmem>>, %arg6: memref<2x32x32xf32, #tpu.memory_space<vmem>>, %arg7: memref<2x32x1xf32, #tpu.memory_space<vmem>>, %arg8: memref<128x8xf32, #tpu.memory_space<vmem>>, %arg9: memref<8x32xf32, #tpu.memory_space<vmem>>, %arg10: memref<8x1xf32, #tpu.memory_space<vmem>>, %arg11: memref<1x32x8xf32, #tpu.memory_space<vmem>>, %arg12: memref<1x8x8xf32, #tpu.memory_space<vmem>>) attributes {dimension_semantics = [#tpu.dimension_semantics<parallel>], iteration_bounds = array<i64: 2>, scalar_prefetch = 0 : i64, scratch_operands = 0 : i64, tpu.core_type = #tpu.core_type<tc>, window_params = [{transform_indices = @transform_0, window_bounds = array<i64: 1, 64, 128>}, {pipeline_mode = #tpu.pipeline_mode<synchronous>, transform_indices = @transform_1, window_bounds = array<i64: 32, 64>}, {pipeline_mode = #tpu.pipeline_mode<synchronous>, transform_indices = @transform_2, window_bounds = array<i64: 32, 1>}, {pipeline_mode = #tpu.pipeline_mode<synchronous>, transform_indices = @transform_3, window_bounds = array<i64: 6, 32, 32>}, {pipeline_mode = #tpu.pipeline_mode<synchronous>, transform_indices = @transform_4, window_bounds = array<i64: 2, 32, 1>}, {pipeline_mode = #tpu.pipeline_mode<synchronous>, transform_indices = @transform_5, window_bounds = array<i64: 2, 32, 32>}, {pipeline_mode = #tpu.pipeline_mode<synchronous>, transform_indices = @transform_6, window_bounds = array<i64: 2, 32, 1>}, {pipeline_mode = #tpu.pipeline_mode<synchronous>, transform_indices = @transform_7, window_bounds = array<i64: 128, 8>}, {pipeline_mode = #tpu.pipeline_mode<synchronous>, transform_indices = @transform_8, window_bounds = array<i64: 8, 32>}, {pipeline_mode = #tpu.pipeline_mode<synchronous>, transform_indices = @transform_9, window_bounds = array<i64: 8, 1>}, {transform_indices = @transform_10, window_bounds = array<i64: 1, 32, 8>}, {transform_indices = @transform_11, window_bounds = array<i64: 1, 8, 8>}]} {
    %c0 = arith.constant 0 : index
    %c0_0 = arith.constant 0 : index
    %c0_1 = arith.constant 0 : index
    %0 = vector.load %arg1[%c0, %c0_0, %c0_1] : memref<1x64x128xf32, #tpu.memory_space<vmem>>, vector<1x64x128xf32>
    %1 = vector.shape_cast %0 : vector<1x64x128xf32> to vector<64x128xf32>
    %c0_2 = arith.constant 0 : index
    %c0_3 = arith.constant 0 : index
    %2 = vector.load %arg8[%c0_2, %c0_3] : memref<128x8xf32, #tpu.memory_space<vmem>>, vector<128x8xf32>
    %cst = arith.constant dense<0.000000e+00> : vector<64x8xf32>
    %3 = tpu.matmul %1, %2, %cst {dimension_numbers = #tpu.dot_dimension_numbers<[1], [0], [0], [1], [0, 0, 1, 1], [], []>} : vector<64x128xf32>, vector<128x8xf32>, vector<64x8xf32> -> vector<64x8xf32>
    %c0_4 = arith.constant 0 : index
    %c0_5 = arith.constant 0 : index
    %4 = vector.load %arg2[%c0_4, %c0_5] : memref<32x64xf32, #tpu.memory_space<vmem>>, vector<32x64xf32>
    %cst_6 = arith.constant dense<0.000000e+00> : vector<32x8xf32>
    %5 = tpu.matmul %4, %3, %cst_6 {dimension_numbers = #tpu.dot_dimension_numbers<[1], [0], [0], [1], [0, 0, 1, 1], [], []>} : vector<32x64xf32>, vector<64x8xf32>, vector<32x8xf32> -> vector<32x8xf32>
    %c0_7 = arith.constant 0 : index
    %c0_8 = arith.constant 0 : index
    %6 = vector.load %arg3[%c0_7, %c0_8] : memref<32x1xf32, #tpu.memory_space<vmem>>, vector<32x1xf32>
    %7 = vector.broadcast %6 : vector<32x1xf32> to vector<32x8xf32>
    %8 = arith.addf %5, %7 : vector<32x8xf32>
    %cst_9 = arith.constant 0.000000e+00 : f32
    %9 = vector.broadcast %cst_9 : f32 to vector<32x1xf32>
    %10 = vector.extract_strided_slice %8 {offsets = [0, 0], sizes = [32, 7], strides = [1, 1]} : vector<32x8xf32> to vector<32x7xf32>
    %11 = tpu.concatenate %9, %10 in 1 : vector<32x1xf32>, vector<32x7xf32> -> vector<32x8xf32>
    %cst_10 = arith.constant 0.000000e+00 : f32
    %12 = vector.broadcast %cst_10 : f32 to vector<32x2xf32>
    %13 = vector.extract_strided_slice %8 {offsets = [0, 0], sizes = [32, 6], strides = [1, 1]} : vector<32x8xf32> to vector<32x6xf32>
    %14 = tpu.concatenate %12, %13 in 1 : vector<32x2xf32>, vector<32x6xf32> -> vector<32x8xf32>
    %c2 = arith.constant 2 : index
    %c0_11 = arith.constant 0 : index
    %c0_12 = arith.constant 0 : index
    %15 = vector.load %arg4[%c2, %c0_11, %c0_12] : memref<6x32x32xf32, #tpu.memory_space<vmem>>, vector<1x32x32xf32>
    %16 = vector.shape_cast %15 : vector<1x32x32xf32> to vector<32x32xf32>
    %cst_13 = arith.constant dense<0.000000e+00> : vector<32x8xf32>
    %17 = tpu.matmul %16, %8, %cst_13 {dimension_numbers = #tpu.dot_dimension_numbers<[1], [0], [0], [1], [0, 0, 1, 1], [], []>} : vector<32x32xf32>, vector<32x8xf32>, vector<32x8xf32> -> vector<32x8xf32>
    %c1 = arith.constant 1 : index
    %c0_14 = arith.constant 0 : index
    %c0_15 = arith.constant 0 : index
    %18 = vector.load %arg4[%c1, %c0_14, %c0_15] : memref<6x32x32xf32, #tpu.memory_space<vmem>>, vector<1x32x32xf32>
    %19 = vector.shape_cast %18 : vector<1x32x32xf32> to vector<32x32xf32>
    %cst_16 = arith.constant dense<0.000000e+00> : vector<32x8xf32>
    %20 = tpu.matmul %19, %11, %cst_16 {dimension_numbers = #tpu.dot_dimension_numbers<[1], [0], [0], [1], [0, 0, 1, 1], [], []>} : vector<32x32xf32>, vector<32x8xf32>, vector<32x8xf32> -> vector<32x8xf32>
    %21 = arith.addf %17, %20 : vector<32x8xf32>
    %c0_17 = arith.constant 0 : index
    %c0_18 = arith.constant 0 : index
    %c0_19 = arith.constant 0 : index
    %22 = vector.load %arg4[%c0_17, %c0_18, %c0_19] : memref<6x32x32xf32, #tpu.memory_space<vmem>>, vector<1x32x32xf32>
    %23 = vector.shape_cast %22 : vector<1x32x32xf32> to vector<32x32xf32>
    %cst_20 = arith.constant dense<0.000000e+00> : vector<32x8xf32>
    %24 = tpu.matmul %23, %14, %cst_20 {dimension_numbers = #tpu.dot_dimension_numbers<[1], [0], [0], [1], [0, 0, 1, 1], [], []>} : vector<32x32xf32>, vector<32x8xf32>, vector<32x8xf32> -> vector<32x8xf32>
    %25 = arith.addf %21, %24 : vector<32x8xf32>
    %c0_21 = arith.constant 0 : index
    %c0_22 = arith.constant 0 : index
    %c0_23 = arith.constant 0 : index
    %26 = vector.load %arg5[%c0_21, %c0_22, %c0_23] : memref<2x32x1xf32, #tpu.memory_space<vmem>>, vector<1x32x1xf32>
    %27 = vector.shape_cast %26 : vector<1x32x1xf32> to vector<32x1xf32>
    %28 = vector.broadcast %27 : vector<32x1xf32> to vector<32x8xf32>
    %29 = arith.addf %25, %28 : vector<32x8xf32>
    %cst_24 = arith.constant 0.000000e+00 : f32
    %30 = vector.broadcast %cst_24 : f32 to vector<32x8xf32>
    %31 = arith.maximumf %29, %30 : vector<32x8xf32>
    %c0_25 = arith.constant 0 : index
    %c0_26 = arith.constant 0 : index
    %c0_27 = arith.constant 0 : index
    %32 = vector.load %arg6[%c0_25, %c0_26, %c0_27] : memref<2x32x32xf32, #tpu.memory_space<vmem>>, vector<1x32x32xf32>
    %33 = vector.shape_cast %32 : vector<1x32x32xf32> to vector<32x32xf32>
    %cst_28 = arith.constant dense<0.000000e+00> : vector<32x8xf32>
    %34 = tpu.matmul %33, %31, %cst_28 {dimension_numbers = #tpu.dot_dimension_numbers<[1], [0], [0], [1], [0, 0, 1, 1], [], []>} : vector<32x32xf32>, vector<32x8xf32>, vector<32x8xf32> -> vector<32x8xf32>
    %35 = arith.addf %8, %34 : vector<32x8xf32>
    %c0_29 = arith.constant 0 : index
    %c0_30 = arith.constant 0 : index
    %c0_31 = arith.constant 0 : index
    %36 = vector.load %arg7[%c0_29, %c0_30, %c0_31] : memref<2x32x1xf32, #tpu.memory_space<vmem>>, vector<1x32x1xf32>
    %37 = vector.shape_cast %36 : vector<1x32x1xf32> to vector<32x1xf32>
    %38 = vector.broadcast %37 : vector<32x1xf32> to vector<32x8xf32>
    %39 = arith.addf %35, %38 : vector<32x8xf32>
    %cst_32 = arith.constant 0.000000e+00 : f32
    %40 = vector.broadcast %cst_32 : f32 to vector<32x2xf32>
    %41 = vector.extract_strided_slice %39 {offsets = [0, 0], sizes = [32, 6], strides = [1, 1]} : vector<32x8xf32> to vector<32x6xf32>
    %42 = tpu.concatenate %40, %41 in 1 : vector<32x2xf32>, vector<32x6xf32> -> vector<32x8xf32>
    %cst_33 = arith.constant 0.000000e+00 : f32
    %43 = vector.broadcast %cst_33 : f32 to vector<32x4xf32>
    %44 = vector.extract_strided_slice %39 {offsets = [0, 0], sizes = [32, 4], strides = [1, 1]} : vector<32x8xf32> to vector<32x4xf32>
    %45 = tpu.concatenate %43, %44 in 1 : vector<32x4xf32>, vector<32x4xf32> -> vector<32x8xf32>
    %c5 = arith.constant 5 : index
    %c0_34 = arith.constant 0 : index
    %c0_35 = arith.constant 0 : index
    %46 = vector.load %arg4[%c5, %c0_34, %c0_35] : memref<6x32x32xf32, #tpu.memory_space<vmem>>, vector<1x32x32xf32>
    %47 = vector.shape_cast %46 : vector<1x32x32xf32> to vector<32x32xf32>
    %cst_36 = arith.constant dense<0.000000e+00> : vector<32x8xf32>
    %48 = tpu.matmul %47, %39, %cst_36 {dimension_numbers = #tpu.dot_dimension_numbers<[1], [0], [0], [1], [0, 0, 1, 1], [], []>} : vector<32x32xf32>, vector<32x8xf32>, vector<32x8xf32> -> vector<32x8xf32>
    %c4 = arith.constant 4 : index
    %c0_37 = arith.constant 0 : index
    %c0_38 = arith.constant 0 : index
    %49 = vector.load %arg4[%c4, %c0_37, %c0_38] : memref<6x32x32xf32, #tpu.memory_space<vmem>>, vector<1x32x32xf32>
    %50 = vector.shape_cast %49 : vector<1x32x32xf32> to vector<32x32xf32>
    %cst_39 = arith.constant dense<0.000000e+00> : vector<32x8xf32>
    %51 = tpu.matmul %50, %42, %cst_39 {dimension_numbers = #tpu.dot_dimension_numbers<[1], [0], [0], [1], [0, 0, 1, 1], [], []>} : vector<32x32xf32>, vector<32x8xf32>, vector<32x8xf32> -> vector<32x8xf32>
    %52 = arith.addf %48, %51 : vector<32x8xf32>
    %c3 = arith.constant 3 : index
    %c0_40 = arith.constant 0 : index
    %c0_41 = arith.constant 0 : index
    %53 = vector.load %arg4[%c3, %c0_40, %c0_41] : memref<6x32x32xf32, #tpu.memory_space<vmem>>, vector<1x32x32xf32>
    %54 = vector.shape_cast %53 : vector<1x32x32xf32> to vector<32x32xf32>
    %cst_42 = arith.constant dense<0.000000e+00> : vector<32x8xf32>
    %55 = tpu.matmul %54, %45, %cst_42 {dimension_numbers = #tpu.dot_dimension_numbers<[1], [0], [0], [1], [0, 0, 1, 1], [], []>} : vector<32x32xf32>, vector<32x8xf32>, vector<32x8xf32> -> vector<32x8xf32>
    %56 = arith.addf %52, %55 : vector<32x8xf32>
    %c1_43 = arith.constant 1 : index
    %c0_44 = arith.constant 0 : index
    %c0_45 = arith.constant 0 : index
    %57 = vector.load %arg5[%c1_43, %c0_44, %c0_45] : memref<2x32x1xf32, #tpu.memory_space<vmem>>, vector<1x32x1xf32>
    %58 = vector.shape_cast %57 : vector<1x32x1xf32> to vector<32x1xf32>
    %59 = vector.broadcast %58 : vector<32x1xf32> to vector<32x8xf32>
    %60 = arith.addf %56, %59 : vector<32x8xf32>
    %cst_46 = arith.constant 0.000000e+00 : f32
    %61 = vector.broadcast %cst_46 : f32 to vector<32x8xf32>
    %62 = arith.maximumf %60, %61 : vector<32x8xf32>
    %c1_47 = arith.constant 1 : index
    %c0_48 = arith.constant 0 : index
    %c0_49 = arith.constant 0 : index
    %63 = vector.load %arg6[%c1_47, %c0_48, %c0_49] : memref<2x32x32xf32, #tpu.memory_space<vmem>>, vector<1x32x32xf32>
    %64 = vector.shape_cast %63 : vector<1x32x32xf32> to vector<32x32xf32>
    %cst_50 = arith.constant dense<0.000000e+00> : vector<32x8xf32>
    %65 = tpu.matmul %64, %62, %cst_50 {dimension_numbers = #tpu.dot_dimension_numbers<[1], [0], [0], [1], [0, 0, 1, 1], [], []>} : vector<32x32xf32>, vector<32x8xf32>, vector<32x8xf32> -> vector<32x8xf32>
    %66 = arith.addf %39, %65 : vector<32x8xf32>
    %c1_51 = arith.constant 1 : index
    %c0_52 = arith.constant 0 : index
    %c0_53 = arith.constant 0 : index
    %67 = vector.load %arg7[%c1_51, %c0_52, %c0_53] : memref<2x32x1xf32, #tpu.memory_space<vmem>>, vector<1x32x1xf32>
    %68 = vector.shape_cast %67 : vector<1x32x1xf32> to vector<32x1xf32>
    %69 = vector.broadcast %68 : vector<32x1xf32> to vector<32x8xf32>
    %70 = arith.addf %66, %69 : vector<32x8xf32>
    %c0_54 = arith.constant 0 : index
    %c0_55 = arith.constant 0 : index
    %c0_56 = arith.constant 0 : index
    %71 = vector.load %arg11[%c0_54, %c0_55, %c0_56] : memref<1x32x8xf32, #tpu.memory_space<vmem>>, vector<1x32x8xf32>
    %72 = vector.shape_cast %71 : vector<1x32x8xf32> to vector<32x8xf32>
    %73 = vector.shape_cast %70 : vector<32x8xf32> to vector<1x32x8xf32>
    tpu.vector_store %arg11[%c0_54, %c0_55, %c0_56], %73 {strides = array<i32>} : memref<1x32x8xf32, #tpu.memory_space<vmem>>, vector<1x32x8xf32>,
    %c0_57 = arith.constant 0 : index
    %c0_58 = arith.constant 0 : index
    %74 = vector.load %arg9[%c0_57, %c0_58] : memref<8x32xf32, #tpu.memory_space<vmem>>, vector<8x32xf32>
    %cst_59 = arith.constant dense<0.000000e+00> : vector<8x8xf32>
    %75 = tpu.matmul %74, %70, %cst_59 {dimension_numbers = #tpu.dot_dimension_numbers<[1], [0], [0], [1], [0, 0, 1, 1], [], []>} : vector<8x32xf32>, vector<32x8xf32>, vector<8x8xf32> -> vector<8x8xf32>
    %c0_60 = arith.constant 0 : index
    %c0_61 = arith.constant 0 : index
    %76 = vector.load %arg10[%c0_60, %c0_61] : memref<8x1xf32, #tpu.memory_space<vmem>>, vector<8x1xf32>
    %77 = vector.broadcast %76 : vector<8x1xf32> to vector<8x8xf32>
    %78 = arith.addf %75, %77 : vector<8x8xf32>
    %c0_62 = arith.constant 0 : index
    %c0_63 = arith.constant 0 : index
    %c0_64 = arith.constant 0 : index
    %79 = vector.load %arg12[%c0_62, %c0_63, %c0_64] : memref<1x8x8xf32, #tpu.memory_space<vmem>>, vector<1x8x8xf32>
    %80 = vector.shape_cast %79 : vector<1x8x8xf32> to vector<8x8xf32>
    %81 = vector.shape_cast %78 : vector<8x8xf32> to vector<1x8x8xf32>
    tpu.vector_store %arg12[%c0_62, %c0_63, %c0_64], %81 {strides = array<i32>} : memref<1x8x8xf32, #tpu.memory_space<vmem>>, vector<1x8x8xf32>,
    return
  }
  func.func @transform_0(%arg0: i32) -> (i32, i32, i32) {
    %c0_i32 = arith.constant 0 : i32
    %c0_i32_0 = arith.constant 0 : i32
    %c0_i32_1 = arith.constant 0 : i32
    return %arg0, %c0_i32, %c0_i32_0 : i32, i32, i32
  }
  func.func @transform_1(%arg0: i32) -> (i32, i32) {
    %c0_i32 = arith.constant 0 : i32
    %c0_i32_0 = arith.constant 0 : i32
    %c0_i32_1 = arith.constant 0 : i32
    return %c0_i32, %c0_i32_0 : i32, i32
  }
  func.func @transform_2(%arg0: i32) -> (i32, i32) {
    %c0_i32 = arith.constant 0 : i32
    %c0_i32_0 = arith.constant 0 : i32
    %c0_i32_1 = arith.constant 0 : i32
    return %c0_i32, %c0_i32_0 : i32, i32
  }
  func.func @transform_3(%arg0: i32) -> (i32, i32, i32) {
    %c0_i32 = arith.constant 0 : i32
    %c0_i32_0 = arith.constant 0 : i32
    %c0_i32_1 = arith.constant 0 : i32
    %c0_i32_2 = arith.constant 0 : i32
    return %c0_i32, %c0_i32_0, %c0_i32_1 : i32, i32, i32
  }
  func.func @transform_4(%arg0: i32) -> (i32, i32, i32) {
    %c0_i32 = arith.constant 0 : i32
    %c0_i32_0 = arith.constant 0 : i32
    %c0_i32_1 = arith.constant 0 : i32
    %c0_i32_2 = arith.constant 0 : i32
    return %c0_i32, %c0_i32_0, %c0_i32_1 : i32, i32, i32
  }
  func.func @transform_5(%arg0: i32) -> (i32, i32, i32) {
    %c0_i32 = arith.constant 0 : i32
    %c0_i32_0 = arith.constant 0 : i32
    %c0_i32_1 = arith.constant 0 : i32
    %c0_i32_2 = arith.constant 0 : i32
    return %c0_i32, %c0_i32_0, %c0_i32_1 : i32, i32, i32
  }
  func.func @transform_6(%arg0: i32) -> (i32, i32, i32) {
    %c0_i32 = arith.constant 0 : i32
    %c0_i32_0 = arith.constant 0 : i32
    %c0_i32_1 = arith.constant 0 : i32
    %c0_i32_2 = arith.constant 0 : i32
    return %c0_i32, %c0_i32_0, %c0_i32_1 : i32, i32, i32
  }
  func.func @transform_7(%arg0: i32) -> (i32, i32) {
    %c0_i32 = arith.constant 0 : i32
    %c0_i32_0 = arith.constant 0 : i32
    %c0_i32_1 = arith.constant 0 : i32
    return %c0_i32, %c0_i32_0 : i32, i32
  }
  func.func @transform_8(%arg0: i32) -> (i32, i32) {
    %c0_i32 = arith.constant 0 : i32
    %c0_i32_0 = arith.constant 0 : i32
    %c0_i32_1 = arith.constant 0 : i32
    return %c0_i32, %c0_i32_0 : i32, i32
  }
  func.func @transform_9(%arg0: i32) -> (i32, i32) {
    %c0_i32 = arith.constant 0 : i32
    %c0_i32_0 = arith.constant 0 : i32
    %c0_i32_1 = arith.constant 0 : i32
    return %c0_i32, %c0_i32_0 : i32, i32
  }
  func.func @transform_10(%arg0: i32) -> (i32, i32, i32) {
    %c0_i32 = arith.constant 0 : i32
    %c0_i32_0 = arith.constant 0 : i32
    %c0_i32_1 = arith.constant 0 : i32
    return %arg0, %c0_i32, %c0_i32_0 : i32, i32, i32
  }
  func.func @transform_11(%arg0: i32) -> (i32, i32, i32) {
    %c0_i32 = arith.constant 0 : i32
    %c0_i32_0 = arith.constant 0 : i32
    %c0_i32_1 = arith.constant 0 : i32
    return %arg0, %c0_i32, %c0_i32_0 : i32, i32, i32
  }
}

module attributes {stable_mosaic.version = 11 : i64} {
  func.func @_fpn_kernel(%arg0: i32, %arg1: memref<1x32x128xf32, #tpu.memory_space<vmem>>, %arg2: memref<1x32x64xf32, #tpu.memory_space<vmem>>, %arg3: memref<1x32x32xf32, #tpu.memory_space<vmem>>, %arg4: memref<1x32x16xf32, #tpu.memory_space<vmem>>, %arg5: memref<32x32xf32, #tpu.memory_space<vmem>>, %arg6: memref<32x1xf32, #tpu.memory_space<vmem>>, %arg7: memref<16x32xf32, #tpu.memory_space<vmem>>, %arg8: memref<32x64xf32, #tpu.memory_space<vmem>>, %arg9: memref<64x128xf32, #tpu.memory_space<vmem>>, %arg10: memref<8x32xf32, #tpu.memory_space<vmem>>, %arg11: memref<8x1xf32, #tpu.memory_space<vmem>>, %arg12: memref<1x32x128xf32, #tpu.memory_space<vmem>>, %arg13: memref<1x32x64xf32, #tpu.memory_space<vmem>>, %arg14: memref<1x32x32xf32, #tpu.memory_space<vmem>>, %arg15: memref<1x8x128xf32, #tpu.memory_space<vmem>>, %arg16: memref<1x8x64xf32, #tpu.memory_space<vmem>>, %arg17: memref<1x8x32xf32, #tpu.memory_space<vmem>>, %arg18: memref<1x8x16xf32, #tpu.memory_space<vmem>>) attributes {dimension_semantics = [#tpu.dimension_semantics<parallel>], iteration_bounds = array<i64: 2>, scalar_prefetch = 0 : i64, scratch_operands = 0 : i64, tpu.core_type = #tpu.core_type<tc>, window_params = [{transform_indices = @transform_0, window_bounds = array<i64: 1, 32, 128>}, {transform_indices = @transform_1, window_bounds = array<i64: 1, 32, 64>}, {transform_indices = @transform_2, window_bounds = array<i64: 1, 32, 32>}, {transform_indices = @transform_3, window_bounds = array<i64: 1, 32, 16>}, {pipeline_mode = #tpu.pipeline_mode<synchronous>, transform_indices = @transform_4, window_bounds = array<i64: 32, 32>}, {pipeline_mode = #tpu.pipeline_mode<synchronous>, transform_indices = @transform_5, window_bounds = array<i64: 32, 1>}, {pipeline_mode = #tpu.pipeline_mode<synchronous>, transform_indices = @transform_6, window_bounds = array<i64: 16, 32>}, {pipeline_mode = #tpu.pipeline_mode<synchronous>, transform_indices = @transform_7, window_bounds = array<i64: 32, 64>}, {pipeline_mode = #tpu.pipeline_mode<synchronous>, transform_indices = @transform_8, window_bounds = array<i64: 64, 128>}, {pipeline_mode = #tpu.pipeline_mode<synchronous>, transform_indices = @transform_9, window_bounds = array<i64: 8, 32>}, {pipeline_mode = #tpu.pipeline_mode<synchronous>, transform_indices = @transform_10, window_bounds = array<i64: 8, 1>}, {transform_indices = @transform_11, window_bounds = array<i64: 1, 32, 128>}, {transform_indices = @transform_12, window_bounds = array<i64: 1, 32, 64>}, {transform_indices = @transform_13, window_bounds = array<i64: 1, 32, 32>}, {transform_indices = @transform_14, window_bounds = array<i64: 1, 8, 128>}, {transform_indices = @transform_15, window_bounds = array<i64: 1, 8, 64>}, {transform_indices = @transform_16, window_bounds = array<i64: 1, 8, 32>}, {transform_indices = @transform_17, window_bounds = array<i64: 1, 8, 16>}]} {
    %c0 = arith.constant 0 : index
    %c0_0 = arith.constant 0 : index
    %0 = vector.load %arg5[%c0, %c0_0] : memref<32x32xf32, #tpu.memory_space<vmem>>, vector<32x32xf32>
    %c0_1 = arith.constant 0 : index
    %c0_2 = arith.constant 0 : index
    %1 = vector.load %arg6[%c0_1, %c0_2] : memref<32x1xf32, #tpu.memory_space<vmem>>, vector<32x1xf32>
    %c0_3 = arith.constant 0 : index
    %c0_4 = arith.constant 0 : index
    %2 = vector.load %arg10[%c0_3, %c0_4] : memref<8x32xf32, #tpu.memory_space<vmem>>, vector<8x32xf32>
    %c0_5 = arith.constant 0 : index
    %c0_6 = arith.constant 0 : index
    %3 = vector.load %arg11[%c0_5, %c0_6] : memref<8x1xf32, #tpu.memory_space<vmem>>, vector<8x1xf32>
    %c0_7 = arith.constant 0 : index
    %c0_8 = arith.constant 0 : index
    %c0_9 = arith.constant 0 : index
    %4 = vector.load %arg4[%c0_7, %c0_8, %c0_9] : memref<1x32x16xf32, #tpu.memory_space<vmem>>, vector<1x32x16xf32>
    %5 = vector.shape_cast %4 : vector<1x32x16xf32> to vector<32x16xf32>
    %c0_10 = arith.constant 0 : index
    %c0_11 = arith.constant 0 : index
    %6 = vector.load %arg7[%c0_10, %c0_11] : memref<16x32xf32, #tpu.memory_space<vmem>>, vector<16x32xf32>
    %cst = arith.constant dense<0.000000e+00> : vector<32x32xf32>
    %7 = tpu.matmul %5, %6, %cst {dimension_numbers = #tpu.dot_dimension_numbers<[1], [0], [0], [1], [0, 0, 1, 1], [], []>} : vector<32x16xf32>, vector<16x32xf32>, vector<32x32xf32> -> vector<32x32xf32>
    %c0_12 = arith.constant 0 : index
    %c0_13 = arith.constant 0 : index
    %c0_14 = arith.constant 0 : index
    %8 = vector.load %arg3[%c0_12, %c0_13, %c0_14] : memref<1x32x32xf32, #tpu.memory_space<vmem>>, vector<1x32x32xf32>
    %9 = vector.shape_cast %8 : vector<1x32x32xf32> to vector<32x32xf32>
    %cst_15 = arith.constant dense<0.000000e+00> : vector<32x32xf32>
    %10 = tpu.matmul %0, %9, %cst_15 {dimension_numbers = #tpu.dot_dimension_numbers<[1], [0], [0], [1], [0, 0, 1, 1], [], []>} : vector<32x32xf32>, vector<32x32xf32>, vector<32x32xf32> -> vector<32x32xf32>
    %11 = arith.addf %7, %10 : vector<32x32xf32>
    %12 = vector.broadcast %1 : vector<32x1xf32> to vector<32x32xf32>
    %13 = arith.addf %11, %12 : vector<32x32xf32>
    %c0_16 = arith.constant 0 : index
    %c0_17 = arith.constant 0 : index
    %14 = vector.load %arg8[%c0_16, %c0_17] : memref<32x64xf32, #tpu.memory_space<vmem>>, vector<32x64xf32>
    %cst_18 = arith.constant dense<0.000000e+00> : vector<32x64xf32>
    %15 = tpu.matmul %13, %14, %cst_18 {dimension_numbers = #tpu.dot_dimension_numbers<[1], [0], [0], [1], [0, 0, 1, 1], [], []>} : vector<32x32xf32>, vector<32x64xf32>, vector<32x64xf32> -> vector<32x64xf32>
    %c0_19 = arith.constant 0 : index
    %c0_20 = arith.constant 0 : index
    %c0_21 = arith.constant 0 : index
    %16 = vector.load %arg2[%c0_19, %c0_20, %c0_21] : memref<1x32x64xf32, #tpu.memory_space<vmem>>, vector<1x32x64xf32>
    %17 = vector.shape_cast %16 : vector<1x32x64xf32> to vector<32x64xf32>
    %cst_22 = arith.constant dense<0.000000e+00> : vector<32x64xf32>
    %18 = tpu.matmul %0, %17, %cst_22 {dimension_numbers = #tpu.dot_dimension_numbers<[1], [0], [0], [1], [0, 0, 1, 1], [], []>} : vector<32x32xf32>, vector<32x64xf32>, vector<32x64xf32> -> vector<32x64xf32>
    %19 = arith.addf %15, %18 : vector<32x64xf32>
    %20 = vector.broadcast %1 : vector<32x1xf32> to vector<32x64xf32>
    %21 = arith.addf %19, %20 : vector<32x64xf32>
    %c0_23 = arith.constant 0 : index
    %c0_24 = arith.constant 0 : index
    %22 = vector.load %arg9[%c0_23, %c0_24] : memref<64x128xf32, #tpu.memory_space<vmem>>, vector<64x128xf32>
    %cst_25 = arith.constant dense<0.000000e+00> : vector<32x128xf32>
    %23 = tpu.matmul %21, %22, %cst_25 {dimension_numbers = #tpu.dot_dimension_numbers<[1], [0], [0], [1], [0, 0, 1, 1], [], []>} : vector<32x64xf32>, vector<64x128xf32>, vector<32x128xf32> -> vector<32x128xf32>
    %c0_26 = arith.constant 0 : index
    %c0_27 = arith.constant 0 : index
    %c0_28 = arith.constant 0 : index
    %24 = vector.load %arg1[%c0_26, %c0_27, %c0_28] : memref<1x32x128xf32, #tpu.memory_space<vmem>>, vector<1x32x128xf32>
    %25 = vector.shape_cast %24 : vector<1x32x128xf32> to vector<32x128xf32>
    %cst_29 = arith.constant dense<0.000000e+00> : vector<32x128xf32>
    %26 = tpu.matmul %0, %25, %cst_29 {dimension_numbers = #tpu.dot_dimension_numbers<[1], [0], [0], [1], [0, 0, 1, 1], [], []>} : vector<32x32xf32>, vector<32x128xf32>, vector<32x128xf32> -> vector<32x128xf32>
    %27 = arith.addf %23, %26 : vector<32x128xf32>
    %28 = vector.broadcast %1 : vector<32x1xf32> to vector<32x128xf32>
    %29 = arith.addf %27, %28 : vector<32x128xf32>
    %c0_30 = arith.constant 0 : index
    %c0_31 = arith.constant 0 : index
    %c0_32 = arith.constant 0 : index
    %30 = vector.load %arg12[%c0_30, %c0_31, %c0_32] : memref<1x32x128xf32, #tpu.memory_space<vmem>>, vector<1x32x128xf32>
    %31 = vector.shape_cast %30 : vector<1x32x128xf32> to vector<32x128xf32>
    %32 = vector.shape_cast %29 : vector<32x128xf32> to vector<1x32x128xf32>
    tpu.vector_store %arg12[%c0_30, %c0_31, %c0_32], %32 {strides = array<i32>} : memref<1x32x128xf32, #tpu.memory_space<vmem>>, vector<1x32x128xf32>,
    %c0_33 = arith.constant 0 : index
    %c0_34 = arith.constant 0 : index
    %c0_35 = arith.constant 0 : index
    %33 = vector.load %arg13[%c0_33, %c0_34, %c0_35] : memref<1x32x64xf32, #tpu.memory_space<vmem>>, vector<1x32x64xf32>
    %34 = vector.shape_cast %33 : vector<1x32x64xf32> to vector<32x64xf32>
    %35 = vector.shape_cast %21 : vector<32x64xf32> to vector<1x32x64xf32>
    tpu.vector_store %arg13[%c0_33, %c0_34, %c0_35], %35 {strides = array<i32>} : memref<1x32x64xf32, #tpu.memory_space<vmem>>, vector<1x32x64xf32>,
    %c0_36 = arith.constant 0 : index
    %c0_37 = arith.constant 0 : index
    %c0_38 = arith.constant 0 : index
    %36 = vector.load %arg14[%c0_36, %c0_37, %c0_38] : memref<1x32x32xf32, #tpu.memory_space<vmem>>, vector<1x32x32xf32>
    %37 = vector.shape_cast %36 : vector<1x32x32xf32> to vector<32x32xf32>
    %38 = vector.shape_cast %13 : vector<32x32xf32> to vector<1x32x32xf32>
    tpu.vector_store %arg14[%c0_36, %c0_37, %c0_38], %38 {strides = array<i32>} : memref<1x32x32xf32, #tpu.memory_space<vmem>>, vector<1x32x32xf32>,
    %cst_39 = arith.constant dense<0.000000e+00> : vector<8x128xf32>
    %39 = tpu.matmul %2, %29, %cst_39 {dimension_numbers = #tpu.dot_dimension_numbers<[1], [0], [0], [1], [0, 0, 1, 1], [], []>} : vector<8x32xf32>, vector<32x128xf32>, vector<8x128xf32> -> vector<8x128xf32>
    %40 = vector.broadcast %3 : vector<8x1xf32> to vector<8x128xf32>
    %41 = arith.addf %39, %40 : vector<8x128xf32>
    %c0_40 = arith.constant 0 : index
    %c0_41 = arith.constant 0 : index
    %c0_42 = arith.constant 0 : index
    %42 = vector.load %arg15[%c0_40, %c0_41, %c0_42] : memref<1x8x128xf32, #tpu.memory_space<vmem>>, vector<1x8x128xf32>
    %43 = vector.shape_cast %42 : vector<1x8x128xf32> to vector<8x128xf32>
    %44 = vector.shape_cast %41 : vector<8x128xf32> to vector<1x8x128xf32>
    tpu.vector_store %arg15[%c0_40, %c0_41, %c0_42], %44 {strides = array<i32>} : memref<1x8x128xf32, #tpu.memory_space<vmem>>, vector<1x8x128xf32>,
    %cst_43 = arith.constant dense<0.000000e+00> : vector<8x64xf32>
    %45 = tpu.matmul %2, %21, %cst_43 {dimension_numbers = #tpu.dot_dimension_numbers<[1], [0], [0], [1], [0, 0, 1, 1], [], []>} : vector<8x32xf32>, vector<32x64xf32>, vector<8x64xf32> -> vector<8x64xf32>
    %46 = vector.broadcast %3 : vector<8x1xf32> to vector<8x64xf32>
    %47 = arith.addf %45, %46 : vector<8x64xf32>
    %c0_44 = arith.constant 0 : index
    %c0_45 = arith.constant 0 : index
    %c0_46 = arith.constant 0 : index
    %48 = vector.load %arg16[%c0_44, %c0_45, %c0_46] : memref<1x8x64xf32, #tpu.memory_space<vmem>>, vector<1x8x64xf32>
    %49 = vector.shape_cast %48 : vector<1x8x64xf32> to vector<8x64xf32>
    %50 = vector.shape_cast %47 : vector<8x64xf32> to vector<1x8x64xf32>
    tpu.vector_store %arg16[%c0_44, %c0_45, %c0_46], %50 {strides = array<i32>} : memref<1x8x64xf32, #tpu.memory_space<vmem>>, vector<1x8x64xf32>,
    %cst_47 = arith.constant dense<0.000000e+00> : vector<8x32xf32>
    %51 = tpu.matmul %2, %13, %cst_47 {dimension_numbers = #tpu.dot_dimension_numbers<[1], [0], [0], [1], [0, 0, 1, 1], [], []>} : vector<8x32xf32>, vector<32x32xf32>, vector<8x32xf32> -> vector<8x32xf32>
    %52 = vector.broadcast %3 : vector<8x1xf32> to vector<8x32xf32>
    %53 = arith.addf %51, %52 : vector<8x32xf32>
    %c0_48 = arith.constant 0 : index
    %c0_49 = arith.constant 0 : index
    %c0_50 = arith.constant 0 : index
    %54 = vector.load %arg17[%c0_48, %c0_49, %c0_50] : memref<1x8x32xf32, #tpu.memory_space<vmem>>, vector<1x8x32xf32>
    %55 = vector.shape_cast %54 : vector<1x8x32xf32> to vector<8x32xf32>
    %56 = vector.shape_cast %53 : vector<8x32xf32> to vector<1x8x32xf32>
    tpu.vector_store %arg17[%c0_48, %c0_49, %c0_50], %56 {strides = array<i32>} : memref<1x8x32xf32, #tpu.memory_space<vmem>>, vector<1x8x32xf32>,
    %cst_51 = arith.constant dense<0.000000e+00> : vector<8x16xf32>
    %57 = tpu.matmul %2, %5, %cst_51 {dimension_numbers = #tpu.dot_dimension_numbers<[1], [0], [0], [1], [0, 0, 1, 1], [], []>} : vector<8x32xf32>, vector<32x16xf32>, vector<8x16xf32> -> vector<8x16xf32>
    %58 = vector.broadcast %3 : vector<8x1xf32> to vector<8x16xf32>
    %59 = arith.addf %57, %58 : vector<8x16xf32>
    %c0_52 = arith.constant 0 : index
    %c0_53 = arith.constant 0 : index
    %c0_54 = arith.constant 0 : index
    %60 = vector.load %arg18[%c0_52, %c0_53, %c0_54] : memref<1x8x16xf32, #tpu.memory_space<vmem>>, vector<1x8x16xf32>
    %61 = vector.shape_cast %60 : vector<1x8x16xf32> to vector<8x16xf32>
    %62 = vector.shape_cast %59 : vector<8x16xf32> to vector<1x8x16xf32>
    tpu.vector_store %arg18[%c0_52, %c0_53, %c0_54], %62 {strides = array<i32>} : memref<1x8x16xf32, #tpu.memory_space<vmem>>, vector<1x8x16xf32>,
    return
  }
  func.func @transform_0(%arg0: i32) -> (i32, i32, i32) {
    %c0_i32 = arith.constant 0 : i32
    %c0_i32_0 = arith.constant 0 : i32
    %c0_i32_1 = arith.constant 0 : i32
    return %arg0, %c0_i32, %c0_i32_0 : i32, i32, i32
  }
  func.func @transform_1(%arg0: i32) -> (i32, i32, i32) {
    %c0_i32 = arith.constant 0 : i32
    %c0_i32_0 = arith.constant 0 : i32
    %c0_i32_1 = arith.constant 0 : i32
    return %arg0, %c0_i32, %c0_i32_0 : i32, i32, i32
  }
  func.func @transform_2(%arg0: i32) -> (i32, i32, i32) {
    %c0_i32 = arith.constant 0 : i32
    %c0_i32_0 = arith.constant 0 : i32
    %c0_i32_1 = arith.constant 0 : i32
    return %arg0, %c0_i32, %c0_i32_0 : i32, i32, i32
  }
  func.func @transform_3(%arg0: i32) -> (i32, i32, i32) {
    %c0_i32 = arith.constant 0 : i32
    %c0_i32_0 = arith.constant 0 : i32
    %c0_i32_1 = arith.constant 0 : i32
    return %arg0, %c0_i32, %c0_i32_0 : i32, i32, i32
  }
  func.func @transform_4(%arg0: i32) -> (i32, i32) {
    %c0_i32 = arith.constant 0 : i32
    %c0_i32_0 = arith.constant 0 : i32
    %c0_i32_1 = arith.constant 0 : i32
    return %c0_i32, %c0_i32_0 : i32, i32
  }
  func.func @transform_5(%arg0: i32) -> (i32, i32) {
    %c0_i32 = arith.constant 0 : i32
    %c0_i32_0 = arith.constant 0 : i32
    %c0_i32_1 = arith.constant 0 : i32
    return %c0_i32, %c0_i32_0 : i32, i32
  }
  func.func @transform_6(%arg0: i32) -> (i32, i32) {
    %c0_i32 = arith.constant 0 : i32
    %c0_i32_0 = arith.constant 0 : i32
    %c0_i32_1 = arith.constant 0 : i32
    return %c0_i32, %c0_i32_0 : i32, i32
  }
  func.func @transform_7(%arg0: i32) -> (i32, i32) {
    %c0_i32 = arith.constant 0 : i32
    %c0_i32_0 = arith.constant 0 : i32
    %c0_i32_1 = arith.constant 0 : i32
    return %c0_i32, %c0_i32_0 : i32, i32
  }
  func.func @transform_8(%arg0: i32) -> (i32, i32) {
    %c0_i32 = arith.constant 0 : i32
    %c0_i32_0 = arith.constant 0 : i32
    %c0_i32_1 = arith.constant 0 : i32
    return %c0_i32, %c0_i32_0 : i32, i32
  }
  func.func @transform_9(%arg0: i32) -> (i32, i32) {
    %c0_i32 = arith.constant 0 : i32
    %c0_i32_0 = arith.constant 0 : i32
    %c0_i32_1 = arith.constant 0 : i32
    return %c0_i32, %c0_i32_0 : i32, i32
  }
  func.func @transform_10(%arg0: i32) -> (i32, i32) {
    %c0_i32 = arith.constant 0 : i32
    %c0_i32_0 = arith.constant 0 : i32
    %c0_i32_1 = arith.constant 0 : i32
    return %c0_i32, %c0_i32_0 : i32, i32
  }
  func.func @transform_11(%arg0: i32) -> (i32, i32, i32) {
    %c0_i32 = arith.constant 0 : i32
    %c0_i32_0 = arith.constant 0 : i32
    %c0_i32_1 = arith.constant 0 : i32
    return %arg0, %c0_i32, %c0_i32_0 : i32, i32, i32
  }
  func.func @transform_12(%arg0: i32) -> (i32, i32, i32) {
    %c0_i32 = arith.constant 0 : i32
    %c0_i32_0 = arith.constant 0 : i32
    %c0_i32_1 = arith.constant 0 : i32
    return %arg0, %c0_i32, %c0_i32_0 : i32, i32, i32
  }
  func.func @transform_13(%arg0: i32) -> (i32, i32, i32) {
    %c0_i32 = arith.constant 0 : i32
    %c0_i32_0 = arith.constant 0 : i32
    %c0_i32_1 = arith.constant 0 : i32
    return %arg0, %c0_i32, %c0_i32_0 : i32, i32, i32
  }
  func.func @transform_14(%arg0: i32) -> (i32, i32, i32) {
    %c0_i32 = arith.constant 0 : i32
    %c0_i32_0 = arith.constant 0 : i32
    %c0_i32_1 = arith.constant 0 : i32
    return %arg0, %c0_i32, %c0_i32_0 : i32, i32, i32
  }
  func.func @transform_15(%arg0: i32) -> (i32, i32, i32) {
    %c0_i32 = arith.constant 0 : i32
    %c0_i32_0 = arith.constant 0 : i32
    %c0_i32_1 = arith.constant 0 : i32
    return %arg0, %c0_i32, %c0_i32_0 : i32, i32, i32
  }
  func.func @transform_16(%arg0: i32) -> (i32, i32, i32) {
    %c0_i32 = arith.constant 0 : i32
    %c0_i32_0 = arith.constant 0 : i32
    %c0_i32_1 = arith.constant 0 : i32
    return %arg0, %c0_i32, %c0_i32_0 : i32, i32, i32
  }
  func.func @transform_17(%arg0: i32) -> (i32, i32, i32) {
    %c0_i32 = arith.constant 0 : i32
    %c0_i32_0 = arith.constant 0 : i32
    %c0_i32_1 = arith.constant 0 : i32
    return %arg0, %c0_i32, %c0_i32_0 : i32, i32, i32
  }
}

module attributes {stable_mosaic.version = 11 : i64} {
  func.func @kernel(%arg0: i32, %arg1: memref<1x8x8xf32, #tpu.memory_space<vmem>>, %arg2: memref<32x8xf32, #tpu.memory_space<vmem>>, %arg3: memref<32x1xf32, #tpu.memory_space<vmem>>, %arg4: memref<6x32x32xf32, #tpu.memory_space<vmem>>, %arg5: memref<2x32x1xf32, #tpu.memory_space<vmem>>, %arg6: memref<2x32x32xf32, #tpu.memory_space<vmem>>, %arg7: memref<2x32x1xf32, #tpu.memory_space<vmem>>, %arg8: memref<8x32xf32, #tpu.memory_space<vmem>>, %arg9: memref<8x1xf32, #tpu.memory_space<vmem>>, %arg10: memref<1x32x8xf32, #tpu.memory_space<vmem>>, %arg11: memref<1x8x8xf32, #tpu.memory_space<vmem>>) attributes {dimension_semantics = [#tpu.dimension_semantics<parallel>], iteration_bounds = array<i64: 2>, scalar_prefetch = 0 : i64, scratch_operands = 0 : i64, tpu.core_type = #tpu.core_type<tc>, window_params = [{transform_indices = @transform_0, window_bounds = array<i64: 1, 8, 8>}, {pipeline_mode = #tpu.pipeline_mode<synchronous>, transform_indices = @transform_1, window_bounds = array<i64: 32, 8>}, {pipeline_mode = #tpu.pipeline_mode<synchronous>, transform_indices = @transform_2, window_bounds = array<i64: 32, 1>}, {pipeline_mode = #tpu.pipeline_mode<synchronous>, transform_indices = @transform_3, window_bounds = array<i64: 6, 32, 32>}, {pipeline_mode = #tpu.pipeline_mode<synchronous>, transform_indices = @transform_4, window_bounds = array<i64: 2, 32, 1>}, {pipeline_mode = #tpu.pipeline_mode<synchronous>, transform_indices = @transform_5, window_bounds = array<i64: 2, 32, 32>}, {pipeline_mode = #tpu.pipeline_mode<synchronous>, transform_indices = @transform_6, window_bounds = array<i64: 2, 32, 1>}, {pipeline_mode = #tpu.pipeline_mode<synchronous>, transform_indices = @transform_7, window_bounds = array<i64: 8, 32>}, {pipeline_mode = #tpu.pipeline_mode<synchronous>, transform_indices = @transform_8, window_bounds = array<i64: 8, 1>}, {transform_indices = @transform_9, window_bounds = array<i64: 1, 32, 8>}, {transform_indices = @transform_10, window_bounds = array<i64: 1, 8, 8>}]} {
    %c0 = arith.constant 0 : index
    %c0_0 = arith.constant 0 : index
    %c0_1 = arith.constant 0 : index
    %0 = vector.load %arg1[%c0, %c0_0, %c0_1] : memref<1x8x8xf32, #tpu.memory_space<vmem>>, vector<1x8x8xf32>
    %1 = vector.shape_cast %0 : vector<1x8x8xf32> to vector<8x8xf32>
    %cst = arith.constant dense<0xFF800000> : vector<8xf32>
    %2 = vector.multi_reduction <maximumf>, %1, %cst [0] : vector<8x8xf32> to vector<8xf32>
    %3 = vector.shape_cast %2 : vector<8xf32> to vector<1x8xf32>
    %4 = vector.broadcast %3 : vector<1x8xf32> to vector<8x8xf32>
    %5 = arith.subf %1, %4 : vector<8x8xf32>
    %6 = math.exp %5 : vector<8x8xf32>
    %cst_2 = arith.constant dense<0.000000e+00> : vector<8xf32>
    %7 = vector.multi_reduction <add>, %6, %cst_2 [0] : vector<8x8xf32> to vector<8xf32>
    %8 = vector.shape_cast %7 : vector<8xf32> to vector<1x8xf32>
    %9 = tpu.reciprocal %8 {approx = true} : vector<1x8xf32> -> vector<1x8xf32>
    %10 = vector.broadcast %9 : vector<1x8xf32> to vector<8x8xf32>
    %11 = arith.mulf %6, %10 : vector<8x8xf32>
    %c0_3 = arith.constant 0 : index
    %c0_4 = arith.constant 0 : index
    %12 = vector.load %arg2[%c0_3, %c0_4] : memref<32x8xf32, #tpu.memory_space<vmem>>, vector<32x8xf32>
    %cst_5 = arith.constant dense<0.000000e+00> : vector<32x8xf32>
    %13 = tpu.matmul %12, %11, %cst_5 {dimension_numbers = #tpu.dot_dimension_numbers<[1], [0], [0], [1], [0, 0, 1, 1], [], []>} : vector<32x8xf32>, vector<8x8xf32>, vector<32x8xf32> -> vector<32x8xf32>
    %c0_6 = arith.constant 0 : index
    %c0_7 = arith.constant 0 : index
    %14 = vector.load %arg3[%c0_6, %c0_7] : memref<32x1xf32, #tpu.memory_space<vmem>>, vector<32x1xf32>
    %15 = vector.broadcast %14 : vector<32x1xf32> to vector<32x8xf32>
    %16 = arith.addf %13, %15 : vector<32x8xf32>
    %cst_8 = arith.constant 0.000000e+00 : f32
    %17 = vector.broadcast %cst_8 : f32 to vector<32x1xf32>
    %18 = vector.extract_strided_slice %16 {offsets = [0, 0], sizes = [32, 7], strides = [1, 1]} : vector<32x8xf32> to vector<32x7xf32>
    %19 = tpu.concatenate %17, %18 in 1 : vector<32x1xf32>, vector<32x7xf32> -> vector<32x8xf32>
    %cst_9 = arith.constant 0.000000e+00 : f32
    %20 = vector.broadcast %cst_9 : f32 to vector<32x2xf32>
    %21 = vector.extract_strided_slice %16 {offsets = [0, 0], sizes = [32, 6], strides = [1, 1]} : vector<32x8xf32> to vector<32x6xf32>
    %22 = tpu.concatenate %20, %21 in 1 : vector<32x2xf32>, vector<32x6xf32> -> vector<32x8xf32>
    %c2 = arith.constant 2 : index
    %c0_10 = arith.constant 0 : index
    %c0_11 = arith.constant 0 : index
    %23 = vector.load %arg4[%c2, %c0_10, %c0_11] : memref<6x32x32xf32, #tpu.memory_space<vmem>>, vector<1x32x32xf32>
    %24 = vector.shape_cast %23 : vector<1x32x32xf32> to vector<32x32xf32>
    %cst_12 = arith.constant dense<0.000000e+00> : vector<32x8xf32>
    %25 = tpu.matmul %24, %16, %cst_12 {dimension_numbers = #tpu.dot_dimension_numbers<[1], [0], [0], [1], [0, 0, 1, 1], [], []>} : vector<32x32xf32>, vector<32x8xf32>, vector<32x8xf32> -> vector<32x8xf32>
    %c1 = arith.constant 1 : index
    %c0_13 = arith.constant 0 : index
    %c0_14 = arith.constant 0 : index
    %26 = vector.load %arg4[%c1, %c0_13, %c0_14] : memref<6x32x32xf32, #tpu.memory_space<vmem>>, vector<1x32x32xf32>
    %27 = vector.shape_cast %26 : vector<1x32x32xf32> to vector<32x32xf32>
    %cst_15 = arith.constant dense<0.000000e+00> : vector<32x8xf32>
    %28 = tpu.matmul %27, %19, %cst_15 {dimension_numbers = #tpu.dot_dimension_numbers<[1], [0], [0], [1], [0, 0, 1, 1], [], []>} : vector<32x32xf32>, vector<32x8xf32>, vector<32x8xf32> -> vector<32x8xf32>
    %29 = arith.addf %25, %28 : vector<32x8xf32>
    %c0_16 = arith.constant 0 : index
    %c0_17 = arith.constant 0 : index
    %c0_18 = arith.constant 0 : index
    %30 = vector.load %arg4[%c0_16, %c0_17, %c0_18] : memref<6x32x32xf32, #tpu.memory_space<vmem>>, vector<1x32x32xf32>
    %31 = vector.shape_cast %30 : vector<1x32x32xf32> to vector<32x32xf32>
    %cst_19 = arith.constant dense<0.000000e+00> : vector<32x8xf32>
    %32 = tpu.matmul %31, %22, %cst_19 {dimension_numbers = #tpu.dot_dimension_numbers<[1], [0], [0], [1], [0, 0, 1, 1], [], []>} : vector<32x32xf32>, vector<32x8xf32>, vector<32x8xf32> -> vector<32x8xf32>
    %33 = arith.addf %29, %32 : vector<32x8xf32>
    %c0_20 = arith.constant 0 : index
    %c0_21 = arith.constant 0 : index
    %c0_22 = arith.constant 0 : index
    %34 = vector.load %arg5[%c0_20, %c0_21, %c0_22] : memref<2x32x1xf32, #tpu.memory_space<vmem>>, vector<1x32x1xf32>
    %35 = vector.shape_cast %34 : vector<1x32x1xf32> to vector<32x1xf32>
    %36 = vector.broadcast %35 : vector<32x1xf32> to vector<32x8xf32>
    %37 = arith.addf %33, %36 : vector<32x8xf32>
    %cst_23 = arith.constant 0.000000e+00 : f32
    %38 = vector.broadcast %cst_23 : f32 to vector<32x8xf32>
    %39 = arith.maximumf %37, %38 : vector<32x8xf32>
    %c0_24 = arith.constant 0 : index
    %c0_25 = arith.constant 0 : index
    %c0_26 = arith.constant 0 : index
    %40 = vector.load %arg6[%c0_24, %c0_25, %c0_26] : memref<2x32x32xf32, #tpu.memory_space<vmem>>, vector<1x32x32xf32>
    %41 = vector.shape_cast %40 : vector<1x32x32xf32> to vector<32x32xf32>
    %cst_27 = arith.constant dense<0.000000e+00> : vector<32x8xf32>
    %42 = tpu.matmul %41, %39, %cst_27 {dimension_numbers = #tpu.dot_dimension_numbers<[1], [0], [0], [1], [0, 0, 1, 1], [], []>} : vector<32x32xf32>, vector<32x8xf32>, vector<32x8xf32> -> vector<32x8xf32>
    %43 = arith.addf %16, %42 : vector<32x8xf32>
    %c0_28 = arith.constant 0 : index
    %c0_29 = arith.constant 0 : index
    %c0_30 = arith.constant 0 : index
    %44 = vector.load %arg7[%c0_28, %c0_29, %c0_30] : memref<2x32x1xf32, #tpu.memory_space<vmem>>, vector<1x32x1xf32>
    %45 = vector.shape_cast %44 : vector<1x32x1xf32> to vector<32x1xf32>
    %46 = vector.broadcast %45 : vector<32x1xf32> to vector<32x8xf32>
    %47 = arith.addf %43, %46 : vector<32x8xf32>
    %cst_31 = arith.constant 0.000000e+00 : f32
    %48 = vector.broadcast %cst_31 : f32 to vector<32x2xf32>
    %49 = vector.extract_strided_slice %47 {offsets = [0, 0], sizes = [32, 6], strides = [1, 1]} : vector<32x8xf32> to vector<32x6xf32>
    %50 = tpu.concatenate %48, %49 in 1 : vector<32x2xf32>, vector<32x6xf32> -> vector<32x8xf32>
    %cst_32 = arith.constant 0.000000e+00 : f32
    %51 = vector.broadcast %cst_32 : f32 to vector<32x4xf32>
    %52 = vector.extract_strided_slice %47 {offsets = [0, 0], sizes = [32, 4], strides = [1, 1]} : vector<32x8xf32> to vector<32x4xf32>
    %53 = tpu.concatenate %51, %52 in 1 : vector<32x4xf32>, vector<32x4xf32> -> vector<32x8xf32>
    %c5 = arith.constant 5 : index
    %c0_33 = arith.constant 0 : index
    %c0_34 = arith.constant 0 : index
    %54 = vector.load %arg4[%c5, %c0_33, %c0_34] : memref<6x32x32xf32, #tpu.memory_space<vmem>>, vector<1x32x32xf32>
    %55 = vector.shape_cast %54 : vector<1x32x32xf32> to vector<32x32xf32>
    %cst_35 = arith.constant dense<0.000000e+00> : vector<32x8xf32>
    %56 = tpu.matmul %55, %47, %cst_35 {dimension_numbers = #tpu.dot_dimension_numbers<[1], [0], [0], [1], [0, 0, 1, 1], [], []>} : vector<32x32xf32>, vector<32x8xf32>, vector<32x8xf32> -> vector<32x8xf32>
    %c4 = arith.constant 4 : index
    %c0_36 = arith.constant 0 : index
    %c0_37 = arith.constant 0 : index
    %57 = vector.load %arg4[%c4, %c0_36, %c0_37] : memref<6x32x32xf32, #tpu.memory_space<vmem>>, vector<1x32x32xf32>
    %58 = vector.shape_cast %57 : vector<1x32x32xf32> to vector<32x32xf32>
    %cst_38 = arith.constant dense<0.000000e+00> : vector<32x8xf32>
    %59 = tpu.matmul %58, %50, %cst_38 {dimension_numbers = #tpu.dot_dimension_numbers<[1], [0], [0], [1], [0, 0, 1, 1], [], []>} : vector<32x32xf32>, vector<32x8xf32>, vector<32x8xf32> -> vector<32x8xf32>
    %60 = arith.addf %56, %59 : vector<32x8xf32>
    %c3 = arith.constant 3 : index
    %c0_39 = arith.constant 0 : index
    %c0_40 = arith.constant 0 : index
    %61 = vector.load %arg4[%c3, %c0_39, %c0_40] : memref<6x32x32xf32, #tpu.memory_space<vmem>>, vector<1x32x32xf32>
    %62 = vector.shape_cast %61 : vector<1x32x32xf32> to vector<32x32xf32>
    %cst_41 = arith.constant dense<0.000000e+00> : vector<32x8xf32>
    %63 = tpu.matmul %62, %53, %cst_41 {dimension_numbers = #tpu.dot_dimension_numbers<[1], [0], [0], [1], [0, 0, 1, 1], [], []>} : vector<32x32xf32>, vector<32x8xf32>, vector<32x8xf32> -> vector<32x8xf32>
    %64 = arith.addf %60, %63 : vector<32x8xf32>
    %c1_42 = arith.constant 1 : index
    %c0_43 = arith.constant 0 : index
    %c0_44 = arith.constant 0 : index
    %65 = vector.load %arg5[%c1_42, %c0_43, %c0_44] : memref<2x32x1xf32, #tpu.memory_space<vmem>>, vector<1x32x1xf32>
    %66 = vector.shape_cast %65 : vector<1x32x1xf32> to vector<32x1xf32>
    %67 = vector.broadcast %66 : vector<32x1xf32> to vector<32x8xf32>
    %68 = arith.addf %64, %67 : vector<32x8xf32>
    %cst_45 = arith.constant 0.000000e+00 : f32
    %69 = vector.broadcast %cst_45 : f32 to vector<32x8xf32>
    %70 = arith.maximumf %68, %69 : vector<32x8xf32>
    %c1_46 = arith.constant 1 : index
    %c0_47 = arith.constant 0 : index
    %c0_48 = arith.constant 0 : index
    %71 = vector.load %arg6[%c1_46, %c0_47, %c0_48] : memref<2x32x32xf32, #tpu.memory_space<vmem>>, vector<1x32x32xf32>
    %72 = vector.shape_cast %71 : vector<1x32x32xf32> to vector<32x32xf32>
    %cst_49 = arith.constant dense<0.000000e+00> : vector<32x8xf32>
    %73 = tpu.matmul %72, %70, %cst_49 {dimension_numbers = #tpu.dot_dimension_numbers<[1], [0], [0], [1], [0, 0, 1, 1], [], []>} : vector<32x32xf32>, vector<32x8xf32>, vector<32x8xf32> -> vector<32x8xf32>
    %74 = arith.addf %47, %73 : vector<32x8xf32>
    %c1_50 = arith.constant 1 : index
    %c0_51 = arith.constant 0 : index
    %c0_52 = arith.constant 0 : index
    %75 = vector.load %arg7[%c1_50, %c0_51, %c0_52] : memref<2x32x1xf32, #tpu.memory_space<vmem>>, vector<1x32x1xf32>
    %76 = vector.shape_cast %75 : vector<1x32x1xf32> to vector<32x1xf32>
    %77 = vector.broadcast %76 : vector<32x1xf32> to vector<32x8xf32>
    %78 = arith.addf %74, %77 : vector<32x8xf32>
    %c0_53 = arith.constant 0 : index
    %c0_54 = arith.constant 0 : index
    %c0_55 = arith.constant 0 : index
    %79 = vector.load %arg10[%c0_53, %c0_54, %c0_55] : memref<1x32x8xf32, #tpu.memory_space<vmem>>, vector<1x32x8xf32>
    %80 = vector.shape_cast %79 : vector<1x32x8xf32> to vector<32x8xf32>
    %81 = vector.shape_cast %78 : vector<32x8xf32> to vector<1x32x8xf32>
    tpu.vector_store %arg10[%c0_53, %c0_54, %c0_55], %81 {strides = array<i32>} : memref<1x32x8xf32, #tpu.memory_space<vmem>>, vector<1x32x8xf32>,
    %c0_56 = arith.constant 0 : index
    %c0_57 = arith.constant 0 : index
    %82 = vector.load %arg8[%c0_56, %c0_57] : memref<8x32xf32, #tpu.memory_space<vmem>>, vector<8x32xf32>
    %cst_58 = arith.constant dense<0.000000e+00> : vector<8x8xf32>
    %83 = tpu.matmul %82, %78, %cst_58 {dimension_numbers = #tpu.dot_dimension_numbers<[1], [0], [0], [1], [0, 0, 1, 1], [], []>} : vector<8x32xf32>, vector<32x8xf32>, vector<8x8xf32> -> vector<8x8xf32>
    %c0_59 = arith.constant 0 : index
    %c0_60 = arith.constant 0 : index
    %84 = vector.load %arg9[%c0_59, %c0_60] : memref<8x1xf32, #tpu.memory_space<vmem>>, vector<8x1xf32>
    %85 = vector.broadcast %84 : vector<8x1xf32> to vector<8x8xf32>
    %86 = arith.addf %83, %85 : vector<8x8xf32>
    %c0_61 = arith.constant 0 : index
    %c0_62 = arith.constant 0 : index
    %c0_63 = arith.constant 0 : index
    %87 = vector.load %arg11[%c0_61, %c0_62, %c0_63] : memref<1x8x8xf32, #tpu.memory_space<vmem>>, vector<1x8x8xf32>
    %88 = vector.shape_cast %87 : vector<1x8x8xf32> to vector<8x8xf32>
    %89 = vector.shape_cast %86 : vector<8x8xf32> to vector<1x8x8xf32>
    tpu.vector_store %arg11[%c0_61, %c0_62, %c0_63], %89 {strides = array<i32>} : memref<1x8x8xf32, #tpu.memory_space<vmem>>, vector<1x8x8xf32>,
    return
  }
  func.func @transform_0(%arg0: i32) -> (i32, i32, i32) {
    %c0_i32 = arith.constant 0 : i32
    %c0_i32_0 = arith.constant 0 : i32
    %c0_i32_1 = arith.constant 0 : i32
    return %arg0, %c0_i32, %c0_i32_0 : i32, i32, i32
  }
  func.func @transform_1(%arg0: i32) -> (i32, i32) {
    %c0_i32 = arith.constant 0 : i32
    %c0_i32_0 = arith.constant 0 : i32
    %c0_i32_1 = arith.constant 0 : i32
    return %c0_i32, %c0_i32_0 : i32, i32
  }
  func.func @transform_2(%arg0: i32) -> (i32, i32) {
    %c0_i32 = arith.constant 0 : i32
    %c0_i32_0 = arith.constant 0 : i32
    %c0_i32_1 = arith.constant 0 : i32
    return %c0_i32, %c0_i32_0 : i32, i32
  }
  func.func @transform_3(%arg0: i32) -> (i32, i32, i32) {
    %c0_i32 = arith.constant 0 : i32
    %c0_i32_0 = arith.constant 0 : i32
    %c0_i32_1 = arith.constant 0 : i32
    %c0_i32_2 = arith.constant 0 : i32
    return %c0_i32, %c0_i32_0, %c0_i32_1 : i32, i32, i32
  }
  func.func @transform_4(%arg0: i32) -> (i32, i32, i32) {
    %c0_i32 = arith.constant 0 : i32
    %c0_i32_0 = arith.constant 0 : i32
    %c0_i32_1 = arith.constant 0 : i32
    %c0_i32_2 = arith.constant 0 : i32
    return %c0_i32, %c0_i32_0, %c0_i32_1 : i32, i32, i32
  }
  func.func @transform_5(%arg0: i32) -> (i32, i32, i32) {
    %c0_i32 = arith.constant 0 : i32
    %c0_i32_0 = arith.constant 0 : i32
    %c0_i32_1 = arith.constant 0 : i32
    %c0_i32_2 = arith.constant 0 : i32
    return %c0_i32, %c0_i32_0, %c0_i32_1 : i32, i32, i32
  }
  func.func @transform_6(%arg0: i32) -> (i32, i32, i32) {
    %c0_i32 = arith.constant 0 : i32
    %c0_i32_0 = arith.constant 0 : i32
    %c0_i32_1 = arith.constant 0 : i32
    %c0_i32_2 = arith.constant 0 : i32
    return %c0_i32, %c0_i32_0, %c0_i32_1 : i32, i32, i32
  }
  func.func @transform_7(%arg0: i32) -> (i32, i32) {
    %c0_i32 = arith.constant 0 : i32
    %c0_i32_0 = arith.constant 0 : i32
    %c0_i32_1 = arith.constant 0 : i32
    return %c0_i32, %c0_i32_0 : i32, i32
  }
  func.func @transform_8(%arg0: i32) -> (i32, i32) {
    %c0_i32 = arith.constant 0 : i32
    %c0_i32_0 = arith.constant 0 : i32
    %c0_i32_1 = arith.constant 0 : i32
    return %c0_i32, %c0_i32_0 : i32, i32
  }
  func.func @transform_9(%arg0: i32) -> (i32, i32, i32) {
    %c0_i32 = arith.constant 0 : i32
    %c0_i32_0 = arith.constant 0 : i32
    %c0_i32_1 = arith.constant 0 : i32
    return %arg0, %c0_i32, %c0_i32_0 : i32, i32, i32
  }
  func.func @transform_10(%arg0: i32) -> (i32, i32, i32) {
    %c0_i32 = arith.constant 0 : i32
    %c0_i32_0 = arith.constant 0 : i32
    %c0_i32_1 = arith.constant 0 : i32
    return %arg0, %c0_i32, %c0_i32_0 : i32, i32, i32
  }
}

module attributes {stable_mosaic.version = 11 : i64} {
  func.func @kernel(%arg0: i32, %arg1: memref<1x8x8xf32, #tpu.memory_space<vmem>>, %arg2: memref<32x8xf32, #tpu.memory_space<vmem>>, %arg3: memref<32x1xf32, #tpu.memory_space<vmem>>, %arg4: memref<6x32x32xf32, #tpu.memory_space<vmem>>, %arg5: memref<2x32x1xf32, #tpu.memory_space<vmem>>, %arg6: memref<2x32x32xf32, #tpu.memory_space<vmem>>, %arg7: memref<2x32x1xf32, #tpu.memory_space<vmem>>, %arg8: memref<8x32xf32, #tpu.memory_space<vmem>>, %arg9: memref<8x1xf32, #tpu.memory_space<vmem>>, %arg10: memref<1x32x8xf32, #tpu.memory_space<vmem>>, %arg11: memref<1x8x8xf32, #tpu.memory_space<vmem>>) attributes {dimension_semantics = [#tpu.dimension_semantics<parallel>], iteration_bounds = array<i64: 2>, scalar_prefetch = 0 : i64, scratch_operands = 0 : i64, tpu.core_type = #tpu.core_type<tc>, window_params = [{transform_indices = @transform_0, window_bounds = array<i64: 1, 8, 8>}, {pipeline_mode = #tpu.pipeline_mode<synchronous>, transform_indices = @transform_1, window_bounds = array<i64: 32, 8>}, {pipeline_mode = #tpu.pipeline_mode<synchronous>, transform_indices = @transform_2, window_bounds = array<i64: 32, 1>}, {pipeline_mode = #tpu.pipeline_mode<synchronous>, transform_indices = @transform_3, window_bounds = array<i64: 6, 32, 32>}, {pipeline_mode = #tpu.pipeline_mode<synchronous>, transform_indices = @transform_4, window_bounds = array<i64: 2, 32, 1>}, {pipeline_mode = #tpu.pipeline_mode<synchronous>, transform_indices = @transform_5, window_bounds = array<i64: 2, 32, 32>}, {pipeline_mode = #tpu.pipeline_mode<synchronous>, transform_indices = @transform_6, window_bounds = array<i64: 2, 32, 1>}, {pipeline_mode = #tpu.pipeline_mode<synchronous>, transform_indices = @transform_7, window_bounds = array<i64: 8, 32>}, {pipeline_mode = #tpu.pipeline_mode<synchronous>, transform_indices = @transform_8, window_bounds = array<i64: 8, 1>}, {transform_indices = @transform_9, window_bounds = array<i64: 1, 32, 8>}, {transform_indices = @transform_10, window_bounds = array<i64: 1, 8, 8>}]} {
    %c0 = arith.constant 0 : index
    %c0_0 = arith.constant 0 : index
    %c0_1 = arith.constant 0 : index
    %0 = vector.load %arg1[%c0, %c0_0, %c0_1] : memref<1x8x8xf32, #tpu.memory_space<vmem>>, vector<1x8x8xf32>
    %1 = vector.shape_cast %0 : vector<1x8x8xf32> to vector<8x8xf32>
    %cst = arith.constant dense<0xFF800000> : vector<8xf32>
    %2 = vector.multi_reduction <maximumf>, %1, %cst [0] : vector<8x8xf32> to vector<8xf32>
    %3 = vector.shape_cast %2 : vector<8xf32> to vector<1x8xf32>
    %4 = vector.broadcast %3 : vector<1x8xf32> to vector<8x8xf32>
    %5 = arith.subf %1, %4 : vector<8x8xf32>
    %6 = math.exp %5 : vector<8x8xf32>
    %cst_2 = arith.constant dense<0.000000e+00> : vector<8xf32>
    %7 = vector.multi_reduction <add>, %6, %cst_2 [0] : vector<8x8xf32> to vector<8xf32>
    %8 = vector.shape_cast %7 : vector<8xf32> to vector<1x8xf32>
    %9 = tpu.reciprocal %8 {approx = true} : vector<1x8xf32> -> vector<1x8xf32>
    %10 = vector.broadcast %9 : vector<1x8xf32> to vector<8x8xf32>
    %11 = arith.mulf %6, %10 : vector<8x8xf32>
    %c0_3 = arith.constant 0 : index
    %c0_4 = arith.constant 0 : index
    %12 = vector.load %arg2[%c0_3, %c0_4] : memref<32x8xf32, #tpu.memory_space<vmem>>, vector<32x8xf32>
    %cst_5 = arith.constant dense<0.000000e+00> : vector<32x8xf32>
    %13 = tpu.matmul %12, %11, %cst_5 {dimension_numbers = #tpu.dot_dimension_numbers<[1], [0], [0], [1], [0, 0, 1, 1], [], []>} : vector<32x8xf32>, vector<8x8xf32>, vector<32x8xf32> -> vector<32x8xf32>
    %c0_6 = arith.constant 0 : index
    %c0_7 = arith.constant 0 : index
    %14 = vector.load %arg3[%c0_6, %c0_7] : memref<32x1xf32, #tpu.memory_space<vmem>>, vector<32x1xf32>
    %15 = vector.broadcast %14 : vector<32x1xf32> to vector<32x8xf32>
    %16 = arith.addf %13, %15 : vector<32x8xf32>
    %cst_8 = arith.constant 0.000000e+00 : f32
    %17 = vector.broadcast %cst_8 : f32 to vector<32x1xf32>
    %18 = vector.extract_strided_slice %16 {offsets = [0, 0], sizes = [32, 7], strides = [1, 1]} : vector<32x8xf32> to vector<32x7xf32>
    %19 = tpu.concatenate %17, %18 in 1 : vector<32x1xf32>, vector<32x7xf32> -> vector<32x8xf32>
    %cst_9 = arith.constant 0.000000e+00 : f32
    %20 = vector.broadcast %cst_9 : f32 to vector<32x2xf32>
    %21 = vector.extract_strided_slice %16 {offsets = [0, 0], sizes = [32, 6], strides = [1, 1]} : vector<32x8xf32> to vector<32x6xf32>
    %22 = tpu.concatenate %20, %21 in 1 : vector<32x2xf32>, vector<32x6xf32> -> vector<32x8xf32>
    %c2 = arith.constant 2 : index
    %c0_10 = arith.constant 0 : index
    %c0_11 = arith.constant 0 : index
    %23 = vector.load %arg4[%c2, %c0_10, %c0_11] : memref<6x32x32xf32, #tpu.memory_space<vmem>>, vector<1x32x32xf32>
    %24 = vector.shape_cast %23 : vector<1x32x32xf32> to vector<32x32xf32>
    %cst_12 = arith.constant dense<0.000000e+00> : vector<32x8xf32>
    %25 = tpu.matmul %24, %16, %cst_12 {dimension_numbers = #tpu.dot_dimension_numbers<[1], [0], [0], [1], [0, 0, 1, 1], [], []>} : vector<32x32xf32>, vector<32x8xf32>, vector<32x8xf32> -> vector<32x8xf32>
    %c1 = arith.constant 1 : index
    %c0_13 = arith.constant 0 : index
    %c0_14 = arith.constant 0 : index
    %26 = vector.load %arg4[%c1, %c0_13, %c0_14] : memref<6x32x32xf32, #tpu.memory_space<vmem>>, vector<1x32x32xf32>
    %27 = vector.shape_cast %26 : vector<1x32x32xf32> to vector<32x32xf32>
    %cst_15 = arith.constant dense<0.000000e+00> : vector<32x8xf32>
    %28 = tpu.matmul %27, %19, %cst_15 {dimension_numbers = #tpu.dot_dimension_numbers<[1], [0], [0], [1], [0, 0, 1, 1], [], []>} : vector<32x32xf32>, vector<32x8xf32>, vector<32x8xf32> -> vector<32x8xf32>
    %29 = arith.addf %25, %28 : vector<32x8xf32>
    %c0_16 = arith.constant 0 : index
    %c0_17 = arith.constant 0 : index
    %c0_18 = arith.constant 0 : index
    %30 = vector.load %arg4[%c0_16, %c0_17, %c0_18] : memref<6x32x32xf32, #tpu.memory_space<vmem>>, vector<1x32x32xf32>
    %31 = vector.shape_cast %30 : vector<1x32x32xf32> to vector<32x32xf32>
    %cst_19 = arith.constant dense<0.000000e+00> : vector<32x8xf32>
    %32 = tpu.matmul %31, %22, %cst_19 {dimension_numbers = #tpu.dot_dimension_numbers<[1], [0], [0], [1], [0, 0, 1, 1], [], []>} : vector<32x32xf32>, vector<32x8xf32>, vector<32x8xf32> -> vector<32x8xf32>
    %33 = arith.addf %29, %32 : vector<32x8xf32>
    %c0_20 = arith.constant 0 : index
    %c0_21 = arith.constant 0 : index
    %c0_22 = arith.constant 0 : index
    %34 = vector.load %arg5[%c0_20, %c0_21, %c0_22] : memref<2x32x1xf32, #tpu.memory_space<vmem>>, vector<1x32x1xf32>
    %35 = vector.shape_cast %34 : vector<1x32x1xf32> to vector<32x1xf32>
    %36 = vector.broadcast %35 : vector<32x1xf32> to vector<32x8xf32>
    %37 = arith.addf %33, %36 : vector<32x8xf32>
    %cst_23 = arith.constant 0.000000e+00 : f32
    %38 = vector.broadcast %cst_23 : f32 to vector<32x8xf32>
    %39 = arith.maximumf %37, %38 : vector<32x8xf32>
    %c0_24 = arith.constant 0 : index
    %c0_25 = arith.constant 0 : index
    %c0_26 = arith.constant 0 : index
    %40 = vector.load %arg6[%c0_24, %c0_25, %c0_26] : memref<2x32x32xf32, #tpu.memory_space<vmem>>, vector<1x32x32xf32>
    %41 = vector.shape_cast %40 : vector<1x32x32xf32> to vector<32x32xf32>
    %cst_27 = arith.constant dense<0.000000e+00> : vector<32x8xf32>
    %42 = tpu.matmul %41, %39, %cst_27 {dimension_numbers = #tpu.dot_dimension_numbers<[1], [0], [0], [1], [0, 0, 1, 1], [], []>} : vector<32x32xf32>, vector<32x8xf32>, vector<32x8xf32> -> vector<32x8xf32>
    %43 = arith.addf %16, %42 : vector<32x8xf32>
    %c0_28 = arith.constant 0 : index
    %c0_29 = arith.constant 0 : index
    %c0_30 = arith.constant 0 : index
    %44 = vector.load %arg7[%c0_28, %c0_29, %c0_30] : memref<2x32x1xf32, #tpu.memory_space<vmem>>, vector<1x32x1xf32>
    %45 = vector.shape_cast %44 : vector<1x32x1xf32> to vector<32x1xf32>
    %46 = vector.broadcast %45 : vector<32x1xf32> to vector<32x8xf32>
    %47 = arith.addf %43, %46 : vector<32x8xf32>
    %cst_31 = arith.constant 0.000000e+00 : f32
    %48 = vector.broadcast %cst_31 : f32 to vector<32x2xf32>
    %49 = vector.extract_strided_slice %47 {offsets = [0, 0], sizes = [32, 6], strides = [1, 1]} : vector<32x8xf32> to vector<32x6xf32>
    %50 = tpu.concatenate %48, %49 in 1 : vector<32x2xf32>, vector<32x6xf32> -> vector<32x8xf32>
    %cst_32 = arith.constant 0.000000e+00 : f32
    %51 = vector.broadcast %cst_32 : f32 to vector<32x4xf32>
    %52 = vector.extract_strided_slice %47 {offsets = [0, 0], sizes = [32, 4], strides = [1, 1]} : vector<32x8xf32> to vector<32x4xf32>
    %53 = tpu.concatenate %51, %52 in 1 : vector<32x4xf32>, vector<32x4xf32> -> vector<32x8xf32>
    %c5 = arith.constant 5 : index
    %c0_33 = arith.constant 0 : index
    %c0_34 = arith.constant 0 : index
    %54 = vector.load %arg4[%c5, %c0_33, %c0_34] : memref<6x32x32xf32, #tpu.memory_space<vmem>>, vector<1x32x32xf32>
    %55 = vector.shape_cast %54 : vector<1x32x32xf32> to vector<32x32xf32>
    %cst_35 = arith.constant dense<0.000000e+00> : vector<32x8xf32>
    %56 = tpu.matmul %55, %47, %cst_35 {dimension_numbers = #tpu.dot_dimension_numbers<[1], [0], [0], [1], [0, 0, 1, 1], [], []>} : vector<32x32xf32>, vector<32x8xf32>, vector<32x8xf32> -> vector<32x8xf32>
    %c4 = arith.constant 4 : index
    %c0_36 = arith.constant 0 : index
    %c0_37 = arith.constant 0 : index
    %57 = vector.load %arg4[%c4, %c0_36, %c0_37] : memref<6x32x32xf32, #tpu.memory_space<vmem>>, vector<1x32x32xf32>
    %58 = vector.shape_cast %57 : vector<1x32x32xf32> to vector<32x32xf32>
    %cst_38 = arith.constant dense<0.000000e+00> : vector<32x8xf32>
    %59 = tpu.matmul %58, %50, %cst_38 {dimension_numbers = #tpu.dot_dimension_numbers<[1], [0], [0], [1], [0, 0, 1, 1], [], []>} : vector<32x32xf32>, vector<32x8xf32>, vector<32x8xf32> -> vector<32x8xf32>
    %60 = arith.addf %56, %59 : vector<32x8xf32>
    %c3 = arith.constant 3 : index
    %c0_39 = arith.constant 0 : index
    %c0_40 = arith.constant 0 : index
    %61 = vector.load %arg4[%c3, %c0_39, %c0_40] : memref<6x32x32xf32, #tpu.memory_space<vmem>>, vector<1x32x32xf32>
    %62 = vector.shape_cast %61 : vector<1x32x32xf32> to vector<32x32xf32>
    %cst_41 = arith.constant dense<0.000000e+00> : vector<32x8xf32>
    %63 = tpu.matmul %62, %53, %cst_41 {dimension_numbers = #tpu.dot_dimension_numbers<[1], [0], [0], [1], [0, 0, 1, 1], [], []>} : vector<32x32xf32>, vector<32x8xf32>, vector<32x8xf32> -> vector<32x8xf32>
    %64 = arith.addf %60, %63 : vector<32x8xf32>
    %c1_42 = arith.constant 1 : index
    %c0_43 = arith.constant 0 : index
    %c0_44 = arith.constant 0 : index
    %65 = vector.load %arg5[%c1_42, %c0_43, %c0_44] : memref<2x32x1xf32, #tpu.memory_space<vmem>>, vector<1x32x1xf32>
    %66 = vector.shape_cast %65 : vector<1x32x1xf32> to vector<32x1xf32>
    %67 = vector.broadcast %66 : vector<32x1xf32> to vector<32x8xf32>
    %68 = arith.addf %64, %67 : vector<32x8xf32>
    %cst_45 = arith.constant 0.000000e+00 : f32
    %69 = vector.broadcast %cst_45 : f32 to vector<32x8xf32>
    %70 = arith.maximumf %68, %69 : vector<32x8xf32>
    %c1_46 = arith.constant 1 : index
    %c0_47 = arith.constant 0 : index
    %c0_48 = arith.constant 0 : index
    %71 = vector.load %arg6[%c1_46, %c0_47, %c0_48] : memref<2x32x32xf32, #tpu.memory_space<vmem>>, vector<1x32x32xf32>
    %72 = vector.shape_cast %71 : vector<1x32x32xf32> to vector<32x32xf32>
    %cst_49 = arith.constant dense<0.000000e+00> : vector<32x8xf32>
    %73 = tpu.matmul %72, %70, %cst_49 {dimension_numbers = #tpu.dot_dimension_numbers<[1], [0], [0], [1], [0, 0, 1, 1], [], []>} : vector<32x32xf32>, vector<32x8xf32>, vector<32x8xf32> -> vector<32x8xf32>
    %74 = arith.addf %47, %73 : vector<32x8xf32>
    %c1_50 = arith.constant 1 : index
    %c0_51 = arith.constant 0 : index
    %c0_52 = arith.constant 0 : index
    %75 = vector.load %arg7[%c1_50, %c0_51, %c0_52] : memref<2x32x1xf32, #tpu.memory_space<vmem>>, vector<1x32x1xf32>
    %76 = vector.shape_cast %75 : vector<1x32x1xf32> to vector<32x1xf32>
    %77 = vector.broadcast %76 : vector<32x1xf32> to vector<32x8xf32>
    %78 = arith.addf %74, %77 : vector<32x8xf32>
    %c0_53 = arith.constant 0 : index
    %c0_54 = arith.constant 0 : index
    %c0_55 = arith.constant 0 : index
    %79 = vector.load %arg10[%c0_53, %c0_54, %c0_55] : memref<1x32x8xf32, #tpu.memory_space<vmem>>, vector<1x32x8xf32>
    %80 = vector.shape_cast %79 : vector<1x32x8xf32> to vector<32x8xf32>
    %81 = vector.shape_cast %78 : vector<32x8xf32> to vector<1x32x8xf32>
    tpu.vector_store %arg10[%c0_53, %c0_54, %c0_55], %81 {strides = array<i32>} : memref<1x32x8xf32, #tpu.memory_space<vmem>>, vector<1x32x8xf32>,
    %c0_56 = arith.constant 0 : index
    %c0_57 = arith.constant 0 : index
    %82 = vector.load %arg8[%c0_56, %c0_57] : memref<8x32xf32, #tpu.memory_space<vmem>>, vector<8x32xf32>
    %cst_58 = arith.constant dense<0.000000e+00> : vector<8x8xf32>
    %83 = tpu.matmul %82, %78, %cst_58 {dimension_numbers = #tpu.dot_dimension_numbers<[1], [0], [0], [1], [0, 0, 1, 1], [], []>} : vector<8x32xf32>, vector<32x8xf32>, vector<8x8xf32> -> vector<8x8xf32>
    %c0_59 = arith.constant 0 : index
    %c0_60 = arith.constant 0 : index
    %84 = vector.load %arg9[%c0_59, %c0_60] : memref<8x1xf32, #tpu.memory_space<vmem>>, vector<8x1xf32>
    %85 = vector.broadcast %84 : vector<8x1xf32> to vector<8x8xf32>
    %86 = arith.addf %83, %85 : vector<8x8xf32>
    %c0_61 = arith.constant 0 : index
    %c0_62 = arith.constant 0 : index
    %c0_63 = arith.constant 0 : index
    %87 = vector.load %arg11[%c0_61, %c0_62, %c0_63] : memref<1x8x8xf32, #tpu.memory_space<vmem>>, vector<1x8x8xf32>
    %88 = vector.shape_cast %87 : vector<1x8x8xf32> to vector<8x8xf32>
    %89 = vector.shape_cast %86 : vector<8x8xf32> to vector<1x8x8xf32>
    tpu.vector_store %arg11[%c0_61, %c0_62, %c0_63], %89 {strides = array<i32>} : memref<1x8x8xf32, #tpu.memory_space<vmem>>, vector<1x8x8xf32>,
    return
  }
  func.func @transform_0(%arg0: i32) -> (i32, i32, i32) {
    %c0_i32 = arith.constant 0 : i32
    %c0_i32_0 = arith.constant 0 : i32
    %c0_i32_1 = arith.constant 0 : i32
    return %arg0, %c0_i32, %c0_i32_0 : i32, i32, i32
  }
  func.func @transform_1(%arg0: i32) -> (i32, i32) {
    %c0_i32 = arith.constant 0 : i32
    %c0_i32_0 = arith.constant 0 : i32
    %c0_i32_1 = arith.constant 0 : i32
    return %c0_i32, %c0_i32_0 : i32, i32
  }
  func.func @transform_2(%arg0: i32) -> (i32, i32) {
    %c0_i32 = arith.constant 0 : i32
    %c0_i32_0 = arith.constant 0 : i32
    %c0_i32_1 = arith.constant 0 : i32
    return %c0_i32, %c0_i32_0 : i32, i32
  }
  func.func @transform_3(%arg0: i32) -> (i32, i32, i32) {
    %c0_i32 = arith.constant 0 : i32
    %c0_i32_0 = arith.constant 0 : i32
    %c0_i32_1 = arith.constant 0 : i32
    %c0_i32_2 = arith.constant 0 : i32
    return %c0_i32, %c0_i32_0, %c0_i32_1 : i32, i32, i32
  }
  func.func @transform_4(%arg0: i32) -> (i32, i32, i32) {
    %c0_i32 = arith.constant 0 : i32
    %c0_i32_0 = arith.constant 0 : i32
    %c0_i32_1 = arith.constant 0 : i32
    %c0_i32_2 = arith.constant 0 : i32
    return %c0_i32, %c0_i32_0, %c0_i32_1 : i32, i32, i32
  }
  func.func @transform_5(%arg0: i32) -> (i32, i32, i32) {
    %c0_i32 = arith.constant 0 : i32
    %c0_i32_0 = arith.constant 0 : i32
    %c0_i32_1 = arith.constant 0 : i32
    %c0_i32_2 = arith.constant 0 : i32
    return %c0_i32, %c0_i32_0, %c0_i32_1 : i32, i32, i32
  }
  func.func @transform_6(%arg0: i32) -> (i32, i32, i32) {
    %c0_i32 = arith.constant 0 : i32
    %c0_i32_0 = arith.constant 0 : i32
    %c0_i32_1 = arith.constant 0 : i32
    %c0_i32_2 = arith.constant 0 : i32
    return %c0_i32, %c0_i32_0, %c0_i32_1 : i32, i32, i32
  }
  func.func @transform_7(%arg0: i32) -> (i32, i32) {
    %c0_i32 = arith.constant 0 : i32
    %c0_i32_0 = arith.constant 0 : i32
    %c0_i32_1 = arith.constant 0 : i32
    return %c0_i32, %c0_i32_0 : i32, i32
  }
  func.func @transform_8(%arg0: i32) -> (i32, i32) {
    %c0_i32 = arith.constant 0 : i32
    %c0_i32_0 = arith.constant 0 : i32
    %c0_i32_1 = arith.constant 0 : i32
    return %c0_i32, %c0_i32_0 : i32, i32
  }
  func.func @transform_9(%arg0: i32) -> (i32, i32, i32) {
    %c0_i32 = arith.constant 0 : i32
    %c0_i32_0 = arith.constant 0 : i32
    %c0_i32_1 = arith.constant 0 : i32
    return %arg0, %c0_i32, %c0_i32_0 : i32, i32, i32
  }
  func.func @transform_10(%arg0: i32) -> (i32, i32, i32) {
    %c0_i32 = arith.constant 0 : i32
    %c0_i32_0 = arith.constant 0 : i32
    %c0_i32_1 = arith.constant 0 : i32
    return %arg0, %c0_i32, %c0_i32_0 : i32, i32, i32
  }
}

</mosaic_0001>

<bundles_post_ra>
// kernel: mstr_forward.10
= control target key start
LH: loop header
LB: loop body
LE: loop exit
PB: predicated region body
PF: predicated region fallthrough
CT: control target
= control target key end

     0   :  { %15 = vsyncpa [#allocation3], 0  ;;  %s2809_s0 = inlined_call_operand.vmem [shape: f32[2,32,128], index: 0, kind: input, shape index: {}]   ;;  %s2810_s1 = inlined_call_operand.vmem [shape: f32[6,32,32], index: 1, kind: input, shape index: {}]   ;;  %s2811_s2 = inlined_call_operand.vmem [shape: f32[2,32,1], index: 2, kind: input, shape index: {}]   ;;  %s2812_s3 = inlined_call_operand.vmem [shape: f32[2,32,32], index: 3, kind: input, shape index: {}]   ;;  %s2813_s4 = inlined_call_operand.vmem [shape: f32[2,32,1], index: 4, kind: input, shape index: {}]   ;;  %s2814_s5 = inlined_call_operand.vmem [shape: f32[128,64], index: 5, kind: input, shape index: {}]   ;;  %s2815_s6 = inlined_call_operand.vmem [shape: f32[8,32], index: 6, kind: input, shape index: {}]   ;;  %s2816_s7 = inlined_call_operand.vmem [shape: f32[8,1], index: 7, kind: input, shape index: {}]   ;;  %s2817_s8 = inlined_call_operand.vmem [shape: f32[2,32,64], index: 8, kind: output, shape index: {0}]   ;;  %s2818_s9 = inlined_call_operand.hbm [shape: f32[2,8,64], index: 9, kind: output, shape index: {1}]  }
   0x1   :  { %17 = vsyncpa [#allocation3 + $0x1], 0  ;;  %s2375_s30 = smov 0   ;;  %s2377_s10 = smov 0  }
   0x2   :  { %s2379_s11 = smov 0   ;;  %s2381_s12 = smov 0  }
   0x3 LB: > { %s2396_s13 = sadd.s32 4294967295, %s2315_s12   ;;  %s1669_s14 = sadd.s32 4294967294, %s2315_s12   ;;  %s2315_s12 = sphi %s2381_s12, %s2832_s12   ;;  %s2311_s11 = sphi %s2379_s11, %s2831_s11   ;;  %s2307_s10 = sphi %s2377_s10, %s2830_s10   ;;  %s2303_s30 = sphi %s2375_s30, %s2829_s30  }
   0x4   : > { %s2400_s15 = sadd.s32 1, %s2315_s12   ;;  %s229_s16 = sadd.s32 1, %s2311_s11 }
   0x5   : > { %s226_s17 = ssub.s32 %s2315_s12, %s2400_s15  ;;  %p239_p0 = scmp.ne.s32.totalorder %s2311_s11, %s2307_s10 }
   0x6   : > { %p227_p1 = scmp.eq.s32.totalorder %s226_s17, 0  ;;  %p240_p2 = scmp.eq.s32.totalorder %s2396_s13, 1 }
   0x7   : > { %p245_p3 = scmp.ne.s32.totalorder %s2307_s10, %s2303_s30  ;;  %p246_p4 = scmp.eq.s32.totalorder %s1669_s14, 1 }
   0x8   : > { %s2411_s18 = scalar_select %p227_p1, %s2311_s11, %s229_s16  }
   0x9   : > { %p2413_p5 = por %p240_p2, %p239_p0  ;;  %p2417_p6 = por %p246_p4, %p245_p3 }
   0xa   : > { %p1672_p7 = scmp.ge.s32.totalorder %s2315_s12, 1  ;;  %p293_p8 = scmp.lt.s32.totalorder %s2315_s12, 3 }
   0xc   : > { %p294_p9 = pnand %p1672_p7, %p293_p8 }
   0xd   : > { %p334_p10 = scmp.lt.s32.totalorder (!%p294_p9), %s2396_s13, 1  ;;  %v1682_v0 = vld [vmem:[%s2810_s1 + $0x20] sm:$0xff] (!%p294_p9)  ;;  %vm396_vm0 = vcmask (!%p294_p9), 261120   ;;  %s2317_s28 = smov (!%p294_p9), 1   ;;  %v697_v8 = vld [vmem:[%s2811_s2 + $0x8] sm:$0xff] (!%p294_p9)  ;;  %v2319_v10 = vmov (!%p294_p9), 0  }
   0xe   : > { %297 = sbr.rel (%p294_p9) target bundleno = 1649 (0x671), region = 52  ;;  %1878 = vmatprep.mubr.msk.f32.mxu1 (!%p294_p9), %vm396_vm0, %v1682_v0  ;;  %s2318_s29 = smov (!%p294_p9), 2   ;;  %v591_v7 = vld [vmem:[%s2810_s1] sm:$0xff] (!%p294_p9)  ;;  %2232 = vset.pattern.permute.xlu1 (!%p294_p9), %v2319_v10  ;;  %v698_v11 = vld [vmem:[%s2811_s2 + $0x10] sm:$0xff] (!%p294_p9)  ;;  %v699_v12 = vld [vmem:[%s2811_s2 + $0x18] sm:$0xff] (!%p294_p9)  ;;  %vm364_vm1 = vcmask (!%p294_p9), 7168  }
   0xf   : > { %1906 = vmatprep.mubr.msk.f32.mxu0 (!%p294_p9), %vm396_vm0, %v591_v7  ;;  %v696_v9 = vld [vmem:[%s2811_s2] sm:$0xff] (!%p294_p9)  ;;  %2231 = vset.pattern.permute.xlu0 (!%p294_p9), %v2319_v10  ;;  %v834_v14 = vld [vmem:[%s2813_s4 + $0x8] sm:$0xff] (!%p294_p9)  ;;  %v835_v15 = vld [vmem:[%s2813_s4 + $0x10] sm:$0xff] (!%p294_p9)  ;;  %vm381_vm2 = vcmask (!%p294_p9), 15360   ;;  %vm893_vm7 = vcmask (!%p294_p9), 31744   ;;  %vm2322_vm10 = vmmov (!%p294_p9), 0  }
  0x10   : > { %v833_v13 = vld [vmem:[%s2813_s4] sm:$0xff] (!%p294_p9)  ;;  %v836_v16 = vld [vmem:[%s2813_s4 + $0x18] sm:$0xff] (!%p294_p9)  ;;  %vm1686_vm3 = vmneg (!%p294_p9), %vm364_vm1  ;;  %vm1477_vm11 = vcmask (!%p294_p9), 523264  }
  0x11   : > { %vm1702_vm4 = vmneg (!%p294_p9), %vm381_vm2  ;;  %v1683_v36 = vld [vmem:[%s2810_s1 + $0x28] sm:$0xff] (!%p294_p9)  ;;  %v1684_v38 = vld [vmem:[%s2810_s1 + $0x30] sm:$0xff] (!%p294_p9) }
  0x12   : > { %vm2479_vm5 = vmpackc.low (!%p294_p9), %vm1686_vm3, %vm1686_vm3  ;;  %v592_v37 = vld [vmem:[%s2810_s1 + $0x8] sm:$0xff] (!%p294_p9)  ;;  %v593_v40 = vld [vmem:[%s2810_s1 + $0x10] sm:$0xff] (!%p294_p9) }
  0x13   : > { %vm2483_vm6 = vmpackc.low (!%p294_p9), %vm1702_vm4, %vm1702_vm4  ;;  %v1685_v41 = vld [vmem:[%s2810_s1 + $0x38] sm:$0xff] (!%p294_p9)  ;;  %v1678_v43 = vld [vmem:[%s2810_s1 + $0x40] sm:$0xff] (!%p294_p9) }
  0x14   : > { %v594_v42 = vld [vmem:[%s2810_s1 + $0x18] sm:$0xff] (!%p294_p9)  ;;  %v1679_v44 = vld [vmem:[%s2810_s1 + $0x48] sm:$0xff] (!%p294_p9)  ;;  %v1680_v45 = vld [vmem:[%s2810_s1 + $0x50] sm:$0xff] (!%p294_p9) }
  0x15   : > { %s2425_s21 = scalar_select %p334_p10, %s2396_s13, 1  ;;  %v1681_v46 = vld [vmem:[%s2810_s1 + $0x58] sm:$0xff]  ;;  %v728_v47 = vld [vmem:[%s2812_s3] sm:$0xff]  ;;  %vm1746_vm8 = vmneg %vm893_vm7 }
  0x16   : > { %vm2638_vm9 = vmpackc.low %vm1746_vm8, %vm1746_vm8 }
  0x17   : > { %s2819_s22 = sshll.u32 %s2425_s21, 5  ;;  %s2828_s17 = sshll.u32 %s2425_s21, 5 }
  0x18   : > { %s338_s25 = scalar_lea.vmem %s2809_s0, %s2819_s22  ;;  %s2320_s22 = smov 4  }
  0x19   : > { %v2436_v1 = vld [vmem:[%s338_s25] sm:$0xff]  ;;  %v2438_v2 = vld [vmem:[%s338_s25 + $0x8] sm:$0xff]  ;;  %v2440_v3 = vld [vmem:[%s338_s25 + $0x10] sm:$0xff] }
  0x1a   : > { %v2211_v4 = vpack.i.bf16 %v2438_v2, %v2436_v1  ;;  %v2445_v5 = vld [vmem:[%s338_s25 + $0x18] sm:$0xff]  ;;  %v2043_v35 = vpack.c.bf16 %v2438_v2, %v2436_v1  ;;  %s343_s25 = scalar_lea.vmem %s2817_s8, %s2828_s17 }
  0x1b   : > { %v2216_v6 = vpack.i.bf16 %v2445_v5, %v2440_v3  ;;  %v2047_v39 = vpack.c.bf16 %v2445_v5, %v2440_v3 }
  0x1c   : > { %2212 = vrot.lane.b32.xlu0 %v2211_v4, %s2317_s28  ;;  %2222 = vrot.lane.b32.xlu1 %v2211_v4, %s2318_s29 }
  0x20   : > { %2217 = vrot.lane.b32.xlu0 %v2216_v6, %s2317_s28  ;;  %2227 = vrot.lane.b32.xlu1 %v2216_v6, %s2318_s29 }
  0x24   : > { %707 = vperm.xlu1 %2232, %v697_v8   ;;  %702 = vperm.xlu0 %2231, %v696_v9  }
  0x28   : > { %712 = vperm.xlu1 %2232, %v698_v11   ;;  %717 = vperm.xlu0 %2231, %v699_v12  }
  0x2c   : > { %839 = vperm.xlu1 %2232, %v833_v13   ;;  %844 = vperm.xlu0 %2231, %v834_v14   ;;  %v729_v14 = vld [vmem:[%s2812_s3 + $0x8] sm:$0xff] }
  0x30   : > { %849 = vperm.xlu1 %2232, %v835_v15   ;;  %854 = vperm.xlu0 %2231, %v836_v16   ;;  %v730_v15 = vld [vmem:[%s2812_s3 + $0x10] sm:$0xff]  ;;  %v731_v16 = vld [vmem:[%s2812_s3 + $0x18] sm:$0xff] }
  0x8e   : > { %v2213_v17 = vpop.permute.xlu0 %2212  ;;  %v2223_v18 = vpop.permute.xlu1 %2222 }
  0x8f   : > { %v2215_v19 = vunpack.i.h.bf16 %v2213_v17  ;;  %v2214_v20 = vunpack.i.l.bf16 %v2213_v17  ;;  %v2225_v22 = vunpack.i.h.bf16 %v2223_v18  ;;  %v2224_v23 = vunpack.i.l.bf16 %v2223_v18 }
  0x91   : > { %v2031_v25 = vpack.c.bf16 %v2215_v19, %v2214_v20  ;;  %v2051_v26 = vpack.c.bf16 %v2225_v22, %v2224_v23 }
  0x92   : > { %v2218_v27 = vpop.permute.xlu0 %2217  ;;  %v2228_v28 = vpop.permute.xlu1 %2227 }
  0x93   : > { %v2220_v29 = vunpack.i.h.bf16 %v2218_v27  ;;  %v2219_v30 = vunpack.i.l.bf16 %v2218_v27  ;;  %2033 = vmatprep.subr.msk.bf16.mxu1 %vm2479_vm5, %v2031_v25  ;;  %v2230_v31 = vunpack.i.h.bf16 %v2228_v28  ;;  %v2229_v32 = vunpack.i.l.bf16 %v2228_v28  ;;  %2053 = vmatprep.subr.msk.bf16.mxu0 %vm2483_vm6, %v2051_v26 }
  0x94   : > { %2036 = vmatpush3.bf16.msk.msra.mxu1 %vm2479_vm5, %v2031_v25  ;;  %2056 = vmatpush3.bf16.msk.msra.mxu0 %vm2483_vm6, %v2051_v26 }
  0x95   : > { %v2037_v33 = vpack.c.bf16 %v2220_v29, %v2219_v30  ;;  %v2057_v34 = vpack.c.bf16 %v2230_v31, %v2229_v32  ;;  %v1722_v29 = vld [vmem:[%s2810_s1 + $0x80] sm:$0xff] }
  0x97   : > { %2039 = vmatprep.subr.msk.bf16.mxu1 %vm2479_vm5, %v2037_v33  ;;  %2059 = vmatprep.subr.msk.bf16.mxu0 %vm2483_vm6, %v2057_v34 }
  0x98   : > { %2042 = vmatpush3.bf16.msk.msra.mxu1 %vm2479_vm5, %v2037_v33  ;;  %2062 = vmatpush3.bf16.msk.msra.mxu0 %vm2483_vm6, %v2057_v34  ;;  %v1760_v34 = vld [vmem:[%s2811_s2 + $0x30] sm:$0xff] }
  0x99   : > { %2044 = vmatprep.subr.bf16.mxu1 %v2043_v35 }
  0x9b   : > { %1879 = vmatmul.mubr.msk.f32.vlgmr.msra.gmra.mrb[0].mxu1 %vm396_vm0, %v1683_v36  ;;  %1907 = vmatmul.mubr.msk.f32.vlgmr.msra.gmra.mrb[0].mxu0 %vm396_vm0, %v592_v37  ;;  %v1770_v36 = vld [vmem:[%s2813_s4 + $0x20] sm:$0xff]  ;;  %v1761_v37 = vld [vmem:[%s2811_s2 + $0x38] sm:$0xff] }
  0x9c   : > { %2046 = vmatpush3.bf16.msra.mxu1 %v2043_v35  ;;  %1881 = vmatprep.mubr.msk.f32.mxu1 %vm396_vm0, %v1684_v38  ;;  %v1759_v35 = vld [vmem:[%s2811_s2 + $0x28] sm:$0xff]  ;;  %v1772_v38 = vld [vmem:[%s2813_s4 + $0x30] sm:$0xff] }
  0x9d   : > { %2048 = vmatprep.subr.bf16.mxu1 %v2047_v39  ;;  %1909 = vmatprep.mubr.msk.f32.mxu0 %vm396_vm0, %v593_v40  ;;  %v1483_v40 = vld [vmem:[%s2816_s7] sm:$0xff] }
  0x9f   : > { %1882 = vmatmul.mubr.msk.f32.gmra.mrb[2].mxu1 %vm396_vm0, %v1685_v41  ;;  %1910 = vmatmul.mubr.msk.f32.gmra.mrb[2].mxu0 %vm396_vm0, %v594_v42  ;;  %v1773_v41 = vld [vmem:[%s2813_s4 + $0x38] sm:$0xff] }
  0xa0   : > { %2050 = vmatpush3.bf16.msra.mxu1 %v2047_v39  ;;  %1892 = vmatprep.mubr.msk.f32.mxu1 %vm396_vm0, %v1678_v43  ;;  %v1771_v39 = vld [vmem:[%s2813_s4 + $0x28] sm:$0xff] }
  0xa3   : > { %1893 = vmatmul.mubr.msk.f32.vlgmr.msra.gmra.mrb[0].mxu1 %vm396_vm0, %v1679_v44  ;;  %v703_v52 = vpop.permute.xlu0 %702  ;;  %v708_v54 = vpop.permute.xlu1 %707 }
  0xa4   : > { %1895 = vmatprep.mubr.msk.f32.mxu1 %vm396_vm0, %v1680_v45 }
  0xa7   : > { %1896 = vmatmul.mubr.msk.f32.gmra.mrb[2].mxu1 %vm396_vm0, %v1681_v46  ;;  %v718_v0 = vpop.permute.xlu0 %717  ;;  %v713_v7 = vpop.permute.xlu1 %712 }
  0xa8   : > { %1920 = vmatprep.mubr.msk.f32.mxu1 %vm396_vm0, %v728_v47 }
  0xab   : > { %v845_v17 = vpop.permute.xlu0 %844  ;;  %v840_v19 = vpop.permute.xlu1 %839 }
  0xaf   : > { %v855_v30 = vpop.permute.xlu0 %854 }
 0x16e   : > { %v1908_v48 = vpop.f32.mrb[0].mxu0 }
 0x16f   : > { %v673_v49 = vpop.f32.mrb[1].mxu0 }
 0x172   : > { %v1911_v50 = vpop.f32.mrb[2].mxu0 }
 0x173   : > { %v683_v51 = vpop.f32.mrb[3].mxu0 }
 0x176   : > { %v1894_v53 = vpop.f32.mrb[0].mxu1 }
 0x177   : > { %v2149_v55 = vadd.f32 %v1908_v48, %v1894_v53  ;;  %v572_v56 = vpop.f32.mrb[1].mxu1  ;;  %v1724_v53 = vld [vmem:[%s2810_s1 + $0x90] sm:$0xff] }
 0x178   : > { %v2150_v57 = vadd.f32 %v673_v49, %v572_v56 }
 0x179   : > { %v721_v58 = vadd.f32 %v2149_v55, %v708_v54 }
 0x17a   : > { %v720_v59 = vadd.f32 %v2150_v57, %v703_v52  ;;  %v1897_v60 = vpop.f32.mrb[2].mxu1  ;;  %v1723_v52 = vld [vmem:[%s2810_s1 + $0x88] sm:$0xff]  ;;  %v1725_v57 = vld [vmem:[%s2810_s1 + $0x98] sm:$0xff] }
 0x17b   : > { %v725_v61 = vmax.f32 %v721_v58, 0.0  ;;  %v2151_v62 = vadd.f32 %v1911_v50, %v1897_v60  ;;  %v582_v63 = vpop.f32.mrb[3].mxu1  ;;  %v1718_v58 = vld [vmem:[%s2810_s1 + $0xa0] sm:$0xff] }
 0x17c   : > { %v724_v4 = vmax.f32 %v720_v59, 0.0  ;;  %v2152_v6 = vadd.f32 %v683_v51, %v582_v63  ;;  %v1719_v63 = vld [vmem:[%s2810_s1 + $0xa8] sm:$0xff] }
 0x17d   : > { %v723_v8 = vadd.f32 %v2151_v62, %v718_v0  ;;  %v1720_v0 = vld [vmem:[%s2810_s1 + $0xb0] sm:$0xff] }
 0x17e   : > { %v722_v9 = vadd.f32 %v2152_v6, %v713_v7  ;;  %v2063_v10 = vpack.c.bf16 %v725_v61, %v724_v4  ;;  %v1721_v6 = vld [vmem:[%s2810_s1 + $0xb8] sm:$0xff]  ;;  %v1742_v7 = vld [vmem:[%s2810_s1 + $0x60] sm:$0xff] }
 0x17f   : > { %v727_v11 = vmax.f32 %v723_v8, 0.0  ;;  %v1743_v8 = vld [vmem:[%s2810_s1 + $0x68] sm:$0xff] }
 0x180   : > { %v726_v12 = vmax.f32 %v722_v9, 0.0  ;;  %2064 = vmatprep.subr.bf16.mxu1 %v2063_v10  ;;  %v1744_v9 = vld [vmem:[%s2810_s1 + $0x70] sm:$0xff] }
 0x181   : > { %2066 = vmatpush3.bf16.msra.mxu1 %v2063_v10  ;;  %v1745_v10 = vld [vmem:[%s2810_s1 + $0x78] sm:$0xff] }
 0x182   : > { %v2067_v13 = vpack.c.bf16 %v727_v11, %v726_v12  ;;  %v1762_v11 = vld [vmem:[%s2812_s3 + $0x20] sm:$0xff] }
 0x183   : > { %1976 = vmatprep.mubr.msk.f32.mxu0 %vm396_vm0, %v1762_v11 }
 0x184   : > { %2068 = vmatprep.subr.bf16.mxu1 %v2067_v13 }
 0x185   : > { %2070 = vmatpush3.bf16.msra.mxu1 %v2067_v13 }
 0x188   : > { %1921 = vmatmul.mubr.msk.f32.vlgmr.msra.gmra.mrb[4].mxu1 %vm396_vm0, %v729_v14 }
 0x189   : > { %1923 = vmatprep.mubr.msk.f32.mxu1 %vm396_vm0, %v730_v15 }
 0x18c   : > { %1924 = vmatmul.mubr.msk.f32.gmra.mrb[6].mxu1 %vm396_vm0, %v731_v16 }
 0x18d   : > { %1934 = vmatprep.mubr.msk.f32.mxu1 %vm396_vm0, %v1722_v29 }
 0x25b   : > { %v1922_v18 = vpop.f32.mrb[4].mxu1 }
 0x25c   : > { %v830_v20 = vadd.f32 %v1922_v18, %v2438_v2  ;;  %v810_v21 = vpop.f32.mrb[5].mxu1 }
 0x25d   : > { %v829_v22 = vadd.f32 %v810_v21, %v2436_v1  ;;  %v850_v1 = vpop.permute.xlu1 %849 }
 0x25e   : > { %v2565_v23 = vadd.f32 %v845_v17, %v830_v20 }
 0x25f   : > { %v2567_v25 = vadd.f32 %v840_v19, %v829_v22  ;;  %v1925_v26 = vpop.f32.mrb[6].mxu1 }
 0x260   : > { %v832_v27 = vadd.f32 %v1925_v26, %v2445_v5  ;;  %v820_v28 = vpop.f32.mrb[7].mxu1 }
 0x261   : > { %v831_v31 = vadd.f32 %v820_v28, %v2440_v3  ;;  %v2233_v2 = vpack.i.bf16 %v2565_v23, %v2567_v25  ;;  %v1758_v3 = vld [vmem:[%s2811_s2 + $0x20] sm:$0xff]  ;;  %v2083_v50 = vpack.c.bf16 %v2565_v23, %v2567_v25 }
 0x262   : > { %v2577_v32 = vadd.f32 %v855_v30, %v832_v27 }
 0x263   : > { %v2579_v33 = vadd.f32 %v850_v1, %v831_v31  ;;  %2234 = vrot.lane.b32.xlu1 %v2233_v2, %s2318_s29  ;;  %v1376_v31 = vld [vmem:[%s2814_s5] sm:$0xff] }
 0x265   : > { %v2238_v5 = vpack.i.bf16 %v2577_v32, %v2579_v33  ;;  %v2087_v56 = vpack.c.bf16 %v2577_v32, %v2579_v33 }
 0x267   : > { %2244 = vrot.lane.b32.xlu1 %v2233_v2, %s2320_s22  ;;  %2239 = vrot.lane.b32.xlu0 %v2238_v5, %s2318_s29  ;;  %v1377_v2 = vld [vmem:[%s2814_s5 + $0x8] sm:$0xff]  ;;  %s331_s29 = sand.u32 1, %s2307_s10  }
 0x268   : > { %s1673_s27 = sshll.u32 %s331_s29, 3  ;;  %s1569_s24 = scalar_lea.sflag [#allocation3], %s331_s29 }
 0x269   : > { %s333_s28 = scalar_lea.vmem [#allocation2], %s1673_s27 }
 0x26a   : > { %s1585_s14 = sshll.u32 %s333_s28, 4  ;;  %s2768_s14 = int_to_ptr.vmem [resolvable:$true] %s1585_s14 }
 0x26b   : > { %1215 = vperm.xlu1 %2232, %v1758_v3   ;;  %2249 = vrot.lane.b32.xlu0 %v2238_v5, %s2320_s22  ;;  %v2111_v3 = vpack.c.bf16 %v1377_v2, %v1376_v31  ;;  %s1776_s22 = sshll.u32 %s2396_s13, 7  ;;  %s2253_s13 = scalar_lea.vmem %s2768_s14, 128 }
 0x26c   : > { %s2766_s23 = scalar_lea.hbm %s2818_s9, %s1776_s22  ;;  %p2254_p11 = scmp.ne.s32.totalorder %s2768_s14, %s2253_s13 }
 0x26e   : > { %p2255_p12 = pnand %p2254_p11, %p2413_p5 }
 0x26f   : > { %1225 = vperm.xlu1 %2232, %v1760_v34   ;;  %1220 = vperm.xlu0 %2231, %v1759_v35   ;;  %v1378_v34 = vld [vmem:[%s2814_s5 + $0x10] sm:$0xff]  ;;  %v1379_v35 = vld [vmem:[%s2814_s5 + $0x18] sm:$0xff] }
 0x270   : > { %p2256_p13 = pneg %p2255_p12 }
 0x273   : > { %1354 = vperm.xlu1 %2232, %v1770_v36   ;;  %1230 = vperm.xlu0 %2231, %v1761_v37   ;;  %v1763_v36 = vld [vmem:[%s2812_s3 + $0x28] sm:$0xff]  ;;  %v1764_v37 = vld [vmem:[%s2812_s3 + $0x30] sm:$0xff] }
 0x277   : > { %1364 = vperm.xlu1 %2232, %v1772_v38   ;;  %1359 = vperm.xlu0 %2231, %v1771_v39   ;;  %v2115_v38 = vpack.c.bf16 %v1379_v35, %v1378_v34  ;;  %v1380_v39 = vld [vmem:[%s2814_s5 + $0x20] sm:$0xff] }
 0x27b   : > { %1486 = vperm.xlu1 %2232, %v1483_v40   ;;  %1369 = vperm.xlu0 %2231, %v1773_v41   ;;  %v1381_v40 = vld [vmem:[%s2814_s5 + $0x28] sm:$0xff]  ;;  %v1765_v41 = vld [vmem:[%s2812_s3 + $0x38] sm:$0xff] }
 0x2d5   : > { %v2235_v42 = vpop.permute.xlu1 %2234 }
 0x2d6   : > { %v2237_v43 = vunpack.i.h.bf16 %v2235_v42  ;;  %v2236_v44 = vunpack.i.l.bf16 %v2235_v42  ;;  %v2119_v42 = vpack.c.bf16 %v1381_v40, %v1380_v39 }
 0x2d8   : > { %v2071_v45 = vpack.c.bf16 %v2237_v43, %v2236_v44  ;;  %v1382_v43 = vld [vmem:[%s2814_s5 + $0x30] sm:$0xff]  ;;  %v1383_v44 = vld [vmem:[%s2814_s5 + $0x38] sm:$0xff] }
 0x2d9   : > { %v2240_v46 = vpop.permute.xlu0 %2239  ;;  %v2245_v51 = vpop.permute.xlu1 %2244 }
 0x2da   : > { %v2242_v47 = vunpack.i.h.bf16 %v2240_v46  ;;  %v2241_v48 = vunpack.i.l.bf16 %v2240_v46  ;;  %2073 = vmatprep.subr.msk.bf16.mxu1 %vm2483_vm6, %v2071_v45  ;;  %v2247_v54 = vunpack.i.h.bf16 %v2245_v51  ;;  %v2246_v55 = vunpack.i.l.bf16 %v2245_v51  ;;  %v1384_v46 = vld [vmem:[%s2814_s5 + $0x40] sm:$0xff] }
 0x2db   : > { %2076 = vmatpush3.bf16.msk.msra.mxu1 %vm2483_vm6, %v2071_v45  ;;  %v2123_v45 = vpack.c.bf16 %v1383_v44, %v1382_v43 }
 0x2dc   : > { %v2077_v49 = vpack.c.bf16 %v2242_v47, %v2241_v48  ;;  %v2091_v60 = vpack.c.bf16 %v2247_v54, %v2246_v55  ;;  %v1385_v47 = vld [vmem:[%s2814_s5 + $0x48] sm:$0xff]  ;;  %v1390_v55 = vld [vmem:[%s2814_s5 + $0x70] sm:$0xff] }
 0x2dd   : > { %v2250_v24 = vpop.permute.xlu0 %2249  ;;  %v2127_v48 = vpack.c.bf16 %v1385_v47, %v1384_v46 }
 0x2de   : > { %2079 = vmatprep.subr.msk.bf16.mxu1 %vm2483_vm6, %v2077_v49  ;;  %v2252_v61 = vunpack.i.h.bf16 %v2250_v24  ;;  %v2251_v62 = vunpack.i.l.bf16 %v2250_v24 }
 0x2df   : > { %2082 = vmatpush3.bf16.msk.msra.mxu1 %vm2483_vm6, %v2077_v49  ;;  %v1386_v49 = vld [vmem:[%s2814_s5 + $0x50] sm:$0xff] }
 0x2e0   : > { %2084 = vmatprep.subr.bf16.mxu1 %v2083_v50  ;;  %v2097_v4 = vpack.c.bf16 %v2252_v61, %v2251_v62 }
 0x2e2   : > { %1935 = vmatmul.mubr.msk.f32.vlgmr.msra.gmra.mrb[8].mxu1 %vm396_vm0, %v1723_v52  ;;  %v1388_v52 = vld [vmem:[%s2814_s5 + $0x60] sm:$0xff] }
 0x2e3   : > { %2086 = vmatpush3.bf16.msra.mxu1 %v2083_v50  ;;  %1937 = vmatprep.mubr.msk.f32.mxu1 %vm396_vm0, %v1724_v53  ;;  %v1387_v50 = vld [vmem:[%s2814_s5 + $0x58] sm:$0xff]  ;;  %v1389_v53 = vld [vmem:[%s2814_s5 + $0x68] sm:$0xff] }
 0x2e4   : > { %2088 = vmatprep.subr.bf16.mxu1 %v2087_v56  ;;  %v2131_v51 = vpack.c.bf16 %v1387_v50, %v1386_v49  ;;  %v2135_v54 = vpack.c.bf16 %v1389_v53, %v1388_v52 }
 0x2e6   : > { %1938 = vmatmul.mubr.msk.f32.gmra.mrb[10].mxu1 %vm396_vm0, %v1725_v57 }
 0x2e7   : > { %2090 = vmatpush3.bf16.msra.mxu1 %v2087_v56  ;;  %1948 = vmatprep.mubr.msk.f32.mxu1 %vm396_vm0, %v1718_v58  ;;  %v1391_v56 = vld [vmem:[%s2814_s5 + $0x78] sm:$0xff] }
 0x2e8   : > { %2093 = vmatprep.subr.msk.bf16.mxu1 %vm2638_vm9, %v2091_v60  ;;  %v2139_v24 = vpack.c.bf16 %v1391_v56, %v1390_v55 }
 0x2ea   : > { %1949 = vmatmul.mubr.msk.f32.vlgmr.msra.gmra.mrb[8].mxu1 %vm396_vm0, %v1719_v63  ;;  %v1216_v13 = vpop.permute.xlu1 %1215 }
 0x2eb   : > { %2096 = vmatpush3.bf16.msk.msra.mxu1 %vm2638_vm9, %v2091_v60  ;;  %1951 = vmatprep.mubr.msk.f32.mxu1 %vm396_vm0, %v1720_v0 }
 0x2ec   : > { %2099 = vmatprep.subr.msk.bf16.mxu1 %vm2638_vm9, %v2097_v4 }
 0x2ee   : > { %1952 = vmatmul.mubr.msk.f32.gmra.mrb[10].mxu1 %vm396_vm0, %v1721_v6  ;;  %v1221_v12 = vpop.permute.xlu0 %1220  ;;  %v1226_v22 = vpop.permute.xlu1 %1225 }
 0x2ef   : > { %2102 = vmatpush3.bf16.msk.msra.mxu1 %vm2638_vm9, %v2097_v4  ;;  %1962 = vmatprep.mubr.msk.f32.mxu1 %vm396_vm0, %v1742_v7 }
 0x2f2   : > { %1963 = vmatmul.mubr.msk.f32.vlgmr.msra.gmra.mrb[8].mxu1 %vm396_vm0, %v1743_v8  ;;  %v1231_v19 = vpop.permute.xlu0 %1230  ;;  %v1355_v58 = vpop.permute.xlu1 %1354 }
 0x2f3   : > { %1965 = vmatprep.mubr.msk.f32.mxu1 %vm396_vm0, %v1744_v9 }
 0x2f6   : > { %1966 = vmatmul.mubr.msk.f32.gmra.mrb[10].mxu1 %vm396_vm0, %v1745_v10  ;;  %v1360_v61 = vpop.permute.xlu0 %1359  ;;  %v1365_v9 = vpop.permute.xlu1 %1364 }
 0x2fa   : > { %v1370_v10 = vpop.permute.xlu0 %1369 }
 0x3c5   : > { %v1964_v14 = vpop.f32.mrb[8].mxu1 }
 0x3c6   : > { %v1234_v15 = vadd.f32 %v1964_v14, %v1221_v12  ;;  %v1185_v16 = vpop.f32.mrb[9].mxu1 }
 0x3c7   : > { %v1233_v17 = vadd.f32 %v1216_v13, %v1185_v16 }
 0x3c8   : > { %v1238_v18 = vmax.f32 %v1234_v15, 0.0 }
 0x3c9   : > { %v1237_v20 = vmax.f32 %v1233_v17, 0.0  ;;  %v1967_v21 = vpop.f32.mrb[10].mxu1  ;;  %v1482_v17 = vld [vmem:[%s2815_s6] sm:$0xff] }
 0x3ca   : > { %v1236_v26 = vadd.f32 %v1967_v21, %v1231_v19  ;;  %v1195_v27 = vpop.f32.mrb[11].mxu1 }
 0x3cb   : > { %v2103_v28 = vpack.c.bf16 %v1238_v18, %v1237_v20  ;;  %v1235_v29 = vadd.f32 %v1226_v22, %v1195_v27  ;;  %v1487_v18 = vpop.permute.xlu1 %1486 }
 0x3cc   : > { %v1240_v30 = vmax.f32 %v1236_v26, 0.0 }
 0x3cd   : > { %v1239_v1 = vmax.f32 %v1235_v29, 0.0  ;;  %2104 = vmatprep.subr.bf16.mxu0 %v2103_v28 }
 0x3ce   : > { %2106 = vmatpush3.bf16.msra.mxu0 %v2103_v28 }
 0x3cf   : > { %v2107_v5 = vpack.c.bf16 %v1240_v30, %v1239_v1 }
 0x3d1   : > { %2108 = vmatprep.subr.bf16.mxu0 %v2107_v5 }
 0x3d2   : > { %2110 = vmatpush3.bf16.msra.mxu0 %v2107_v5 }
 0x3d3   : > { %2112 = vmatprep.subr.bf16.mxu0 %v2111_v3 }
 0x3d5   : > { %1977 = vmatmul.mubr.msk.f32.vlgmr.msra.gmra.mrb[4].mxu0 %vm396_vm0, %v1763_v36 }
 0x3d6   : > { %1979 = vmatprep.mubr.msk.f32.mxu0 %vm396_vm0, %v1764_v37  ;;  %2114 = vmatpush3.bf16.msra.mxu0 %v2111_v3 }
 0x3d7   : > { %2116 = vmatprep.subr.bf16.mxu0 %v2115_v38 }
 0x3d9   : > { %1980 = vmatmul.mubr.msk.f32.gmra.mrb[6].mxu0 %vm396_vm0, %v1765_v41 }
 0x3da   : > { %2118 = vmatpush3.bf16.msra.mxu0 %v2115_v38 }
 0x3db   : > { %2120 = vmatprep.subr.bf16.mxu0 %v2119_v42 }
 0x3de   : > { %2122 = vmatpush3.bf16.msra.mxu0 %v2119_v42 }
 0x3df   : > { %2124 = vmatprep.subr.bf16.mxu0 %v2123_v45 }
 0x3e2   : > { %2126 = vmatpush3.bf16.msra.mxu0 %v2123_v45 }
 0x3e3   : > { %2128 = vmatprep.subr.bf16.mxu0 %v2127_v48 }
 0x3e6   : > { %2130 = vmatpush3.bf16.msra.mxu0 %v2127_v48 }
 0x3e7   : > { %2132 = vmatprep.subr.bf16.mxu0 %v2131_v51 }
 0x3ea   : > { %2134 = vmatpush3.bf16.msra.mxu0 %v2131_v51 }
 0x3eb   : > { %2136 = vmatprep.subr.bf16.mxu0 %v2135_v54 }
 0x3ee   : > { %2138 = vmatpush3.bf16.msra.mxu0 %v2135_v54 }
 0x3ef   : > { %2140 = vmatprep.subr.bf16.mxu0 %v2139_v24 }
 0x3f2   : > { %2142 = vmatpush3.bf16.msra.mxu0 %v2139_v24 }
 0x4a8   : > { %v1978_v57 = vpop.f32.mrb[4].mxu0 }
 0x4a9   : > { %v1344_v59 = vadd.f32 %v1978_v57, %v2565_v23  ;;  %v1324_v60 = vpop.f32.mrb[5].mxu0  ;;  %v2321_v23 = vmov 0.0|0.0  }
 0x4aa   : > { %v1343_v62 = vadd.f32 %v1324_v60, %v2567_v25  ;;  %2143 = vmatprep.subr.bf16.mxu1 %v2321_v23  ;;  %v2323_v25 = vmov 0.0  }
 0x4ab   : > { %v1373_v4 = vadd.f32 %v1360_v61, %v1344_v59  ;;  %2028 = vmatprep.mubr.msk.f32.mxu1 %vm2322_vm10, %v2323_v25 }
 0x4ac   : > { %v1372_v63 = vadd.f32 %v1355_v58, %v1343_v62  ;;  %v1981_v0 = vpop.f32.mrb[6].mxu0 }
 0x4ad   : > { %v1346_v6 = vadd.f32 %v1981_v0, %v2577_v32  ;;  %v1334_v7 = vpop.f32.mrb[7].mxu0 }
 0x4ae   : > { %v1345_v8 = vadd.f32 %v1334_v7, %v2579_v33  ;;  %2014 = vmatprep.mubr.f32.mxu0 %v1372_v63 }
 0x4af   : > { %2015 = vmatmul.mubr.f32.vlgmr.msra.gmra.mrb[8].mxu0 %v1373_v4  ;;  %v1375_v12 = vadd.f32 %v1370_v10, %v1346_v6 }
 0x4b0   : > { %v1374_v11 = vadd.f32 %v1365_v9, %v1345_v8 }
 0x4b2   : > { %2017 = vmatprep.mubr.f32.mxu0 %v1374_v11 }
 0x4b3   : > { %2018 = vmatmul.mubr.f32.gmra.mrb[10].mxu0 %v1375_v12 }
 0x582   : > { %v2016_v32 = vpop.f32.mrb[8].mxu0 }
 0x583   : > { %1479 = vst.msk [vmem:[%s343_s25 + $0x8] sm:$0xff] %vm1477_vm11, %v2016_v32  ;;  %v1458_v33 = vpop.f32.mrb[9].mxu0 }
 0x584   : > { %1478 = vst.msk [vmem:[%s343_s25] sm:$0xff] %vm1477_vm11, %v1458_v33  ;;  %v2144_v13 = vpack.c.bf16 %v2016_v32, %v1458_v33 }
 0x586   : > { %v2019_v14 = vpop.f32.mrb[10].mxu0  ;;  %2145 = vmatpush3.bf16.msra.mxu1 %v2144_v13 }
 0x587   : > { %1481 = vst.msk [vmem:[%s343_s25 + $0x18] sm:$0xff] %vm1477_vm11, %v2019_v14  ;;  %v1468_v15 = vpop.f32.mrb[11].mxu0  ;;  %2146 = vmatprep.subr.bf16.mxu1 %v2321_v23 }
 0x588   : > { %1480 = vst.msk [vmem:[%s343_s25 + $0x10] sm:$0xff] %vm1477_vm11, %v1468_v15  ;;  %v2147_v16 = vpack.c.bf16 %v2019_v14, %v1468_v15  ;;  %s2324_s25 = smov [#allocation2]  }
 0x589   : > { %s2257_s21 = sshll.u32 %s2324_s25, 4  ;;  %s2258_s21 = int_to_ptr.vmem [resolvable:$false] %s2257_s21 }
 0x58a   : > { %2148 = vmatpush3.bf16.msra.mxu1 %v2147_v16  ;;  %s2259_s26 = scalar_lea.vmem %s2258_s21, 256  ;;  %p2260_p0 = scmp.lt.s32.totalorder %s2768_s14, %s2258_s21 }
 0x58b   : > { %p2261_p1 = scmp.lt.s32.totalorder %s2259_s26, %s2253_s13 }
 0x58d   : > { %2029 = vmatmul.mubr.msk.f32.vlgmr.msra.gmra.mrb[12].mxu1 %vm396_vm0, %v1482_v17  ;;  %p2262_p2 = por %p2261_p1, %p2260_p0 }
 0x58f   : > { %p2263_p3 = pnand %p2262_p2, %p2256_p13 }
 0x660   : > { %v1558_v19 = vpop.f32.mrb[12].mxu1 }
 0x661   : > { %v1559_v20 = vadd.f32 %v1558_v19, %v1487_v18  ;;  %v2030_v21 = vpop.f32.mrb[13].mxu1 }
 0x663   : > { %1562 = vst.msk [vmem:[%s333_s28] sm:$0xff] %vm1477_vm11, %v1559_v20 }
 0x664   : > { %2266 = shalt.err (!%p2263_p3)
}
 0x665   : > { %s2267_s29 = scalar_lea.hbm %s2766_s23, 128  ;;  %s2271_s28 = scalar_lea.hbm %s2818_s9, 256 }
 0x666   : > { %p2268_p4 = scmp.ne.s32.totalorder %s2766_s23, %s2267_s29  ;;  %p2272_p9 = scmp.lt.u32.totalorder %s2766_s23, %s2818_s9 }
 0x667   : > { %p2273_p10 = scmp.lt.u32.totalorder %s2271_s28, %s2267_s29  ;;  %p2275_p12 = scmp.lt.u32.totalorder %s2267_s29, %s2766_s23 }
 0x668   : > { %p2269_p7 = pnand %p2268_p4, %p2413_p5 }
 0x669   : > { %p2274_p11 = por %p2273_p10, %p2272_p9 }
 0x66a   : > { %p2270_p8 = pneg %p2269_p7 }
 0x66b   : > { %p2276_p13 = por %p2275_p12, %p2274_p11 }
 0x66d   : > { %p2277_p0 = pnand %p2276_p13, %p2270_p8 }
 0x66f   : > { %2280 = shalt.err (!%p2277_p0)
}
 0x670   : > { %2165 = dma.vmem_to_hbm [thread:$0]  (%p2413_p5), %s2768_s14, 128, %s2766_s23, %s1569_s24  }
 0x671 PF: > { %p2171_p1 = scmp.ge.s32.totalorder %s2315_s12, 2  ;;  %s1605_s13 = sand.u32 1, %s2303_s30  }
 0x672   : > { %s1606_s25 = scalar_lea.sflag [#allocation3], %s1605_s13 }
 0x673   : > { %p2168_p2 = pnand %p2171_p1, %p2417_p6 }
 0x675   : > { %2298 = dma.done.wait (!%p2168_p2), %s1606_s25, 128  }
 0x676   : > { %2300 = vsyncadd (!%p2168_p2), %s1606_s25, 4294967168  ;;  %p20_p3 = scmp.ge.s32.totalorder %s2400_s15, 4   ;;  %s2829_s30 = smov %s2307_s10 }
 0x677   : > { %s2830_s10 = smov %s2311_s11  ;;  %s2831_s11 = smov %s2411_s18 }
 0x678   : > { %s2832_s12 = smov %s2400_s15  ;;  %22 = sbr.rel (!%p20_p3) target bundleno = 3 (0x3), region = 107 }
 0x67f   :  { %1611 = vsyncpa [#allocation3], 1 }
 0x680   :  { %1613 = vsyncpa [#allocation3 + $0x1], 1 }

// kernel: mstr_forward.11
= control target key start
LH: loop header
LB: loop body
LE: loop exit
PB: predicated region body
PF: predicated region fallthrough
CT: control target
= control target key end

     0   :  { %15 = vsyncpa [#allocation3], 0  ;;  %s2753_s0 = inlined_call_operand.vmem [shape: f32[2,32,64], index: 0, kind: input, shape index: {}]   ;;  %s2754_s1 = inlined_call_operand.vmem [shape: f32[6,32,32], index: 1, kind: input, shape index: {}]   ;;  %s2755_s2 = inlined_call_operand.vmem [shape: f32[2,32,1], index: 2, kind: input, shape index: {}]   ;;  %s2756_s3 = inlined_call_operand.vmem [shape: f32[2,32,32], index: 3, kind: input, shape index: {}]   ;;  %s2757_s4 = inlined_call_operand.vmem [shape: f32[2,32,1], index: 4, kind: input, shape index: {}]   ;;  %s2758_s5 = inlined_call_operand.vmem [shape: f32[64,32], index: 5, kind: input, shape index: {}]   ;;  %s2759_s6 = inlined_call_operand.vmem [shape: f32[8,32], index: 6, kind: input, shape index: {}]   ;;  %s2760_s7 = inlined_call_operand.vmem [shape: f32[8,1], index: 7, kind: input, shape index: {}]   ;;  %s2761_s8 = inlined_call_operand.vmem [shape: f32[2,32,32], index: 8, kind: output, shape index: {0}]   ;;  %s2762_s9 = inlined_call_operand.hbm [shape: f32[2,8,32], index: 9, kind: output, shape index: {1}]  }
   0x1   :  { %17 = vsyncpa [#allocation3 + $0x1], 0  ;;  %s2343_s30 = smov 0   ;;  %s2345_s10 = smov 0  }
   0x2   :  { %s2347_s11 = smov 0   ;;  %s2349_s12 = smov 0  }
   0x3 LB: > { %s2364_s13 = sadd.s32 4294967295, %s2283_s12   ;;  %s1673_s14 = sadd.s32 4294967294, %s2283_s12   ;;  %s2283_s12 = sphi %s2349_s12, %s2776_s12   ;;  %s2279_s11 = sphi %s2347_s11, %s2775_s11   ;;  %s2275_s10 = sphi %s2345_s10, %s2774_s10   ;;  %s2271_s30 = sphi %s2343_s30, %s2773_s30  }
   0x4   : > { %s2368_s15 = sadd.s32 1, %s2283_s12   ;;  %s229_s16 = sadd.s32 1, %s2279_s11 }
   0x5   : > { %s226_s17 = ssub.s32 %s2283_s12, %s2368_s15  ;;  %p239_p0 = scmp.ne.s32.totalorder %s2279_s11, %s2275_s10 }
   0x6   : > { %p227_p1 = scmp.eq.s32.totalorder %s226_s17, 0  ;;  %p240_p2 = scmp.eq.s32.totalorder %s2364_s13, 1 }
   0x7   : > { %p245_p3 = scmp.ne.s32.totalorder %s2275_s10, %s2271_s30  ;;  %p246_p4 = scmp.eq.s32.totalorder %s1673_s14, 1 }
   0x8   : > { %s2379_s18 = scalar_select %p227_p1, %s2279_s11, %s229_s16  }
   0x9   : > { %p2381_p5 = por %p240_p2, %p239_p0  ;;  %p2385_p6 = por %p246_p4, %p245_p3 }
   0xa   : > { %p1676_p7 = scmp.ge.s32.totalorder %s2283_s12, 1  ;;  %p293_p8 = scmp.lt.s32.totalorder %s2283_s12, 3 }
   0xc   : > { %p294_p9 = pnand %p1676_p7, %p293_p8 }
   0xd   : > { %p334_p10 = scmp.lt.s32.totalorder (!%p294_p9), %s2364_s13, 1  ;;  %v1682_v0 = vld [vmem:[%s2754_s1 + $0x40] sm:$0xff] (!%p294_p9)  ;;  %vm396_vm0 = vcmask (!%p294_p9), 261120   ;;  %s2285_s28 = smov (!%p294_p9), 1   ;;  %v1683_v10 = vld [vmem:[%s2754_s1 + $0x48] sm:$0xff] (!%p294_p9)  ;;  %v1684_v11 = vld [vmem:[%s2754_s1 + $0x50] sm:$0xff] (!%p294_p9) }
   0xe   : > { %297 = sbr.rel (%p294_p9) target bundleno = 1645 (0x66d), region = 52  ;;  %1892 = vmatprep.mubr.msk.f32.mxu0 (!%p294_p9), %vm396_vm0, %v1682_v0  ;;  %v1686_v9 = vld [vmem:[%s2754_s1 + $0x20] sm:$0xff] (!%p294_p9)  ;;  %s2286_s16 = smov (!%p294_p9), 2   ;;  %v697_v12 = vld [vmem:[%s2755_s2 + $0x8] sm:$0xff] (!%p294_p9)  ;;  %v2287_v14 = vmov (!%p294_p9), 0   ;;  %v1685_v15 = vld [vmem:[%s2754_s1 + $0x58] sm:$0xff] (!%p294_p9) }
   0xf   : > { %1878 = vmatprep.mubr.msk.f32.mxu1 (!%p294_p9), %vm396_vm0, %v1686_v9  ;;  %v696_v13 = vld [vmem:[%s2755_s2] sm:$0xff] (!%p294_p9)  ;;  %2200 = vset.pattern.permute.xlu1 (!%p294_p9), %v2287_v14  ;;  %v698_v17 = vld [vmem:[%s2755_s2 + $0x10] sm:$0xff] (!%p294_p9)  ;;  %v699_v18 = vld [vmem:[%s2755_s2 + $0x18] sm:$0xff] (!%p294_p9)  ;;  %vm364_vm1 = vcmask (!%p294_p9), 7168   ;;  %vm381_vm3 = vcmask (!%p294_p9), 15360   ;;  %s2288_s22 = smov (!%p294_p9), 4  }
  0x10   : > { %2199 = vset.pattern.permute.xlu0 (!%p294_p9), %v2287_v14  ;;  %v591_v16 = vld [vmem:[%s2754_s1] sm:$0xff] (!%p294_p9)  ;;  %v834_v20 = vld [vmem:[%s2757_s4 + $0x8] sm:$0xff] (!%p294_p9)  ;;  %v835_v21 = vld [vmem:[%s2757_s4 + $0x10] sm:$0xff] (!%p294_p9)  ;;  %vm893_vm7 = vcmask (!%p294_p9), 31744   ;;  %vm1384_vm10 = vcmask (!%p294_p9), 523264   ;;  %vm2290_vm11 = vmmov (!%p294_p9), 0  }
  0x11   : > { %v833_v19 = vld [vmem:[%s2757_s4] sm:$0xff] (!%p294_p9)  ;;  %v836_v22 = vld [vmem:[%s2757_s4 + $0x18] sm:$0xff] (!%p294_p9)  ;;  %vm1690_vm2 = vmneg (!%p294_p9), %vm364_vm1  ;;  %s1784_s29 = sshll.u32 (!%p294_p9), %s2364_s13, 7 }
  0x12   : > { %vm2467_vm4 = vmpackc.low (!%p294_p9), %vm1690_vm2, %vm1690_vm2  ;;  %v1687_v41 = vld [vmem:[%s2754_s1 + $0x28] sm:$0xff] (!%p294_p9)  ;;  %v1688_v42 = vld [vmem:[%s2754_s1 + $0x30] sm:$0xff] (!%p294_p9) }
  0x13   : > { %vm1706_vm5 = vmneg (!%p294_p9), %vm381_vm3  ;;  %v592_v43 = vld [vmem:[%s2754_s1 + $0x8] sm:$0xff] (!%p294_p9)  ;;  %v1689_v44 = vld [vmem:[%s2754_s1 + $0x38] sm:$0xff] (!%p294_p9) }
  0x14   : > { %vm2475_vm6 = vmpackc.low (!%p294_p9), %vm1706_vm5, %vm1706_vm5  ;;  %v593_v45 = vld [vmem:[%s2754_s1 + $0x10] sm:$0xff] (!%p294_p9)  ;;  %v594_v46 = vld [vmem:[%s2754_s1 + $0x18] sm:$0xff] (!%p294_p9) }
  0x15   : > { %s2393_s21 = scalar_select %p334_p10, %s2364_s13, 1  ;;  %v728_v47 = vld [vmem:[%s2756_s3] sm:$0xff]  ;;  %v729_v14 = vld [vmem:[%s2756_s3 + $0x8] sm:$0xff]  ;;  %vm1750_vm8 = vmneg %vm893_vm7 }
  0x16   : > { %vm2606_vm9 = vmpackc.low %vm1750_vm8, %vm1750_vm8 }
  0x17   : > { %s2763_s24 = sshll.u32 %s2393_s21, 5 }
  0x18   : > { %s338_s27 = scalar_lea.vmem %s2753_s0, %s2763_s24 }
  0x19   : > { %v2405_v1 = vld [vmem:[%s338_s27] sm:$0xff]  ;;  %v2407_v2 = vld [vmem:[%s338_s27 + $0x8] sm:$0xff]  ;;  %v2409_v3 = vld [vmem:[%s338_s27 + $0x10] sm:$0xff] }
  0x1a   : > { %v2179_v4 = vpack.i.bf16 %v2407_v2, %v2405_v1  ;;  %v2413_v5 = vld [vmem:[%s338_s27 + $0x18] sm:$0xff]  ;;  %v2027_v6 = vpack.c.bf16 %v2407_v2, %v2405_v1  ;;  %s331_s27 = sand.u32 1, %s2275_s10  }
  0x1b   : > { %v2189_v7 = vpack.i.bf16 %v2413_v5, %v2409_v3  ;;  %v2031_v8 = vpack.c.bf16 %v2413_v5, %v2409_v3  ;;  %s1573_s23 = scalar_lea.sflag [#allocation3], %s331_s27 }
  0x1c   : > { %2180 = vrot.lane.b32.xlu0 %v2179_v4, %s2285_s28  ;;  %2028 = vmatprep.subr.bf16.mxu0 %v2027_v6 }
  0x1d   : > { %2190 = vrot.lane.b32.xlu1 %v2189_v7, %s2285_s28  ;;  %2030 = vmatpush3.bf16.msra.mxu0 %v2027_v6  ;;  %s1677_s28 = sshll.u32 %s331_s27, 3 }
  0x1e   : > { %2032 = vmatprep.subr.bf16.mxu0 %v2031_v8  ;;  %s333_s14 = scalar_lea.vmem [#allocation2], %s1677_s28 }
  0x1f   : > { %s1589_s24 = sshll.u32 %s333_s14, 4  ;;  %s2712_s24 = int_to_ptr.vmem [resolvable:$true] %s1589_s24 }
  0x20   : > { %2185 = vrot.lane.b32.xlu0 %v2179_v4, %s2286_s16  ;;  %s2221_s13 = scalar_lea.vmem %s2712_s24, 128 }
  0x21   : > { %2195 = vrot.lane.b32.xlu1 %v2189_v7, %s2286_s16  ;;  %2034 = vmatpush3.bf16.msra.mxu0 %v2031_v8  ;;  %p2222_p11 = scmp.ne.s32.totalorder %s2712_s24, %s2221_s13 }
  0x23   : > { %p2223_p12 = pnand %p2222_p11, %p2381_p5 }
  0x24   : > { %1893 = vmatmul.mubr.msk.f32.vlgmr.msra.gmra.mrb[0].mxu0 %vm396_vm0, %v1683_v10  ;;  %702 = vperm.xlu0 %2199, %v696_v13  }
  0x25   : > { %1895 = vmatprep.mubr.msk.f32.mxu0 %vm396_vm0, %v1684_v11  ;;  %707 = vperm.xlu1 %2200, %v697_v12   ;;  %p2224_p13 = pneg %p2223_p12 }
  0x28   : > { %1896 = vmatmul.mubr.msk.f32.gmra.mrb[2].mxu0 %vm396_vm0, %v1685_v15  ;;  %717 = vperm.xlu0 %2199, %v699_v18   ;;  %v730_v15 = vld [vmem:[%s2756_s3 + $0x10] sm:$0xff] }
  0x29   : > { %1906 = vmatprep.mubr.msk.f32.mxu0 %vm396_vm0, %v591_v16  ;;  %712 = vperm.xlu1 %2200, %v698_v17   ;;  %v731_v16 = vld [vmem:[%s2756_s3 + $0x18] sm:$0xff] }
  0x2c   : > { %844 = vperm.xlu0 %2199, %v834_v20  }
  0x2d   : > { %839 = vperm.xlu1 %2200, %v833_v19  }
  0x30   : > { %854 = vperm.xlu0 %2199, %v836_v22  }
  0x31   : > { %849 = vperm.xlu1 %2200, %v835_v21  }
  0x8e   : > { %v2181_v23 = vpop.permute.xlu0 %2180 }
  0x8f   : > { %v2183_v24 = vunpack.i.h.bf16 %v2181_v23  ;;  %v2182_v25 = vunpack.i.l.bf16 %v2181_v23  ;;  %v2191_v26 = vpop.permute.xlu1 %2190 }
  0x90   : > { %v2193_v27 = vunpack.i.h.bf16 %v2191_v26  ;;  %v2192_v28 = vunpack.i.l.bf16 %v2191_v26 }
  0x91   : > { %v2015_v30 = vpack.c.bf16 %v2183_v24, %v2182_v25 }
  0x92   : > { %v2021_v31 = vpack.c.bf16 %v2193_v27, %v2192_v28  ;;  %v2186_v32 = vpop.permute.xlu0 %2185  ;;  %v1726_v28 = vld [vmem:[%s2754_s1 + $0x80] sm:$0xff] }
  0x93   : > { %v2188_v33 = vunpack.i.h.bf16 %v2186_v32  ;;  %v2187_v34 = vunpack.i.l.bf16 %v2186_v32  ;;  %2017 = vmatprep.subr.msk.bf16.mxu1 %vm2467_vm4, %v2015_v30  ;;  %v2196_v35 = vpop.permute.xlu1 %2195 }
  0x94   : > { %2020 = vmatpush3.bf16.msk.msra.mxu1 %vm2467_vm4, %v2015_v30  ;;  %v2198_v36 = vunpack.i.h.bf16 %v2196_v35  ;;  %v2197_v37 = vunpack.i.l.bf16 %v2196_v35  ;;  %v1774_v35 = vld [vmem:[%s2757_s4 + $0x20] sm:$0xff] }
  0x95   : > { %v2035_v39 = vpack.c.bf16 %v2188_v33, %v2187_v34  ;;  %2023 = vmatprep.subr.msk.bf16.mxu1 %vm2467_vm4, %v2021_v31  ;;  %v1764_v33 = vld [vmem:[%s2755_s2 + $0x30] sm:$0xff]  ;;  %v1763_v34 = vld [vmem:[%s2755_s2 + $0x28] sm:$0xff] }
  0x96   : > { %v2041_v40 = vpack.c.bf16 %v2198_v36, %v2197_v37  ;;  %v1765_v36 = vld [vmem:[%s2755_s2 + $0x38] sm:$0xff]  ;;  %v1776_v37 = vld [vmem:[%s2757_s4 + $0x30] sm:$0xff] }
  0x97   : > { %2037 = vmatprep.subr.msk.bf16.mxu0 %vm2475_vm6, %v2035_v39 }
  0x98   : > { %2026 = vmatpush3.bf16.msk.msra.mxu1 %vm2467_vm4, %v2021_v31  ;;  %2040 = vmatpush3.bf16.msk.msra.mxu0 %vm2475_vm6, %v2035_v39  ;;  %v1775_v39 = vld [vmem:[%s2757_s4 + $0x28] sm:$0xff] }
  0x99   : > { %2043 = vmatprep.subr.msk.bf16.mxu0 %vm2475_vm6, %v2041_v40 }
  0x9b   : > { %1879 = vmatmul.mubr.msk.f32.vlgmr.msra.gmra.mrb[0].mxu1 %vm396_vm0, %v1687_v41  ;;  %v1777_v41 = vld [vmem:[%s2757_s4 + $0x38] sm:$0xff] }
  0x9c   : > { %2046 = vmatpush3.bf16.msk.msra.mxu0 %vm2475_vm6, %v2041_v40  ;;  %1881 = vmatprep.mubr.msk.f32.mxu1 %vm396_vm0, %v1688_v42  ;;  %v1487_v40 = vld [vmem:[%s2760_s7] sm:$0xff] }
  0x9f   : > { %1907 = vmatmul.mubr.msk.f32.vlgmr.msra.gmra.mrb[0].mxu0 %vm396_vm0, %v592_v43  ;;  %1882 = vmatmul.mubr.msk.f32.gmra.mrb[2].mxu1 %vm396_vm0, %v1689_v44 }
  0xa0   : > { %1909 = vmatprep.mubr.msk.f32.mxu0 %vm396_vm0, %v593_v45  ;;  %1920 = vmatprep.mubr.msk.f32.mxu1 %vm396_vm0, %v728_v47 }
  0xa3   : > { %1910 = vmatmul.mubr.msk.f32.gmra.mrb[2].mxu0 %vm396_vm0, %v594_v46  ;;  %v703_v51 = vpop.permute.xlu0 %702 }
  0xa4   : > { %v708_v50 = vpop.permute.xlu1 %707 }
  0xa7   : > { %v718_v0 = vpop.permute.xlu0 %717 }
  0xa8   : > { %v713_v7 = vpop.permute.xlu1 %712 }
  0xab   : > { %v845_v17 = vpop.permute.xlu0 %844 }
  0xac   : > { %v840_v19 = vpop.permute.xlu1 %839 }
  0xaf   : > { %v855_v29 = vpop.permute.xlu0 %854 }
 0x16e   : > { %v1880_v48 = vpop.f32.mrb[0].mxu1 }
 0x16f   : > { %v475_v49 = vpop.f32.mrb[1].mxu1 }
 0x172   : > { %v1908_v52 = vpop.f32.mrb[0].mxu0  ;;  %v1883_v53 = vpop.f32.mrb[2].mxu1 }
 0x173   : > { %v2117_v54 = vadd.f32 %v1908_v52, %v1880_v48  ;;  %v673_v55 = vpop.f32.mrb[1].mxu0  ;;  %v485_v56 = vpop.f32.mrb[3].mxu1  ;;  %v1727_v52 = vld [vmem:[%s2754_s1 + $0x88] sm:$0xff] }
 0x174   : > { %v2118_v57 = vadd.f32 %v673_v55, %v475_v49 }
 0x175   : > { %v721_v58 = vadd.f32 %v2117_v54, %v708_v50 }
 0x176   : > { %v720_v59 = vadd.f32 %v2118_v57, %v703_v51  ;;  %v1911_v60 = vpop.f32.mrb[2].mxu0  ;;  %v1729_v57 = vld [vmem:[%s2754_s1 + $0x98] sm:$0xff] }
 0x177   : > { %v725_v61 = vmax.f32 %v721_v58, 0.0  ;;  %v2119_v62 = vadd.f32 %v1911_v60, %v1883_v53  ;;  %v683_v63 = vpop.f32.mrb[3].mxu0  ;;  %v1728_v53 = vld [vmem:[%s2754_s1 + $0x90] sm:$0xff]  ;;  %v1722_v58 = vld [vmem:[%s2754_s1 + $0xa0] sm:$0xff] }
 0x178   : > { %v724_v4 = vmax.f32 %v720_v59, 0.0  ;;  %v2120_v6 = vadd.f32 %v683_v63, %v485_v56  ;;  %v1723_v63 = vld [vmem:[%s2754_s1 + $0xa8] sm:$0xff] }
 0x179   : > { %v723_v8 = vadd.f32 %v2119_v62, %v718_v0  ;;  %v1724_v0 = vld [vmem:[%s2754_s1 + $0xb0] sm:$0xff] }
 0x17a   : > { %v722_v9 = vadd.f32 %v2120_v6, %v713_v7  ;;  %v2047_v10 = vpack.c.bf16 %v725_v61, %v724_v4  ;;  %v1725_v6 = vld [vmem:[%s2754_s1 + $0xb8] sm:$0xff]  ;;  %v1746_v7 = vld [vmem:[%s2754_s1 + $0x60] sm:$0xff] }
 0x17b   : > { %v727_v11 = vmax.f32 %v723_v8, 0.0  ;;  %v1747_v8 = vld [vmem:[%s2754_s1 + $0x68] sm:$0xff] }
 0x17c   : > { %v726_v12 = vmax.f32 %v722_v9, 0.0  ;;  %2048 = vmatprep.subr.bf16.mxu1 %v2047_v10  ;;  %v1748_v9 = vld [vmem:[%s2754_s1 + $0x70] sm:$0xff] }
 0x17d   : > { %2050 = vmatpush3.bf16.msra.mxu1 %v2047_v10  ;;  %v1749_v10 = vld [vmem:[%s2754_s1 + $0x78] sm:$0xff] }
 0x17e   : > { %v2051_v13 = vpack.c.bf16 %v727_v11, %v726_v12  ;;  %v1766_v11 = vld [vmem:[%s2756_s3 + $0x20] sm:$0xff] }
 0x17f   : > { %1976 = vmatprep.mubr.msk.f32.mxu0 %vm396_vm0, %v1766_v11 }
 0x180   : > { %2052 = vmatprep.subr.bf16.mxu1 %v2051_v13 }
 0x181   : > { %2054 = vmatpush3.bf16.msra.mxu1 %v2051_v13 }
 0x184   : > { %1921 = vmatmul.mubr.msk.f32.vlgmr.msra.gmra.mrb[4].mxu1 %vm396_vm0, %v729_v14 }
 0x185   : > { %1923 = vmatprep.mubr.msk.f32.mxu1 %vm396_vm0, %v730_v15 }
 0x188   : > { %1924 = vmatmul.mubr.msk.f32.gmra.mrb[6].mxu1 %vm396_vm0, %v731_v16 }
 0x189   : > { %1934 = vmatprep.mubr.msk.f32.mxu1 %vm396_vm0, %v1726_v28 }
 0x257   : > { %v1922_v18 = vpop.f32.mrb[4].mxu1 }
 0x258   : > { %v830_v20 = vadd.f32 %v1922_v18, %v2407_v2  ;;  %v810_v21 = vpop.f32.mrb[5].mxu1 }
 0x259   : > { %v829_v22 = vadd.f32 %v810_v21, %v2405_v1  ;;  %v850_v1 = vpop.permute.xlu1 %849 }
 0x25a   : > { %v2533_v23 = vadd.f32 %v845_v17, %v830_v20 }
 0x25b   : > { %v2535_v24 = vadd.f32 %v840_v19, %v829_v22  ;;  %v1925_v25 = vpop.f32.mrb[6].mxu1 }
 0x25c   : > { %v832_v26 = vadd.f32 %v1925_v25, %v2413_v5  ;;  %v820_v27 = vpop.f32.mrb[7].mxu1 }
 0x25d   : > { %v831_v30 = vadd.f32 %v820_v27, %v2409_v3  ;;  %v2201_v2 = vpack.i.bf16 %v2533_v23, %v2535_v24  ;;  %v1762_v3 = vld [vmem:[%s2755_s2 + $0x20] sm:$0xff]  ;;  %v2067_v50 = vpack.c.bf16 %v2533_v23, %v2535_v24 }
 0x25e   : > { %v2545_v31 = vadd.f32 %v855_v29, %v832_v26 }
 0x25f   : > { %v2547_v32 = vadd.f32 %v850_v1, %v831_v30  ;;  %2202 = vrot.lane.b32.xlu1 %v2201_v2, %s2286_s16  ;;  %v1376_v30 = vld [vmem:[%s2758_s5] sm:$0xff] }
 0x261   : > { %v2206_v5 = vpack.i.bf16 %v2545_v31, %v2547_v32  ;;  %v2071_v56 = vpack.c.bf16 %v2545_v31, %v2547_v32 }
 0x263   : > { %2212 = vrot.lane.b32.xlu1 %v2201_v2, %s2288_s22  ;;  %2207 = vrot.lane.b32.xlu0 %v2206_v5, %s2286_s16  ;;  %v1377_v2 = vld [vmem:[%s2758_s5 + $0x8] sm:$0xff]  ;;  %s2772_s16 = sshll.u32 %s2393_s21, 5 }
 0x264   : > { %s343_s25 = scalar_lea.vmem %s2761_s8, %s2772_s16 }
 0x267   : > { %1215 = vperm.xlu1 %2200, %v1762_v3   ;;  %2217 = vrot.lane.b32.xlu0 %v2206_v5, %s2288_s22  ;;  %v2095_v3 = vpack.c.bf16 %v1377_v2, %v1376_v30  ;;  %s2710_s22 = scalar_lea.hbm %s2762_s9, %s1784_s29 }
 0x26b   : > { %1225 = vperm.xlu1 %2200, %v1764_v33   ;;  %1220 = vperm.xlu0 %2199, %v1763_v34   ;;  %v1378_v33 = vld [vmem:[%s2758_s5 + $0x10] sm:$0xff]  ;;  %v1379_v34 = vld [vmem:[%s2758_s5 + $0x18] sm:$0xff] }
 0x26f   : > { %1354 = vperm.xlu1 %2200, %v1774_v35   ;;  %1230 = vperm.xlu0 %2199, %v1765_v36   ;;  %v1767_v35 = vld [vmem:[%s2756_s3 + $0x28] sm:$0xff]  ;;  %v1768_v36 = vld [vmem:[%s2756_s3 + $0x30] sm:$0xff] }
 0x273   : > { %1364 = vperm.xlu1 %2200, %v1776_v37   ;;  %1359 = vperm.xlu0 %2199, %v1775_v39   ;;  %v2099_v37 = vpack.c.bf16 %v1379_v34, %v1378_v33  ;;  %v1380_v39 = vld [vmem:[%s2758_s5 + $0x20] sm:$0xff] }
 0x277   : > { %1490 = vperm.xlu1 %2200, %v1487_v40   ;;  %1369 = vperm.xlu0 %2199, %v1777_v41   ;;  %v1381_v40 = vld [vmem:[%s2758_s5 + $0x28] sm:$0xff]  ;;  %v1769_v41 = vld [vmem:[%s2756_s3 + $0x38] sm:$0xff] }
 0x2d1   : > { %v2203_v42 = vpop.permute.xlu1 %2202 }
 0x2d2   : > { %v2205_v43 = vunpack.i.h.bf16 %v2203_v42  ;;  %v2204_v44 = vunpack.i.l.bf16 %v2203_v42  ;;  %v2103_v42 = vpack.c.bf16 %v1381_v40, %v1380_v39 }
 0x2d4   : > { %v2055_v45 = vpack.c.bf16 %v2205_v43, %v2204_v44  ;;  %v1382_v43 = vld [vmem:[%s2758_s5 + $0x30] sm:$0xff]  ;;  %v1383_v44 = vld [vmem:[%s2758_s5 + $0x38] sm:$0xff] }
 0x2d5   : > { %v2208_v46 = vpop.permute.xlu0 %2207  ;;  %v2213_v51 = vpop.permute.xlu1 %2212 }
 0x2d6   : > { %v2210_v47 = vunpack.i.h.bf16 %v2208_v46  ;;  %v2209_v48 = vunpack.i.l.bf16 %v2208_v46  ;;  %2057 = vmatprep.subr.msk.bf16.mxu1 %vm2475_vm6, %v2055_v45  ;;  %v2215_v54 = vunpack.i.h.bf16 %v2213_v51  ;;  %v2214_v55 = vunpack.i.l.bf16 %v2213_v51 }
 0x2d7   : > { %2060 = vmatpush3.bf16.msk.msra.mxu1 %vm2475_vm6, %v2055_v45  ;;  %v2107_v45 = vpack.c.bf16 %v1383_v44, %v1382_v43 }
 0x2d8   : > { %v2061_v49 = vpack.c.bf16 %v2210_v47, %v2209_v48  ;;  %v2075_v60 = vpack.c.bf16 %v2215_v54, %v2214_v55 }
 0x2d9   : > { %v2218_v38 = vpop.permute.xlu0 %2217 }
 0x2da   : > { %2063 = vmatprep.subr.msk.bf16.mxu1 %vm2475_vm6, %v2061_v49  ;;  %v2220_v61 = vunpack.i.h.bf16 %v2218_v38  ;;  %v2219_v62 = vunpack.i.l.bf16 %v2218_v38 }
 0x2db   : > { %2066 = vmatpush3.bf16.msk.msra.mxu1 %vm2475_vm6, %v2061_v49 }
 0x2dc   : > { %2068 = vmatprep.subr.bf16.mxu1 %v2067_v50  ;;  %v2081_v4 = vpack.c.bf16 %v2220_v61, %v2219_v62 }
 0x2de   : > { %1935 = vmatmul.mubr.msk.f32.vlgmr.msra.gmra.mrb[8].mxu1 %vm396_vm0, %v1727_v52 }
 0x2df   : > { %2070 = vmatpush3.bf16.msra.mxu1 %v2067_v50  ;;  %1937 = vmatprep.mubr.msk.f32.mxu1 %vm396_vm0, %v1728_v53 }
 0x2e0   : > { %2072 = vmatprep.subr.bf16.mxu1 %v2071_v56 }
 0x2e2   : > { %1938 = vmatmul.mubr.msk.f32.gmra.mrb[10].mxu1 %vm396_vm0, %v1729_v57 }
 0x2e3   : > { %2074 = vmatpush3.bf16.msra.mxu1 %v2071_v56  ;;  %1948 = vmatprep.mubr.msk.f32.mxu1 %vm396_vm0, %v1722_v58 }
 0x2e4   : > { %2077 = vmatprep.subr.msk.bf16.mxu1 %vm2606_vm9, %v2075_v60 }
 0x2e6   : > { %1949 = vmatmul.mubr.msk.f32.vlgmr.msra.gmra.mrb[8].mxu1 %vm396_vm0, %v1723_v63  ;;  %v1216_v13 = vpop.permute.xlu1 %1215 }
 0x2e7   : > { %2080 = vmatpush3.bf16.msk.msra.mxu1 %vm2606_vm9, %v2075_v60  ;;  %1951 = vmatprep.mubr.msk.f32.mxu1 %vm396_vm0, %v1724_v0  ;;  %v2289_v60 = vmov 0.0|0.0  }
 0x2e8   : > { %2083 = vmatprep.subr.msk.bf16.mxu1 %vm2606_vm9, %v2081_v4 }
 0x2ea   : > { %1952 = vmatmul.mubr.msk.f32.gmra.mrb[10].mxu1 %vm396_vm0, %v1725_v6  ;;  %v1221_v12 = vpop.permute.xlu0 %1220  ;;  %v1226_v22 = vpop.permute.xlu1 %1225 }
 0x2eb   : > { %2086 = vmatpush3.bf16.msk.msra.mxu1 %vm2606_vm9, %v2081_v4  ;;  %1962 = vmatprep.mubr.msk.f32.mxu1 %vm396_vm0, %v1746_v7  ;;  %v1486_v4 = vld [vmem:[%s2759_s6] sm:$0xff] }
 0x2ec   : > { %2111 = vmatprep.subr.bf16.mxu1 %v2289_v60 }
 0x2ee   : > { %1963 = vmatmul.mubr.msk.f32.vlgmr.msra.gmra.mrb[8].mxu1 %vm396_vm0, %v1747_v8  ;;  %v1231_v19 = vpop.permute.xlu0 %1230  ;;  %v1355_v47 = vpop.permute.xlu1 %1354 }
 0x2ef   : > { %1965 = vmatprep.mubr.msk.f32.mxu1 %vm396_vm0, %v1748_v9 }
 0x2f2   : > { %1966 = vmatmul.mubr.msk.f32.gmra.mrb[10].mxu1 %vm396_vm0, %v1749_v10  ;;  %v1360_v50 = vpop.permute.xlu0 %1359  ;;  %v1365_v57 = vpop.permute.xlu1 %1364 }
 0x2f6   : > { %v1370_v58 = vpop.permute.xlu0 %1369  ;;  %v1491_v6 = vpop.permute.xlu1 %1490 }
 0x3c1   : > { %v1964_v14 = vpop.f32.mrb[8].mxu1 }
 0x3c2   : > { %v1234_v15 = vadd.f32 %v1964_v14, %v1221_v12  ;;  %v1185_v16 = vpop.f32.mrb[9].mxu1 }
 0x3c3   : > { %v1233_v17 = vadd.f32 %v1216_v13, %v1185_v16 }
 0x3c4   : > { %v1238_v18 = vmax.f32 %v1234_v15, 0.0 }
 0x3c5   : > { %v1237_v20 = vmax.f32 %v1233_v17, 0.0  ;;  %v1967_v21 = vpop.f32.mrb[10].mxu1 }
 0x3c6   : > { %v1236_v25 = vadd.f32 %v1967_v21, %v1231_v19  ;;  %v1195_v26 = vpop.f32.mrb[11].mxu1 }
 0x3c7   : > { %v2087_v27 = vpack.c.bf16 %v1238_v18, %v1237_v20  ;;  %v1235_v28 = vadd.f32 %v1226_v22, %v1195_v26 }
 0x3c8   : > { %v1240_v29 = vmax.f32 %v1236_v25, 0.0 }
 0x3c9   : > { %v1239_v1 = vmax.f32 %v1235_v28, 0.0  ;;  %2088 = vmatprep.subr.bf16.mxu0 %v2087_v27 }
 0x3ca   : > { %2090 = vmatpush3.bf16.msra.mxu0 %v2087_v27 }
 0x3cb   : > { %v2091_v5 = vpack.c.bf16 %v1240_v29, %v1239_v1 }
 0x3cd   : > { %2092 = vmatprep.subr.bf16.mxu0 %v2091_v5 }
 0x3ce   : > { %2094 = vmatpush3.bf16.msra.mxu0 %v2091_v5 }
 0x3cf   : > { %2096 = vmatprep.subr.bf16.mxu0 %v2095_v3 }
 0x3d1   : > { %1977 = vmatmul.mubr.msk.f32.vlgmr.msra.gmra.mrb[4].mxu0 %vm396_vm0, %v1767_v35 }
 0x3d2   : > { %1979 = vmatprep.mubr.msk.f32.mxu0 %vm396_vm0, %v1768_v36  ;;  %2098 = vmatpush3.bf16.msra.mxu0 %v2095_v3 }
 0x3d3   : > { %2100 = vmatprep.subr.bf16.mxu0 %v2099_v37 }
 0x3d5   : > { %1980 = vmatmul.mubr.msk.f32.gmra.mrb[6].mxu0 %vm396_vm0, %v1769_v41 }
 0x3d6   : > { %2102 = vmatpush3.bf16.msra.mxu0 %v2099_v37 }
 0x3d7   : > { %2104 = vmatprep.subr.bf16.mxu0 %v2103_v42 }
 0x3da   : > { %2106 = vmatpush3.bf16.msra.mxu0 %v2103_v42 }
 0x3db   : > { %2108 = vmatprep.subr.bf16.mxu0 %v2107_v45 }
 0x3de   : > { %2110 = vmatpush3.bf16.msra.mxu0 %v2107_v45 }
 0x4a4   : > { %v1978_v46 = vpop.f32.mrb[4].mxu0 }
 0x4a5   : > { %v1344_v48 = vadd.f32 %v1978_v46, %v2533_v23  ;;  %v1324_v49 = vpop.f32.mrb[5].mxu0 }
 0x4a6   : > { %v1343_v51 = vadd.f32 %v1324_v49, %v2535_v24  ;;  %v2291_v24 = vmov 0.0  }
 0x4a7   : > { %v1373_v54 = vadd.f32 %v1360_v50, %v1344_v48  ;;  %2012 = vmatprep.mubr.msk.f32.mxu1 %vm2290_vm11, %v2291_v24 }
 0x4a8   : > { %v1372_v52 = vadd.f32 %v1355_v47, %v1343_v51  ;;  %v1981_v53 = vpop.f32.mrb[6].mxu0 }
 0x4a9   : > { %v1346_v55 = vadd.f32 %v1981_v53, %v2545_v31  ;;  %v1334_v56 = vpop.f32.mrb[7].mxu0 }
 0x4aa   : > { %v1345_v38 = vadd.f32 %v1334_v56, %v2547_v32  ;;  %1998 = vmatprep.mubr.msk.f32.mxu0 %vm1384_vm10, %v1372_v52 }
 0x4ab   : > { %1999 = vmatmul.mubr.msk.f32.vlgmr.msra.gmra.mrb[8].mxu0 %vm1384_vm10, %v1373_v54  ;;  %v1375_v23 = vadd.f32 %v1370_v58, %v1346_v55 }
 0x4ac   : > { %v1374_v59 = vadd.f32 %v1365_v57, %v1345_v38 }
 0x4ae   : > { %2001 = vmatprep.mubr.msk.f32.mxu0 %vm1384_vm10, %v1374_v59 }
 0x4af   : > { %2002 = vmatmul.mubr.msk.f32.gmra.mrb[10].mxu0 %vm1384_vm10, %v1375_v23 }
 0x57e   : > { %v2000_v31 = vpop.f32.mrb[8].mxu0 }
 0x57f   : > { %1483 = vst.msk [vmem:[%s343_s25 + $0x8] sm:$0xff] %vm396_vm0, %v2000_v31  ;;  %v1463_v32 = vpop.f32.mrb[9].mxu0 }
 0x580   : > { %1482 = vst.msk [vmem:[%s343_s25] sm:$0xff] %vm396_vm0, %v1463_v32  ;;  %v2112_v61 = vpack.c.bf16 %v2000_v31, %v1463_v32 }
 0x582   : > { %v2003_v62 = vpop.f32.mrb[10].mxu0  ;;  %2113 = vmatpush3.bf16.msra.mxu1 %v2112_v61 }
 0x583   : > { %1485 = vst.msk [vmem:[%s343_s25 + $0x18] sm:$0xff] %vm396_vm0, %v2003_v62  ;;  %v1473_v63 = vpop.f32.mrb[11].mxu0  ;;  %2114 = vmatprep.subr.bf16.mxu1 %v2289_v60 }
 0x584   : > { %1484 = vst.msk [vmem:[%s343_s25 + $0x10] sm:$0xff] %vm396_vm0, %v1473_v63  ;;  %v2115_v0 = vpack.c.bf16 %v2003_v62, %v1473_v63  ;;  %s2292_s25 = smov [#allocation2]  }
 0x585   : > { %s2225_s21 = sshll.u32 %s2292_s25, 4  ;;  %s2226_s21 = int_to_ptr.vmem [resolvable:$false] %s2225_s21 }
 0x586   : > { %2116 = vmatpush3.bf16.msra.mxu1 %v2115_v0  ;;  %s2227_s26 = scalar_lea.vmem %s2226_s21, 256  ;;  %p2228_p0 = scmp.lt.s32.totalorder %s2712_s24, %s2226_s21 }
 0x587   : > { %p2229_p1 = scmp.lt.s32.totalorder %s2227_s26, %s2221_s13 }
 0x589   : > { %2013 = vmatmul.mubr.msk.f32.vlgmr.msra.gmra.mrb[12].mxu1 %vm396_vm0, %v1486_v4  ;;  %p2230_p2 = por %p2229_p1, %p2228_p0 }
 0x58b   : > { %p2231_p3 = pnand %p2230_p2, %p2224_p13 }
 0x65c   : > { %v1562_v7 = vpop.f32.mrb[12].mxu1 }
 0x65d   : > { %v1563_v8 = vadd.f32 %v1562_v7, %v1491_v6  ;;  %v2014_v9 = vpop.f32.mrb[13].mxu1 }
 0x65f   : > { %1566 = vst.msk [vmem:[%s333_s14] sm:$0xff] %vm396_vm0, %v1563_v8 }
 0x660   : > { %2234 = shalt.err (!%p2231_p3)
}
 0x661   : > { %s2235_s27 = scalar_lea.hbm %s2710_s22, 128  ;;  %s2239_s14 = scalar_lea.hbm %s2762_s9, 256 }
 0x662   : > { %p2236_p4 = scmp.ne.s32.totalorder %s2710_s22, %s2235_s27  ;;  %p2240_p9 = scmp.lt.u32.totalorder %s2710_s22, %s2762_s9 }
 0x663   : > { %p2241_p10 = scmp.lt.u32.totalorder %s2239_s14, %s2235_s27  ;;  %p2243_p12 = scmp.lt.u32.totalorder %s2235_s27, %s2710_s22 }
 0x664   : > { %p2237_p7 = pnand %p2236_p4, %p2381_p5 }
 0x665   : > { %p2242_p11 = por %p2241_p10, %p2240_p9 }
 0x666   : > { %p2238_p8 = pneg %p2237_p7 }
 0x667   : > { %p2244_p13 = por %p2243_p12, %p2242_p11 }
 0x669   : > { %p2245_p0 = pnand %p2244_p13, %p2238_p8 }
 0x66b   : > { %2248 = shalt.err (!%p2245_p0)
}
 0x66c   : > { %2133 = dma.vmem_to_hbm [thread:$0]  (%p2381_p5), %s2712_s24, 128, %s2710_s22, %s1573_s23  }
 0x66d PF: > { %p2139_p1 = scmp.ge.s32.totalorder %s2283_s12, 2  ;;  %s1609_s13 = sand.u32 1, %s2271_s30  }
 0x66e   : > { %s1610_s25 = scalar_lea.sflag [#allocation3], %s1609_s13 }
 0x66f   : > { %p2136_p2 = pnand %p2139_p1, %p2385_p6 }
 0x671   : > { %2266 = dma.done.wait (!%p2136_p2), %s1610_s25, 128  }
 0x672   : > { %2268 = vsyncadd (!%p2136_p2), %s1610_s25, 4294967168  ;;  %p20_p3 = scmp.ge.s32.totalorder %s2368_s15, 4   ;;  %s2773_s30 = smov %s2275_s10 }
 0x673   : > { %s2774_s10 = smov %s2279_s11  ;;  %s2775_s11 = smov %s2379_s18 }
 0x674   : > { %s2776_s12 = smov %s2368_s15  ;;  %22 = sbr.rel (!%p20_p3) target bundleno = 3 (0x3), region = 107 }
 0x67b   :  { %1615 = vsyncpa [#allocation3], 1 }
 0x67c   :  { %1617 = vsyncpa [#allocation3 + $0x1], 1 }

// kernel: mstr_forward.9
= control target key start
LH: loop header
LB: loop body
LE: loop exit
PB: predicated region body
PF: predicated region fallthrough
CT: control target
= control target key end

     0   :  { %16 = vsyncpa [#allocation3], 0  ;;  %s2995_s0 = inlined_call_operand.vmem [shape: f32[2,64,128], index: 0, kind: input, shape index: {}]   ;;  %s2996_s1 = inlined_call_operand.hbm [shape: f32[32,64], index: 1, kind: input, shape index: {}]   ;;  %s2997_s2 = inlined_call_operand.vmem [shape: f32[32,1], index: 2, kind: input, shape index: {}]   ;;  %s2998_s3 = inlined_call_operand.vmem [shape: f32[6,32,32], index: 3, kind: input, shape index: {}]   ;;  %s2999_s4 = inlined_call_operand.vmem [shape: f32[2,32,1], index: 4, kind: input, shape index: {}]   ;;  %s3000_s5 = inlined_call_operand.vmem [shape: f32[2,32,32], index: 5, kind: input, shape index: {}]   ;;  %s3001_s6 = inlined_call_operand.vmem [shape: f32[2,32,1], index: 6, kind: input, shape index: {}]   ;;  %s3002_s7 = inlined_call_operand.hbm [shape: f32[8,32], index: 7, kind: input, shape index: {}]   ;;  %s3003_s8 = inlined_call_operand.vmem [shape: f32[8,1], index: 8, kind: input, shape index: {}]   ;;  %s3004_s9 = inlined_call_operand.vmem [shape: f32[2,32,128], index: 9, kind: output, shape index: {0}]   ;;  %s3005_s10 = inlined_call_operand.hbm [shape: f32[2,8,128], index: 10, kind: output, shape index: {1}]  }
   0x1   :  { %17 = vsyncpa [#allocation6], 0 }
   0x2   :  { %18 = vsyncpa [#allocation4], 0 }
   0x3   :  { %20 = vsyncpa [#allocation4 + $0x1], 0  ;;  %s2544_s13 = smov 0   ;;  %s2546_s14 = smov 0  }
   0x4   :  { %s2548_s15 = smov 0   ;;  %s2550_s16 = smov 0  }
   0x5 LB: > { %3013 = sst [smem:[#allocation11_spill]] %s2471_s15  ;;  %s2565_s17 = sadd.s32 4294967295, %s2475_s16   ;;  %s2475_s16 = sphi %s2550_s16, %s3033_s16   ;;  %s2471_s15 = sphi %s2548_s15, %s3035_s15   ;;  %s2467_s14 = sphi %s2546_s14, %s3037_s14   ;;  %s2463_s13 = sphi %s2544_s13, %s3036_s13  }
   0x6   : > { %s1774_s18 = sadd.s32 4294967294, %s2475_s16   ;;  %s2569_s19 = sadd.s32 1, %s2475_s16  }
   0x7   : > { %3014 = sst [smem:[#allocation12_spill]] %s2569_s19  ;;  %s253_s20 = sadd.s32 1, %s2471_s15 }
   0x8   : > { %s250_s21 = ssub.s32 %s2475_s16, %s2569_s19  ;;  %p263_p0 = scmp.ne.s32.totalorder %s2471_s15, %s2467_s14 }
   0x9   : > { %p251_p1 = scmp.eq.s32.totalorder %s250_s21, 0  ;;  %p264_p2 = scmp.eq.s32.totalorder %s2565_s17, 1 }
   0xa   : > { %p269_p3 = scmp.ne.s32.totalorder %s2467_s14, %s2463_s13  ;;  %p270_p4 = scmp.eq.s32.totalorder %s1774_s18, 1 }
   0xb   : > { %s2580_s22 = scalar_select %p251_p1, %s2471_s15, %s253_s20  }
   0xc   : > { %p2582_p5 = por %p264_p2, %p263_p0  ;;  %p2586_p6 = por %p270_p4, %p269_p3 }
   0xd   : > { %3015 = sst [smem:[#allocation13_spill]] %s2580_s22  ;;  %p1775_p7 = scmp.ge.s32.totalorder %s2475_s16, 1 }
   0xe   : > { %s3016_s23 = scalar_select %p2582_p5, 1, 0 }
   0xf   : > { %s3017_s24 = scalar_select %p2586_p6, 1, 0 }
  0x10   : > { %p277_p8 = scmp.lt.s32.totalorder %s2475_s16, 3  ;;  %p3006_p9 = scmp.eq.s32.totalorder %s2565_s17, 0 }
  0x11   : > { %3018 = sst [smem:[#allocation14_spill]] %s3017_s24  ;;  %s2477_s26 = smov [#allocation2]  }
  0x12   : > { %p2593_p10 = pnand %p1775_p7, %p277_p8  ;;  %s289_s27 = sshll.u32 %s2477_s26, 4  ;;  %s290_s27 = int_to_ptr.vmem [resolvable:$true] %s289_s27 }
  0x13   : > { %s2478_s29 = smov [#allocation5]   ;;  %s2349_s18 = scalar_lea.hbm %s2996_s1, 512 }
  0x14   : > { %s3019_s25 = scalar_select %p2593_p10, 1, 0 }
  0x15   : > { %p2248_p11 = pneg %p2593_p10  ;;  %s318_s30 = sshll.u32 %s2478_s29, 4  ;;  %s2605_s30 = int_to_ptr.vmem [resolvable:$true] %s318_s30 }
  0x16   : > { %p2350_p13 = scmp.ne.s32.totalorder %s2996_s1, %s2349_s18  ;;  %p2356_p3 = scmp.lt.u32.totalorder %s2349_s18, %s2996_s1 }
  0x17   : > { %p2601_p12 = pnand %p3006_p9, %p2248_p11 }
  0x19   : > { %p2351_p0 = pneg %p2601_p12 }
  0x1b   : > { %p2352_p1 = pnand %p2351_p0, %p2350_p13 }
  0x1d   : > { %p2353_p2 = pneg %p2352_p1 }
  0x1f   : > { %p2358_p4 = pnand %p2356_p3, %p2353_p2 }
  0x21   : > { %2361 = shalt.err (!%p2358_p4)
}
  0x22   : > { %s2362_s29 = scalar_lea.vmem %s290_s27, 512  ;;  %p2370_p9 = scmp.lt.s32.totalorder %s290_s27, %s290_s27 }
  0x23   : > { %p2363_p7 = scmp.ne.s32.totalorder %s290_s27, %s2362_s29  ;;  %p2371_p6 = scmp.lt.s32.totalorder %s2362_s29, %s2362_s29 }
  0x25   : > { %p2365_p8 = pnand %p2363_p7, %p2351_p0  ;;  %p2372_p5 = por %p2371_p6, %p2370_p9 }
  0x27   : > { %p2366_p11 = pneg %p2365_p8 }
  0x29   : > { %p2373_p10 = pnand %p2372_p5, %p2366_p11 }
  0x2b   : > { %2376 = shalt.err (!%p2373_p10)
}
  0x2c   : > { %s2479_s11 = smov 128   ;;  %s2480_s12 = smov 8  }
  0x2d   : > { %2251 = dma.hbm_to_vmem [thread:$0]  (!%p2601_p12), %s2996_s1, 512, %s290_s27, [#allocation3], %s2479_s11, %s2479_s11, %s2480_s12  }
  0x2e   : > { %s2377_s26 = scalar_lea.hbm %s3002_s7, 128 }
  0x2f   : > { %p2378_p13 = scmp.ne.s32.totalorder %s3002_s7, %s2377_s26  ;;  %p2384_p9 = scmp.lt.u32.totalorder %s2377_s26, %s3002_s7 }
  0x31   : > { %p2380_p5 = pnand %p2378_p13, %p2351_p0 }
  0x33   : > { %p2381_p6 = pneg %p2380_p5 }
  0x35   : > { %p2386_p10 = pnand %p2384_p9, %p2381_p6 }
  0x37   : > { %2389 = shalt.err (!%p2386_p10)
}
  0x38   : > { %s2390_s27 = scalar_lea.vmem %s2605_s30, 128  ;;  %p2398_p4 = scmp.lt.s32.totalorder %s2605_s30, %s2605_s30 }
  0x39   : > { %p2391_p1 = scmp.ne.s32.totalorder %s2605_s30, %s2390_s27  ;;  %p2399_p7 = scmp.lt.s32.totalorder %s2390_s27, %s2390_s27 }
  0x3b   : > { %p2393_p2 = pnand %p2391_p1, %p2351_p0  ;;  %p2400_p8 = por %p2399_p7, %p2398_p4 }
  0x3d   : > { %p2394_p3 = pneg %p2393_p2 }
  0x3f   : > { %p2401_p11 = pnand %p2400_p8, %p2394_p3 }
  0x41   : > { %2404 = shalt.err (!%p2401_p11)
}
  0x42   : > { %2254 = dma.hbm_to_vmem [thread:$0]  (!%p2601_p12), %s3002_s7, 128, %s2605_s30, [#allocation6]  }
  0x43   : > { %p3021_p13 = scmp.ne.s32.totalorder %s3019_s25, 0 }
  0x44   : > { %p3022_p5 = scmp.eq.s32.totalorder (!%p3021_p13), %s2565_s17, 0 }
  0x45   : > { %342 = sbr.rel (%p3021_p13) target bundleno = 1736 (0x6c8), region = 56 }
  0x4c   : > { %2450 = dma.done.wait (%p3022_p5), [#allocation3], 512   ;;  %p3023_p0 = pmov %p3022_p5 }
  0x4e   : > { %2452 = vsyncadd (%p3023_p0), [#allocation3], 4294966784  ;;  %p3024_p6 = pmov %p3023_p0 }
  0x4f   : > { %p3025_p9 = pmov %p3023_p0 }
  0x50   : > { %2454 = dma.done.wait (%p3024_p6), [#allocation6], 128  }
  0x51   : > { %2456 = vsyncadd (%p3025_p9), [#allocation6], 4294967168  ;;  %p389_p10 = scmp.lt.s32.totalorder %s2565_s17, 1  ;;  %v2481_v0 = vmov 0   ;;  %vm435_vm0 = vcmask 523264   ;;  %v407_v9 = vld [vmem:[#allocation2] sm:$0xff] }
  0x52   : > { %2307 = vset.pattern.permute.xlu0 %v2481_v0  ;;  %2308 = vset.pattern.permute.xlu1 %v2481_v0  ;;  %v411_v10 = vld [vmem:[%s2997_s2] sm:$0xff]  ;;  %v413_v11 = vld [vmem:[%s2997_s2 + $0x10] sm:$0xff]  ;;  %v412_v15 = vld [vmem:[%s2997_s2 + $0x8] sm:$0xff]  ;;  %vm581_vm1 = vcmask 261120   ;;  %s2483_s28 = smov 2   ;;  %vm549_vm2 = vcmask 7168  }
  0x53   : > { %s2666_s24 = scalar_select %p389_p10, %s2565_s17, 1  ;;  %1991 = vmatprep.mubr.msk.f32.mxu0 %vm435_vm0, %v407_v9  ;;  %417 = vperm.xlu0 %2307, %v411_v10   ;;  %v414_v16 = vld [vmem:[%s2997_s2 + $0x18] sm:$0xff]  ;;  %v408_v18 = vld [vmem:[#allocation2 + $0x8] sm:$0xff]  ;;  %v409_v19 = vld [vmem:[#allocation2 + $0x10] sm:$0xff]  ;;  %vm566_vm5 = vcmask 15360   ;;  %vm1078_vm8 = vcmask 31744  }
  0x54   : > { %427 = vperm.xlu1 %2308, %v413_v11   ;;  %v410_v20 = vld [vmem:[#allocation2 + $0x18] sm:$0xff]  ;;  %v1795_v28 = vld [vmem:[%s2998_s3 + $0x20] sm:$0xff]  ;;  %v882_v37 = vld [vmem:[%s2999_s4 + $0x8] sm:$0xff]  ;;  %s2484_s27 = smov 4   ;;  %vm2486_vm11 = vmmov 0   ;;  %s1889_s26 = sshll.u32 %s2565_s17, 7 }
  0x55   : > { %s1892_s25 = sshll.u32 %s2666_s24, 6  ;;  %2005 = vmatprep.mubr.msk.f32.mxu1 %vm581_vm1, %v1795_v28  ;;  %v881_v36 = vld [vmem:[%s2999_s4] sm:$0xff]  ;;  %v883_v38 = vld [vmem:[%s2999_s4 + $0x10] sm:$0xff]  ;;  %v884_v39 = vld [vmem:[%s2999_s4 + $0x18] sm:$0xff]  ;;  %s1893_s22 = sshll.u32 %s2666_s24, 5 }
  0x56   : > { %s393_s11 = scalar_lea.vmem %s2995_s0, %s1892_s25  ;;  %s2482_s25 = smov 1   ;;  %v1018_v40 = vld [vmem:[%s3001_s6] sm:$0xff]  ;;  %v1019_v41 = vld [vmem:[%s3001_s6 + $0x8] sm:$0xff]  ;;  %v1020_v42 = vld [vmem:[%s3001_s6 + $0x10] sm:$0xff] }
  0x57   : > { %v399_v1 = vld [vmem:[%s393_s11] sm:$0xff]  ;;  %v400_v2 = vld [vmem:[%s393_s11 + $0x8] sm:$0xff]  ;;  %v401_v3 = vld [vmem:[%s393_s11 + $0x10] sm:$0xff]  ;;  %422 = vperm.xlu0 %2307, %v412_v15   ;;  %s398_s20 = scalar_lea.vmem %s3004_s9, %s1893_s22  ;;  %s386_s24 = sand.u32 1, %s2467_s14  }
  0x58   : > { %v2120_v4 = vpack.c.bf16 %v400_v2, %v399_v1  ;;  %v402_v5 = vld [vmem:[%s393_s11 + $0x18] sm:$0xff]  ;;  %v403_v7 = vld [vmem:[%s393_s11 + $0x20] sm:$0xff]  ;;  %v404_v8 = vld [vmem:[%s393_s11 + $0x28] sm:$0xff]  ;;  %432 = vperm.xlu1 %2308, %v414_v16   ;;  %s1782_s21 = sshll.u32 %s386_s24, 3  ;;  %s1652_s30 = scalar_lea.sflag [#allocation4], %s386_s24 }
  0x59   : > { %v2124_v6 = vpack.c.bf16 %v402_v5, %v401_v3  ;;  %v2128_v12 = vpack.c.bf16 %v404_v8, %v403_v7  ;;  %v405_v13 = vld [vmem:[%s393_s11 + $0x30] sm:$0xff]  ;;  %v406_v14 = vld [vmem:[%s393_s11 + $0x38] sm:$0xff]  ;;  %vm1799_vm3 = vmneg %vm549_vm2  ;;  %s388_s29 = scalar_lea.vmem [#allocation7], %s1782_s21  ;;  %p3030_p1 = scmp.ne.s32.totalorder %s3016_s23, 0 }
  0x5a   : > { %2121 = vmatprep.subr.bf16.mxu0 %v2120_v4  ;;  %v2132_v17 = vpack.c.bf16 %v406_v14, %v405_v13  ;;  %v1021_v43 = vld [vmem:[%s3001_s6 + $0x18] sm:$0xff]  ;;  %vm2137_vm4 = vmpackc.low %vm1799_vm3, %vm1799_vm3  ;;  %v1796_v54 = vld [vmem:[%s2998_s3 + $0x28] sm:$0xff]  ;;  %s2488_s17 = smov [#allocation7]  }
  0x5b   : > { %2123 = vmatpush3.bf16.msra.mxu0 %v2120_v4  ;;  %v1797_v55 = vld [vmem:[%s2998_s3 + $0x30] sm:$0xff]  ;;  %vm1815_vm6 = vmneg %vm566_vm5  ;;  %v1798_v60 = vld [vmem:[%s2998_s3 + $0x38] sm:$0xff]  ;;  %s2409_s12 = sshll.u32 %s2488_s17, 4  ;;  %s2410_s12 = int_to_ptr.vmem [resolvable:$false] %s2409_s12 }
  0x5c   : > { %2125 = vmatprep.subr.bf16.mxu0 %v2124_v6  ;;  %v1791_v61 = vld [vmem:[%s2998_s3 + $0x40] sm:$0xff]  ;;  %vm2748_vm7 = vmpackc.low %vm1815_vm6, %vm1815_vm6  ;;  %v1792_v2 = vld [vmem:[%s2998_s3 + $0x48] sm:$0xff]  ;;  %s2411_s22 = scalar_lea.vmem %s2410_s12, 256 }
  0x5d   : > { %v1793_v3 = vld [vmem:[%s2998_s3 + $0x50] sm:$0xff]  ;;  %v1794_v5 = vld [vmem:[%s2998_s3 + $0x58] sm:$0xff]  ;;  %v777_v7 = vld [vmem:[%s2998_s3 + $0x8] sm:$0xff] }
  0x5e   : > { %v778_v8 = vld [vmem:[%s2998_s3 + $0x10] sm:$0xff]  ;;  %v779_v9 = vld [vmem:[%s2998_s3 + $0x18] sm:$0xff]  ;;  %v913_v10 = vld [vmem:[%s3000_s5] sm:$0xff] }
  0x5f   : > { %2127 = vmatpush3.bf16.msra.mxu0 %v2124_v6  ;;  %v776_v6 = vld [vmem:[%s2998_s3] sm:$0xff]  ;;  %vm1859_vm9 = vmneg %vm1078_vm8 }
  0x60   : > { %2129 = vmatprep.subr.bf16.mxu0 %v2128_v12  ;;  %vm2881_vm10 = vmpackc.low %vm1859_vm9, %vm1859_vm9 }
  0x63   : > { %2131 = vmatpush3.bf16.msra.mxu0 %v2128_v12 }
  0x64   : > { %2133 = vmatprep.subr.bf16.mxu0 %v2132_v17 }
  0x67   : > { %2135 = vmatpush3.bf16.msra.mxu0 %v2132_v17 }
  0x6a   : > { %1992 = vmatmul.mubr.msk.f32.vlgmr.msra.gmra.mrb[0].mxu0 %vm435_vm0, %v408_v18 }
  0x6b   : > { %1994 = vmatprep.mubr.msk.f32.mxu0 %vm435_vm0, %v409_v19 }
  0x6e   : > { %1995 = vmatmul.mubr.msk.f32.gmra.mrb[2].mxu0 %vm435_vm0, %v410_v20 }
  0xd2   : > { %v418_v21 = vpop.permute.xlu0 %417 }
  0xd3   : > { %v428_v22 = vpop.permute.xlu1 %427 }
  0xd6   : > { %v423_v23 = vpop.permute.xlu0 %422 }
  0xd7   : > { %v433_v29 = vpop.permute.xlu1 %432 }
 0x13d   : > { %v1993_v24 = vpop.f32.mrb[0].mxu0 }
 0x13e   : > { %v2688_v25 = vadd.f32 %v1993_v24, %v423_v23  ;;  %v514_v26 = vpop.f32.mrb[1].mxu0 }
 0x13f   : > { %v2690_v27 = vadd.f32 %v514_v26, %v418_v21 }
 0x141   : > { %v1996_v30 = vpop.f32.mrb[2].mxu0  ;;  %v2309_v31 = vpack.i.bf16 %v2688_v25, %v2690_v27  ;;  %v2148_v52 = vpack.c.bf16 %v2688_v25, %v2690_v27 }
 0x142   : > { %v2698_v32 = vadd.f32 %v1996_v30, %v433_v29  ;;  %v524_v33 = vpop.f32.mrb[3].mxu0 }
 0x143   : > { %v2700_v34 = vadd.f32 %v524_v33, %v428_v22  ;;  %2310 = vrot.lane.b32.xlu0 %v2309_v31, %s2482_s25  ;;  %v915_v33 = vld [vmem:[%s3000_s5 + $0x10] sm:$0xff] }
 0x145   : > { %v2314_v35 = vpack.i.bf16 %v2698_v32, %v2700_v34  ;;  %v2152_v58 = vpack.c.bf16 %v2698_v32, %v2700_v34 }
 0x147   : > { %2315 = vrot.lane.b32.xlu1 %v2314_v35, %s2482_s25  ;;  %2320 = vrot.lane.b32.xlu0 %v2309_v31, %s2483_s28  ;;  %v914_v31 = vld [vmem:[%s3000_s5 + $0x8] sm:$0xff]  ;;  %s2953_s25 = scalar_lea.hbm %s3005_s10, %s1889_s26 }
 0x14b   : > { %2325 = vrot.lane.b32.xlu1 %v2314_v35, %s2483_s28  ;;  %887 = vperm.xlu0 %2307, %v881_v36   ;;  %v916_v35 = vld [vmem:[%s3000_s5 + $0x18] sm:$0xff] }
 0x14f   : > { %892 = vperm.xlu1 %2308, %v882_v37   ;;  %897 = vperm.xlu0 %2307, %v883_v38  }
 0x153   : > { %902 = vperm.xlu1 %2308, %v884_v39   ;;  %1024 = vperm.xlu0 %2307, %v1018_v40  }
 0x157   : > { %1029 = vperm.xlu1 %2308, %v1019_v41   ;;  %1034 = vperm.xlu0 %2307, %v1020_v42  }
 0x15b   : > { %1039 = vperm.xlu1 %2308, %v1021_v43  }
 0x1b5   : > { %v2311_v44 = vpop.permute.xlu0 %2310 }
 0x1b6   : > { %v2313_v45 = vunpack.i.h.bf16 %v2311_v44  ;;  %v2312_v46 = vunpack.i.l.bf16 %v2311_v44 }
 0x1b8   : > { %v2136_v47 = vpack.c.bf16 %v2313_v45, %v2312_v46 }
 0x1b9   : > { %v2316_v48 = vpop.permute.xlu1 %2315  ;;  %v2321_v53 = vpop.permute.xlu0 %2320 }
 0x1ba   : > { %v2318_v49 = vunpack.i.h.bf16 %v2316_v48  ;;  %v2317_v50 = vunpack.i.l.bf16 %v2316_v48  ;;  %2138 = vmatprep.subr.msk.bf16.mxu1 %vm2137_vm4, %v2136_v47  ;;  %v2323_v56 = vunpack.i.h.bf16 %v2321_v53  ;;  %v2322_v57 = vunpack.i.l.bf16 %v2321_v53  ;;  %v1872_v53 = vld [vmem:[%s2999_s4 + $0x28] sm:$0xff] }
 0x1bb   : > { %2141 = vmatpush3.bf16.msk.msra.mxu1 %vm2137_vm4, %v2136_v47  ;;  %v1835_v47 = vld [vmem:[%s2998_s3 + $0x80] sm:$0xff] }
 0x1bc   : > { %v2142_v51 = vpack.c.bf16 %v2318_v49, %v2317_v50  ;;  %v2156_v63 = vpack.c.bf16 %v2323_v56, %v2322_v57  ;;  %2061 = vmatprep.mubr.msk.f32.mxu0 %vm581_vm1, %v1835_v47  ;;  %v1885_v56 = vld [vmem:[%s3001_s6 + $0x30] sm:$0xff]  ;;  %v1884_v57 = vld [vmem:[%s3001_s6 + $0x28] sm:$0xff] }
 0x1bd   : > { %v2326_v59 = vpop.permute.xlu1 %2325 }
 0x1be   : > { %2144 = vmatprep.subr.msk.bf16.mxu1 %vm2137_vm4, %v2142_v51  ;;  %v2328_v0 = vunpack.i.h.bf16 %v2326_v59  ;;  %v2327_v1 = vunpack.i.l.bf16 %v2326_v59  ;;  %v1886_v59 = vld [vmem:[%s3001_s6 + $0x38] sm:$0xff] }
 0x1bf   : > { %2147 = vmatpush3.bf16.msk.msra.mxu1 %vm2137_vm4, %v2142_v51 }
 0x1c0   : > { %2149 = vmatprep.subr.bf16.mxu1 %v2148_v52  ;;  %v2162_v4 = vpack.c.bf16 %v2328_v0, %v2327_v1 }
 0x1c2   : > { %2006 = vmatmul.mubr.msk.f32.vlgmr.msra.gmra.mrb[0].mxu1 %vm581_vm1, %v1796_v54  ;;  %v1883_v54 = vld [vmem:[%s3001_s6 + $0x20] sm:$0xff] }
 0x1c3   : > { %2151 = vmatpush3.bf16.msra.mxu1 %v2148_v52  ;;  %2008 = vmatprep.mubr.msk.f32.mxu1 %vm581_vm1, %v1797_v55  ;;  %v1873_v52 = vld [vmem:[%s2999_s4 + $0x30] sm:$0xff]  ;;  %v1874_v55 = vld [vmem:[%s2999_s4 + $0x38] sm:$0xff] }
 0x1c4   : > { %2153 = vmatprep.subr.bf16.mxu1 %v2152_v58 }
 0x1c6   : > { %2009 = vmatmul.mubr.msk.f32.gmra.mrb[2].mxu1 %vm581_vm1, %v1798_v60 }
 0x1c7   : > { %2155 = vmatpush3.bf16.msra.mxu1 %v2152_v58  ;;  %2019 = vmatprep.mubr.msk.f32.mxu1 %vm581_vm1, %v1791_v61  ;;  %v1566_v58 = vld [vmem:[%s3003_s8] sm:$0xff] }
 0x1c8   : > { %2158 = vmatprep.subr.msk.bf16.mxu1 %vm2748_vm7, %v2156_v63 }
 0x1ca   : > { %2020 = vmatmul.mubr.msk.f32.vlgmr.msra.gmra.mrb[0].mxu1 %vm581_vm1, %v1792_v2  ;;  %v888_v12 = vpop.permute.xlu0 %887 }
 0x1cb   : > { %2161 = vmatpush3.bf16.msk.msra.mxu1 %vm2748_vm7, %v2156_v63  ;;  %2022 = vmatprep.mubr.msk.f32.mxu1 %vm581_vm1, %v1793_v3 }
 0x1cc   : > { %2164 = vmatprep.subr.msk.bf16.mxu1 %vm2748_vm7, %v2162_v4 }
 0x1ce   : > { %2023 = vmatmul.mubr.msk.f32.gmra.mrb[2].mxu1 %vm581_vm1, %v1794_v5  ;;  %v893_v11 = vpop.permute.xlu1 %892  ;;  %v898_v21 = vpop.permute.xlu0 %897 }
 0x1cf   : > { %2167 = vmatpush3.bf16.msk.msra.mxu1 %vm2748_vm7, %v2162_v4  ;;  %2033 = vmatprep.mubr.msk.f32.mxu1 %vm581_vm1, %v776_v6 }
 0x1d2   : > { %2034 = vmatmul.mubr.msk.f32.vlgmr.msra.gmra.mrb[0].mxu1 %vm581_vm1, %v777_v7  ;;  %v903_v18 = vpop.permute.xlu1 %902  ;;  %v1025_v38 = vpop.permute.xlu0 %1024  ;;  %v1836_v7 = vld [vmem:[%s2998_s3 + $0x88] sm:$0xff] }
 0x1d3   : > { %2036 = vmatprep.mubr.msk.f32.mxu1 %vm581_vm1, %v778_v8  ;;  %v1837_v8 = vld [vmem:[%s2998_s3 + $0x90] sm:$0xff] }
 0x1d6   : > { %2037 = vmatmul.mubr.msk.f32.gmra.mrb[2].mxu1 %vm581_vm1, %v779_v9  ;;  %v1030_v36 = vpop.permute.xlu1 %1029 }
 0x1d7   : > { %2047 = vmatprep.mubr.msk.f32.mxu1 %vm581_vm1, %v913_v10 }
 0x1da   : > { %v1040_v48 = vpop.permute.xlu1 %1039 }
 0x2a5   : > { %v2035_v13 = vpop.f32.mrb[0].mxu1 }
 0x2a6   : > { %v906_v14 = vadd.f32 %v2035_v13, %v893_v11  ;;  %v858_v15 = vpop.f32.mrb[1].mxu1  ;;  %v1831_v13 = vld [vmem:[%s2998_s3 + $0xa0] sm:$0xff] }
 0x2a7   : > { %v905_v16 = vadd.f32 %v888_v12, %v858_v15  ;;  %v1838_v12 = vld [vmem:[%s2998_s3 + $0x98] sm:$0xff] }
 0x2a8   : > { %v910_v17 = vmax.f32 %v906_v14, 0.0 }
 0x2a9   : > { %v909_v19 = vmax.f32 %v905_v16, 0.0  ;;  %v2038_v20 = vpop.f32.mrb[2].mxu1 }
 0x2aa   : > { %v908_v22 = vadd.f32 %v2038_v20, %v903_v18  ;;  %v868_v23 = vpop.f32.mrb[3].mxu1  ;;  %v1832_v18 = vld [vmem:[%s2998_s3 + $0xa8] sm:$0xff] }
 0x2ab   : > { %v2168_v24 = vpack.c.bf16 %v910_v17, %v909_v19  ;;  %v907_v26 = vadd.f32 %v898_v21, %v868_v23  ;;  %v1833_v19 = vld [vmem:[%s2998_s3 + $0xb0] sm:$0xff]  ;;  %v1834_v21 = vld [vmem:[%s2998_s3 + $0xb8] sm:$0xff]  ;;  %v1856_v23 = vld [vmem:[%s2998_s3 + $0x68] sm:$0xff] }
 0x2ac   : > { %v912_v28 = vmax.f32 %v908_v22, 0.0  ;;  %v1855_v22 = vld [vmem:[%s2998_s3 + $0x60] sm:$0xff] }
 0x2ad   : > { %v911_v29 = vmax.f32 %v907_v26, 0.0  ;;  %2169 = vmatprep.subr.bf16.mxu1 %v2168_v24  ;;  %v1858_v26 = vld [vmem:[%s2998_s3 + $0x78] sm:$0xff] }
 0x2ae   : > { %2171 = vmatpush3.bf16.msra.mxu1 %v2168_v24  ;;  %v1857_v24 = vld [vmem:[%s2998_s3 + $0x70] sm:$0xff] }
 0x2af   : > { %v2172_v30 = vpack.c.bf16 %v912_v28, %v911_v29  ;;  %v1875_v28 = vld [vmem:[%s3000_s5 + $0x20] sm:$0xff] }
 0x2b1   : > { %2173 = vmatprep.subr.bf16.mxu1 %v2172_v30 }
 0x2b2   : > { %2175 = vmatpush3.bf16.msra.mxu1 %v2172_v30 }
 0x2b5   : > { %2048 = vmatmul.mubr.msk.f32.vlgmr.msra.gmra.mrb[4].mxu1 %vm581_vm1, %v914_v31 }
 0x2b6   : > { %2050 = vmatprep.mubr.msk.f32.mxu1 %vm581_vm1, %v915_v33 }
 0x2b9   : > { %2051 = vmatmul.mubr.msk.f32.gmra.mrb[6].mxu1 %vm581_vm1, %v916_v35 }
 0x2ba   : > { %2103 = vmatprep.mubr.msk.f32.mxu1 %vm581_vm1, %v1875_v28 }
 0x388   : > { %v2049_v37 = vpop.f32.mrb[4].mxu1 }
 0x389   : > { %v1015_v39 = vadd.f32 %v2049_v37, %v2688_v25  ;;  %v995_v40 = vpop.f32.mrb[5].mxu1 }
 0x38a   : > { %v1014_v41 = vadd.f32 %v995_v40, %v2690_v27  ;;  %v1035_v27 = vpop.permute.xlu0 %1034 }
 0x38b   : > { %v2808_v42 = vadd.f32 %v1030_v36, %v1015_v39 }
 0x38c   : > { %v2810_v43 = vadd.f32 %v1025_v38, %v1014_v41  ;;  %v2052_v44 = vpop.f32.mrb[6].mxu1 }
 0x38d   : > { %v1017_v45 = vadd.f32 %v2052_v44, %v2698_v32  ;;  %v1005_v46 = vpop.f32.mrb[7].mxu1 }
 0x38e   : > { %v1016_v49 = vadd.f32 %v1005_v46, %v2700_v34  ;;  %v2329_v25 = vpack.i.bf16 %v2808_v42, %v2810_v43  ;;  %v1871_v34 = vld [vmem:[%s2999_s4 + $0x20] sm:$0xff]  ;;  %v2188_v5 = vpack.c.bf16 %v2808_v42, %v2810_v43 }
 0x38f   : > { %v2820_v50 = vadd.f32 %v1040_v48, %v1017_v45 }
 0x390   : > { %v2822_v51 = vadd.f32 %v1035_v27, %v1016_v49  ;;  %2330 = vrot.lane.b32.xlu0 %v2329_v25, %s2483_s28  ;;  %v1876_v27 = vld [vmem:[%s3000_s5 + $0x28] sm:$0xff] }
 0x392   : > { %v2334_v32 = vpack.i.bf16 %v2820_v50, %v2822_v51  ;;  %v2192_v11 = vpack.c.bf16 %v2820_v50, %v2822_v51 }
 0x394   : > { %2340 = vrot.lane.b32.xlu0 %v2329_v25, %s2484_s27  ;;  %2335 = vrot.lane.b32.xlu1 %v2334_v32, %s2483_s28 }
 0x398   : > { %1400 = vperm.xlu0 %2307, %v1871_v34   ;;  %2345 = vrot.lane.b32.xlu1 %v2334_v32, %s2484_s27  ;;  %v1877_v32 = vld [vmem:[%s3000_s5 + $0x30] sm:$0xff]  ;;  %v1878_v34 = vld [vmem:[%s3000_s5 + $0x38] sm:$0xff]  ;;  %s1668_s27 = sshll.u32 %s388_s29, 4  ;;  %s2955_s27 = int_to_ptr.vmem [resolvable:$true] %s1668_s27 }
 0x399   : > { %s2405_s11 = scalar_lea.vmem %s2955_s27, 128  ;;  %p2412_p4 = scmp.lt.s32.totalorder %s2955_s27, %s2410_s12 }
 0x39a   : > { %p2406_p12 = scmp.ne.s32.totalorder %s2955_s27, %s2405_s11  ;;  %p2413_p7 = scmp.lt.s32.totalorder %s2411_s22, %s2405_s11 }
 0x39c   : > { %1410 = vperm.xlu0 %2307, %v1873_v52   ;;  %1405 = vperm.xlu1 %2308, %v1872_v53   ;;  %v2485_v52 = vmov 0.0|0.0   ;;  %v2487_v53 = vmov 0.0   ;;  %p2407_p2 = pnand %p2406_p12, %p3030_p1  ;;  %p2414_p8 = por %p2413_p7, %p2412_p4 }
 0x39e   : > { %p2408_p3 = pneg %p2407_p2 }
 0x3a0   : > { %1539 = vperm.xlu0 %2307, %v1883_v54   ;;  %1415 = vperm.xlu1 %2308, %v1874_v55   ;;  %p2415_p11 = pnand %p2414_p8, %p2408_p3 }
 0x3a4   : > { %1549 = vperm.xlu0 %2307, %v1885_v56   ;;  %1544 = vperm.xlu1 %2308, %v1884_v57  }
 0x3a8   : > { %1569 = vperm.xlu0 %2307, %v1566_v58   ;;  %1554 = vperm.xlu1 %2308, %v1886_v59  }
 0x402   : > { %v2331_v60 = vpop.permute.xlu0 %2330 }
 0x403   : > { %v2333_v61 = vunpack.i.h.bf16 %v2331_v60  ;;  %v2332_v63 = vunpack.i.l.bf16 %v2331_v60 }
 0x405   : > { %v2176_v0 = vpack.c.bf16 %v2333_v61, %v2332_v63 }
 0x406   : > { %v2336_v1 = vpop.permute.xlu1 %2335  ;;  %v2341_v6 = vpop.permute.xlu0 %2340 }
 0x407   : > { %v2338_v2 = vunpack.i.h.bf16 %v2336_v1  ;;  %v2337_v3 = vunpack.i.l.bf16 %v2336_v1  ;;  %2178 = vmatprep.subr.msk.bf16.mxu0 %vm2748_vm7, %v2176_v0  ;;  %v2343_v9 = vunpack.i.h.bf16 %v2341_v6  ;;  %v2342_v10 = vunpack.i.l.bf16 %v2341_v6 }
 0x408   : > { %2181 = vmatpush3.bf16.msk.msra.mxu0 %vm2748_vm7, %v2176_v0 }
 0x409   : > { %v2182_v4 = vpack.c.bf16 %v2338_v2, %v2337_v3  ;;  %v2196_v15 = vpack.c.bf16 %v2343_v9, %v2342_v10 }
 0x40a   : > { %v2346_v62 = vpop.permute.xlu1 %2345 }
 0x40b   : > { %2184 = vmatprep.subr.msk.bf16.mxu0 %vm2748_vm7, %v2182_v4  ;;  %v2348_v16 = vunpack.i.h.bf16 %v2346_v62  ;;  %v2347_v17 = vunpack.i.l.bf16 %v2346_v62 }
 0x40c   : > { %2187 = vmatpush3.bf16.msk.msra.mxu0 %vm2748_vm7, %v2182_v4 }
 0x40d   : > { %2189 = vmatprep.subr.bf16.mxu0 %v2188_v5  ;;  %v2202_v20 = vpack.c.bf16 %v2348_v16, %v2347_v17 }
 0x40f   : > { %2062 = vmatmul.mubr.msk.f32.vlgmr.msra.gmra.mrb[4].mxu0 %vm581_vm1, %v1836_v7  ;;  %v1565_v7 = vld [vmem:[#allocation5] sm:$0xff] }
 0x410   : > { %2191 = vmatpush3.bf16.msra.mxu0 %v2188_v5  ;;  %2064 = vmatprep.mubr.msk.f32.mxu0 %vm581_vm1, %v1837_v8 }
 0x411   : > { %2193 = vmatprep.subr.bf16.mxu0 %v2192_v11 }
 0x413   : > { %2065 = vmatmul.mubr.msk.f32.gmra.mrb[6].mxu0 %vm581_vm1, %v1838_v12 }
 0x414   : > { %2195 = vmatpush3.bf16.msra.mxu0 %v2192_v11  ;;  %2075 = vmatprep.mubr.msk.f32.mxu0 %vm581_vm1, %v1831_v13 }
 0x415   : > { %2198 = vmatprep.subr.msk.bf16.mxu0 %vm2881_vm10, %v2196_v15 }
 0x417   : > { %2076 = vmatmul.mubr.msk.f32.vlgmr.msra.gmra.mrb[4].mxu0 %vm581_vm1, %v1832_v18  ;;  %v1401_v30 = vpop.permute.xlu0 %1400 }
 0x418   : > { %2201 = vmatpush3.bf16.msk.msra.mxu0 %vm2881_vm10, %v2196_v15  ;;  %2078 = vmatprep.mubr.msk.f32.mxu0 %vm581_vm1, %v1833_v19 }
 0x419   : > { %2204 = vmatprep.subr.msk.bf16.mxu0 %vm2881_vm10, %v2202_v20 }
 0x41b   : > { %2079 = vmatmul.mubr.msk.f32.gmra.mrb[6].mxu0 %vm581_vm1, %v1834_v21  ;;  %v1406_v29 = vpop.permute.xlu1 %1405  ;;  %v1411_v41 = vpop.permute.xlu0 %1410 }
 0x41c   : > { %2207 = vmatpush3.bf16.msk.msra.mxu0 %vm2881_vm10, %v2202_v20  ;;  %2089 = vmatprep.mubr.msk.f32.mxu0 %vm581_vm1, %v1855_v22 }
 0x41f   : > { %2090 = vmatmul.mubr.msk.f32.vlgmr.msra.gmra.mrb[4].mxu0 %vm581_vm1, %v1856_v23  ;;  %v1416_v38 = vpop.permute.xlu1 %1415  ;;  %v1540_v56 = vpop.permute.xlu0 %1539 }
 0x420   : > { %2092 = vmatprep.mubr.msk.f32.mxu0 %vm581_vm1, %v1857_v24 }
 0x423   : > { %2093 = vmatmul.mubr.msk.f32.gmra.mrb[6].mxu0 %vm581_vm1, %v1858_v26  ;;  %v1545_v54 = vpop.permute.xlu1 %1544  ;;  %v1550_v4 = vpop.permute.xlu0 %1549 }
 0x427   : > { %v1555_v2 = vpop.permute.xlu1 %1554 }
 0x4f2   : > { %v2091_v31 = vpop.f32.mrb[4].mxu0 }
 0x4f3   : > { %v1419_v33 = vadd.f32 %v2091_v31, %v1406_v29  ;;  %v1370_v35 = vpop.f32.mrb[5].mxu0 }
 0x4f4   : > { %v1418_v36 = vadd.f32 %v1401_v30, %v1370_v35 }
 0x4f5   : > { %v1423_v37 = vmax.f32 %v1419_v33, 0.0 }
 0x4f6   : > { %v1422_v39 = vmax.f32 %v1418_v36, 0.0  ;;  %v2094_v40 = vpop.f32.mrb[6].mxu0 }
 0x4f7   : > { %v1421_v44 = vadd.f32 %v2094_v40, %v1416_v38  ;;  %v1380_v45 = vpop.f32.mrb[7].mxu0 }
 0x4f8   : > { %v2208_v46 = vpack.c.bf16 %v1423_v37, %v1422_v39  ;;  %v1420_v47 = vadd.f32 %v1411_v41, %v1380_v45 }
 0x4f9   : > { %v1425_v48 = vmax.f32 %v1421_v44, 0.0 }
 0x4fa   : > { %v1424_v49 = vmax.f32 %v1420_v47, 0.0  ;;  %2209 = vmatprep.subr.bf16.mxu1 %v2208_v46 }
 0x4fb   : > { %2211 = vmatpush3.bf16.msra.mxu1 %v2208_v46 }
 0x4fc   : > { %v2212_v25 = vpack.c.bf16 %v1425_v48, %v1424_v49 }
 0x4fe   : > { %2213 = vmatprep.subr.bf16.mxu1 %v2212_v25 }
 0x4ff   : > { %2215 = vmatpush3.bf16.msra.mxu1 %v2212_v25 }
 0x500   : > { %2216 = vmatprep.subr.bf16.mxu1 %v2485_v52 }
 0x502   : > { %2104 = vmatmul.mubr.msk.f32.vlgmr.msra.gmra.mrb[8].mxu1 %vm581_vm1, %v1876_v27 }
 0x503   : > { %2106 = vmatprep.mubr.msk.f32.mxu1 %vm581_vm1, %v1877_v32 }
 0x506   : > { %2107 = vmatmul.mubr.msk.f32.gmra.mrb[10].mxu1 %vm581_vm1, %v1878_v34 }
 0x507   : > { %2117 = vmatprep.mubr.msk.f32.mxu1 %vm2486_vm11, %v2487_v53 }
 0x5d5   : > { %v2105_v55 = vpop.f32.mrb[8].mxu1 }
 0x5d6   : > { %v1529_v57 = vadd.f32 %v2105_v55, %v2808_v42  ;;  %v1509_v58 = vpop.f32.mrb[9].mxu1 }
 0x5d7   : > { %v1528_v59 = vadd.f32 %v1509_v58, %v2810_v43 }
 0x5d8   : > { %v1558_v60 = vadd.f32 %v1545_v54, %v1529_v57 }
 0x5d9   : > { %v1557_v61 = vadd.f32 %v1540_v56, %v1528_v59  ;;  %v2108_v63 = vpop.f32.mrb[10].mxu1 }
 0x5da   : > { %1562 = vst [vmem:[%s398_s20 + $0x8] sm:$0xff] %v1558_v60  ;;  %v1531_v0 = vadd.f32 %v2108_v63, %v2820_v50  ;;  %v1519_v1 = vpop.f32.mrb[11].mxu1  ;;  %v1570_v50 = vpop.permute.xlu0 %1569 }
 0x5db   : > { %1561 = vst [vmem:[%s398_s20] sm:$0xff] %v1557_v61  ;;  %v2217_v3 = vpack.c.bf16 %v1558_v60, %v1557_v61  ;;  %v1530_v42 = vadd.f32 %v1519_v1, %v2822_v51 }
 0x5dc   : > { %v1560_v5 = vadd.f32 %v1555_v2, %v1531_v0 }
 0x5dd   : > { %v1559_v6 = vadd.f32 %v1550_v4, %v1530_v42  ;;  %2218 = vmatpush3.bf16.msra.mxu1 %v2217_v3 }
 0x5de   : > { %1564 = vst [vmem:[%s398_s20 + $0x18] sm:$0xff] %v1560_v5  ;;  %2219 = vmatprep.subr.bf16.mxu1 %v2485_v52 }
 0x5df   : > { %1563 = vst [vmem:[%s398_s20 + $0x10] sm:$0xff] %v1559_v6  ;;  %v2220_v43 = vpack.c.bf16 %v1560_v5, %v1559_v6 }
 0x5e1   : > { %2221 = vmatpush3.bf16.msra.mxu1 %v2220_v43 }
 0x5e4   : > { %2118 = vmatmul.mubr.msk.f32.vlgmr.msra.gmra.mrb[12].mxu1 %vm581_vm1, %v1565_v7 }
 0x6b7   : > { %v1641_v51 = vpop.f32.mrb[12].mxu1 }
 0x6b8   : > { %v1642_v8 = vadd.f32 %v1641_v51, %v1570_v50  ;;  %v2119_v9 = vpop.f32.mrb[13].mxu1 }
 0x6ba   : > { %1645 = vst [vmem:[%s388_s29] sm:$0xff] %v1642_v8 }
 0x6bb   : > { %2418 = shalt.err (!%p2415_p11)
}
 0x6bc   : > { %s2419_s18 = scalar_lea.hbm %s2953_s25, 128  ;;  %s2423_s24 = scalar_lea.hbm %s3005_s10, 256 }
 0x6bd   : > { %p2420_p13 = scmp.ne.s32.totalorder %s2953_s25, %s2419_s18  ;;  %p2424_p6 = scmp.lt.u32.totalorder %s2953_s25, %s3005_s10 }
 0x6be   : > { %p2425_p9 = scmp.lt.u32.totalorder %s2423_s24, %s2419_s18  ;;  %p2427_p12 = scmp.lt.u32.totalorder %s2419_s18, %s2953_s25 }
 0x6bf   : > { %p2421_p5 = pnand %p2420_p13, %p3030_p1 }
 0x6c0   : > { %p2426_p10 = por %p2425_p9, %p2424_p6 }
 0x6c1   : > { %p2422_p0 = pneg %p2421_p5 }
 0x6c2   : > { %p2428_p2 = por %p2427_p12, %p2426_p10 }
 0x6c4   : > { %p2429_p3 = pnand %p2428_p2, %p2422_p0 }
 0x6c6   : > { %2432 = shalt.err (!%p2429_p3)
}
 0x6c7   : > { %2246 = dma.vmem_to_hbm [thread:$0]  (%p3030_p1), %s2955_s27, 128, %s2953_s25, %s1652_s30  }
 0x6c8 PF: > { %s3031_s29 = sld [smem:[#allocation14_spill]]  ;;  %p2263_p4 = scmp.ge.s32.totalorder %s2475_s16, 2 }
 0x6c9   : > { %s1688_s15 = sand.u32 1, %s2463_s13  }
 0x6ca   : > { %s1689_s19 = scalar_lea.sflag [#allocation4], %s1688_s15 }
 0x6ce   : > { %p3032_p7 = scmp.ne.s32.totalorder %s3031_s29, 0 }
 0x6d0   : > { %p2256_p8 = pnand %p2263_p4, %p3032_p7 }
 0x6d2   : > { %2458 = dma.done.wait (!%p2256_p8), %s1689_s19, 128  }
 0x6d3   : > { %2460 = vsyncadd (!%p2256_p8), %s1689_s19, 4294967168  ;;  %s3033_s16 = sld [smem:[#allocation12_spill]]  ;;  %s3034_s11 = sld [smem:[#allocation11_spill]] }
 0x6d4   : > { %s3035_s15 = sld [smem:[#allocation13_spill]]  ;;  %s3036_s13 = smov %s2467_s14 }
 0x6d9   : > { %p23_p11 = scmp.ge.s32.totalorder %s3033_s16, 4   ;;  %s3037_s14 = smov %s3034_s11 }
 0x6db   :  { %25 = sbr.rel (!%p23_p11) target bundleno = 5 (0x5), region = 120 }
 0x6e2   :  { %1694 = vsyncpa [#allocation3], 1 }
 0x6e3   :  { %1696 = vsyncpa [#allocation3 + $0x1], 1 }
 0x6e4   :  { %1697 = vsyncpa [#allocation6], 1 }
 0x6e5   :  { %1698 = vsyncpa [#allocation4], 1 }
 0x6e6   :  { %1700 = vsyncpa [#allocation4 + $0x1], 1 }

// kernel: mstr_forward.12
= control target key start
LH: loop header
LB: loop body
LE: loop exit
PB: predicated region body
PF: predicated region fallthrough
CT: control target
= control target key end

     0   :  { %15 = vsyncpa [#allocation3], 0  ;;  %s2709_s0 = inlined_call_operand.vmem [shape: f32[2,32,32], index: 0, kind: input, shape index: {}]   ;;  %s2710_s1 = inlined_call_operand.vmem [shape: f32[6,32,32], index: 1, kind: input, shape index: {}]   ;;  %s2711_s2 = inlined_call_operand.vmem [shape: f32[2,32,1], index: 2, kind: input, shape index: {}]   ;;  %s2712_s3 = inlined_call_operand.vmem [shape: f32[2,32,32], index: 3, kind: input, shape index: {}]   ;;  %s2713_s4 = inlined_call_operand.vmem [shape: f32[2,32,1], index: 4, kind: input, shape index: {}]   ;;  %s2714_s5 = inlined_call_operand.vmem [shape: f32[32,16], index: 5, kind: input, shape index: {}]   ;;  %s2715_s6 = inlined_call_operand.vmem [shape: f32[8,32], index: 6, kind: input, shape index: {}]   ;;  %s2716_s7 = inlined_call_operand.vmem [shape: f32[8,1], index: 7, kind: input, shape index: {}]   ;;  %s2717_s8 = inlined_call_operand.vmem [shape: f32[2,32,16], index: 8, kind: output, shape index: {0}]   ;;  %s2718_s9 = inlined_call_operand.hbm [shape: f32[2,8,16], index: 9, kind: output, shape index: {1}]  }
   0x1   :  { %17 = vsyncpa [#allocation3 + $0x1], 0  ;;  %s2319_s30 = smov 0   ;;  %s2321_s10 = smov 0  }
   0x2   :  { %s2323_s11 = smov 0   ;;  %s2325_s12 = smov 0  }
   0x3 LB: > { %s2340_s13 = sadd.s32 4294967295, %s2259_s12   ;;  %s1669_s14 = sadd.s32 4294967294, %s2259_s12   ;;  %s2259_s12 = sphi %s2325_s12, %s2730_s12   ;;  %s2255_s11 = sphi %s2323_s11, %s2729_s11   ;;  %s2251_s10 = sphi %s2321_s10, %s2728_s10   ;;  %s2247_s30 = sphi %s2319_s30, %s2727_s30  }
   0x4   : > { %s2344_s15 = sadd.s32 1, %s2259_s12   ;;  %s229_s16 = sadd.s32 1, %s2255_s11 }
   0x5   : > { %s226_s17 = ssub.s32 %s2259_s12, %s2344_s15  ;;  %p239_p0 = scmp.ne.s32.totalorder %s2255_s11, %s2251_s10 }
   0x6   : > { %p227_p1 = scmp.eq.s32.totalorder %s226_s17, 0  ;;  %p240_p2 = scmp.eq.s32.totalorder %s2340_s13, 1 }
   0x7   : > { %p245_p3 = scmp.ne.s32.totalorder %s2251_s10, %s2247_s30  ;;  %p246_p4 = scmp.eq.s32.totalorder %s1669_s14, 1 }
   0x8   : > { %s2355_s18 = scalar_select %p227_p1, %s2255_s11, %s229_s16  }
   0x9   : > { %p2357_p5 = por %p240_p2, %p239_p0  ;;  %p2361_p6 = por %p246_p4, %p245_p3 }
   0xa   : > { %p1672_p7 = scmp.ge.s32.totalorder %s2259_s12, 1  ;;  %p293_p8 = scmp.lt.s32.totalorder %s2259_s12, 3 }
   0xc   : > { %p294_p9 = pnand %p1672_p7, %p293_p8 }
   0xd   : > { %p334_p10 = scmp.lt.s32.totalorder (!%p294_p9), %s2340_s13, 1  ;;  %v1682_v0 = vld [vmem:[%s2710_s1 + $0x20] sm:$0xff] (!%p294_p9)  ;;  %vm396_vm0 = vcmask (!%p294_p9), 261120   ;;  %s2261_s28 = smov (!%p294_p9), 1   ;;  %v697_v7 = vld [vmem:[%s2711_s2 + $0x8] sm:$0xff] (!%p294_p9)  ;;  %v2263_v9 = vmov (!%p294_p9), 0  }
   0xe   : > { %297 = sbr.rel (%p294_p9) target bundleno = 1655 (0x677), region = 52  ;;  %1870 = vmatprep.mubr.msk.f32.mxu0 (!%p294_p9), %vm396_vm0, %v1682_v0  ;;  %s2262_s29 = smov (!%p294_p9), 2   ;;  %v696_v8 = vld [vmem:[%s2711_s2] sm:$0xff] (!%p294_p9)  ;;  %2176 = vset.pattern.permute.xlu1 (!%p294_p9), %v2263_v9  ;;  %v698_v10 = vld [vmem:[%s2711_s2 + $0x10] sm:$0xff] (!%p294_p9)  ;;  %v699_v11 = vld [vmem:[%s2711_s2 + $0x18] sm:$0xff] (!%p294_p9)  ;;  %vm364_vm1 = vcmask (!%p294_p9), 7168  }
   0xf   : > { %2175 = vset.pattern.permute.xlu0 (!%p294_p9), %v2263_v9  ;;  %v833_v12 = vld [vmem:[%s2713_s4] sm:$0xff] (!%p294_p9)  ;;  %v834_v13 = vld [vmem:[%s2713_s4 + $0x8] sm:$0xff] (!%p294_p9)  ;;  %v835_v14 = vld [vmem:[%s2713_s4 + $0x10] sm:$0xff] (!%p294_p9)  ;;  %vm381_vm4 = vcmask (!%p294_p9), 15360   ;;  %s2264_s27 = smov (!%p294_p9), 4   ;;  %vm893_vm7 = vcmask (!%p294_p9), 31744  }
  0x10   : > { %v836_v15 = vld [vmem:[%s2713_s4 + $0x18] sm:$0xff] (!%p294_p9)  ;;  %vm1686_vm2 = vmneg (!%p294_p9), %vm364_vm1  ;;  %v1683_v26 = vld [vmem:[%s2710_s1 + $0x28] sm:$0xff] (!%p294_p9)  ;;  %vm2266_vm10 = vmmov (!%p294_p9), 0   ;;  %vm1477_vm11 = vcmask (!%p294_p9), 130048  }
  0x11   : > { %vm2000_vm3 = vmpackc.low (!%p294_p9), %vm1686_vm2, %vm1686_vm2  ;;  %v1684_v29 = vld [vmem:[%s2710_s1 + $0x30] sm:$0xff] (!%p294_p9)  ;;  %v1685_v32 = vld [vmem:[%s2710_s1 + $0x38] sm:$0xff] (!%p294_p9) }
  0x12   : > { %vm1702_vm5 = vmneg (!%p294_p9), %vm381_vm4  ;;  %v1678_v36 = vld [vmem:[%s2710_s1 + $0x40] sm:$0xff] (!%p294_p9)  ;;  %v1679_v38 = vld [vmem:[%s2710_s1 + $0x48] sm:$0xff] (!%p294_p9) }
  0x13   : > { %vm2437_vm6 = vmpackc.low (!%p294_p9), %vm1702_vm5, %vm1702_vm5  ;;  %v1680_v40 = vld [vmem:[%s2710_s1 + $0x50] sm:$0xff] (!%p294_p9)  ;;  %v1681_v41 = vld [vmem:[%s2710_s1 + $0x58] sm:$0xff] (!%p294_p9) }
  0x14   : > { %v591_v42 = vld [vmem:[%s2710_s1] sm:$0xff] (!%p294_p9)  ;;  %v592_v43 = vld [vmem:[%s2710_s1 + $0x8] sm:$0xff] (!%p294_p9)  ;;  %v593_v44 = vld [vmem:[%s2710_s1 + $0x10] sm:$0xff] (!%p294_p9) }
  0x15   : > { %s2369_s21 = scalar_select %p334_p10, %s2340_s13, 1  ;;  %v594_v45 = vld [vmem:[%s2710_s1 + $0x18] sm:$0xff]  ;;  %v728_v46 = vld [vmem:[%s2712_s3] sm:$0xff]  ;;  %vm1746_vm8 = vmneg %vm893_vm7 }
  0x16   : > { %1912 = vmatprep.mubr.msk.f32.mxu1 %vm396_vm0, %v728_v46  ;;  %vm2570_vm9 = vmpackc.low %vm1746_vm8, %vm1746_vm8 }
  0x17   : > { %s2719_s22 = sshll.u32 %s2369_s21, 5  ;;  %s2726_s14 = sshll.u32 %s2369_s21, 5 }
  0x18   : > { %s338_s25 = scalar_lea.vmem %s2709_s0, %s2719_s22  ;;  %s343_s23 = scalar_lea.vmem %s2717_s8, %s2726_s14 }
  0x19   : > { %v2380_v1 = vld [vmem:[%s338_s25] sm:$0xff]  ;;  %v2382_v2 = vld [vmem:[%s338_s25 + $0x8] sm:$0xff]  ;;  %v2384_v3 = vld [vmem:[%s338_s25 + $0x10] sm:$0xff] }
  0x1a   : > { %v2155_v4 = vpack.i.bf16 %v2382_v2, %v2380_v1  ;;  %v2389_v5 = vld [vmem:[%s338_s25 + $0x18] sm:$0xff]  ;;  %v2011_v25 = vpack.c.bf16 %v2382_v2, %v2380_v1  ;;  %s331_s25 = sand.u32 1, %s2251_s10  }
  0x1b   : > { %v2160_v6 = vpack.i.bf16 %v2389_v5, %v2384_v3  ;;  %v2015_v30 = vpack.c.bf16 %v2389_v5, %v2384_v3  ;;  %s1673_s22 = sshll.u32 %s331_s25, 3  ;;  %s1569_s17 = scalar_lea.sflag [#allocation3], %s331_s25 }
  0x1c   : > { %2156 = vrot.lane.b32.xlu0 %v2155_v4, %s2261_s28  ;;  %2166 = vrot.lane.b32.xlu1 %v2155_v4, %s2262_s29  ;;  %v729_v4 = vld [vmem:[%s2712_s3 + $0x8] sm:$0xff]  ;;  %s333_s26 = scalar_lea.vmem [#allocation2], %s1673_s22 }
  0x20   : > { %2161 = vrot.lane.b32.xlu0 %v2160_v6, %s2261_s28  ;;  %2171 = vrot.lane.b32.xlu1 %v2160_v6, %s2262_s29  ;;  %v730_v6 = vld [vmem:[%s2712_s3 + $0x10] sm:$0xff] }
  0x24   : > { %707 = vperm.xlu1 %2176, %v697_v7   ;;  %702 = vperm.xlu0 %2175, %v696_v8   ;;  %v731_v7 = vld [vmem:[%s2712_s3 + $0x18] sm:$0xff] }
  0x28   : > { %712 = vperm.xlu1 %2176, %v698_v10   ;;  %717 = vperm.xlu0 %2175, %v699_v11  }
  0x2c   : > { %839 = vperm.xlu1 %2176, %v833_v12   ;;  %844 = vperm.xlu0 %2175, %v834_v13  }
  0x30   : > { %849 = vperm.xlu1 %2176, %v835_v14   ;;  %854 = vperm.xlu0 %2175, %v836_v15  }
  0x8e   : > { %v2157_v16 = vpop.permute.xlu0 %2156  ;;  %v2167_v23 = vpop.permute.xlu1 %2166 }
  0x8f   : > { %v2159_v17 = vunpack.i.h.bf16 %v2157_v16  ;;  %v2158_v18 = vunpack.i.l.bf16 %v2157_v16  ;;  %v2169_v27 = vunpack.i.h.bf16 %v2167_v23  ;;  %v2168_v28 = vunpack.i.l.bf16 %v2167_v23 }
  0x91   : > { %v1999_v19 = vpack.c.bf16 %v2159_v17, %v2158_v18  ;;  %v2019_v33 = vpack.c.bf16 %v2169_v27, %v2168_v28  ;;  %v1761_v27 = vld [vmem:[%s2711_s2 + $0x38] sm:$0xff]  ;;  %v1772_v28 = vld [vmem:[%s2713_s4 + $0x30] sm:$0xff] }
  0x92   : > { %v2162_v20 = vpop.permute.xlu0 %2161  ;;  %v2172_v31 = vpop.permute.xlu1 %2171 }
  0x93   : > { %v2164_v21 = vunpack.i.h.bf16 %v2162_v20  ;;  %v2163_v22 = vunpack.i.l.bf16 %v2162_v20  ;;  %2001 = vmatprep.subr.msk.bf16.mxu0 %vm2000_vm3, %v1999_v19  ;;  %v2174_v34 = vunpack.i.h.bf16 %v2172_v31  ;;  %v2173_v35 = vunpack.i.l.bf16 %v2172_v31  ;;  %v1773_v31 = vld [vmem:[%s2713_s4 + $0x38] sm:$0xff] }
  0x94   : > { %2004 = vmatpush3.bf16.msk.msra.mxu0 %vm2000_vm3, %v1999_v19  ;;  %v1722_v19 = vld [vmem:[%s2710_s1 + $0x80] sm:$0xff] }
  0x95   : > { %v2005_v24 = vpack.c.bf16 %v2164_v21, %v2163_v22  ;;  %v2025_v39 = vpack.c.bf16 %v2174_v34, %v2173_v35 }
  0x97   : > { %2007 = vmatprep.subr.msk.bf16.mxu0 %vm2000_vm3, %v2005_v24 }
  0x98   : > { %2010 = vmatpush3.bf16.msk.msra.mxu0 %vm2000_vm3, %v2005_v24  ;;  %v1760_v24 = vld [vmem:[%s2711_s2 + $0x30] sm:$0xff] }
  0x99   : > { %2012 = vmatprep.subr.bf16.mxu0 %v2011_v25 }
  0x9b   : > { %1871 = vmatmul.mubr.msk.f32.vlgmr.msra.gmra.mrb[0].mxu0 %vm396_vm0, %v1683_v26  ;;  %v1770_v26 = vld [vmem:[%s2713_s4 + $0x20] sm:$0xff] }
  0x9c   : > { %2014 = vmatpush3.bf16.msra.mxu0 %v2011_v25  ;;  %1873 = vmatprep.mubr.msk.f32.mxu0 %vm396_vm0, %v1684_v29  ;;  %v1759_v25 = vld [vmem:[%s2711_s2 + $0x28] sm:$0xff] }
  0x9d   : > { %2016 = vmatprep.subr.bf16.mxu0 %v2015_v30  ;;  %v1771_v29 = vld [vmem:[%s2713_s4 + $0x28] sm:$0xff] }
  0x9f   : > { %1874 = vmatmul.mubr.msk.f32.gmra.mrb[2].mxu0 %vm396_vm0, %v1685_v32 }
  0xa0   : > { %2018 = vmatpush3.bf16.msra.mxu0 %v2015_v30  ;;  %1884 = vmatprep.mubr.msk.f32.mxu0 %vm396_vm0, %v1678_v36  ;;  %v1483_v30 = vld [vmem:[%s2716_s7] sm:$0xff] }
  0xa1   : > { %2021 = vmatprep.subr.msk.bf16.mxu0 %vm2437_vm6, %v2019_v33 }
  0xa3   : > { %1885 = vmatmul.mubr.msk.f32.vlgmr.msra.gmra.mrb[0].mxu0 %vm396_vm0, %v1679_v38  ;;  %v703_v47 = vpop.permute.xlu0 %702  ;;  %v708_v48 = vpop.permute.xlu1 %707 }
  0xa4   : > { %2024 = vmatpush3.bf16.msk.msra.mxu0 %vm2437_vm6, %v2019_v33  ;;  %1887 = vmatprep.mubr.msk.f32.mxu0 %vm396_vm0, %v1680_v40 }
  0xa5   : > { %2027 = vmatprep.subr.msk.bf16.mxu0 %vm2437_vm6, %v2025_v39 }
  0xa7   : > { %1888 = vmatmul.mubr.msk.f32.gmra.mrb[2].mxu0 %vm396_vm0, %v1681_v41  ;;  %v718_v54 = vpop.permute.xlu0 %717  ;;  %v713_v57 = vpop.permute.xlu1 %712 }
  0xa8   : > { %2030 = vmatpush3.bf16.msk.msra.mxu0 %vm2437_vm6, %v2025_v39  ;;  %1898 = vmatprep.mubr.msk.f32.mxu0 %vm396_vm0, %v591_v42 }
  0xab   : > { %1899 = vmatmul.mubr.msk.f32.vlgmr.msra.gmra.mrb[0].mxu0 %vm396_vm0, %v592_v43  ;;  %v845_v8 = vpop.permute.xlu0 %844  ;;  %v840_v10 = vpop.permute.xlu1 %839  ;;  %v1723_v43 = vld [vmem:[%s2710_s1 + $0x88] sm:$0xff] }
  0xac   : > { %1901 = vmatprep.mubr.msk.f32.mxu0 %vm396_vm0, %v593_v44  ;;  %v1724_v44 = vld [vmem:[%s2710_s1 + $0x90] sm:$0xff] }
  0xaf   : > { %1902 = vmatmul.mubr.msk.f32.gmra.mrb[2].mxu0 %vm396_vm0, %v594_v45  ;;  %v855_v20 = vpop.permute.xlu0 %854 }
 0x17e   : > { %v1900_v49 = vpop.f32.mrb[0].mxu0 }
 0x17f   : > { %v721_v50 = vadd.f32 %v1900_v49, %v708_v48  ;;  %v673_v51 = vpop.f32.mrb[1].mxu0  ;;  %v1725_v48 = vld [vmem:[%s2710_s1 + $0x98] sm:$0xff]  ;;  %v1718_v49 = vld [vmem:[%s2710_s1 + $0xa0] sm:$0xff] }
 0x180   : > { %v720_v52 = vadd.f32 %v703_v47, %v673_v51 }
 0x181   : > { %v725_v53 = vmax.f32 %v721_v50, 0.0  ;;  %v1482_v50 = vld [vmem:[%s2715_s6] sm:$0xff] }
 0x182   : > { %v724_v55 = vmax.f32 %v720_v52, 0.0  ;;  %v1903_v56 = vpop.f32.mrb[2].mxu0 }
 0x183   : > { %v723_v58 = vadd.f32 %v1903_v56, %v718_v54  ;;  %v683_v59 = vpop.f32.mrb[3].mxu0  ;;  %v1719_v54 = vld [vmem:[%s2710_s1 + $0xa8] sm:$0xff] }
 0x184   : > { %v722_v60 = vadd.f32 %v713_v57, %v683_v59  ;;  %v2031_v61 = vpack.c.bf16 %v725_v53, %v724_v55  ;;  %v1720_v55 = vld [vmem:[%s2710_s1 + $0xb0] sm:$0xff]  ;;  %v1721_v57 = vld [vmem:[%s2710_s1 + $0xb8] sm:$0xff]  ;;  %v1743_v59 = vld [vmem:[%s2710_s1 + $0x68] sm:$0xff] }
 0x185   : > { %v727_v62 = vmax.f32 %v723_v58, 0.0  ;;  %v1742_v58 = vld [vmem:[%s2710_s1 + $0x60] sm:$0xff] }
 0x186   : > { %v726_v63 = vmax.f32 %v722_v60, 0.0  ;;  %2032 = vmatprep.subr.bf16.mxu1 %v2031_v61  ;;  %v1744_v60 = vld [vmem:[%s2710_s1 + $0x70] sm:$0xff] }
 0x187   : > { %2034 = vmatpush3.bf16.msra.mxu1 %v2031_v61  ;;  %v1745_v61 = vld [vmem:[%s2710_s1 + $0x78] sm:$0xff] }
 0x188   : > { %v2035_v0 = vpack.c.bf16 %v727_v62, %v726_v63  ;;  %v1762_v62 = vld [vmem:[%s2712_s3 + $0x20] sm:$0xff] }
 0x189   : > { %1968 = vmatprep.mubr.msk.f32.mxu0 %vm396_vm0, %v1762_v62 }
 0x18a   : > { %2036 = vmatprep.subr.bf16.mxu1 %v2035_v0 }
 0x18b   : > { %2038 = vmatpush3.bf16.msra.mxu1 %v2035_v0 }
 0x18e   : > { %1913 = vmatmul.mubr.msk.f32.vlgmr.msra.gmra.mrb[0].mxu1 %vm396_vm0, %v729_v4 }
 0x18f   : > { %1915 = vmatprep.mubr.msk.f32.mxu1 %vm396_vm0, %v730_v6 }
 0x192   : > { %1916 = vmatmul.mubr.msk.f32.gmra.mrb[2].mxu1 %vm396_vm0, %v731_v7 }
 0x193   : > { %1926 = vmatprep.mubr.msk.f32.mxu1 %vm396_vm0, %v1722_v19 }
 0x261   : > { %v1914_v9 = vpop.f32.mrb[0].mxu1 }
 0x262   : > { %v830_v11 = vadd.f32 %v1914_v9, %v2382_v2  ;;  %v810_v12 = vpop.f32.mrb[1].mxu1 }
 0x263   : > { %v829_v13 = vadd.f32 %v810_v12, %v2380_v1  ;;  %v850_v1 = vpop.permute.xlu1 %849 }
 0x264   : > { %v2497_v14 = vadd.f32 %v845_v8, %v830_v11 }
 0x265   : > { %v2499_v15 = vadd.f32 %v840_v10, %v829_v13  ;;  %v1917_v16 = vpop.f32.mrb[2].mxu1 }
 0x266   : > { %v832_v17 = vadd.f32 %v1917_v16, %v2389_v5  ;;  %v820_v18 = vpop.f32.mrb[3].mxu1 }
 0x267   : > { %v831_v21 = vadd.f32 %v820_v18, %v2384_v3  ;;  %v2177_v2 = vpack.i.bf16 %v2497_v14, %v2499_v15  ;;  %v1758_v3 = vld [vmem:[%s2711_s2 + $0x20] sm:$0xff]  ;;  %v2051_v41 = vpack.c.bf16 %v2497_v14, %v2499_v15 }
 0x268   : > { %v2509_v22 = vadd.f32 %v855_v20, %v832_v17 }
 0x269   : > { %v2511_v23 = vadd.f32 %v850_v1, %v831_v21  ;;  %2178 = vrot.lane.b32.xlu1 %v2177_v2, %s2262_s29  ;;  %v1376_v21 = vld [vmem:[%s2714_s5] sm:$0xff] }
 0x26b   : > { %v2182_v5 = vpack.i.bf16 %v2509_v22, %v2511_v23  ;;  %v2055_v47 = vpack.c.bf16 %v2509_v22, %v2511_v23 }
 0x26d   : > { %2188 = vrot.lane.b32.xlu1 %v2177_v2, %s2264_s27  ;;  %2183 = vrot.lane.b32.xlu0 %v2182_v5, %s2262_s29  ;;  %v1377_v2 = vld [vmem:[%s2714_s5 + $0x8] sm:$0xff]  ;;  %s1780_s29 = sshll.u32 %s2340_s13, 7 }
 0x26e   : > { %s2666_s16 = scalar_lea.hbm %s2718_s9, %s1780_s29 }
 0x271   : > { %1215 = vperm.xlu1 %2176, %v1758_v3   ;;  %2193 = vrot.lane.b32.xlu0 %v2182_v5, %s2264_s27  ;;  %v2079_v3 = vpack.c.bf16 %v1377_v2, %v1376_v21  ;;  %s1585_s27 = sshll.u32 %s333_s26, 4  ;;  %s2668_s27 = int_to_ptr.vmem [resolvable:$true] %s1585_s27 }
 0x272   : > { %s2197_s13 = scalar_lea.vmem %s2668_s27, 128 }
 0x273   : > { %p2198_p11 = scmp.ne.s32.totalorder %s2668_s27, %s2197_s13 }
 0x275   : > { %1225 = vperm.xlu1 %2176, %v1760_v24   ;;  %1220 = vperm.xlu0 %2175, %v1759_v25   ;;  %v1763_v24 = vld [vmem:[%s2712_s3 + $0x28] sm:$0xff]  ;;  %v1764_v25 = vld [vmem:[%s2712_s3 + $0x30] sm:$0xff]  ;;  %p2199_p12 = pnand %p2198_p11, %p2357_p5 }
 0x277   : > { %p2200_p13 = pneg %p2199_p12 }
 0x279   : > { %1354 = vperm.xlu1 %2176, %v1770_v26   ;;  %1230 = vperm.xlu0 %2175, %v1761_v27   ;;  %v1765_v26 = vld [vmem:[%s2712_s3 + $0x38] sm:$0xff]  ;;  %v1378_v27 = vld [vmem:[%s2714_s5 + $0x10] sm:$0xff] }
 0x27d   : > { %1364 = vperm.xlu1 %2176, %v1772_v28   ;;  %1359 = vperm.xlu0 %2175, %v1771_v29   ;;  %v1379_v28 = vld [vmem:[%s2714_s5 + $0x18] sm:$0xff] }
 0x27e   : > { %v2083_v29 = vpack.c.bf16 %v1379_v28, %v1378_v27 }
 0x281   : > { %1486 = vperm.xlu1 %2176, %v1483_v30   ;;  %1369 = vperm.xlu0 %2175, %v1773_v31  }
 0x2db   : > { %v2179_v32 = vpop.permute.xlu1 %2178 }
 0x2dc   : > { %v2181_v33 = vunpack.i.h.bf16 %v2179_v32  ;;  %v2180_v34 = vunpack.i.l.bf16 %v2179_v32 }
 0x2de   : > { %v2039_v35 = vpack.c.bf16 %v2181_v33, %v2180_v34 }
 0x2df   : > { %v2184_v36 = vpop.permute.xlu0 %2183  ;;  %v2189_v42 = vpop.permute.xlu1 %2188 }
 0x2e0   : > { %v2186_v38 = vunpack.i.h.bf16 %v2184_v36  ;;  %v2185_v39 = vunpack.i.l.bf16 %v2184_v36  ;;  %2041 = vmatprep.subr.msk.bf16.mxu1 %vm2437_vm6, %v2039_v35  ;;  %v2191_v45 = vunpack.i.h.bf16 %v2189_v42  ;;  %v2190_v46 = vunpack.i.l.bf16 %v2189_v42 }
 0x2e1   : > { %2044 = vmatpush3.bf16.msk.msra.mxu1 %vm2437_vm6, %v2039_v35 }
 0x2e2   : > { %v2045_v40 = vpack.c.bf16 %v2186_v38, %v2185_v39  ;;  %v2059_v51 = vpack.c.bf16 %v2191_v45, %v2190_v46 }
 0x2e3   : > { %v2194_v37 = vpop.permute.xlu0 %2193 }
 0x2e4   : > { %2047 = vmatprep.subr.msk.bf16.mxu1 %vm2437_vm6, %v2045_v40  ;;  %v2196_v52 = vunpack.i.h.bf16 %v2194_v37  ;;  %v2195_v53 = vunpack.i.l.bf16 %v2194_v37 }
 0x2e5   : > { %2050 = vmatpush3.bf16.msk.msra.mxu1 %vm2437_vm6, %v2045_v40 }
 0x2e6   : > { %2052 = vmatprep.subr.bf16.mxu1 %v2051_v41  ;;  %v2065_v56 = vpack.c.bf16 %v2196_v52, %v2195_v53 }
 0x2e8   : > { %1927 = vmatmul.mubr.msk.f32.vlgmr.msra.gmra.mrb[4].mxu1 %vm396_vm0, %v1723_v43 }
 0x2e9   : > { %2054 = vmatpush3.bf16.msra.mxu1 %v2051_v41  ;;  %1929 = vmatprep.mubr.msk.f32.mxu1 %vm396_vm0, %v1724_v44 }
 0x2ea   : > { %2056 = vmatprep.subr.bf16.mxu1 %v2055_v47 }
 0x2ec   : > { %1930 = vmatmul.mubr.msk.f32.gmra.mrb[6].mxu1 %vm396_vm0, %v1725_v48 }
 0x2ed   : > { %2058 = vmatpush3.bf16.msra.mxu1 %v2055_v47  ;;  %1940 = vmatprep.mubr.msk.f32.mxu1 %vm396_vm0, %v1718_v49 }
 0x2ee   : > { %2061 = vmatprep.subr.msk.bf16.mxu1 %vm2570_vm9, %v2059_v51 }
 0x2f0   : > { %1941 = vmatmul.mubr.msk.f32.vlgmr.msra.gmra.mrb[4].mxu1 %vm396_vm0, %v1719_v54  ;;  %v1216_v0 = vpop.permute.xlu1 %1215 }
 0x2f1   : > { %2064 = vmatpush3.bf16.msk.msra.mxu1 %vm2570_vm9, %v2059_v51  ;;  %1943 = vmatprep.mubr.msk.f32.mxu1 %vm396_vm0, %v1720_v55 }
 0x2f2   : > { %2067 = vmatprep.subr.msk.bf16.mxu1 %vm2570_vm9, %v2065_v56 }
 0x2f4   : > { %1944 = vmatmul.mubr.msk.f32.gmra.mrb[6].mxu1 %vm396_vm0, %v1721_v57  ;;  %v1221_v63 = vpop.permute.xlu0 %1220  ;;  %v1226_v13 = vpop.permute.xlu1 %1225 }
 0x2f5   : > { %2070 = vmatpush3.bf16.msk.msra.mxu1 %vm2570_vm9, %v2065_v56  ;;  %1954 = vmatprep.mubr.msk.f32.mxu1 %vm396_vm0, %v1742_v58 }
 0x2f8   : > { %1955 = vmatmul.mubr.msk.f32.vlgmr.msra.gmra.mrb[4].mxu1 %vm396_vm0, %v1743_v59  ;;  %v1231_v10 = vpop.permute.xlu0 %1230  ;;  %v1355_v31 = vpop.permute.xlu1 %1354 }
 0x2f9   : > { %1957 = vmatprep.mubr.msk.f32.mxu1 %vm396_vm0, %v1744_v60 }
 0x2fc   : > { %1958 = vmatmul.mubr.msk.f32.gmra.mrb[6].mxu1 %vm396_vm0, %v1745_v61  ;;  %v1360_v34 = vpop.permute.xlu0 %1359  ;;  %v1365_v43 = vpop.permute.xlu1 %1364 }
 0x300   : > { %v1370_v44 = vpop.permute.xlu0 %1369  ;;  %v1487_v51 = vpop.permute.xlu1 %1486 }
 0x3cb   : > { %v1956_v4 = vpop.f32.mrb[4].mxu1 }
 0x3cc   : > { %v1234_v6 = vadd.f32 %v1956_v4, %v1221_v63  ;;  %v1185_v7 = vpop.f32.mrb[5].mxu1 }
 0x3cd   : > { %v1233_v8 = vadd.f32 %v1216_v0, %v1185_v7 }
 0x3ce   : > { %v1238_v9 = vmax.f32 %v1234_v6, 0.0 }
 0x3cf   : > { %v1237_v11 = vmax.f32 %v1233_v8, 0.0  ;;  %v1959_v12 = vpop.f32.mrb[6].mxu1 }
 0x3d0   : > { %v1236_v16 = vadd.f32 %v1959_v12, %v1231_v10  ;;  %v1195_v17 = vpop.f32.mrb[7].mxu1 }
 0x3d1   : > { %v2071_v18 = vpack.c.bf16 %v1238_v9, %v1237_v11  ;;  %v1235_v19 = vadd.f32 %v1226_v13, %v1195_v17 }
 0x3d2   : > { %v1240_v20 = vmax.f32 %v1236_v16, 0.0 }
 0x3d3   : > { %v1239_v1 = vmax.f32 %v1235_v19, 0.0  ;;  %2072 = vmatprep.subr.bf16.mxu0 %v2071_v18 }
 0x3d4   : > { %2074 = vmatpush3.bf16.msra.mxu0 %v2071_v18 }
 0x3d5   : > { %v2075_v5 = vpack.c.bf16 %v1240_v20, %v1239_v1 }
 0x3d7   : > { %2076 = vmatprep.subr.bf16.mxu0 %v2075_v5 }
 0x3d8   : > { %2078 = vmatpush3.bf16.msra.mxu0 %v2075_v5 }
 0x3d9   : > { %2080 = vmatprep.subr.bf16.mxu0 %v2079_v3 }
 0x3db   : > { %1969 = vmatmul.mubr.msk.f32.vlgmr.msra.gmra.mrb[4].mxu0 %vm396_vm0, %v1763_v24 }
 0x3dc   : > { %1971 = vmatprep.mubr.msk.f32.mxu0 %vm396_vm0, %v1764_v25  ;;  %2082 = vmatpush3.bf16.msra.mxu0 %v2079_v3 }
 0x3dd   : > { %2084 = vmatprep.subr.bf16.mxu0 %v2083_v29 }
 0x3df   : > { %1972 = vmatmul.mubr.msk.f32.gmra.mrb[6].mxu0 %vm396_vm0, %v1765_v26 }
 0x3e0   : > { %2086 = vmatpush3.bf16.msra.mxu0 %v2083_v29 }
 0x4ae   : > { %v1970_v30 = vpop.f32.mrb[4].mxu0 }
 0x4af   : > { %v1344_v32 = vadd.f32 %v1970_v30, %v2497_v14  ;;  %v1324_v33 = vpop.f32.mrb[5].mxu0 }
 0x4b0   : > { %v1343_v35 = vadd.f32 %v1324_v33, %v2499_v15  ;;  %v2265_v15 = vmov 0.0|0.0  }
 0x4b1   : > { %v1373_v39 = vadd.f32 %v1360_v34, %v1344_v32  ;;  %2087 = vmatprep.subr.bf16.mxu1 %v2265_v15 }
 0x4b2   : > { %v1372_v36 = vadd.f32 %v1355_v31, %v1343_v35  ;;  %v1973_v38 = vpop.f32.mrb[6].mxu0 }
 0x4b3   : > { %v1346_v40 = vadd.f32 %v1973_v38, %v2509_v22  ;;  %v1334_v41 = vpop.f32.mrb[7].mxu0  ;;  %v2267_v22 = vmov 0.0  }
 0x4b4   : > { %v1345_v42 = vadd.f32 %v1334_v41, %v2511_v23  ;;  %1982 = vmatprep.mubr.msk.f32.mxu0 %vm396_vm0, %v1372_v36  ;;  %1996 = vmatprep.mubr.msk.f32.mxu1 %vm2266_vm10, %v2267_v22 }
 0x4b5   : > { %1983 = vmatmul.mubr.msk.f32.vlgmr.msra.gmra.mrb[8].mxu0 %vm396_vm0, %v1373_v39  ;;  %v1375_v45 = vadd.f32 %v1370_v44, %v1346_v40 }
 0x4b6   : > { %v1374_v14 = vadd.f32 %v1365_v43, %v1345_v42 }
 0x4b8   : > { %1985 = vmatprep.mubr.msk.f32.mxu0 %vm396_vm0, %v1374_v14 }
 0x4b9   : > { %1986 = vmatmul.mubr.msk.f32.gmra.mrb[10].mxu0 %vm396_vm0, %v1375_v45 }
 0x588   : > { %v1984_v23 = vpop.f32.mrb[8].mxu0 }
 0x589   : > { %1479 = vst.msk [vmem:[%s343_s23 + $0x8] sm:$0xff] %vm1477_vm11, %v1984_v23  ;;  %v1458_v46 = vpop.f32.mrb[9].mxu0 }
 0x58a   : > { %1478 = vst.msk [vmem:[%s343_s23] sm:$0xff] %vm1477_vm11, %v1458_v46  ;;  %v2088_v47 = vpack.c.bf16 %v1984_v23, %v1458_v46 }
 0x58c   : > { %v1987_v37 = vpop.f32.mrb[10].mxu0  ;;  %2089 = vmatpush3.bf16.msra.mxu1 %v2088_v47 }
 0x58d   : > { %1481 = vst.msk [vmem:[%s343_s23 + $0x18] sm:$0xff] %vm1477_vm11, %v1987_v37  ;;  %v1468_v48 = vpop.f32.mrb[11].mxu0  ;;  %2090 = vmatprep.subr.bf16.mxu1 %v2265_v15 }
 0x58e   : > { %1480 = vst.msk [vmem:[%s343_s23 + $0x10] sm:$0xff] %vm1477_vm11, %v1468_v48  ;;  %v2091_v49 = vpack.c.bf16 %v1987_v37, %v1468_v48  ;;  %s2268_s23 = smov [#allocation2]  }
 0x58f   : > { %s2201_s21 = sshll.u32 %s2268_s23, 4  ;;  %s2202_s21 = int_to_ptr.vmem [resolvable:$false] %s2201_s21 }
 0x590   : > { %2092 = vmatpush3.bf16.msra.mxu1 %v2091_v49  ;;  %s2203_s24 = scalar_lea.vmem %s2202_s21, 256  ;;  %p2204_p0 = scmp.lt.s32.totalorder %s2668_s27, %s2202_s21 }
 0x591   : > { %p2205_p1 = scmp.lt.s32.totalorder %s2203_s24, %s2197_s13 }
 0x593   : > { %1997 = vmatmul.mubr.msk.f32.vlgmr.msra.gmra.mrb[8].mxu1 %vm396_vm0, %v1482_v50  ;;  %p2206_p2 = por %p2205_p1, %p2204_p0 }
 0x595   : > { %p2207_p3 = pnand %p2206_p2, %p2200_p13 }
 0x666   : > { %v1558_v52 = vpop.f32.mrb[8].mxu1 }
 0x667   : > { %v1559_v53 = vadd.f32 %v1558_v52, %v1487_v51  ;;  %v1998_v54 = vpop.f32.mrb[9].mxu1 }
 0x669   : > { %1562 = vst.msk [vmem:[%s333_s26] sm:$0xff] %vm1477_vm11, %v1559_v53 }
 0x66a   : > { %2210 = shalt.err (!%p2207_p3)
}
 0x66b   : > { %s2211_s25 = scalar_lea.hbm %s2666_s16, 128  ;;  %s2215_s26 = scalar_lea.hbm %s2718_s9, 256 }
 0x66c   : > { %p2212_p4 = scmp.ne.s32.totalorder %s2666_s16, %s2211_s25  ;;  %p2216_p9 = scmp.lt.u32.totalorder %s2666_s16, %s2718_s9 }
 0x66d   : > { %p2217_p10 = scmp.lt.u32.totalorder %s2215_s26, %s2211_s25  ;;  %p2219_p12 = scmp.lt.u32.totalorder %s2211_s25, %s2666_s16 }
 0x66e   : > { %p2213_p7 = pnand %p2212_p4, %p2357_p5 }
 0x66f   : > { %p2218_p11 = por %p2217_p10, %p2216_p9 }
 0x670   : > { %p2214_p8 = pneg %p2213_p7 }
 0x671   : > { %p2220_p13 = por %p2219_p12, %p2218_p11 }
 0x673   : > { %p2221_p0 = pnand %p2220_p13, %p2214_p8 }
 0x675   : > { %2224 = shalt.err (!%p2221_p0)
}
 0x676   : > { %2109 = dma.vmem_to_hbm [thread:$0]  (%p2357_p5), %s2668_s27, 128, %s2666_s16, %s1569_s17  }
 0x677 PF: > { %p2115_p1 = scmp.ge.s32.totalorder %s2259_s12, 2  ;;  %s1605_s13 = sand.u32 1, %s2247_s30  }
 0x678   : > { %s1606_s23 = scalar_lea.sflag [#allocation3], %s1605_s13 }
 0x679   : > { %p2112_p2 = pnand %p2115_p1, %p2361_p6 }
 0x67b   : > { %2242 = dma.done.wait (!%p2112_p2), %s1606_s23, 128  }
 0x67c   : > { %2244 = vsyncadd (!%p2112_p2), %s1606_s23, 4294967168  ;;  %p20_p3 = scmp.ge.s32.totalorder %s2344_s15, 4   ;;  %s2727_s30 = smov %s2251_s10 }
 0x67d   : > { %s2728_s10 = smov %s2255_s11  ;;  %s2729_s11 = smov %s2355_s18 }
 0x67e   : > { %s2730_s12 = smov %s2344_s15  ;;  %22 = sbr.rel (!%p20_p3) target bundleno = 3 (0x3), region = 107 }
 0x685   :  { %1611 = vsyncpa [#allocation3], 1 }
 0x686   :  { %1613 = vsyncpa [#allocation3 + $0x1], 1 }

// kernel: mstr_forward.13
= control target key start
LH: loop header
LB: loop body
LE: loop exit
PB: predicated region body
PF: predicated region fallthrough
CT: control target
= control target key end

     0   :  { %s3347_s0 = inlined_call_operand.vmem [shape: f32[2,32,128], index: 0, kind: input, shape index: {}]   ;;  %s3348_s1 = inlined_call_operand.vmem [shape: f32[2,32,64], index: 1, kind: input, shape index: {}]   ;;  %s3349_s2 = inlined_call_operand.vmem [shape: f32[2,32,32], index: 2, kind: input, shape index: {}]   ;;  %s3350_s3 = inlined_call_operand.vmem [shape: f32[2,32,16], index: 3, kind: input, shape index: {}]   ;;  %s3351_s4 = inlined_call_operand.vmem [shape: f32[32,32], index: 4, kind: input, shape index: {}]   ;;  %s3352_s5 = inlined_call_operand.vmem [shape: f32[32,1], index: 5, kind: input, shape index: {}]   ;;  %s3353_s6 = inlined_call_operand.vmem [shape: f32[16,32], index: 6, kind: input, shape index: {}]   ;;  %s3354_s7 = inlined_call_operand.vmem [shape: f32[32,64], index: 7, kind: input, shape index: {}]   ;;  %s3355_s8 = inlined_call_operand.vmem [shape: f32[64,128], index: 8, kind: input, shape index: {}]   ;;  %s3356_s9 = inlined_call_operand.vmem [shape: f32[8,32], index: 9, kind: input, shape index: {}]   ;;  %s3357_s10 = inlined_call_operand.vmem [shape: f32[8,1], index: 10, kind: input, shape index: {}]   ;;  %s3358_s11 = inlined_call_operand.hbm [shape: f32[2,32,128], index: 11, kind: output, shape index: {0}]   ;;  %s3359_s12 = inlined_call_operand.hbm [shape: f32[2,32,64], index: 12, kind: output, shape index: {1}]   ;;  %s3360_s13 = inlined_call_operand.hbm [shape: f32[2,32,32], index: 13, kind: output, shape index: {2}]   ;;  %s3361_s14 = inlined_call_operand.hbm [shape: f32[2,8,128], index: 14, kind: output, shape index: {3}]   ;;  %s3362_s15 = inlined_call_operand.hbm [shape: f32[2,8,64], index: 15, kind: output, shape index: {4}]   ;;  %s3363_s16 = inlined_call_operand.hbm [shape: f32[2,8,32], index: 16, kind: output, shape index: {5}]   ;;  %s3364_s17 = inlined_call_operand.hbm [shape: f32[2,8,16], index: 17, kind: output, shape index: {6}]  }
   0x1   :  { %3374 = sst [smem:[#allocation23_spill]] %s3347_s0 }
   0x2   :  { %3375 = sst [smem:[#allocation24_spill]] %s3348_s1 }
   0x3   :  { %3376 = sst [smem:[#allocation25_spill]] %s3349_s2 }
   0x4   :  { %3377 = sst [smem:[#allocation26_spill]] %s3350_s3 }
   0x5   :  { %3378 = sst [smem:[#allocation27_spill]] %s3351_s4 }
   0x6   :  { %3379 = sst [smem:[#allocation28_spill]] %s3352_s5 }
   0x7   :  { %3380 = sst [smem:[#allocation29_spill]] %s3353_s6 }
   0x8   :  { %3381 = sst [smem:[#allocation30_spill]] %s3354_s7 }
   0x9   :  { %3382 = sst [smem:[#allocation31_spill]] %s3355_s8 }
   0xa   :  { %23 = vsyncpa [#allocation3], 0 }
   0xb   :  { %25 = vsyncpa [#allocation3 + $0x1], 0 }
   0xc   :  { %26 = vsyncpa [#allocation5], 0 }
   0xd   :  { %28 = vsyncpa [#allocation5 + $0x1], 0 }
   0xe   :  { %29 = vsyncpa [#allocation8], 0 }
   0xf   :  { %31 = vsyncpa [#allocation8 + $0x1], 0 }
  0x10   :  { %32 = vsyncpa [#allocation11], 0 }
  0x11   :  { %34 = vsyncpa [#allocation11 + $0x1], 0  ;;  %s2792_s24 = smov 0   ;;  %s2794_s25 = smov 0  }
  0x12   :  { %s2796_s26 = smov 0   ;;  %s2798_s27 = smov 0  }
  0x13 LB: > { %3383 = sst [smem:[#allocation17_spill]] %s2675_s24  ;;  %s2813_s28 = sadd.s32 4294967295, %s2687_s27   ;;  %s2687_s27 = sphi %s2798_s27, %s3407_s27   ;;  %s2683_s26 = sphi %s2796_s26, %s3409_s26   ;;  %s2679_s25 = sphi %s2794_s25, %s3411_s25   ;;  %s2675_s24 = sphi %s2792_s24, %s3410_s24  }
  0x14   : > { %3384 = sst [smem:[#allocation18_spill]] %s2683_s26  ;;  %s3365_s29 = sadd.s32 4294967294, %s2687_s27  }
  0x15   : > { %3385 = sst [smem:[#allocation19_spill]] %s2687_s27  ;;  %s2817_s0 = sadd.s32 1, %s2687_s27  }
  0x16   : > { %3386 = sst [smem:[#allocation20_spill]] %s2817_s0  ;;  %s298_s30 = sadd.s32 1, %s2683_s26 }
  0x17   : > { %s295_s18 = ssub.s32 %s2687_s27, %s2817_s0  ;;  %p308_p0 = scmp.ne.s32.totalorder %s2683_s26, %s2679_s25 }
  0x18   : > { %p296_p1 = scmp.eq.s32.totalorder %s295_s18, 0  ;;  %p309_p2 = scmp.eq.s32.totalorder %s2813_s28, 1 }
  0x19   : > { %p314_p3 = scmp.ne.s32.totalorder %s2679_s25, %s2675_s24  ;;  %p315_p4 = scmp.eq.s32.totalorder %s3365_s29, 1 }
  0x1a   : > { %s2830_s19 = scalar_select %p296_p1, %s2683_s26, %s298_s30  }
  0x1b   : > { %p2832_p5 = por %p309_p2, %p308_p0  ;;  %p2836_p6 = por %p315_p4, %p314_p3 }
  0x1c   : > { %3387 = sst [smem:[#allocation21_spill]] %s2830_s19  ;;  %p2008_p7 = scmp.ge.s32.totalorder %s2687_s27, 1 }
  0x1d   : > { %s3389_s20 = scalar_select %p2836_p6, 1, 0 }
  0x1e   : > { %p542_p8 = scmp.lt.s32.totalorder %s2687_s27, 3 }
  0x1f   : > { %3390 = sst [smem:[#allocation22_spill]] %s3389_s20 }
  0x20   : > { %p543_p9 = pnand %p2008_p7, %p542_p8 }
  0x21   : > { %p639_p10 = scmp.lt.s32.totalorder (!%p543_p9), %s2813_s28, 1  ;;  %s3391_s6 = sld [smem:[#allocation29_spill]] (!%p543_p9)  ;;  %vm679_vm0 = vcmask (!%p543_p9), 261120   ;;  %v2689_v4 = vmov (!%p543_p9), 0   ;;  %vm777_vm1 = vcmask (!%p543_p9), 130048   ;;  %v668_v12 = vld [vmem:[%s3357_s10] sm:$0xff] (!%p543_p9) }
  0x22   : > { %546 = sbr.rel (%p543_p9) target bundleno = 1014 (0x3f6), region = 64  ;;  %s3392_s4 = sld [smem:[#allocation27_spill]] (!%p543_p9)  ;;  %2443 = vset.pattern.permute.xlu0 (!%p543_p9), %v2689_v4  ;;  %2444 = vset.pattern.permute.xlu1 (!%p543_p9), %v2689_v4  ;;  %vm2691_vm2 = vmmov (!%p543_p9), 0   ;;  %vm1190_vm3 = vcmask (!%p543_p9), 523264  }
  0x23   : > { %s3393_s5 = sld [smem:[#allocation28_spill]] (!%p543_p9)  ;;  %s3394_s2 = sld [smem:[#allocation25_spill]] (!%p543_p9) }
  0x24   : > { %s3395_s3 = sld [smem:[#allocation26_spill]] (!%p543_p9)  ;;  %s3396_s26 = sld [smem:[#allocation24_spill]] (!%p543_p9) }
  0x25   : > { %s3397_s7 = sld [smem:[#allocation30_spill]] (!%p543_p9)  ;;  %s3398_s20 = sld [smem:[#allocation23_spill]] (!%p543_p9) }
  0x26   : > { %s3399_s8 = sld [smem:[#allocation31_spill]] (!%p543_p9)  ;;  %s3086_s30 = sand.u32 (!%p543_p9), 1, %s2813_s28  }
  0x27   : > { %v673_v0 = vld [vmem:[%s3391_s6] sm:$0xff] (!%p543_p9)  ;;  %v674_v1 = vld [vmem:[%s3391_s6 + $0x8] sm:$0xff] (!%p543_p9)  ;;  %s3089_s18 = sshll.u32 (!%p543_p9), %s2813_s28, 9 }
  0x28   : > { %v2852_v2 = vld [vmem:[%s3392_s4] sm:$0xff] (!%p543_p9)  ;;  %v2288_v3 = vpack.c.bf16 (!%p543_p9), %v674_v1, %v673_v0  ;;  %v660_v30 = vld [vmem:[%s3392_s4 + $0x8] sm:$0xff] (!%p543_p9)  ;;  %v661_v31 = vld [vmem:[%s3392_s4 + $0x10] sm:$0xff] (!%p543_p9) }
  0x29   : > { %2156 = vmatprep.mubr.msk.f32.mxu0 %vm679_vm0, %v2852_v2  ;;  %s640_s19 = scalar_select %p639_p10, %s2813_s28, 1  ;;  %v663_v5 = vld [vmem:[%s3393_s5] sm:$0xff]  ;;  %v665_v6 = vld [vmem:[%s3393_s5 + $0x10] sm:$0xff]  ;;  %v664_v7 = vld [vmem:[%s3393_s5 + $0x8] sm:$0xff] }
  0x2a   : > { %2289 = vmatprep.subr.bf16.mxu1 %v2288_v3  ;;  %877 = vperm.xlu0 %2443, %v663_v5   ;;  %v666_v8 = vld [vmem:[%s3393_s5 + $0x18] sm:$0xff] }
  0x2b   : > { %s2863_s29 = sshll.u32 %s640_s19, 5  ;;  %2291 = vmatpush3.bf16.msra.mxu1 %v2288_v3  ;;  %887 = vperm.xlu1 %2444, %v665_v6   ;;  %v899_v28 = vld [vmem:[%s3397_s7] sm:$0xff]  ;;  %v900_v29 = vld [vmem:[%s3397_s7 + $0x8] sm:$0xff]  ;;  %v662_v33 = vld [vmem:[%s3392_s4 + $0x18] sm:$0xff] }
  0x2c   : > { %s653_s6 = scalar_lea.vmem %s3394_s2, %s2863_s29  ;;  %s658_s23 = scalar_lea.vmem %s3395_s3, %s2863_s29  ;;  %v2300_v32 = vpack.c.bf16 %v900_v29, %v899_v28  ;;  %v901_v34 = vld [vmem:[%s3397_s7 + $0x10] sm:$0xff]  ;;  %v902_v35 = vld [vmem:[%s3397_s7 + $0x18] sm:$0xff]  ;;  %v1093_v43 = vld [vmem:[%s3399_s8] sm:$0xff] }
  0x2d   : > { %v675_v9 = vld [vmem:[%s653_s6] sm:$0xff]  ;;  %v676_v10 = vld [vmem:[%s653_s6 + $0x8] sm:$0xff]  ;;  %v677_v11 = vld [vmem:[%s653_s6 + $0x10] sm:$0xff]  ;;  %s648_s21 = scalar_lea.vmem %s3396_s26, %s2863_s29  ;;  %v2304_v36 = vpack.c.bf16 %v902_v35, %v901_v34  ;;  %s643_s22 = scalar_lea.vmem %s3398_s20, %s2863_s29 }
  0x2e   : > { %v2280_v13 = vpack.c.bf16 %v676_v10, %v675_v9  ;;  %v678_v14 = vld [vmem:[%s653_s6 + $0x18] sm:$0xff]  ;;  %v2886_v15 = vld [vmem:[%s658_s23] sm:$0xff]  ;;  %v2888_v16 = vld [vmem:[%s658_s23 + $0x8] sm:$0xff]  ;;  %882 = vperm.xlu0 %2443, %v664_v7   ;;  %s3095_s6 = scalar_lea.hbm %s3359_s12, %s3089_s18 }
  0x2f   : > { %v2284_v17 = vpack.c.bf16 %v678_v14, %v677_v11  ;;  %2166 = vmatprep.mubr.msk.f32.mxu1 %vm777_vm1, %v2886_v15  ;;  %v2351_v18 = vpack.c.bf16 %v2888_v16, %v2886_v15  ;;  %v2894_v19 = vld [vmem:[%s658_s23 + $0x10] sm:$0xff]  ;;  %v2896_v20 = vld [vmem:[%s658_s23 + $0x18] sm:$0xff]  ;;  %892 = vperm.xlu1 %2444, %v666_v8   ;;  %v903_v21 = vld [vmem:[%s648_s21] sm:$0xff]  ;;  %v2692_v14 = vmov 0.0  }
  0x30   : > { %2281 = vmatprep.subr.bf16.mxu0 %v2280_v13  ;;  %2167 = vmatmul.mubr.msk.f32.vlgmr.msra.gmra.mrb[0].mxu1 %vm777_vm1, %v2888_v16  ;;  %v2354_v22 = vpack.c.bf16 %v2896_v20, %v2894_v19  ;;  %v904_v23 = vld [vmem:[%s648_s21 + $0x8] sm:$0xff]  ;;  %v905_v24 = vld [vmem:[%s648_s21 + $0x10] sm:$0xff]  ;;  %v906_v25 = vld [vmem:[%s648_s21 + $0x18] sm:$0xff] }
  0x31   : > { %2283 = vmatpush3.bf16.msra.mxu0 %v2280_v13  ;;  %2169 = vmatprep.mubr.msk.f32.mxu1 %vm777_vm1, %v2894_v19  ;;  %v2292_v26 = vpack.c.bf16 %v904_v23, %v903_v21  ;;  %v2296_v27 = vpack.c.bf16 %v906_v25, %v905_v24  ;;  %v1101_v37 = vld [vmem:[%s643_s22] sm:$0xff]  ;;  %v1102_v38 = vld [vmem:[%s643_s22 + $0x8] sm:$0xff]  ;;  %v1103_v39 = vld [vmem:[%s643_s22 + $0x10] sm:$0xff]  ;;  %v2690_v13 = vmov 0.0|0.0  }
  0x32   : > { %2285 = vmatprep.subr.bf16.mxu0 %v2284_v17  ;;  %1306 = vperm.xlu0 %2443, %v668_v12   ;;  %v2308_v40 = vpack.c.bf16 %v1102_v38, %v1101_v37  ;;  %v1104_v41 = vld [vmem:[%s643_s22 + $0x18] sm:$0xff]  ;;  %v1094_v44 = vld [vmem:[%s3399_s8 + $0x8] sm:$0xff]  ;;  %v1095_v46 = vld [vmem:[%s3399_s8 + $0x10] sm:$0xff]  ;;  %s2965_s22 = sand.u32 1, %s2679_s25  }
  0x33   : > { %2293 = vmatprep.subr.bf16.mxu1 %v2292_v26  ;;  %v2312_v42 = vpack.c.bf16 %v1104_v41, %v1103_v39  ;;  %v2316_v45 = vpack.c.bf16 %v1094_v44, %v1093_v43  ;;  %v1096_v47 = vld [vmem:[%s3399_s8 + $0x18] sm:$0xff]  ;;  %v1097_v49 = vld [vmem:[%s3399_s8 + $0x20] sm:$0xff]  ;;  %v1098_v50 = vld [vmem:[%s3399_s8 + $0x28] sm:$0xff]  ;;  %s2968_s23 = sshll.u32 %s2965_s22, 5  ;;  %s3054_s0 = sshll.u32 %s2965_s22, 3 }
  0x34   : > { %2170 = vmatmul.mubr.msk.f32.gmra.mrb[2].mxu1 %vm777_vm1, %v2896_v20  ;;  %v2320_v48 = vpack.c.bf16 %v1096_v47, %v1095_v46  ;;  %v2324_v51 = vpack.c.bf16 %v1098_v50, %v1097_v49  ;;  %s2978_s19 = scalar_lea.vmem [#allocation6], %s2968_s23  ;;  %v1099_v10 = vld [vmem:[%s3399_s8 + $0x30] sm:$0xff]  ;;  %v1100_v11 = vld [vmem:[%s3399_s8 + $0x38] sm:$0xff]  ;;  %s3020_s21 = scalar_lea.vmem [#allocation4], %s2968_s23  ;;  %v667_v15 = vld [vmem:[%s3356_s9] sm:$0xff] }
  0x35   : > { %2287 = vmatpush3.bf16.msra.mxu0 %v2284_v17  ;;  %2295 = vmatpush3.bf16.msra.mxu1 %v2292_v26  ;;  %v2328_v12 = vpack.c.bf16 %v1100_v11, %v1099_v10  ;;  %s3049_s27 = scalar_lea.vmem [#allocation2], %s2968_s23  ;;  %s3373_s20 = scalar_lea.vmem [#allocation12], %s3054_s0 }
  0x36   : > { %2297 = vmatprep.subr.bf16.mxu1 %v2296_v27  ;;  %2180 = vmatprep.mubr.msk.f32.mxu1 %vm679_vm0, %v2852_v2  ;;  %s1656_s23 = sshll.u32 %s3020_s21, 4  ;;  %s3083_s23 = int_to_ptr.vmem [resolvable:$true] %s1656_s23 }
  0x37   : > { %2309 = vmatprep.subr.bf16.mxu0 %v2308_v40 }
  0x38   : > { %2157 = vmatmul.mubr.msk.f32.vlgmr.msra.gmra.mrb[0].mxu0 %vm679_vm0, %v660_v30 }
  0x39   : > { %2159 = vmatprep.mubr.msk.f32.mxu0 %vm679_vm0, %v661_v31  ;;  %2299 = vmatpush3.bf16.msra.mxu1 %v2296_v27 }
  0x3a   : > { %2301 = vmatprep.subr.bf16.mxu1 %v2300_v32  ;;  %2311 = vmatpush3.bf16.msra.mxu0 %v2308_v40 }
  0x3b   : > { %2313 = vmatprep.subr.bf16.mxu0 %v2312_v42 }
  0x3c   : > { %2160 = vmatmul.mubr.msk.f32.gmra.mrb[2].mxu0 %vm679_vm0, %v662_v33  ;;  %2181 = vmatmul.mubr.msk.f32.vlgmr.msra.gmra.mrb[4].mxu1 %vm679_vm0, %v660_v30 }
  0x3d   : > { %2303 = vmatpush3.bf16.msra.mxu1 %v2300_v32  ;;  %2183 = vmatprep.mubr.msk.f32.mxu1 %vm679_vm0, %v661_v31 }
  0x3e   : > { %2208 = vmatprep.mubr.msk.f32.mxu0 %vm679_vm0, %v2852_v2  ;;  %2305 = vmatprep.subr.bf16.mxu1 %v2304_v36 }
  0x3f   : > { %2315 = vmatpush3.bf16.msra.mxu0 %v2312_v42 }
  0x40   : > { %2184 = vmatmul.mubr.msk.f32.gmra.mrb[6].mxu1 %vm679_vm0, %v662_v33  ;;  %2317 = vmatprep.subr.bf16.mxu0 %v2316_v45 }
  0x41   : > { %2307 = vmatpush3.bf16.msra.mxu1 %v2304_v36 }
  0x42   : > { %2209 = vmatmul.mubr.msk.f32.vlgmr.msra.gmra.mrb[4].mxu0 %vm679_vm0, %v660_v30  ;;  %2332 = vmatprep.subr.bf16.mxu1 %v2690_v13 }
  0x43   : > { %2319 = vmatpush3.bf16.msra.mxu0 %v2316_v45  ;;  %2211 = vmatprep.mubr.msk.f32.mxu0 %vm679_vm0, %v661_v31 }
  0x44   : > { %2321 = vmatprep.subr.bf16.mxu0 %v2320_v48 }
  0x46   : > { %2212 = vmatmul.mubr.msk.f32.gmra.mrb[6].mxu0 %vm679_vm0, %v662_v33 }
  0x47   : > { %2323 = vmatpush3.bf16.msra.mxu0 %v2320_v48 }
  0x48   : > { %2325 = vmatprep.subr.bf16.mxu0 %v2324_v51 }
  0x4b   : > { %2327 = vmatpush3.bf16.msra.mxu0 %v2324_v51 }
  0x4c   : > { %2329 = vmatprep.subr.bf16.mxu0 %v2328_v12 }
  0x4f   : > { %2331 = vmatpush3.bf16.msra.mxu0 %v2328_v12 }
  0x50   : > { %2350 = vmatprep.subr.bf16.mxu0 %v2690_v13 }
  0xa9   : > { %v2962_v54 = vpop.permute.xlu0 %877 }
  0xaa   : > { %v2970_v57 = vpop.permute.xlu1 %887 }
  0xad   : > { %v883_v61 = vpop.permute.xlu0 %882 }
  0xae   : > { %v893_v5 = vpop.permute.xlu1 %892 }
  0xb1   : > { %v3059_v35 = vpop.permute.xlu0 %1306 }
 0x103   : > { %v2168_v52 = vpop.f32.mrb[0].mxu1 }
 0x104   : > { %v856_v53 = vpop.f32.mrb[1].mxu1 }
 0x107   : > { %v2171_v55 = vpop.f32.mrb[2].mxu1 }
 0x108   : > { %v866_v56 = vpop.f32.mrb[3].mxu1 }
 0x10b   : > { %v2158_v58 = vpop.f32.mrb[0].mxu0 }
 0x10c   : > { %v862_v59 = vadd.f32 %v2168_v52, %v2158_v58  ;;  %v758_v60 = vpop.f32.mrb[1].mxu0 }
 0x10d   : > { %v857_v62 = vadd.f32 %v856_v53, %v758_v60 }
 0x10e   : > { %v2972_v63 = vadd.f32 %v883_v61, %v862_v59 }
 0x10f   : > { %v2975_v0 = vadd.f32 %v2962_v54, %v857_v62  ;;  %v2161_v1 = vpop.f32.mrb[2].mxu0 }
 0x110   : > { %1301 = vst.msk [vmem:[%s2978_s19 + $0x8] sm:$0xff] %vm679_vm0, %v2972_v63  ;;  %v872_v2 = vadd.f32 %v2171_v55, %v2161_v1  ;;  %v768_v3 = vpop.f32.mrb[3].mxu0 }
 0x111   : > { %1300 = vst.msk [vmem:[%s2978_s19] sm:$0xff] %vm679_vm0, %v2975_v0  ;;  %v2345_v4 = vpack.c.bf16 %v2972_v63, %v2975_v0  ;;  %v867_v6 = vadd.f32 %v866_v56, %v768_v3  ;;  %2194 = vmatprep.mubr.msk.f32.mxu1 %vm679_vm0, %v2975_v0 }
 0x112   : > { %v2990_v7 = vadd.f32 %v893_v5, %v872_v2  ;;  %2195 = vmatmul.mubr.msk.f32.vlgmr.msra.gmra.mrb[4].mxu1 %vm679_vm0, %v2972_v63 }
 0x113   : > { %v2995_v8 = vadd.f32 %v2970_v57, %v867_v6 }
 0x114   : > { %1303 = vst.msk [vmem:[%s2978_s19 + $0x18] sm:$0xff] %vm679_vm0, %v2990_v7 }
 0x115   : > { %1302 = vst.msk [vmem:[%s2978_s19 + $0x10] sm:$0xff] %vm679_vm0, %v2995_v8  ;;  %v2348_v9 = vpack.c.bf16 %v2990_v7, %v2995_v8  ;;  %2197 = vmatprep.mubr.msk.f32.mxu1 %vm679_vm0, %v2995_v8 }
 0x116   : > { %2198 = vmatmul.mubr.msk.f32.gmra.mrb[6].mxu1 %vm679_vm0, %v2990_v7 }
 0x117   : > { %2244 = vmatprep.mubr.msk.f32.mxu1 %vm2691_vm2, %v2692_v14 }
 0x1e5   : > { %v2196_v17 = vpop.f32.mrb[4].mxu1 }
 0x1e6   : > { %v1090_v21 = vadd.f32 %v2196_v17, %v883_v61  ;;  %v1070_v23 = vpop.f32.mrb[5].mxu1 }
 0x1e7   : > { %v1089_v24 = vadd.f32 %v1070_v23, %v2962_v54 }
 0x1e8   : > { %1297 = vst.msk [vmem:[%s3020_s21 + $0x8] sm:$0xff] %vm1190_vm3, %v1090_v21 }
 0x1e9   : > { %1296 = vst.msk [vmem:[%s3020_s21] sm:$0xff] %vm1190_vm3, %v1089_v24  ;;  %v2339_v25 = vpack.c.bf16 %v1090_v21, %v1089_v24  ;;  %v2199_v26 = vpop.f32.mrb[6].mxu1  ;;  %2230 = vmatprep.mubr.msk.f32.mxu0 %vm1190_vm3, %v1089_v24 }
 0x1ea   : > { %v1092_v27 = vadd.f32 %v2199_v26, %v893_v5  ;;  %v1080_v28 = vpop.f32.mrb[7].mxu1  ;;  %2231 = vmatmul.mubr.msk.f32.vlgmr.msra.gmra.mrb[4].mxu0 %vm1190_vm3, %v1090_v21 }
 0x1eb   : > { %v1091_v29 = vadd.f32 %v1080_v28, %v2970_v57  ;;  %2352 = vmatpush3.bf16.msra.mxu0 %v2351_v18 }
 0x1ec   : > { %1299 = vst.msk [vmem:[%s3020_s21 + $0x18] sm:$0xff] %vm1190_vm3, %v1092_v27  ;;  %2353 = vmatprep.subr.bf16.mxu0 %v2690_v13 }
 0x1ed   : > { %1298 = vst.msk [vmem:[%s3020_s21 + $0x10] sm:$0xff] %vm1190_vm3, %v1091_v29  ;;  %v2342_v30 = vpack.c.bf16 %v1092_v27, %v1091_v29  ;;  %2233 = vmatprep.mubr.msk.f32.mxu0 %vm1190_vm3, %v1091_v29  ;;  %s2693_s21 = smov [#allocation4]  }
 0x1ee   : > { %2234 = vmatmul.mubr.msk.f32.gmra.mrb[6].mxu0 %vm1190_vm3, %v1092_v27  ;;  %s2449_s2 = sshll.u32 %s2693_s21, 4  ;;  %s2450_s2 = int_to_ptr.vmem [resolvable:$false] %s2449_s2 }
 0x1ef   : > { %2355 = vmatpush3.bf16.msra.mxu0 %v2354_v22  ;;  %2277 = vmatprep.mubr.msk.f32.mxu0 %vm2691_vm2, %v2692_v14  ;;  %s2451_s3 = scalar_lea.vmem %s2450_s2, 1024  ;;  %p2452_p0 = scmp.lt.s32.totalorder %s3083_s23, %s2450_s2 }
 0x1f2   : > { %2278 = vmatmul.mubr.msk.f32.vlgmr.msra.gmra.mrb[8].mxu0 %vm679_vm0, %v667_v15 }
 0x2bd   : > { %v2232_v16 = vpop.f32.mrb[4].mxu0 }
 0x2be   : > { %v1289_v18 = vadd.f32 %v2232_v16, %v883_v61  ;;  %v1269_v31 = vpop.f32.mrb[5].mxu0 }
 0x2bf   : > { %v1288_v32 = vadd.f32 %v1269_v31, %v2962_v54 }
 0x2c0   : > { %1293 = vst [vmem:[%s3049_s27 + $0x8] sm:$0xff] %v1289_v18 }
 0x2c1   : > { %1292 = vst [vmem:[%s3049_s27] sm:$0xff] %v1288_v32  ;;  %v2333_v19 = vpack.c.bf16 %v1289_v18, %v1288_v32  ;;  %v2235_v20 = vpop.f32.mrb[6].mxu0 }
 0x2c2   : > { %v1291_v22 = vadd.f32 %v2235_v20, %v893_v5  ;;  %v1279_v33 = vpop.f32.mrb[7].mxu0 }
 0x2c3   : > { %v1290_v34 = vadd.f32 %v1279_v33, %v2970_v57  ;;  %2334 = vmatpush3.bf16.msra.mxu1 %v2333_v19 }
 0x2c4   : > { %1295 = vst [vmem:[%s3049_s27 + $0x18] sm:$0xff] %v1291_v22  ;;  %2335 = vmatprep.subr.bf16.mxu1 %v2690_v13 }
 0x2c5   : > { %1294 = vst [vmem:[%s3049_s27 + $0x10] sm:$0xff] %v1290_v34  ;;  %v2336_v36 = vpack.c.bf16 %v1291_v22, %v1290_v34  ;;  %v1591_v37 = vpop.f32.mrb[8].mxu0 }
 0x2c6   : > { %v1592_v38 = vadd.f32 %v1591_v37, %v3059_v35  ;;  %v2279_v39 = vpop.f32.mrb[9].mxu0 }
 0x2c7   : > { %2337 = vmatpush3.bf16.msra.mxu1 %v2336_v36 }
 0x2c8   : > { %1595 = vst.msk [vmem:[%s3373_s20] sm:$0xff] %vm777_vm1, %v1592_v38  ;;  %2338 = vmatprep.subr.bf16.mxu1 %v2690_v13  ;;  %s2445_s20 = scalar_lea.vmem %s3083_s23, 512 }
 0x2c9   : > { %p2446_p11 = scmp.ne.s32.totalorder %s3083_s23, %s2445_s20  ;;  %p2453_p1 = scmp.lt.s32.totalorder %s2451_s3, %s2445_s20 }
 0x2ca   : > { %2245 = vmatmul.mubr.msk.f32.vlgmr.msra.gmra.mrb[8].mxu1 %vm679_vm0, %v667_v15 }
 0x2cb   : > { %2340 = vmatpush3.bf16.msra.mxu1 %v2339_v25  ;;  %2255 = vmatprep.mubr.msk.f32.mxu1 %vm2691_vm2, %v2692_v14  ;;  %p2447_p12 = pnand %p2446_p11, %p2832_p5  ;;  %p2454_p2 = por %p2453_p1, %p2452_p0 }
 0x2cc   : > { %2341 = vmatprep.subr.bf16.mxu1 %v2690_v13 }
 0x2cd   : > { %p2448_p13 = pneg %p2447_p12 }
 0x2cf   : > { %2343 = vmatpush3.bf16.msra.mxu1 %v2342_v30  ;;  %p2455_p3 = pnand %p2454_p2, %p2448_p13 }
 0x2d0   : > { %2344 = vmatprep.subr.bf16.mxu1 %v2690_v13 }
 0x2d2   : > { %2256 = vmatmul.mubr.msk.f32.vlgmr.msra.gmra.mrb[10].mxu1 %vm679_vm0, %v667_v15 }
 0x2d3   : > { %2346 = vmatpush3.bf16.msra.mxu1 %v2345_v4  ;;  %2266 = vmatprep.mubr.msk.f32.mxu1 %vm2691_vm2, %v2692_v14 }
 0x2d4   : > { %2347 = vmatprep.subr.bf16.mxu1 %v2690_v13 }
 0x2d7   : > { %2349 = vmatpush3.bf16.msra.mxu1 %v2348_v9 }
 0x2da   : > { %2267 = vmatmul.mubr.msk.f32.vlgmr.msra.gmra.mrb[12].mxu1 %vm679_vm0, %v667_v15 }
 0x2db   : > { %2458 = shalt.err (!%p2455_p3)
}
 0x2dc   : > { %s2459_s26 = scalar_lea.hbm %s3095_s6, 512  ;;  %s2463_s21 = scalar_lea.hbm %s3359_s12, 1024 }
 0x2dd   : > { %p2460_p4 = scmp.ne.s32.totalorder %s3095_s6, %s2459_s26  ;;  %p2464_p9 = scmp.lt.u32.totalorder %s3095_s6, %s3359_s12 }
 0x2de   : > { %p2465_p10 = scmp.lt.u32.totalorder %s2463_s21, %s2459_s26  ;;  %p2467_p12 = scmp.lt.u32.totalorder %s2459_s26, %s3095_s6 }
 0x2df   : > { %p2461_p7 = pnand %p2460_p4, %p2832_p5 }
 0x2e0   : > { %p2466_p11 = por %p2465_p10, %p2464_p9 }
 0x2e1   : > { %p2462_p8 = pneg %p2461_p7 }
 0x2e2   : > { %p2468_p13 = por %p2467_p12, %p2466_p11 }
 0x2e4   : > { %p2469_p0 = pnand %p2468_p13, %p2462_p8 }
 0x2e6   : > { %2472 = shalt.err (!%p2469_p0)
}
 0x2e7   : > { %s2694_s3 = smov 128   ;;  %s2695_s20 = smov 8  }
 0x2e8   : > { %s3400_s4 = scalar_lea.sflag [#allocation5], %s3086_s30  ;;  %s1672_s24 = sshll.u32 %s2978_s19, 4  ;;  %s3126_s24 = int_to_ptr.vmem [resolvable:$true] %s1672_s24 }
 0x2e9   : > { %2369 = dma.vmem_to_hbm [thread:$0]  (%p2832_p5), %s3083_s23, 512, %s3095_s6, %s3400_s4, %s2694_s3, %s2694_s3, %s2695_s20  }
 0x2ea   : > { %s1640_s26 = sshll.u32 %s3049_s27, 4  ;;  %s3134_s2 = scalar_lea.hbm %s3360_s13, %s3089_s18  ;;  %s3128_s26 = int_to_ptr.vmem [resolvable:$true] %s1640_s26 }
 0x2eb   : > { %s3140_s8 = scalar_lea.hbm %s3358_s11, %s3089_s18  ;;  %s1597_s23 = scalar_lea.sflag [#allocation3], %s2965_s22 }
 0x2ec   : > { %s2473_s19 = scalar_lea.vmem %s3128_s26, 512  ;;  %s2696_s27 = smov [#allocation2]  }
 0x2ed   : > { %p2474_p1 = scmp.ne.s32.totalorder %s3128_s26, %s2473_s19  ;;  %s2477_s6 = sshll.u32 %s2696_s27, 4  ;;  %s2478_s6 = int_to_ptr.vmem [resolvable:$false] %s2477_s6 }
 0x2ee   : > { %s2479_s4 = scalar_lea.vmem %s2478_s6, 1024  ;;  %p2480_p4 = scmp.lt.s32.totalorder %s3128_s26, %s2478_s6 }
 0x2ef   : > { %p2475_p2 = pnand %p2474_p1, %p2832_p5  ;;  %p2481_p7 = scmp.lt.s32.totalorder %s2479_s4, %s2473_s19 }
 0x2f1   : > { %p2476_p3 = pneg %p2475_p2  ;;  %p2482_p8 = por %p2481_p7, %p2480_p4 }
 0x2f3   : > { %p2483_p9 = pnand %p2482_p8, %p2476_p3 }
 0x2f5   : > { %2486 = shalt.err (!%p2483_p9)
}
 0x2f6   : > { %s2487_s5 = scalar_lea.hbm %s3140_s8, 512  ;;  %s2491_s29 = scalar_lea.hbm %s3358_s11, 1024 }
 0x2f7   : > { %p2488_p10 = scmp.ne.s32.totalorder %s3140_s8, %s2487_s5  ;;  %p2492_p13 = scmp.lt.u32.totalorder %s3140_s8, %s3358_s11 }
 0x2f8   : > { %p2493_p0 = scmp.lt.u32.totalorder %s2491_s29, %s2487_s5  ;;  %p2495_p2 = scmp.lt.u32.totalorder %s2487_s5, %s3140_s8 }
 0x2f9   : > { %p2489_p11 = pnand %p2488_p10, %p2832_p5 }
 0x2fa   : > { %p2494_p1 = por %p2493_p0, %p2492_p13 }
 0x2fb   : > { %p2490_p12 = pneg %p2489_p11 }
 0x2fc   : > { %p2496_p3 = por %p2495_p2, %p2494_p1 }
 0x2fe   : > { %p2497_p4 = pnand %p2496_p3, %p2490_p12 }
 0x300   : > { %2500 = shalt.err (!%p2497_p4)
}
 0x301   : > { %2368 = dma.vmem_to_hbm [thread:$0]  (%p2832_p5), %s3128_s26, 512, %s3140_s8, %s1597_s23, %s2694_s3, %s2694_s3, %s2695_s20  }
 0x302   : > { %s2501_s19 = scalar_lea.vmem %s3126_s24, 512  ;;  %s2697_s6 = smov [#allocation6]  }
 0x303   : > { %p2502_p7 = scmp.ne.s32.totalorder %s3126_s24, %s2501_s19  ;;  %s2505_s4 = sshll.u32 %s2697_s6, 4  ;;  %s2506_s4 = int_to_ptr.vmem [resolvable:$false] %s2505_s4 }
 0x304   : > { %s2507_s5 = scalar_lea.vmem %s2506_s4, 1024  ;;  %p2508_p10 = scmp.lt.s32.totalorder %s3126_s24, %s2506_s4 }
 0x305   : > { %p2503_p8 = pnand %p2502_p7, %p2832_p5  ;;  %p2509_p11 = scmp.lt.s32.totalorder %s2507_s5, %s2501_s19 }
 0x307   : > { %p2504_p9 = pneg %p2503_p8  ;;  %p2510_p12 = por %p2509_p11, %p2508_p10 }
 0x309   : > { %p2511_p13 = pnand %p2510_p12, %p2504_p9 }
 0x30b   : > { %2514 = shalt.err (!%p2511_p13)
}
 0x30c   : > { %s2515_s8 = scalar_lea.hbm %s3134_s2, 512  ;;  %s2519_s23 = scalar_lea.hbm %s3360_s13, 1024 }
 0x30d   : > { %p2516_p0 = scmp.ne.s32.totalorder %s3134_s2, %s2515_s8  ;;  %p2520_p3 = scmp.lt.u32.totalorder %s3134_s2, %s3360_s13 }
 0x30e   : > { %p2521_p4 = scmp.lt.u32.totalorder %s2519_s23, %s2515_s8  ;;  %p2523_p8 = scmp.lt.u32.totalorder %s2515_s8, %s3134_s2 }
 0x30f   : > { %p2517_p1 = pnand %p2516_p0, %p2832_p5 }
 0x310   : > { %p2522_p7 = por %p2521_p4, %p2520_p3 }
 0x311   : > { %p2518_p2 = pneg %p2517_p1 }
 0x312   : > { %p2524_p9 = por %p2523_p8, %p2522_p7 }
 0x314   : > { %p2525_p10 = pnand %p2524_p9, %p2518_p2 }
 0x316   : > { %2528 = shalt.err (!%p2525_p10)
}
 0x317   : > { %s3401_s29 = scalar_lea.sflag [#allocation5], %s3086_s30  ;;  %s3196_s21 = sshll.u32 %s2813_s28, 7 }
 0x318   : > { %2370 = dma.vmem_to_hbm [thread:$0]  (%p2832_p5), %s3126_s24, 512, %s3134_s2, %s3401_s29, %s2694_s3, %s2694_s3, %s2695_s20  }
 0x319   : > { %s617_s27 = scalar_lea.vmem [#allocation7], %s3054_s0  ;;  %s3204_s5 = scalar_lea.hbm %s3361_s14, %s3196_s21 }
 0x31a   : > { %s1688_s19 = sshll.u32 %s617_s27, 4  ;;  %s1612_s28 = scalar_lea.sflag [#allocation8], %s3086_s30  ;;  %s3206_s19 = int_to_ptr.vmem [resolvable:$true] %s1688_s19 }
 0x31b   : > { %s2529_s3 = scalar_lea.vmem %s3206_s19, 128  ;;  %s2698_s20 = smov [#allocation7]  }
 0x31c   : > { %p2530_p11 = scmp.ne.s32.totalorder %s3206_s19, %s2529_s3  ;;  %s2533_s24 = sshll.u32 %s2698_s20, 4  ;;  %s2534_s24 = int_to_ptr.vmem [resolvable:$false] %s2533_s24 }
 0x31d   : > { %s2535_s2 = scalar_lea.vmem %s2534_s24, 256  ;;  %p2536_p0 = scmp.lt.s32.totalorder %s3206_s19, %s2534_s24 }
 0x31e   : > { %p2531_p12 = pnand %p2530_p11, %p2832_p5  ;;  %p2537_p1 = scmp.lt.s32.totalorder %s2535_s2, %s2529_s3 }
 0x320   : > { %p2532_p13 = pneg %p2531_p12  ;;  %p2538_p2 = por %p2537_p1, %p2536_p0 }
 0x322   : > { %p2539_p3 = pnand %p2538_p2, %p2532_p13 }
 0x39d   : > { %v1378_v40 = vpop.f32.mrb[8].mxu1 }
 0x39e   : > { %v1379_v41 = vadd.f32 %v1378_v40, %v3059_v35  ;;  %v2246_v42 = vpop.f32.mrb[9].mxu1 }
 0x3a0   : > { %1382 = vst [vmem:[%s617_s27] sm:$0xff] %v1379_v41 }
 0x3a1   : > { %2542 = shalt.err (!%p2539_p3)
}
 0x3a2   : > { %s2543_s8 = scalar_lea.hbm %s3204_s5, 128  ;;  %s2547_s23 = scalar_lea.hbm %s3361_s14, 256 }
 0x3a3   : > { %p2544_p4 = scmp.ne.s32.totalorder %s3204_s5, %s2543_s8  ;;  %p2548_p9 = scmp.lt.u32.totalorder %s3204_s5, %s3361_s14 }
 0x3a4   : > { %p2549_p10 = scmp.lt.u32.totalorder %s2547_s23, %s2543_s8  ;;  %p2551_p12 = scmp.lt.u32.totalorder %s2543_s8, %s3204_s5 }
 0x3a5   : > { %p2545_p7 = pnand %p2544_p4, %p2832_p5 }
 0x3a6   : > { %p2550_p11 = por %p2549_p10, %p2548_p9 }
 0x3a7   : > { %p2546_p8 = pneg %p2545_p7 }
 0x3a8   : > { %p2552_p13 = por %p2551_p12, %p2550_p11 }
 0x3aa   : > { %p2553_p0 = pnand %p2552_p13, %p2546_p8 }
 0x3ac   : > { %2556 = shalt.err (!%p2553_p0)
}
 0x3ad   : > { %2371 = dma.vmem_to_hbm [thread:$0]  (%p2832_p5), %s3206_s19, 128, %s3204_s5, %s1612_s28   ;;  %v1449_v43 = vpop.f32.mrb[10].mxu1 }
 0x3ae   : > { %s624_s29 = scalar_lea.vmem [#allocation9], %s3054_s0  ;;  %v1450_v44 = vadd.f32 %v1449_v43, %v3059_v35  ;;  %v2257_v45 = vpop.f32.mrb[11].mxu1  ;;  %s3238_s3 = scalar_lea.hbm %s3362_s15, %s3196_s21 }
 0x3af   : > { %s1701_s27 = sshll.u32 %s624_s29, 4  ;;  %s2699_s19 = smov [#allocation9]   ;;  %s1702_s27 = int_to_ptr.vmem [resolvable:$true] %s1701_s27 }
 0x3b0   : > { %1453 = vst.msk [vmem:[%s624_s29] sm:$0xff] %vm1190_vm3, %v1450_v44  ;;  %s2557_s20 = scalar_lea.vmem %s1702_s27, 128  ;;  %s2561_s5 = sshll.u32 %s2699_s19, 4  ;;  %s2562_s5 = int_to_ptr.vmem [resolvable:$false] %s2561_s5 }
 0x3b1   : > { %p2558_p1 = scmp.ne.s32.totalorder %s1702_s27, %s2557_s20  ;;  %s2563_s24 = scalar_lea.vmem %s2562_s5, 256 }
 0x3b2   : > { %p2564_p4 = scmp.lt.s32.totalorder %s1702_s27, %s2562_s5  ;;  %p2565_p7 = scmp.lt.s32.totalorder %s2563_s24, %s2557_s20 }
 0x3b3   : > { %p2559_p2 = pnand %p2558_p1, %p2832_p5 }
 0x3b4   : > { %p2566_p8 = por %p2565_p7, %p2564_p4 }
 0x3b5   : > { %p2560_p3 = pneg %p2559_p2 }
 0x3b7   : > { %p2567_p9 = pnand %p2566_p8, %p2560_p3 }
 0x3b9   : > { %2570 = shalt.err (!%p2567_p9)
}
 0x3ba   : > { %s2571_s2 = scalar_lea.hbm %s3238_s3, 128  ;;  %s2575_s26 = scalar_lea.hbm %s3362_s15, 256 }
 0x3bb   : > { %p2572_p10 = scmp.ne.s32.totalorder %s3238_s3, %s2571_s2  ;;  %p2576_p13 = scmp.lt.u32.totalorder %s3238_s3, %s3362_s15 }
 0x3bc   : > { %p2577_p0 = scmp.lt.u32.totalorder %s2575_s26, %s2571_s2  ;;  %p2579_p2 = scmp.lt.u32.totalorder %s2571_s2, %s3238_s3 }
 0x3bd   : > { %p2573_p11 = pnand %p2572_p10, %p2832_p5 }
 0x3be   : > { %p2578_p1 = por %p2577_p0, %p2576_p13 }
 0x3bf   : > { %p2574_p12 = pneg %p2573_p11 }
 0x3c0   : > { %p2580_p3 = por %p2579_p2, %p2578_p1 }
 0x3c2   : > { %p2581_p4 = pnand %p2580_p3, %p2574_p12 }
 0x3c4   : > { %2584 = shalt.err (!%p2581_p4)
}
 0x3c5   : > { %2372 = dma.vmem_to_hbm [thread:$0]  (%p2832_p5), %s1702_s27, 128, %s3238_s3, %s1612_s28   ;;  %v1520_v46 = vpop.f32.mrb[12].mxu1 }
 0x3c6   : > { %s631_s18 = scalar_lea.vmem [#allocation10], %s3054_s0  ;;  %s3402_s6 = scalar_lea.vmem [#allocation12], %s3054_s0  ;;  %v1521_v47 = vadd.f32 %v1520_v46, %v3059_v35  ;;  %v2268_v48 = vpop.f32.mrb[13].mxu1 }
 0x3c7   : > { %s1714_s29 = sshll.u32 %s631_s18, 4  ;;  %s1727_s4 = sshll.u32 %s3402_s6, 4  ;;  %s3270_s29 = int_to_ptr.vmem [resolvable:$true] %s1714_s29  ;;  %s3278_s4 = int_to_ptr.vmem [resolvable:$true] %s1727_s4 }
 0x3c8   : > { %s3268_s5 = scalar_lea.hbm %s3363_s16, %s3196_s21  ;;  %s3276_s28 = scalar_lea.hbm %s3364_s17, %s3196_s21  ;;  %1524 = vst.msk [vmem:[%s631_s18] sm:$0xff] %vm679_vm0, %v1521_v47 }
 0x3c9   : > { %s1622_s0 = scalar_lea.sflag [#allocation11], %s3086_s30  ;;  %s2585_s27 = scalar_lea.vmem %s3270_s29, 128 }
 0x3ca   : > { %p2586_p7 = scmp.ne.s32.totalorder %s3270_s29, %s2585_s27  ;;  %s2700_s3 = smov [#allocation10]  }
 0x3cb   : > { %s2589_s8 = sshll.u32 %s2700_s3, 4  ;;  %s2590_s8 = int_to_ptr.vmem [resolvable:$false] %s2589_s8 }
 0x3cc   : > { %p2587_p8 = pnand %p2586_p7, %p2832_p5  ;;  %s2591_s22 = scalar_lea.vmem %s2590_s8, 256 }
 0x3cd   : > { %p2592_p10 = scmp.lt.s32.totalorder %s3270_s29, %s2590_s8  ;;  %p2593_p11 = scmp.lt.s32.totalorder %s2591_s22, %s2585_s27 }
 0x3ce   : > { %p2588_p9 = pneg %p2587_p8 }
 0x3cf   : > { %p2594_p12 = por %p2593_p11, %p2592_p10 }
 0x3d1   : > { %p2595_p13 = pnand %p2594_p12, %p2588_p9 }
 0x3d3   : > { %2598 = shalt.err (!%p2595_p13)
}
 0x3d4   : > { %s2599_s21 = scalar_lea.hbm %s3268_s5, 128  ;;  %s2603_s7 = scalar_lea.hbm %s3363_s16, 256 }
 0x3d5   : > { %p2600_p0 = scmp.ne.s32.totalorder %s3268_s5, %s2599_s21  ;;  %p2604_p3 = scmp.lt.u32.totalorder %s3268_s5, %s3363_s16 }
 0x3d6   : > { %p2605_p4 = scmp.lt.u32.totalorder %s2603_s7, %s2599_s21  ;;  %p2607_p8 = scmp.lt.u32.totalorder %s2599_s21, %s3268_s5 }
 0x3d7   : > { %p2601_p1 = pnand %p2600_p0, %p2832_p5 }
 0x3d8   : > { %p2606_p7 = por %p2605_p4, %p2604_p3 }
 0x3d9   : > { %p2602_p2 = pneg %p2601_p1 }
 0x3da   : > { %p2608_p9 = por %p2607_p8, %p2606_p7 }
 0x3dc   : > { %p2609_p10 = pnand %p2608_p9, %p2602_p2 }
 0x3de   : > { %2612 = shalt.err (!%p2609_p10)
}
 0x3df   : > { %2373 = dma.vmem_to_hbm [thread:$0]  (%p2832_p5), %s3270_s29, 128, %s3268_s5, %s1622_s0  }
 0x3e0   : > { %s2613_s20 = scalar_lea.vmem %s3278_s4, 128  ;;  %s2701_s19 = smov [#allocation12]  }
 0x3e1   : > { %p2614_p11 = scmp.ne.s32.totalorder %s3278_s4, %s2613_s20  ;;  %s2617_s24 = sshll.u32 %s2701_s19, 4  ;;  %s2618_s24 = int_to_ptr.vmem [resolvable:$false] %s2617_s24 }
 0x3e2   : > { %s2619_s2 = scalar_lea.vmem %s2618_s24, 256  ;;  %p2620_p0 = scmp.lt.s32.totalorder %s3278_s4, %s2618_s24 }
 0x3e3   : > { %p2615_p12 = pnand %p2614_p11, %p2832_p5  ;;  %p2621_p1 = scmp.lt.s32.totalorder %s2619_s2, %s2613_s20 }
 0x3e5   : > { %p2616_p13 = pneg %p2615_p12  ;;  %p2622_p2 = por %p2621_p1, %p2620_p0 }
 0x3e7   : > { %p2623_p3 = pnand %p2622_p2, %p2616_p13 }
 0x3e9   : > { %2626 = shalt.err (!%p2623_p3)
}
 0x3ea   : > { %s2627_s29 = scalar_lea.hbm %s3276_s28, 128  ;;  %s2631_s3 = scalar_lea.hbm %s3364_s17, 256 }
 0x3eb   : > { %p2628_p4 = scmp.ne.s32.totalorder %s3276_s28, %s2627_s29  ;;  %p2632_p9 = scmp.lt.u32.totalorder %s3276_s28, %s3364_s17 }
 0x3ec   : > { %p2633_p10 = scmp.lt.u32.totalorder %s2631_s3, %s2627_s29  ;;  %p2635_p12 = scmp.lt.u32.totalorder %s2627_s29, %s3276_s28 }
 0x3ed   : > { %p2629_p7 = pnand %p2628_p4, %p2832_p5 }
 0x3ee   : > { %p2634_p11 = por %p2633_p10, %p2632_p9 }
 0x3ef   : > { %p2630_p8 = pneg %p2629_p7 }
 0x3f0   : > { %p2636_p13 = por %p2635_p12, %p2634_p11 }
 0x3f2   : > { %p2637_p0 = pnand %p2636_p13, %p2630_p8 }
 0x3f4   : > { %2640 = shalt.err (!%p2637_p0)
}
 0x3f5   : > { %2374 = dma.vmem_to_hbm [thread:$0]  (%p2832_p5), %s3278_s4, 128, %s3276_s28, %s1622_s0  }
 0x3f6 PF: > { %s3403_s21 = sld [smem:[#allocation19_spill]]  ;;  %s3404_s26 = sld [smem:[#allocation17_spill]] }
 0x3fc   : > { %p2404_p1 = scmp.ge.s32.totalorder %s3403_s21, 2  ;;  %s1739_s7 = sand.u32 1, %s3404_s26  }
 0x3fd   : > { %s1740_s18 = scalar_lea.sflag [#allocation3], %s1739_s7 }
 0x3fe   : > { %p2383_p2 = pnand %p2404_p1, %p2836_p6 }
 0x400   : > { %2658 = dma.done.wait (!%p2383_p2), %s1740_s18, 512  }
 0x401   : > { %2660 = vsyncadd (!%p2383_p2), %s1740_s18, 4294966784  ;;  %s3406_s6 = sadd.s32 4294967294, %s3403_s21  }
 0x402   : > { %s1748_s20 = sand.u32 1, %s3406_s6  }
 0x403   : > { %s1749_s1 = scalar_lea.sflag [#allocation5], %s1748_s20 }
 0x404   : > { %2662 = dma.done.wait (!%p2383_p2), %s1749_s1, 1024  }
 0x405   : > { %2664 = vsyncadd (!%p2383_p2), %s1749_s1, 4294966272  ;;  %s1767_s30 = scalar_lea.sflag [#allocation8], %s1748_s20 }
 0x406   : > { %2666 = dma.done.wait (!%p2383_p2), %s1767_s30, 256  }
 0x407   : > { %2668 = vsyncadd (!%p2383_p2), %s1767_s30, 4294967040  ;;  %s1785_s4 = scalar_lea.sflag [#allocation11], %s1748_s20 }
 0x408   : > { %2670 = dma.done.wait (!%p2383_p2), %s1785_s4, 256  }
 0x409   : > { %2672 = vsyncadd (!%p2383_p2), %s1785_s4, 4294967040  ;;  %s3407_s27 = sld [smem:[#allocation20_spill]]  ;;  %s3408_s28 = sld [smem:[#allocation18_spill]] }
 0x40a   : > { %s3409_s26 = sld [smem:[#allocation21_spill]]  ;;  %s3410_s24 = smov %s2679_s25 }
 0x40f   : > { %p37_p5 = scmp.ge.s32.totalorder %s3407_s27, 4   ;;  %s3411_s25 = smov %s3408_s28 }
 0x411   :  { %39 = sbr.rel (!%p37_p5) target bundleno = 19 (0x13), region = 204 }
 0x418   :  { %1799 = vsyncpa [#allocation3], 1 }
 0x419   :  { %1801 = vsyncpa [#allocation3 + $0x1], 1 }
 0x41a   :  { %1802 = vsyncpa [#allocation5], 1 }
 0x41b   :  { %1804 = vsyncpa [#allocation5 + $0x1], 1 }
 0x41c   :  { %1805 = vsyncpa [#allocation8], 1 }
 0x41d   :  { %1807 = vsyncpa [#allocation8 + $0x1], 1 }
 0x41e   :  { %1808 = vsyncpa [#allocation11], 1 }
 0x41f   :  { %1810 = vsyncpa [#allocation11 + $0x1], 1 }

// kernel: mstr_forward.14
= control target key start
LH: loop header
LB: loop body
LE: loop exit
PB: predicated region body
PF: predicated region fallthrough
CT: control target
= control target key end

     0   :  { %s2544_s17 = smov 0   ;;  %s2919_s0 = inlined_call_operand.vmem [shape: f32[2,64,128], index: 0, kind: input, shape index: {}]   ;;  %s2920_s1 = inlined_call_operand.vmem [shape: f32[32,64], index: 1, kind: input, shape index: {}]   ;;  %s2921_s2 = inlined_call_operand.vmem [shape: f32[32,1], index: 2, kind: input, shape index: {}]   ;;  %s2922_s3 = inlined_call_operand.vmem [shape: f32[6,32,32], index: 3, kind: input, shape index: {}]   ;;  %s2923_s4 = inlined_call_operand.vmem [shape: f32[2,32,1], index: 4, kind: input, shape index: {}]   ;;  %s2924_s5 = inlined_call_operand.vmem [shape: f32[2,32,32], index: 5, kind: input, shape index: {}]   ;;  %s2925_s6 = inlined_call_operand.vmem [shape: f32[2,32,1], index: 6, kind: input, shape index: {}]   ;;  %s2926_s7 = inlined_call_operand.vmem [shape: f32[128,8], index: 7, kind: input, shape index: {}]   ;;  %s2927_s8 = inlined_call_operand.vmem [shape: f32[8,32], index: 8, kind: input, shape index: {}]   ;;  %s2928_s9 = inlined_call_operand.vmem [shape: f32[8,1], index: 9, kind: input, shape index: {}]   ;;  %s2929_s10 = inlined_call_operand.vmem [shape: f32[2,32,8], index: 10, kind: output, shape index: {0}]   ;;  %s2930_s11 = inlined_call_operand.vmem [shape: f32[2,8,8], index: 11, kind: output, shape index: {1}]  }
   0x1 LB: > { %s1853_s18 = sadd.s32 4294967295, %s2475_s17   ;;  %p1857_p0 = scmp.ge.s32.totalorder %s2475_s17, 1  ;;  %s2475_s17 = sphi %s2544_s17, %s22_s17  }
   0x2   : > { %p340_p1 = scmp.lt.s32.totalorder %s2475_s17, 3 }
   0x4   : > { %p341_p2 = pnand %p1857_p0, %p340_p1 }
   0x5   : > { %v406_v0 = vld [vmem:[%s2926_s7] sm:$0xff] (!%p341_p2)  ;;  %v407_v1 = vld [vmem:[%s2926_s7 + $0x8] sm:$0xff] (!%p341_p2)  ;;  %v408_v2 = vld [vmem:[%s2926_s7 + $0x10] sm:$0xff] (!%p341_p2)  ;;  %p384_p3 = scmp.lt.s32.totalorder (!%p341_p2), %s1853_s18, 1  ;;  %vm555_vm0 = vcmask (!%p341_p2), 523264   ;;  %v2477_v35 = vmov (!%p341_p2), 0  }
   0x6   : > { %344 = sbr.rel (%p341_p2) target bundleno = 1888 (0x760), region = 60  ;;  %v2262_v3 = vpack.c.bf16 (!%p341_p2), %v407_v1, %v406_v0  ;;  %v409_v4 = vld [vmem:[%s2926_s7 + $0x18] sm:$0xff] (!%p341_p2)  ;;  %v410_v6 = vld [vmem:[%s2926_s7 + $0x20] sm:$0xff] (!%p341_p2)  ;;  %v411_v7 = vld [vmem:[%s2926_s7 + $0x28] sm:$0xff] (!%p341_p2)  ;;  %2427 = vset.pattern.permute.xlu0 (!%p341_p2), %v2477_v35  ;;  %2428 = vset.pattern.permute.xlu1 (!%p341_p2), %v2477_v35  ;;  %vm701_vm1 = vcmask (!%p341_p2), 261120   ;;  %s2478_s23 = smov (!%p341_p2), 1  }
   0x7   : > { %v2266_v5 = vpack.c.bf16 (!%p341_p2), %v409_v4, %v408_v2  ;;  %v2270_v8 = vpack.c.bf16 (!%p341_p2), %v411_v7, %v410_v6  ;;  %v412_v9 = vld [vmem:[%s2926_s7 + $0x30] sm:$0xff] (!%p341_p2)  ;;  %v413_v10 = vld [vmem:[%s2926_s7 + $0x38] sm:$0xff] (!%p341_p2)  ;;  %v414_v13 = vld [vmem:[%s2926_s7 + $0x40] sm:$0xff] (!%p341_p2)  ;;  %s2479_s24 = smov (!%p341_p2), 2   ;;  %vm669_vm2 = vcmask (!%p341_p2), 7168   ;;  %vm686_vm5 = vcmask (!%p341_p2), 15360  }
   0x8   : > { %2263 = vmatprep.subr.bf16.mxu0 (!%p341_p2), %v2262_v3  ;;  %v2274_v12 = vpack.c.bf16 (!%p341_p2), %v413_v10, %v412_v9  ;;  %v415_v14 = vld [vmem:[%s2926_s7 + $0x48] sm:$0xff] (!%p341_p2)  ;;  %v416_v16 = vld [vmem:[%s2926_s7 + $0x50] sm:$0xff] (!%p341_p2)  ;;  %v417_v17 = vld [vmem:[%s2926_s7 + $0x58] sm:$0xff] (!%p341_p2)  ;;  %s2480_s25 = smov (!%p341_p2), 4   ;;  %vm1198_vm8 = vcmask (!%p341_p2), 31744   ;;  %vm2482_vm11 = vmmov (!%p341_p2), 0  }
   0x9   : > { %2265 = vmatpush3.bf16.msra.mxu0 (!%p341_p2), %v2262_v3  ;;  %v2278_v15 = vpack.c.bf16 (!%p341_p2), %v415_v14, %v414_v13  ;;  %v2282_v18 = vpack.c.bf16 (!%p341_p2), %v417_v17, %v416_v16  ;;  %v418_v19 = vld [vmem:[%s2926_s7 + $0x60] sm:$0xff] (!%p341_p2)  ;;  %v419_v20 = vld [vmem:[%s2926_s7 + $0x68] sm:$0xff] (!%p341_p2)  ;;  %v420_v22 = vld [vmem:[%s2926_s7 + $0x70] sm:$0xff] (!%p341_p2)  ;;  %vm1681_vm12 = vcmask (!%p341_p2), 64512  }
   0xa   : > { %2267 = vmatprep.subr.bf16.mxu0 (!%p341_p2), %v2266_v5  ;;  %v2286_v21 = vpack.c.bf16 (!%p341_p2), %v419_v20, %v418_v19  ;;  %v421_v23 = vld [vmem:[%s2926_s7 + $0x78] sm:$0xff] (!%p341_p2)  ;;  %v527_v32 = vld [vmem:[%s2920_s1] sm:$0xff] (!%p341_p2)  ;;  %v533_v34 = vld [vmem:[%s2921_s2 + $0x10] sm:$0xff] (!%p341_p2) }
   0xb   : > { %v2290_v24 = vpack.c.bf16 (!%p341_p2), %v421_v23, %v420_v22  ;;  %2133 = vmatprep.mubr.msk.f32.mxu1 (!%p341_p2), %vm555_vm0, %v527_v32  ;;  %v531_v33 = vld [vmem:[%s2921_s2] sm:$0xff] (!%p341_p2)  ;;  %547 = vperm.xlu1 (!%p341_p2), %2428, %v533_v34   ;;  %v532_v36 = vld [vmem:[%s2921_s2 + $0x8] sm:$0xff] (!%p341_p2)  ;;  %v534_v37 = vld [vmem:[%s2921_s2 + $0x18] sm:$0xff] (!%p341_p2) }
   0xc   : > { %537 = vperm.xlu0 (!%p341_p2), %2427, %v531_v33   ;;  %v528_v50 = vld [vmem:[%s2920_s1 + $0x8] sm:$0xff] (!%p341_p2)  ;;  %v529_v51 = vld [vmem:[%s2920_s1 + $0x10] sm:$0xff] (!%p341_p2)  ;;  %v530_v52 = vld [vmem:[%s2920_s1 + $0x18] sm:$0xff] (!%p341_p2) }
   0xd   : > { %s2936_s18 = smov (!%p384_p3, %s1853_s18), 1  ;;  %2269 = vmatpush3.bf16.msra.mxu0 %v2266_v5  ;;  %v1871_v60 = vld [vmem:[%s2922_s3 + $0x20] sm:$0xff]  ;;  %v1002_v5 = vld [vmem:[%s2923_s4 + $0x8] sm:$0xff]  ;;  %v1003_v6 = vld [vmem:[%s2923_s4 + $0x10] sm:$0xff] }
   0xe   : > { %s1966_s12 = sshll.u32 %s2936_s18, 6  ;;  %2271 = vmatprep.subr.bf16.mxu0 %v2270_v8  ;;  %v1001_v4 = vld [vmem:[%s2923_s4] sm:$0xff]  ;;  %v1004_v7 = vld [vmem:[%s2923_s4 + $0x18] sm:$0xff]  ;;  %v1139_v9 = vld [vmem:[%s2925_s6 + $0x8] sm:$0xff]  ;;  %s1967_s22 = sshll.u32 %s2936_s18, 5 }
   0xf   : > { %s2576_s15 = scalar_lea.vmem %s2919_s0, %s1966_s12  ;;  %552 = vperm.xlu1 %2428, %v534_v37   ;;  %v1140_v10 = vld [vmem:[%s2925_s6 + $0x10] sm:$0xff]  ;;  %vm1875_vm3 = vmneg %vm669_vm2  ;;  %v1872_v22 = vld [vmem:[%s2922_s3 + $0x28] sm:$0xff]  ;;  %s393_s26 = scalar_lea.vmem %s2929_s10, %s1967_s22 }
  0x10   : > { %v398_v11 = vld [vmem:[%s2576_s15] sm:$0xff]  ;;  %v399_v25 = vld [vmem:[%s2576_s15 + $0x8] sm:$0xff]  ;;  %v400_v26 = vld [vmem:[%s2576_s15 + $0x10] sm:$0xff]  ;;  %542 = vperm.xlu0 %2427, %v532_v36   ;;  %s1862_s28 = sshll.u32 %s2936_s18, 3 }
  0x11   : > { %2105 = vmatprep.mubr.f32.mxu0 %v398_v11  ;;  %2273 = vmatpush3.bf16.msra.mxu0 %v2270_v8  ;;  %v401_v27 = vld [vmem:[%s2576_s15 + $0x18] sm:$0xff]  ;;  %v402_v28 = vld [vmem:[%s2576_s15 + $0x20] sm:$0xff]  ;;  %v403_v29 = vld [vmem:[%s2576_s15 + $0x28] sm:$0xff]  ;;  %s397_s12 = scalar_lea.vmem %s2930_s11, %s1862_s28 }
  0x12   : > { %2275 = vmatprep.subr.bf16.mxu0 %v2274_v12  ;;  %v404_v30 = vld [vmem:[%s2576_s15 + $0x30] sm:$0xff]  ;;  %v405_v31 = vld [vmem:[%s2576_s15 + $0x38] sm:$0xff]  ;;  %v1138_v8 = vld [vmem:[%s2925_s6] sm:$0xff] }
  0x13   : > { %v1141_v11 = vld [vmem:[%s2925_s6 + $0x18] sm:$0xff]  ;;  %vm2311_vm4 = vmpackc.low %vm1875_vm3, %vm1875_vm3  ;;  %v1873_v23 = vld [vmem:[%s2922_s3 + $0x30] sm:$0xff] }
  0x14   : > { %vm1891_vm6 = vmneg %vm686_vm5  ;;  %v1868_v34 = vld [vmem:[%s2922_s3 + $0x48] sm:$0xff]  ;;  %v1869_v35 = vld [vmem:[%s2922_s3 + $0x50] sm:$0xff] }
  0x15   : > { %2277 = vmatpush3.bf16.msra.mxu0 %v2274_v12  ;;  %vm2704_vm7 = vmpackc.low %vm1891_vm6, %vm1891_vm6  ;;  %v1870_v37 = vld [vmem:[%s2922_s3 + $0x58] sm:$0xff] }
  0x16   : > { %2279 = vmatprep.subr.bf16.mxu0 %v2278_v15  ;;  %vm1935_vm9 = vmneg %vm1198_vm8 }
  0x17   : > { %vm2837_vm10 = vmpackc.low %vm1935_vm9, %vm1935_vm9 }
  0x19   : > { %2281 = vmatpush3.bf16.msra.mxu0 %v2278_v15 }
  0x1a   : > { %2283 = vmatprep.subr.bf16.mxu0 %v2282_v18 }
  0x1d   : > { %2285 = vmatpush3.bf16.msra.mxu0 %v2282_v18 }
  0x1e   : > { %2287 = vmatprep.subr.bf16.mxu0 %v2286_v21 }
  0x21   : > { %2289 = vmatpush3.bf16.msra.mxu0 %v2286_v21 }
  0x22   : > { %2291 = vmatprep.subr.bf16.mxu0 %v2290_v24 }
  0x25   : > { %2293 = vmatpush3.bf16.msra.mxu0 %v2290_v24 }
  0x28   : > { %2106 = vmatmul.mubr.f32.vlgmr.msra.gmra.mrb[0].mxu0 %v399_v25 }
  0x29   : > { %2108 = vmatprep.mubr.f32.mxu0 %v400_v26 }
  0x2c   : > { %2109 = vmatmul.mubr.f32.gmra.mrb[2].mxu0 %v401_v27 }
  0x2d   : > { %2111 = vmatprep.mubr.f32.mxu0 %v402_v28  ;;  %v1874_v28 = vld [vmem:[%s2922_s3 + $0x38] sm:$0xff] }
  0x30   : > { %2112 = vmatmul.mubr.f32.gmra.mrb[4].mxu0 %v403_v29  ;;  %v1867_v29 = vld [vmem:[%s2922_s3 + $0x40] sm:$0xff] }
  0x31   : > { %2114 = vmatprep.mubr.f32.mxu0 %v404_v30 }
  0x34   : > { %2115 = vmatmul.mubr.f32.gmra.mrb[6].mxu0 %v405_v31 }
  0x8a   : > { %v548_v54 = vpop.permute.xlu1 %547 }
  0x8b   : > { %v538_v53 = vpop.permute.xlu0 %537 }
  0x8e   : > { %v553_v61 = vpop.permute.xlu1 %552 }
  0x8f   : > { %v543_v55 = vpop.permute.xlu0 %542 }
  0xfb   : > { %v2107_v38 = vpop.f32.mrb[0].mxu0 }
  0xfc   : > { %v488_v39 = vpop.f32.mrb[1].mxu0 }
  0xfd   : > { %v2294_v40 = vpack.c.bf16 %v2107_v38, %v488_v39  ;;  %v896_v38 = vld [vmem:[%s2922_s3] sm:$0xff]  ;;  %v897_v39 = vld [vmem:[%s2922_s3 + $0x8] sm:$0xff] }
  0xff   : > { %v2110_v41 = vpop.f32.mrb[2].mxu0  ;;  %2295 = vmatprep.subr.bf16.mxu1 %v2294_v40 }
 0x100   : > { %v498_v42 = vpop.f32.mrb[3].mxu0  ;;  %2297 = vmatpush3.bf16.msra.mxu1 %v2294_v40  ;;  %v898_v40 = vld [vmem:[%s2922_s3 + $0x10] sm:$0xff] }
 0x101   : > { %v2298_v43 = vpack.c.bf16 %v2110_v41, %v498_v42  ;;  %v899_v41 = vld [vmem:[%s2922_s3 + $0x18] sm:$0xff]  ;;  %v1033_v42 = vld [vmem:[%s2924_s5] sm:$0xff] }
 0x102   : > { %2189 = vmatprep.mubr.msk.f32.mxu0 %vm701_vm1, %v1033_v42 }
 0x103   : > { %v2113_v44 = vpop.f32.mrb[4].mxu0  ;;  %2299 = vmatprep.subr.bf16.mxu1 %v2298_v43 }
 0x104   : > { %v508_v45 = vpop.f32.mrb[5].mxu0  ;;  %2301 = vmatpush3.bf16.msra.mxu1 %v2298_v43 }
 0x105   : > { %v2302_v46 = vpack.c.bf16 %v2113_v44, %v508_v45 }
 0x107   : > { %v2116_v47 = vpop.f32.mrb[6].mxu0  ;;  %2303 = vmatprep.subr.bf16.mxu1 %v2302_v46 }
 0x108   : > { %v518_v48 = vpop.f32.mrb[7].mxu0  ;;  %2305 = vmatpush3.bf16.msra.mxu1 %v2302_v46 }
 0x109   : > { %v2306_v49 = vpack.c.bf16 %v2116_v47, %v518_v48 }
 0x10b   : > { %2307 = vmatprep.subr.bf16.mxu1 %v2306_v49 }
 0x10c   : > { %2309 = vmatpush3.bf16.msra.mxu1 %v2306_v49 }
 0x10f   : > { %2134 = vmatmul.mubr.msk.f32.vlgmr.msra.gmra.mrb[0].mxu1 %vm555_vm0, %v528_v50 }
 0x110   : > { %2136 = vmatprep.mubr.msk.f32.mxu1 %vm555_vm0, %v529_v51 }
 0x113   : > { %2137 = vmatmul.mubr.msk.f32.gmra.mrb[2].mxu1 %vm555_vm0, %v530_v52 }
 0x114   : > { %2147 = vmatprep.mubr.msk.f32.mxu1 %vm701_vm1, %v1871_v60 }
 0x1e2   : > { %v2135_v56 = vpop.f32.mrb[0].mxu1 }
 0x1e3   : > { %v2644_v57 = vadd.f32 %v2135_v56, %v543_v55  ;;  %v634_v58 = vpop.f32.mrb[1].mxu1 }
 0x1e4   : > { %v2646_v59 = vadd.f32 %v634_v58, %v538_v53 }
 0x1e6   : > { %v2138_v62 = vpop.f32.mrb[2].mxu1  ;;  %v2429_v63 = vpack.i.bf16 %v2644_v57, %v2646_v59  ;;  %v2322_v20 = vpack.c.bf16 %v2644_v57, %v2646_v59 }
 0x1e7   : > { %v2654_v0 = vadd.f32 %v2138_v62, %v553_v61  ;;  %v644_v1 = vpop.f32.mrb[3].mxu1 }
 0x1e8   : > { %v2656_v2 = vadd.f32 %v644_v1, %v548_v54  ;;  %2430 = vrot.lane.b32.xlu0 %v2429_v63, %s2478_s23  ;;  %v1035_v1 = vld [vmem:[%s2924_s5 + $0x10] sm:$0xff] }
 0x1ea   : > { %v2434_v3 = vpack.i.bf16 %v2654_v0, %v2656_v2  ;;  %v2326_v26 = vpack.c.bf16 %v2654_v0, %v2656_v2 }
 0x1ec   : > { %2435 = vrot.lane.b32.xlu1 %v2434_v3, %s2478_s23  ;;  %2440 = vrot.lane.b32.xlu0 %v2429_v63, %s2479_s24  ;;  %v1034_v63 = vld [vmem:[%s2924_s5 + $0x8] sm:$0xff] }
 0x1f0   : > { %2445 = vrot.lane.b32.xlu1 %v2434_v3, %s2479_s24  ;;  %1007 = vperm.xlu0 %2427, %v1001_v4   ;;  %v1036_v3 = vld [vmem:[%s2924_s5 + $0x18] sm:$0xff] }
 0x1f4   : > { %1012 = vperm.xlu1 %2428, %v1002_v5   ;;  %1017 = vperm.xlu0 %2427, %v1003_v6  }
 0x1f8   : > { %1022 = vperm.xlu1 %2428, %v1004_v7   ;;  %1144 = vperm.xlu0 %2427, %v1138_v8  }
 0x1fc   : > { %1149 = vperm.xlu1 %2428, %v1139_v9   ;;  %1154 = vperm.xlu0 %2427, %v1140_v10  }
 0x200   : > { %1159 = vperm.xlu1 %2428, %v1141_v11  }
 0x25a   : > { %v2431_v12 = vpop.permute.xlu0 %2430 }
 0x25b   : > { %v2433_v13 = vunpack.i.h.bf16 %v2431_v12  ;;  %v2432_v14 = vunpack.i.l.bf16 %v2431_v12 }
 0x25d   : > { %v2310_v15 = vpack.c.bf16 %v2433_v13, %v2432_v14 }
 0x25e   : > { %v2436_v16 = vpop.permute.xlu1 %2435  ;;  %v2441_v21 = vpop.permute.xlu0 %2440 }
 0x25f   : > { %v2438_v17 = vunpack.i.h.bf16 %v2436_v16  ;;  %v2437_v18 = vunpack.i.l.bf16 %v2436_v16  ;;  %2312 = vmatprep.subr.msk.bf16.mxu1 %vm2311_vm4, %v2310_v15  ;;  %v2443_v24 = vunpack.i.h.bf16 %v2441_v21  ;;  %v2442_v25 = vunpack.i.l.bf16 %v2441_v21  ;;  %v1948_v21 = vld [vmem:[%s2923_s4 + $0x28] sm:$0xff] }
 0x260   : > { %2315 = vmatpush3.bf16.msk.msra.mxu1 %vm2311_vm4, %v2310_v15  ;;  %v1911_v15 = vld [vmem:[%s2922_s3 + $0x80] sm:$0xff] }
 0x261   : > { %v2316_v19 = vpack.c.bf16 %v2438_v17, %v2437_v18  ;;  %v2330_v31 = vpack.c.bf16 %v2443_v24, %v2442_v25  ;;  %v1961_v24 = vld [vmem:[%s2925_s6 + $0x30] sm:$0xff]  ;;  %v1960_v25 = vld [vmem:[%s2925_s6 + $0x28] sm:$0xff] }
 0x262   : > { %v2446_v27 = vpop.permute.xlu1 %2445 }
 0x263   : > { %2318 = vmatprep.subr.msk.bf16.mxu1 %vm2311_vm4, %v2316_v19  ;;  %v2448_v32 = vunpack.i.h.bf16 %v2446_v27  ;;  %v2447_v33 = vunpack.i.l.bf16 %v2446_v27  ;;  %v1962_v27 = vld [vmem:[%s2925_s6 + $0x38] sm:$0xff] }
 0x264   : > { %2321 = vmatpush3.bf16.msk.msra.mxu1 %vm2311_vm4, %v2316_v19 }
 0x265   : > { %2323 = vmatprep.subr.bf16.mxu1 %v2322_v20  ;;  %v2336_v36 = vpack.c.bf16 %v2448_v32, %v2447_v33 }
 0x267   : > { %2148 = vmatmul.mubr.msk.f32.vlgmr.msra.gmra.mrb[4].mxu1 %vm701_vm1, %v1872_v22  ;;  %v1959_v22 = vld [vmem:[%s2925_s6 + $0x20] sm:$0xff] }
 0x268   : > { %2325 = vmatpush3.bf16.msra.mxu1 %v2322_v20  ;;  %2150 = vmatprep.mubr.msk.f32.mxu1 %vm701_vm1, %v1873_v23  ;;  %v1949_v20 = vld [vmem:[%s2923_s4 + $0x30] sm:$0xff]  ;;  %v1950_v23 = vld [vmem:[%s2923_s4 + $0x38] sm:$0xff] }
 0x269   : > { %2327 = vmatprep.subr.bf16.mxu1 %v2326_v26 }
 0x26b   : > { %2151 = vmatmul.mubr.msk.f32.gmra.mrb[6].mxu1 %vm701_vm1, %v1874_v28 }
 0x26c   : > { %2329 = vmatpush3.bf16.msra.mxu1 %v2326_v26  ;;  %2161 = vmatprep.mubr.msk.f32.mxu1 %vm701_vm1, %v1867_v29  ;;  %v1687_v26 = vld [vmem:[%s2928_s9] sm:$0xff] }
 0x26d   : > { %2332 = vmatprep.subr.msk.bf16.mxu1 %vm2704_vm7, %v2330_v31 }
 0x26f   : > { %2162 = vmatmul.mubr.msk.f32.vlgmr.msra.gmra.mrb[4].mxu1 %vm701_vm1, %v1868_v34  ;;  %v1008_v44 = vpop.permute.xlu0 %1007 }
 0x270   : > { %2335 = vmatpush3.bf16.msk.msra.mxu1 %vm2704_vm7, %v2330_v31  ;;  %2164 = vmatprep.mubr.msk.f32.mxu1 %vm701_vm1, %v1869_v35 }
 0x271   : > { %2338 = vmatprep.subr.msk.bf16.mxu1 %vm2704_vm7, %v2336_v36 }
 0x273   : > { %2165 = vmatmul.mubr.msk.f32.gmra.mrb[6].mxu1 %vm701_vm1, %v1870_v37  ;;  %v1013_v43 = vpop.permute.xlu1 %1012  ;;  %v1018_v53 = vpop.permute.xlu0 %1017 }
 0x274   : > { %2341 = vmatpush3.bf16.msk.msra.mxu1 %vm2704_vm7, %v2336_v36  ;;  %2175 = vmatprep.mubr.msk.f32.mxu1 %vm701_vm1, %v896_v38 }
 0x277   : > { %2176 = vmatmul.mubr.msk.f32.vlgmr.msra.gmra.mrb[4].mxu1 %vm701_vm1, %v897_v39  ;;  %v1023_v50 = vpop.permute.xlu1 %1022  ;;  %v1145_v6 = vpop.permute.xlu0 %1144  ;;  %v1912_v39 = vld [vmem:[%s2922_s3 + $0x88] sm:$0xff] }
 0x278   : > { %2178 = vmatprep.mubr.msk.f32.mxu1 %vm701_vm1, %v898_v40  ;;  %v1913_v40 = vld [vmem:[%s2922_s3 + $0x90] sm:$0xff] }
 0x27b   : > { %2179 = vmatmul.mubr.msk.f32.gmra.mrb[6].mxu1 %vm701_vm1, %v899_v41  ;;  %v1150_v4 = vpop.permute.xlu1 %1149 }
 0x27c   : > { %2203 = vmatprep.mubr.msk.f32.mxu1 %vm701_vm1, %v1911_v15 }
 0x27f   : > { %v1160_v16 = vpop.permute.xlu1 %1159 }
 0x34a   : > { %v2177_v45 = vpop.f32.mrb[4].mxu1 }
 0x34b   : > { %v1026_v46 = vadd.f32 %v2177_v45, %v1013_v43  ;;  %v978_v47 = vpop.f32.mrb[5].mxu1  ;;  %v1907_v45 = vld [vmem:[%s2922_s3 + $0xa0] sm:$0xff] }
 0x34c   : > { %v1025_v48 = vadd.f32 %v1008_v44, %v978_v47  ;;  %v1914_v44 = vld [vmem:[%s2922_s3 + $0x98] sm:$0xff] }
 0x34d   : > { %v1030_v49 = vmax.f32 %v1026_v46, 0.0 }
 0x34e   : > { %v1029_v51 = vmax.f32 %v1025_v48, 0.0  ;;  %v2180_v52 = vpop.f32.mrb[6].mxu1 }
 0x34f   : > { %v1028_v54 = vadd.f32 %v2180_v52, %v1023_v50  ;;  %v988_v55 = vpop.f32.mrb[7].mxu1  ;;  %v1908_v50 = vld [vmem:[%s2922_s3 + $0xa8] sm:$0xff] }
 0x350   : > { %v2342_v56 = vpack.c.bf16 %v1030_v49, %v1029_v51  ;;  %v1027_v58 = vadd.f32 %v1018_v53, %v988_v55  ;;  %v1909_v51 = vld [vmem:[%s2922_s3 + $0xb0] sm:$0xff]  ;;  %v1910_v53 = vld [vmem:[%s2922_s3 + $0xb8] sm:$0xff]  ;;  %v1932_v55 = vld [vmem:[%s2922_s3 + $0x68] sm:$0xff] }
 0x351   : > { %v1032_v60 = vmax.f32 %v1028_v54, 0.0  ;;  %v1931_v54 = vld [vmem:[%s2922_s3 + $0x60] sm:$0xff] }
 0x352   : > { %v1031_v61 = vmax.f32 %v1027_v58, 0.0  ;;  %2343 = vmatprep.subr.bf16.mxu0 %v2342_v56  ;;  %v1934_v58 = vld [vmem:[%s2922_s3 + $0x78] sm:$0xff] }
 0x353   : > { %2345 = vmatpush3.bf16.msra.mxu0 %v2342_v56  ;;  %v1933_v56 = vld [vmem:[%s2922_s3 + $0x70] sm:$0xff] }
 0x354   : > { %v2346_v62 = vpack.c.bf16 %v1032_v60, %v1031_v61  ;;  %v1951_v60 = vld [vmem:[%s2924_s5 + $0x20] sm:$0xff] }
 0x356   : > { %2347 = vmatprep.subr.bf16.mxu0 %v2346_v62 }
 0x357   : > { %2349 = vmatpush3.bf16.msra.mxu0 %v2346_v62 }
 0x35a   : > { %2190 = vmatmul.mubr.msk.f32.vlgmr.msra.gmra.mrb[8].mxu0 %vm701_vm1, %v1034_v63 }
 0x35b   : > { %2192 = vmatprep.mubr.msk.f32.mxu0 %vm701_vm1, %v1035_v1 }
 0x35e   : > { %2193 = vmatmul.mubr.msk.f32.gmra.mrb[10].mxu0 %vm701_vm1, %v1036_v3 }
 0x35f   : > { %2245 = vmatprep.mubr.msk.f32.mxu0 %vm701_vm1, %v1951_v60 }
 0x42d   : > { %v2191_v5 = vpop.f32.mrb[8].mxu0 }
 0x42e   : > { %v1135_v7 = vadd.f32 %v2191_v5, %v2644_v57  ;;  %v1115_v8 = vpop.f32.mrb[9].mxu0 }
 0x42f   : > { %v1134_v9 = vadd.f32 %v1115_v8, %v2646_v59  ;;  %v1155_v59 = vpop.permute.xlu0 %1154 }
 0x430   : > { %v2764_v10 = vadd.f32 %v1150_v4, %v1135_v7 }
 0x431   : > { %v2766_v11 = vadd.f32 %v1145_v6, %v1134_v9  ;;  %v2194_v12 = vpop.f32.mrb[10].mxu0 }
 0x432   : > { %v1137_v13 = vadd.f32 %v2194_v12, %v2654_v0  ;;  %v1125_v14 = vpop.f32.mrb[11].mxu0 }
 0x433   : > { %v1136_v17 = vadd.f32 %v1125_v14, %v2656_v2  ;;  %v2449_v57 = vpack.i.bf16 %v2764_v10, %v2766_v11  ;;  %v1947_v2 = vld [vmem:[%s2923_s4 + $0x20] sm:$0xff]  ;;  %v2362_v37 = vpack.c.bf16 %v2764_v10, %v2766_v11 }
 0x434   : > { %v2776_v18 = vadd.f32 %v1160_v16, %v1137_v13 }
 0x435   : > { %v2778_v19 = vadd.f32 %v1155_v59, %v1136_v17  ;;  %2450 = vrot.lane.b32.xlu0 %v2449_v57, %s2479_s24  ;;  %v1952_v59 = vld [vmem:[%s2924_s5 + $0x28] sm:$0xff] }
 0x437   : > { %v2454_v0 = vpack.i.bf16 %v2776_v18, %v2778_v19  ;;  %v2366_v43 = vpack.c.bf16 %v2776_v18, %v2778_v19 }
 0x439   : > { %2460 = vrot.lane.b32.xlu0 %v2449_v57, %s2480_s25  ;;  %2455 = vrot.lane.b32.xlu1 %v2454_v0, %s2479_s24 }
 0x43d   : > { %1520 = vperm.xlu0 %2427, %v1947_v2   ;;  %2465 = vrot.lane.b32.xlu1 %v2454_v0, %s2480_s25  ;;  %v1953_v0 = vld [vmem:[%s2924_s5 + $0x30] sm:$0xff]  ;;  %v1954_v2 = vld [vmem:[%s2924_s5 + $0x38] sm:$0xff] }
 0x441   : > { %1530 = vperm.xlu0 %2427, %v1949_v20   ;;  %1525 = vperm.xlu1 %2428, %v1948_v21   ;;  %v2481_v20 = vmov 0.0|0.0   ;;  %v2483_v21 = vmov 0.0  }
 0x445   : > { %1659 = vperm.xlu0 %2427, %v1959_v22   ;;  %1535 = vperm.xlu1 %2428, %v1950_v23  }
 0x449   : > { %1669 = vperm.xlu0 %2427, %v1961_v24   ;;  %1664 = vperm.xlu1 %2428, %v1960_v25  }
 0x44d   : > { %1690 = vperm.xlu0 %2427, %v1687_v26   ;;  %1674 = vperm.xlu1 %2428, %v1962_v27  }
 0x4a7   : > { %v2451_v28 = vpop.permute.xlu0 %2450 }
 0x4a8   : > { %v2453_v29 = vunpack.i.h.bf16 %v2451_v28  ;;  %v2452_v31 = vunpack.i.l.bf16 %v2451_v28 }
 0x4aa   : > { %v2350_v32 = vpack.c.bf16 %v2453_v29, %v2452_v31 }
 0x4ab   : > { %v2456_v33 = vpop.permute.xlu1 %2455  ;;  %v2461_v38 = vpop.permute.xlu0 %2460 }
 0x4ac   : > { %v2458_v34 = vunpack.i.h.bf16 %v2456_v33  ;;  %v2457_v35 = vunpack.i.l.bf16 %v2456_v33  ;;  %2352 = vmatprep.subr.msk.bf16.mxu1 %vm2704_vm7, %v2350_v32  ;;  %v2463_v41 = vunpack.i.h.bf16 %v2461_v38  ;;  %v2462_v42 = vunpack.i.l.bf16 %v2461_v38 }
 0x4ad   : > { %2355 = vmatpush3.bf16.msk.msra.mxu1 %vm2704_vm7, %v2350_v32 }
 0x4ae   : > { %v2356_v36 = vpack.c.bf16 %v2458_v34, %v2457_v35  ;;  %v2370_v47 = vpack.c.bf16 %v2463_v41, %v2462_v42 }
 0x4af   : > { %v2466_v30 = vpop.permute.xlu1 %2465 }
 0x4b0   : > { %2358 = vmatprep.subr.msk.bf16.mxu1 %vm2704_vm7, %v2356_v36  ;;  %v2468_v48 = vunpack.i.h.bf16 %v2466_v30  ;;  %v2467_v49 = vunpack.i.l.bf16 %v2466_v30 }
 0x4b1   : > { %2361 = vmatpush3.bf16.msk.msra.mxu1 %vm2704_vm7, %v2356_v36 }
 0x4b2   : > { %2363 = vmatprep.subr.bf16.mxu1 %v2362_v37  ;;  %v2376_v52 = vpack.c.bf16 %v2468_v48, %v2467_v49 }
 0x4b4   : > { %2204 = vmatmul.mubr.msk.f32.vlgmr.msra.gmra.mrb[8].mxu1 %vm701_vm1, %v1912_v39 }
 0x4b5   : > { %2365 = vmatpush3.bf16.msra.mxu1 %v2362_v37  ;;  %2206 = vmatprep.mubr.msk.f32.mxu1 %vm701_vm1, %v1913_v40 }
 0x4b6   : > { %2367 = vmatprep.subr.bf16.mxu1 %v2366_v43 }
 0x4b8   : > { %2207 = vmatmul.mubr.msk.f32.gmra.mrb[10].mxu1 %vm701_vm1, %v1914_v44 }
 0x4b9   : > { %2369 = vmatpush3.bf16.msra.mxu1 %v2366_v43  ;;  %2217 = vmatprep.mubr.msk.f32.mxu1 %vm701_vm1, %v1907_v45 }
 0x4ba   : > { %2372 = vmatprep.subr.msk.bf16.mxu1 %vm2837_vm10, %v2370_v47 }
 0x4bc   : > { %2218 = vmatmul.mubr.msk.f32.vlgmr.msra.gmra.mrb[8].mxu1 %vm701_vm1, %v1908_v50  ;;  %v1521_v62 = vpop.permute.xlu0 %1520 }
 0x4bd   : > { %2375 = vmatpush3.bf16.msk.msra.mxu1 %vm2837_vm10, %v2370_v47  ;;  %2220 = vmatprep.mubr.msk.f32.mxu1 %vm701_vm1, %v1909_v51 }
 0x4be   : > { %2378 = vmatprep.subr.msk.bf16.mxu1 %vm2837_vm10, %v2376_v52 }
 0x4c0   : > { %2221 = vmatmul.mubr.msk.f32.gmra.mrb[10].mxu1 %vm701_vm1, %v1910_v53  ;;  %v1526_v61 = vpop.permute.xlu1 %1525  ;;  %v1531_v9 = vpop.permute.xlu0 %1530 }
 0x4c1   : > { %2381 = vmatpush3.bf16.msk.msra.mxu1 %vm2837_vm10, %v2376_v52  ;;  %2231 = vmatprep.mubr.msk.f32.mxu1 %vm701_vm1, %v1931_v54 }
 0x4c4   : > { %2232 = vmatmul.mubr.msk.f32.vlgmr.msra.gmra.mrb[8].mxu1 %vm701_vm1, %v1932_v55  ;;  %v1536_v6 = vpop.permute.xlu1 %1535  ;;  %v1660_v24 = vpop.permute.xlu0 %1659 }
 0x4c5   : > { %2234 = vmatprep.mubr.msk.f32.mxu1 %vm701_vm1, %v1933_v56 }
 0x4c8   : > { %2235 = vmatmul.mubr.msk.f32.gmra.mrb[10].mxu1 %vm701_vm1, %v1934_v58  ;;  %v1665_v22 = vpop.permute.xlu1 %1664  ;;  %v1670_v36 = vpop.permute.xlu0 %1669 }
 0x4cc   : > { %v1675_v34 = vpop.permute.xlu1 %1674  ;;  %v1691_v39 = vpop.permute.xlu0 %1690 }
 0x597   : > { %v2233_v63 = vpop.f32.mrb[8].mxu1 }
 0x598   : > { %v1539_v1 = vadd.f32 %v2233_v63, %v1526_v61  ;;  %v1490_v3 = vpop.f32.mrb[9].mxu1 }
 0x599   : > { %v1538_v4 = vadd.f32 %v1521_v62, %v1490_v3 }
 0x59a   : > { %v1543_v5 = vmax.f32 %v1539_v1, 0.0 }
 0x59b   : > { %v1542_v7 = vmax.f32 %v1538_v4, 0.0  ;;  %v2236_v8 = vpop.f32.mrb[10].mxu1 }
 0x59c   : > { %v1541_v12 = vadd.f32 %v2236_v8, %v1536_v6  ;;  %v1500_v13 = vpop.f32.mrb[11].mxu1 }
 0x59d   : > { %v2382_v14 = vpack.c.bf16 %v1543_v5, %v1542_v7  ;;  %v1540_v15 = vadd.f32 %v1531_v9, %v1500_v13 }
 0x59e   : > { %v1545_v16 = vmax.f32 %v1541_v12, 0.0 }
 0x59f   : > { %v1544_v17 = vmax.f32 %v1540_v15, 0.0  ;;  %2383 = vmatprep.subr.bf16.mxu0 %v2382_v14 }
 0x5a0   : > { %2385 = vmatpush3.bf16.msra.mxu0 %v2382_v14 }
 0x5a1   : > { %v2386_v57 = vpack.c.bf16 %v1545_v16, %v1544_v17 }
 0x5a3   : > { %2387 = vmatprep.subr.bf16.mxu0 %v2386_v57 }
 0x5a4   : > { %2389 = vmatpush3.bf16.msra.mxu0 %v2386_v57 }
 0x5a5   : > { %2390 = vmatprep.subr.bf16.mxu0 %v2481_v20 }
 0x5a7   : > { %2246 = vmatmul.mubr.msk.f32.vlgmr.msra.gmra.mrb[12].mxu0 %vm701_vm1, %v1952_v59 }
 0x5a8   : > { %2248 = vmatprep.mubr.msk.f32.mxu0 %vm701_vm1, %v1953_v0 }
 0x5ab   : > { %2249 = vmatmul.mubr.msk.f32.gmra.mrb[14].mxu0 %vm701_vm1, %v1954_v2 }
 0x5ac   : > { %2259 = vmatprep.mubr.msk.f32.mxu0 %vm2482_vm11, %v2483_v21 }
 0x67a   : > { %v2247_v23 = vpop.f32.mrb[12].mxu0 }
 0x67b   : > { %v1649_v25 = vadd.f32 %v2247_v23, %v2764_v10  ;;  %v1629_v26 = vpop.f32.mrb[13].mxu0 }
 0x67c   : > { %v1648_v27 = vadd.f32 %v1629_v26, %v2766_v11 }
 0x67d   : > { %v1678_v28 = vadd.f32 %v1665_v22, %v1649_v25 }
 0x67e   : > { %v1677_v29 = vadd.f32 %v1660_v24, %v1648_v27  ;;  %v2250_v31 = vpop.f32.mrb[14].mxu0 }
 0x67f   : > { %1683 = vst.msk [vmem:[%s393_s26 + $0x8] sm:$0xff] %vm1681_vm12, %v1678_v28  ;;  %v1651_v32 = vadd.f32 %v2250_v31, %v2776_v18  ;;  %v1639_v33 = vpop.f32.mrb[15].mxu0  ;;  %v1686_v18 = vld [vmem:[%s2927_s8] sm:$0xff] }
 0x680   : > { %1682 = vst.msk [vmem:[%s393_s26] sm:$0xff] %vm1681_vm12, %v1677_v29  ;;  %v2391_v10 = vpack.c.bf16 %v1678_v28, %v1677_v29  ;;  %v1650_v35 = vadd.f32 %v1639_v33, %v2778_v19 }
 0x681   : > { %v1680_v37 = vadd.f32 %v1675_v34, %v1651_v32 }
 0x682   : > { %v1679_v38 = vadd.f32 %v1670_v36, %v1650_v35  ;;  %2392 = vmatpush3.bf16.msra.mxu0 %v2391_v10 }
 0x683   : > { %1685 = vst.msk [vmem:[%s393_s26 + $0x18] sm:$0xff] %vm1681_vm12, %v1680_v37  ;;  %2393 = vmatprep.subr.bf16.mxu0 %v2481_v20 }
 0x684   : > { %1684 = vst.msk [vmem:[%s393_s26 + $0x10] sm:$0xff] %vm1681_vm12, %v1679_v38  ;;  %v2394_v11 = vpack.c.bf16 %v1680_v37, %v1679_v38 }
 0x686   : > { %2395 = vmatpush3.bf16.msra.mxu0 %v2394_v11 }
 0x689   : > { %2260 = vmatmul.mubr.msk.f32.vlgmr.msra.gmra.mrb[16].mxu0 %vm701_vm1, %v1686_v18 }
 0x75c   : > { %v1762_v19 = vpop.f32.mrb[16].mxu0 }
 0x75d   : > { %v1763_v40 = vadd.f32 %v1762_v19, %v1691_v39  ;;  %v2261_v41 = vpop.f32.mrb[17].mxu0 }
 0x75f   : > { %1766 = vst.msk [vmem:[%s397_s12] sm:$0xff] %vm1681_vm12, %v1763_v40 }
 0x760 PF: > { %s22_s17 = sadd.s32 1, %s2475_s17  }
 0x761   : > { %p19_p4 = scmp.ge.s32.totalorder %s22_s17, 4  }
 0x763   :  { %21 = sbr.rel (!%p19_p4) target bundleno = 1 (0x1), region = 110 }

// kernel: mstr_forward.17
= control target key start
LH: loop header
LB: loop body
LE: loop exit
PB: predicated region body
PF: predicated region fallthrough
CT: control target
= control target key end

     0   :  { %s2774_s0 = inlined_call_operand.vmem [shape: f32[2,8,8], index: 0, kind: input, shape index: {}]   ;;  %s2775_s1 = inlined_call_operand.vmem [shape: f32[32,8], index: 1, kind: input, shape index: {}]   ;;  %s2776_s2 = inlined_call_operand.vmem [shape: f32[32,1], index: 2, kind: input, shape index: {}]   ;;  %s2777_s3 = inlined_call_operand.vmem [shape: f32[6,32,32], index: 3, kind: input, shape index: {}]   ;;  %s2778_s4 = inlined_call_operand.vmem [shape: f32[2,32,1], index: 4, kind: input, shape index: {}]   ;;  %s2779_s5 = inlined_call_operand.vmem [shape: f32[2,32,32], index: 5, kind: input, shape index: {}]   ;;  %s2780_s6 = inlined_call_operand.vmem [shape: f32[2,32,1], index: 6, kind: input, shape index: {}]   ;;  %s2781_s7 = inlined_call_operand.vmem [shape: f32[8,32], index: 7, kind: input, shape index: {}]   ;;  %s2782_s8 = inlined_call_operand.vmem [shape: f32[8,1], index: 8, kind: input, shape index: {}]   ;;  %s2783_s9 = inlined_call_operand.vmem [shape: f32[2,32,8], index: 9, kind: output, shape index: {0}]   ;;  %s2784_s10 = inlined_call_operand.hbm [shape: f32[2,8,8], index: 10, kind: output, shape index: {1}]  }
   0x1   :  { %2787 = sst [smem:[#allocation5_spill]] %s2774_s0 }
   0x2   :  { %16 = vsyncpa [#allocation3], 0 }
   0x3   :  { %18 = vsyncpa [#allocation3 + $0x1], 0  ;;  %s2373_s13 = smov 0   ;;  %s2375_s14 = smov 0  }
   0x4   :  { %s2377_s15 = smov 0   ;;  %s2379_s16 = smov 0  }
   0x5 LB: > { %s2394_s17 = sadd.s32 4294967295, %s2308_s16   ;;  %s1733_s18 = sadd.s32 4294967294, %s2308_s16   ;;  %s2308_s16 = sphi %s2379_s16, %s2799_s16   ;;  %s2304_s15 = sphi %s2377_s15, %s2798_s15   ;;  %s2300_s14 = sphi %s2375_s14, %s2797_s14   ;;  %s2296_s13 = sphi %s2373_s13, %s2796_s13  }
   0x6   : > { %s2398_s19 = sadd.s32 1, %s2308_s16   ;;  %s251_s20 = sadd.s32 1, %s2304_s15 }
   0x7   : > { %s248_s21 = ssub.s32 %s2308_s16, %s2398_s19  ;;  %p261_p0 = scmp.ne.s32.totalorder %s2304_s15, %s2300_s14 }
   0x8   : > { %p249_p1 = scmp.eq.s32.totalorder %s248_s21, 0  ;;  %p262_p2 = scmp.eq.s32.totalorder %s2394_s17, 1 }
   0x9   : > { %p267_p3 = scmp.ne.s32.totalorder %s2300_s14, %s2296_s13  ;;  %p268_p4 = scmp.eq.s32.totalorder %s1733_s18, 1 }
   0xa   : > { %s2409_s22 = scalar_select %p249_p1, %s2304_s15, %s251_s20  }
   0xb   : > { %p2411_p5 = por %p262_p2, %p261_p0  ;;  %p2415_p6 = por %p268_p4, %p267_p3 }
   0xc   : > { %p1736_p7 = scmp.ge.s32.totalorder %s2308_s16, 1  ;;  %p317_p8 = scmp.lt.s32.totalorder %s2308_s16, 3 }
   0xe   : > { %p318_p9 = pnand %p1736_p7, %p317_p8 }
   0xf   : > { %p359_p10 = scmp.lt.s32.totalorder (!%p318_p9), %s2394_s17, 1  ;;  %vm369_vm0 = vcmask (!%p318_p9), 64512   ;;  %v389_v0 = vld [vmem:[%s2775_s1] sm:$0xff] (!%p318_p9)  ;;  %v2310_v1 = vmov (!%p318_p9), 0   ;;  %v395_v3 = vld [vmem:[%s2776_s2 + $0x10] sm:$0xff] (!%p318_p9)  ;;  %v394_v4 = vld [vmem:[%s2776_s2 + $0x8] sm:$0xff] (!%p318_p9) }
  0x10   : > { %321 = sbr.rel (%p318_p9) target bundleno = 1714 (0x6b2), region = 56  ;;  %1923 = vmatprep.mubr.msk.f32.mxu0 (!%p318_p9), %vm369_vm0, %v389_v0  ;;  %2200 = vset.pattern.permute.xlu0 (!%p318_p9), %v2310_v1  ;;  %v393_v2 = vld [vmem:[%s2776_s2] sm:$0xff] (!%p318_p9)  ;;  %v396_v5 = vld [vmem:[%s2776_s2 + $0x18] sm:$0xff] (!%p318_p9)  ;;  %s2790_s0 = sld [smem:[#allocation5_spill]] (!%p318_p9)  ;;  %v390_v26 = vld [vmem:[%s2775_s1 + $0x8] sm:$0xff] (!%p318_p9)  ;;  %vm562_vm1 = vcmask (!%p318_p9), 261120  }
  0x11   : > { %399 = vperm.xlu0 (!%p318_p9), %2200, %v393_v2   ;;  %2201 = vset.pattern.permute.xlu1 (!%p318_p9), %v2310_v1  ;;  %v391_v27 = vld [vmem:[%s2775_s1 + $0x10] sm:$0xff] (!%p318_p9)  ;;  %v392_v28 = vld [vmem:[%s2775_s1 + $0x18] sm:$0xff] (!%p318_p9)  ;;  %v1749_v36 = vld [vmem:[%s2777_s3 + $0x20] sm:$0xff] (!%p318_p9)  ;;  %s2311_s27 = smov (!%p318_p9), 1   ;;  %vm530_vm2 = vcmask (!%p318_p9), 7168   ;;  %vm547_vm5 = vcmask (!%p318_p9), 15360  }
  0x12   : > { %409 = vperm.xlu1 (!%p318_p9), %2201, %v395_v3   ;;  %1937 = vmatprep.mubr.msk.f32.mxu1 (!%p318_p9), %vm562_vm1, %v1749_v36  ;;  %v862_v44 = vld [vmem:[%s2778_s4] sm:$0xff] (!%p318_p9)  ;;  %v863_v45 = vld [vmem:[%s2778_s4 + $0x8] sm:$0xff] (!%p318_p9)  ;;  %v864_v46 = vld [vmem:[%s2778_s4 + $0x10] sm:$0xff] (!%p318_p9)  ;;  %s2793_s26 = smov (!%p318_p9), 2   ;;  %vm1059_vm8 = vcmask (!%p318_p9), 31744   ;;  %vm2315_vm11 = vmmov (!%p318_p9), 0  }
  0x13   : > { %v865_v47 = vld [vmem:[%s2778_s4 + $0x18] sm:$0xff] (!%p318_p9)  ;;  %v999_v48 = vld [vmem:[%s2780_s6] sm:$0xff] (!%p318_p9)  ;;  %v1000_v49 = vld [vmem:[%s2780_s6 + $0x8] sm:$0xff] (!%p318_p9)  ;;  %s1843_s29 = sshll.u32 (!%p318_p9), %s2394_s17, 7 }
  0x14   : > { %v1001_v50 = vld [vmem:[%s2780_s6 + $0x10] sm:$0xff] (!%p318_p9)  ;;  %v1002_v51 = vld [vmem:[%s2780_s6 + $0x18] sm:$0xff] (!%p318_p9)  ;;  %vm1753_vm3 = vmneg (!%p318_p9), %vm530_vm2  ;;  %s2731_s21 = scalar_lea.hbm (!%p318_p9), %s2784_s10, %s1843_s29 }
  0x15   : > { %404 = vperm.xlu0 (!%p318_p9), %2200, %v394_v4   ;;  %vm2053_vm4 = vmpackc.low (!%p318_p9), %vm1753_vm3, %vm1753_vm3  ;;  %v1750_v62 = vld [vmem:[%s2777_s3 + $0x28] sm:$0xff] (!%p318_p9)  ;;  %v1751_v63 = vld [vmem:[%s2777_s3 + $0x30] sm:$0xff] (!%p318_p9) }
  0x16   : > { %414 = vperm.xlu1 (!%p318_p9), %2201, %v396_v5   ;;  %vm1769_vm6 = vmneg (!%p318_p9), %vm547_vm5  ;;  %v1752_v4 = vld [vmem:[%s2777_s3 + $0x38] sm:$0xff] (!%p318_p9)  ;;  %v1745_v5 = vld [vmem:[%s2777_s3 + $0x40] sm:$0xff] (!%p318_p9) }
  0x17   : > { %s2433_s11 = scalar_select %p359_p10, %s2394_s17, 1  ;;  %vm2519_vm7 = vmpackc.low %vm1769_vm6, %vm1769_vm6 }
  0x18   : > { %vm1813_vm9 = vmneg %vm1059_vm8 }
  0x19   : > { %s1738_s20 = sshll.u32 %s2433_s11, 3  ;;  %vm2652_vm10 = vmpackc.low %vm1813_vm9, %vm1813_vm9 }
  0x1a   : > { %s362_s28 = scalar_lea.vmem %s2790_s0, %s1738_s20  ;;  %s1846_s20 = sshll.u32 %s2433_s11, 5 }
  0x1b   : > { %v368_v6 = vld [vmem:[%s362_s28] sm:$0xff]  ;;  %s2785_s28 = smov 2   ;;  %s367_s0 = scalar_lea.vmem %s2783_s9, %s1846_s20 }
  0x1c   : > { %v370_v7 = vsel %vm369_vm0, %v368_v6, -inf }
  0x1d   : > { %v371_v8 = vrot.slane %v370_v7, 4 }
  0x1f   : > { %v372_v9 = vmax.f32 %v370_v7, %v371_v8 }
  0x21   : > { %v373_v10 = vrot.slane %v372_v9, 2 }
  0x23   : > { %v374_v11 = vmax.f32 %v372_v9, %v373_v10  ;;  %v1746_v10 = vld [vmem:[%s2777_s3 + $0x48] sm:$0xff] }
  0x25   : > { %v375_v12 = vrot.slane %v374_v11, 1 }
  0x27   : > { %v376_v13 = vmax.f32 %v374_v11, %v375_v12  ;;  %v1747_v11 = vld [vmem:[%s2777_s3 + $0x50] sm:$0xff] }
  0x29   : > { %v377_v14 = vsub.f32 %v368_v6, %v376_v13  ;;  %v1748_v13 = vld [vmem:[%s2777_s3 + $0x58] sm:$0xff] }
  0x2b   : > { %v378_v15 = vmul.f32 1.442695, %v377_v14  ;;  %v757_v14 = vld [vmem:[%s2777_s3] sm:$0xff] }
  0x2d   : > { %2242 = vpow2.f32 %v378_v15  ;;  %v758_v15 = vld [vmem:[%s2777_s3 + $0x8] sm:$0xff] }
  0x37   : > { %v2243_v16 = vpop.eup %2242 }
  0x38   : > { %v380_v17 = vsel %vm369_vm0, %v2243_v16, 0.0 }
  0x39   : > { %v381_v18 = vrot.slane %v380_v17, 4 }
  0x3b   : > { %v382_v19 = vadd.f32 %v381_v18, %v380_v17  ;;  %v760_v17 = vld [vmem:[%s2777_s3 + $0x18] sm:$0xff]  ;;  %v894_v18 = vld [vmem:[%s2779_s5] sm:$0xff] }
  0x3d   : > { %v383_v20 = vrot.slane %v382_v19, 2 }
  0x3f   : > { %v384_v21 = vadd.f32 %v383_v20, %v382_v19 }
  0x41   : > { %v385_v22 = vrot.slane %v384_v21, 1 }
  0x43   : > { %v386_v23 = vadd.f32 %v385_v22, %v384_v21 }
  0x45   : > { %2244 = vrcp.f32 %v386_v23 }
  0x4f   : > { %v2245_v24 = vpop.eup %2244 }
  0x50   : > { %v388_v25 = vmul.f32 %v2245_v24, %v2243_v16  ;;  %v759_v16 = vld [vmem:[%s2777_s3 + $0x10] sm:$0xff] }
  0x52   : > { %1921 = vmatprep.subr.mxu0 %v388_v25 }
  0x53   : > { %1922 = vmatpush3.msra.mxu0 %v388_v25 }
  0x54   : > { %1924 = vmatmul.mubr.msk.f32.vlgmr.msra.gmra.mrb[0].mxu0 %vm369_vm0, %v390_v26 }
  0x55   : > { %1926 = vmatprep.mubr.msk.f32.mxu0 %vm369_vm0, %v391_v27 }
  0x58   : > { %1927 = vmatmul.mubr.msk.f32.gmra.mrb[2].mxu0 %vm369_vm0, %v392_v28 }
  0x59   : > { %1979 = vmatprep.mubr.msk.f32.mxu0 %vm562_vm1, %v894_v18 }
  0x90   : > { %v400_v29 = vpop.permute.xlu0 %399 }
  0x91   : > { %v410_v30 = vpop.permute.xlu1 %409 }
  0x94   : > { %v405_v31 = vpop.permute.xlu0 %404 }
  0x95   : > { %v415_v37 = vpop.permute.xlu1 %414 }
 0x127   : > { %v1925_v32 = vpop.f32.mrb[0].mxu0 }
 0x128   : > { %v2459_v33 = vadd.f32 %v1925_v32, %v405_v31  ;;  %v495_v34 = vpop.f32.mrb[1].mxu0 }
 0x129   : > { %v2461_v35 = vadd.f32 %v495_v34, %v400_v29 }
 0x12b   : > { %v1928_v38 = vpop.f32.mrb[2].mxu0  ;;  %v2202_v39 = vpack.i.bf16 %v2459_v33, %v2461_v35  ;;  %v2064_v60 = vpack.c.bf16 %v2459_v33, %v2461_v35 }
 0x12c   : > { %v2469_v40 = vadd.f32 %v1928_v38, %v415_v37  ;;  %v505_v41 = vpop.f32.mrb[3].mxu0 }
 0x12d   : > { %v2471_v42 = vadd.f32 %v505_v41, %v410_v30  ;;  %2203 = vrot.lane.b32.xlu0 %v2202_v39, %s2311_s27  ;;  %v896_v41 = vld [vmem:[%s2779_s5 + $0x10] sm:$0xff] }
 0x12f   : > { %v2207_v43 = vpack.i.bf16 %v2469_v40, %v2471_v42  ;;  %v2068_v2 = vpack.c.bf16 %v2469_v40, %v2471_v42 }
 0x131   : > { %2208 = vrot.lane.b32.xlu1 %v2207_v43, %s2311_s27  ;;  %2213 = vrot.lane.b32.xlu0 %v2202_v39, %s2785_s28  ;;  %v895_v39 = vld [vmem:[%s2779_s5 + $0x8] sm:$0xff]  ;;  %s2313_s27 = smov 4  }
 0x135   : > { %2218 = vrot.lane.b32.xlu1 %v2207_v43, %s2785_s28  ;;  %868 = vperm.xlu0 %2200, %v862_v44   ;;  %v897_v43 = vld [vmem:[%s2779_s5 + $0x18] sm:$0xff] }
 0x139   : > { %873 = vperm.xlu1 %2201, %v863_v45   ;;  %878 = vperm.xlu0 %2200, %v864_v46  }
 0x13d   : > { %883 = vperm.xlu1 %2201, %v865_v47   ;;  %1005 = vperm.xlu0 %2200, %v999_v48  }
 0x141   : > { %1010 = vperm.xlu1 %2201, %v1000_v49   ;;  %1015 = vperm.xlu0 %2200, %v1001_v50  }
 0x145   : > { %1020 = vperm.xlu1 %2201, %v1002_v51  }
 0x19f   : > { %v2204_v52 = vpop.permute.xlu0 %2203 }
 0x1a0   : > { %v2206_v53 = vunpack.i.h.bf16 %v2204_v52  ;;  %v2205_v54 = vunpack.i.l.bf16 %v2204_v52 }
 0x1a2   : > { %v2052_v55 = vpack.c.bf16 %v2206_v53, %v2205_v54 }
 0x1a3   : > { %v2209_v56 = vpop.permute.xlu1 %2208  ;;  %v2214_v61 = vpop.permute.xlu0 %2213 }
 0x1a4   : > { %v2211_v57 = vunpack.i.h.bf16 %v2209_v56  ;;  %v2210_v58 = vunpack.i.l.bf16 %v2209_v56  ;;  %2054 = vmatprep.subr.msk.bf16.mxu1 %vm2053_vm4, %v2052_v55  ;;  %v2216_v0 = vunpack.i.h.bf16 %v2214_v61  ;;  %v2215_v1 = vunpack.i.l.bf16 %v2214_v61  ;;  %v1826_v61 = vld [vmem:[%s2778_s4 + $0x28] sm:$0xff] }
 0x1a5   : > { %2057 = vmatpush3.bf16.msk.msra.mxu1 %vm2053_vm4, %v2052_v55  ;;  %v1789_v55 = vld [vmem:[%s2777_s3 + $0x80] sm:$0xff] }
 0x1a6   : > { %v2058_v59 = vpack.c.bf16 %v2211_v57, %v2210_v58  ;;  %v2072_v7 = vpack.c.bf16 %v2216_v0, %v2215_v1  ;;  %v1839_v0 = vld [vmem:[%s2780_s6 + $0x30] sm:$0xff]  ;;  %v1838_v1 = vld [vmem:[%s2780_s6 + $0x28] sm:$0xff] }
 0x1a7   : > { %v2219_v3 = vpop.permute.xlu1 %2218 }
 0x1a8   : > { %2060 = vmatprep.subr.msk.bf16.mxu1 %vm2053_vm4, %v2058_v59  ;;  %v2221_v8 = vunpack.i.h.bf16 %v2219_v3  ;;  %v2220_v9 = vunpack.i.l.bf16 %v2219_v3  ;;  %v1840_v3 = vld [vmem:[%s2780_s6 + $0x38] sm:$0xff] }
 0x1a9   : > { %2063 = vmatpush3.bf16.msk.msra.mxu1 %vm2053_vm4, %v2058_v59 }
 0x1aa   : > { %2065 = vmatprep.subr.bf16.mxu1 %v2064_v60  ;;  %v2078_v12 = vpack.c.bf16 %v2221_v8, %v2220_v9 }
 0x1ac   : > { %1938 = vmatmul.mubr.msk.f32.vlgmr.msra.gmra.mrb[0].mxu1 %vm562_vm1, %v1750_v62  ;;  %v1837_v62 = vld [vmem:[%s2780_s6 + $0x20] sm:$0xff] }
 0x1ad   : > { %2067 = vmatpush3.bf16.msra.mxu1 %v2064_v60  ;;  %1940 = vmatprep.mubr.msk.f32.mxu1 %vm562_vm1, %v1751_v63  ;;  %v1827_v60 = vld [vmem:[%s2778_s4 + $0x30] sm:$0xff]  ;;  %v1828_v63 = vld [vmem:[%s2778_s4 + $0x38] sm:$0xff] }
 0x1ae   : > { %2069 = vmatprep.subr.bf16.mxu1 %v2068_v2 }
 0x1b0   : > { %1941 = vmatmul.mubr.msk.f32.gmra.mrb[2].mxu1 %vm562_vm1, %v1752_v4 }
 0x1b1   : > { %2071 = vmatpush3.bf16.msra.mxu1 %v2068_v2  ;;  %1951 = vmatprep.mubr.msk.f32.mxu1 %vm562_vm1, %v1745_v5  ;;  %v1547_v2 = vld [vmem:[%s2782_s8] sm:$0xff] }
 0x1b2   : > { %2074 = vmatprep.subr.msk.bf16.mxu1 %vm2519_vm7, %v2072_v7 }
 0x1b4   : > { %1952 = vmatmul.mubr.msk.f32.vlgmr.msra.gmra.mrb[0].mxu1 %vm562_vm1, %v1746_v10  ;;  %v869_v20 = vpop.permute.xlu0 %868 }
 0x1b5   : > { %2077 = vmatpush3.bf16.msk.msra.mxu1 %vm2519_vm7, %v2072_v7  ;;  %1954 = vmatprep.mubr.msk.f32.mxu1 %vm562_vm1, %v1747_v11 }
 0x1b6   : > { %2080 = vmatprep.subr.msk.bf16.mxu1 %vm2519_vm7, %v2078_v12 }
 0x1b8   : > { %1955 = vmatmul.mubr.msk.f32.gmra.mrb[2].mxu1 %vm562_vm1, %v1748_v13  ;;  %v874_v19 = vpop.permute.xlu1 %873  ;;  %v879_v29 = vpop.permute.xlu0 %878 }
 0x1b9   : > { %2083 = vmatpush3.bf16.msk.msra.mxu1 %vm2519_vm7, %v2078_v12  ;;  %1965 = vmatprep.mubr.msk.f32.mxu1 %vm562_vm1, %v757_v14 }
 0x1bc   : > { %1966 = vmatmul.mubr.msk.f32.vlgmr.msra.gmra.mrb[0].mxu1 %vm562_vm1, %v758_v15  ;;  %v884_v26 = vpop.permute.xlu1 %883  ;;  %v1006_v46 = vpop.permute.xlu0 %1005  ;;  %v1790_v15 = vld [vmem:[%s2777_s3 + $0x88] sm:$0xff] }
 0x1bd   : > { %1968 = vmatprep.mubr.msk.f32.mxu1 %vm562_vm1, %v759_v16  ;;  %v1791_v16 = vld [vmem:[%s2777_s3 + $0x90] sm:$0xff] }
 0x1c0   : > { %1969 = vmatmul.mubr.msk.f32.gmra.mrb[2].mxu1 %vm562_vm1, %v760_v17  ;;  %v1011_v44 = vpop.permute.xlu1 %1010 }
 0x1c4   : > { %v1021_v56 = vpop.permute.xlu1 %1020 }
 0x28f   : > { %v1967_v21 = vpop.f32.mrb[0].mxu1 }
 0x290   : > { %v887_v22 = vadd.f32 %v1967_v21, %v874_v19  ;;  %v839_v23 = vpop.f32.mrb[1].mxu1  ;;  %v1785_v21 = vld [vmem:[%s2777_s3 + $0xa0] sm:$0xff] }
 0x291   : > { %v886_v24 = vadd.f32 %v869_v20, %v839_v23  ;;  %v1792_v20 = vld [vmem:[%s2777_s3 + $0x98] sm:$0xff] }
 0x292   : > { %v891_v25 = vmax.f32 %v887_v22, 0.0 }
 0x293   : > { %v890_v27 = vmax.f32 %v886_v24, 0.0  ;;  %v1970_v28 = vpop.f32.mrb[2].mxu1 }
 0x294   : > { %v889_v30 = vadd.f32 %v1970_v28, %v884_v26  ;;  %v849_v31 = vpop.f32.mrb[3].mxu1  ;;  %v1786_v26 = vld [vmem:[%s2777_s3 + $0xa8] sm:$0xff] }
 0x295   : > { %v2084_v32 = vpack.c.bf16 %v891_v25, %v890_v27  ;;  %v888_v34 = vadd.f32 %v879_v29, %v849_v31  ;;  %v1787_v27 = vld [vmem:[%s2777_s3 + $0xb0] sm:$0xff]  ;;  %v1788_v29 = vld [vmem:[%s2777_s3 + $0xb8] sm:$0xff]  ;;  %v1810_v31 = vld [vmem:[%s2777_s3 + $0x68] sm:$0xff] }
 0x296   : > { %v893_v36 = vmax.f32 %v889_v30, 0.0  ;;  %v1809_v30 = vld [vmem:[%s2777_s3 + $0x60] sm:$0xff] }
 0x297   : > { %v892_v37 = vmax.f32 %v888_v34, 0.0  ;;  %2085 = vmatprep.subr.bf16.mxu0 %v2084_v32  ;;  %v1812_v34 = vld [vmem:[%s2777_s3 + $0x78] sm:$0xff] }
 0x298   : > { %2087 = vmatpush3.bf16.msra.mxu0 %v2084_v32  ;;  %v1811_v32 = vld [vmem:[%s2777_s3 + $0x70] sm:$0xff] }
 0x299   : > { %v2088_v38 = vpack.c.bf16 %v893_v36, %v892_v37  ;;  %v1829_v36 = vld [vmem:[%s2779_s5 + $0x20] sm:$0xff] }
 0x29a   : > { %2035 = vmatprep.mubr.msk.f32.mxu1 %vm562_vm1, %v1829_v36 }
 0x29b   : > { %2089 = vmatprep.subr.bf16.mxu0 %v2088_v38 }
 0x29c   : > { %2091 = vmatpush3.bf16.msra.mxu0 %v2088_v38 }
 0x29f   : > { %1980 = vmatmul.mubr.msk.f32.vlgmr.msra.gmra.mrb[4].mxu0 %vm562_vm1, %v895_v39 }
 0x2a0   : > { %1982 = vmatprep.mubr.msk.f32.mxu0 %vm562_vm1, %v896_v41 }
 0x2a3   : > { %1983 = vmatmul.mubr.msk.f32.gmra.mrb[6].mxu0 %vm562_vm1, %v897_v43 }
 0x2a4   : > { %1993 = vmatprep.mubr.msk.f32.mxu0 %vm562_vm1, %v1789_v55 }
 0x372   : > { %v1981_v45 = vpop.f32.mrb[4].mxu0 }
 0x373   : > { %v996_v47 = vadd.f32 %v1981_v45, %v2459_v33  ;;  %v976_v48 = vpop.f32.mrb[5].mxu0 }
 0x374   : > { %v995_v49 = vadd.f32 %v976_v48, %v2461_v35  ;;  %v1016_v35 = vpop.permute.xlu0 %1015 }
 0x375   : > { %v2579_v50 = vadd.f32 %v1011_v44, %v996_v47 }
 0x376   : > { %v2581_v51 = vadd.f32 %v1006_v46, %v995_v49  ;;  %v1984_v52 = vpop.f32.mrb[6].mxu0 }
 0x377   : > { %v998_v53 = vadd.f32 %v1984_v52, %v2469_v40  ;;  %v986_v54 = vpop.f32.mrb[7].mxu0 }
 0x378   : > { %v997_v57 = vadd.f32 %v986_v54, %v2471_v42  ;;  %v2222_v33 = vpack.i.bf16 %v2579_v50, %v2581_v51  ;;  %v1825_v42 = vld [vmem:[%s2778_s4 + $0x20] sm:$0xff]  ;;  %v2104_v13 = vpack.c.bf16 %v2579_v50, %v2581_v51 }
 0x379   : > { %v2591_v58 = vadd.f32 %v1021_v56, %v998_v53 }
 0x37a   : > { %v2593_v59 = vadd.f32 %v1016_v35, %v997_v57  ;;  %2223 = vrot.lane.b32.xlu0 %v2222_v33, %s2793_s26  ;;  %v1830_v35 = vld [vmem:[%s2779_s5 + $0x28] sm:$0xff] }
 0x37c   : > { %v2227_v40 = vpack.i.bf16 %v2591_v58, %v2593_v59  ;;  %v2108_v19 = vpack.c.bf16 %v2591_v58, %v2593_v59 }
 0x37e   : > { %2233 = vrot.lane.b32.xlu0 %v2222_v33, %s2313_s27  ;;  %2228 = vrot.lane.b32.xlu1 %v2227_v40, %s2793_s26  ;;  %s356_s26 = sand.u32 1, %s2300_s14  }
 0x37f   : > { %s1633_s28 = scalar_lea.sflag [#allocation3], %s356_s26 }
 0x382   : > { %1381 = vperm.xlu0 %2200, %v1825_v42   ;;  %2238 = vrot.lane.b32.xlu1 %v2227_v40, %s2313_s27  ;;  %v1831_v40 = vld [vmem:[%s2779_s5 + $0x30] sm:$0xff]  ;;  %v1832_v42 = vld [vmem:[%s2779_s5 + $0x38] sm:$0xff]  ;;  %s1737_s27 = sshll.u32 %s356_s26, 3 }
 0x383   : > { %s358_s30 = scalar_lea.vmem [#allocation2], %s1737_s27 }
 0x384   : > { %s1649_s12 = sshll.u32 %s358_s30, 4  ;;  %s2733_s12 = int_to_ptr.vmem [resolvable:$true] %s1649_s12 }
 0x385   : > { %s2246_s17 = scalar_lea.vmem %s2733_s12, 128 }
 0x386   : > { %1391 = vperm.xlu0 %2200, %v1827_v60   ;;  %1386 = vperm.xlu1 %2201, %v1826_v61   ;;  %v2314_v60 = vmov 0.0|0.0   ;;  %v2316_v61 = vmov 0.0   ;;  %p2247_p11 = scmp.ne.s32.totalorder %s2733_s12, %s2246_s17 }
 0x388   : > { %p2248_p12 = pnand %p2247_p11, %p2411_p5 }
 0x38a   : > { %1520 = vperm.xlu0 %2200, %v1837_v62   ;;  %1396 = vperm.xlu1 %2201, %v1828_v63   ;;  %p2249_p13 = pneg %p2248_p12 }
 0x38e   : > { %1530 = vperm.xlu0 %2200, %v1839_v0   ;;  %1525 = vperm.xlu1 %2201, %v1838_v1  }
 0x392   : > { %1550 = vperm.xlu0 %2200, %v1547_v2   ;;  %1535 = vperm.xlu1 %2201, %v1840_v3  }
 0x3ec   : > { %v2224_v4 = vpop.permute.xlu0 %2223 }
 0x3ed   : > { %v2226_v5 = vunpack.i.h.bf16 %v2224_v4  ;;  %v2225_v7 = vunpack.i.l.bf16 %v2224_v4 }
 0x3ef   : > { %v2092_v8 = vpack.c.bf16 %v2226_v5, %v2225_v7 }
 0x3f0   : > { %v2229_v9 = vpop.permute.xlu1 %2228  ;;  %v2234_v14 = vpop.permute.xlu0 %2233 }
 0x3f1   : > { %v2231_v10 = vunpack.i.h.bf16 %v2229_v9  ;;  %v2230_v11 = vunpack.i.l.bf16 %v2229_v9  ;;  %2094 = vmatprep.subr.msk.bf16.mxu0 %vm2519_vm7, %v2092_v8  ;;  %v2236_v17 = vunpack.i.h.bf16 %v2234_v14  ;;  %v2235_v18 = vunpack.i.l.bf16 %v2234_v14 }
 0x3f2   : > { %2097 = vmatpush3.bf16.msk.msra.mxu0 %vm2519_vm7, %v2092_v8 }
 0x3f3   : > { %v2098_v12 = vpack.c.bf16 %v2231_v10, %v2230_v11  ;;  %v2112_v23 = vpack.c.bf16 %v2236_v17, %v2235_v18 }
 0x3f4   : > { %v2239_v6 = vpop.permute.xlu1 %2238 }
 0x3f5   : > { %2100 = vmatprep.subr.msk.bf16.mxu0 %vm2519_vm7, %v2098_v12  ;;  %v2241_v24 = vunpack.i.h.bf16 %v2239_v6  ;;  %v2240_v25 = vunpack.i.l.bf16 %v2239_v6 }
 0x3f6   : > { %2103 = vmatpush3.bf16.msk.msra.mxu0 %vm2519_vm7, %v2098_v12 }
 0x3f7   : > { %2105 = vmatprep.subr.bf16.mxu0 %v2104_v13  ;;  %v2118_v28 = vpack.c.bf16 %v2241_v24, %v2240_v25 }
 0x3f9   : > { %1994 = vmatmul.mubr.msk.f32.vlgmr.msra.gmra.mrb[8].mxu0 %vm562_vm1, %v1790_v15 }
 0x3fa   : > { %2107 = vmatpush3.bf16.msra.mxu0 %v2104_v13  ;;  %1996 = vmatprep.mubr.msk.f32.mxu0 %vm562_vm1, %v1791_v16 }
 0x3fb   : > { %2109 = vmatprep.subr.bf16.mxu0 %v2108_v19 }
 0x3fd   : > { %1997 = vmatmul.mubr.msk.f32.gmra.mrb[10].mxu0 %vm562_vm1, %v1792_v20 }
 0x3fe   : > { %2111 = vmatpush3.bf16.msra.mxu0 %v2108_v19  ;;  %2007 = vmatprep.mubr.msk.f32.mxu0 %vm562_vm1, %v1785_v21 }
 0x3ff   : > { %2114 = vmatprep.subr.msk.bf16.mxu0 %vm2652_vm10, %v2112_v23 }
 0x401   : > { %2008 = vmatmul.mubr.msk.f32.vlgmr.msra.gmra.mrb[8].mxu0 %vm562_vm1, %v1786_v26  ;;  %v1382_v38 = vpop.permute.xlu0 %1381 }
 0x402   : > { %2117 = vmatpush3.bf16.msk.msra.mxu0 %vm2652_vm10, %v2112_v23  ;;  %2010 = vmatprep.mubr.msk.f32.mxu0 %vm562_vm1, %v1787_v27 }
 0x403   : > { %2120 = vmatprep.subr.msk.bf16.mxu0 %vm2652_vm10, %v2118_v28 }
 0x405   : > { %2011 = vmatmul.mubr.msk.f32.gmra.mrb[10].mxu0 %vm562_vm1, %v1788_v29  ;;  %v1387_v37 = vpop.permute.xlu1 %1386  ;;  %v1392_v49 = vpop.permute.xlu0 %1391 }
 0x406   : > { %2123 = vmatpush3.bf16.msk.msra.mxu0 %vm2652_vm10, %v2118_v28  ;;  %2021 = vmatprep.mubr.msk.f32.mxu0 %vm562_vm1, %v1809_v30 }
 0x409   : > { %2022 = vmatmul.mubr.msk.f32.vlgmr.msra.gmra.mrb[8].mxu0 %vm562_vm1, %v1810_v31  ;;  %v1397_v46 = vpop.permute.xlu1 %1396  ;;  %v1521_v0 = vpop.permute.xlu0 %1520 }
 0x40a   : > { %2024 = vmatprep.mubr.msk.f32.mxu0 %vm562_vm1, %v1811_v32 }
 0x40d   : > { %2025 = vmatmul.mubr.msk.f32.gmra.mrb[10].mxu0 %vm562_vm1, %v1812_v34  ;;  %v1526_v62 = vpop.permute.xlu1 %1525  ;;  %v1531_v12 = vpop.permute.xlu0 %1530 }
 0x411   : > { %v1536_v10 = vpop.permute.xlu1 %1535 }
 0x4dc   : > { %v2023_v39 = vpop.f32.mrb[8].mxu0 }
 0x4dd   : > { %v1400_v41 = vadd.f32 %v2023_v39, %v1387_v37  ;;  %v1351_v43 = vpop.f32.mrb[9].mxu0 }
 0x4de   : > { %v1399_v44 = vadd.f32 %v1382_v38, %v1351_v43 }
 0x4df   : > { %v1404_v45 = vmax.f32 %v1400_v41, 0.0 }
 0x4e0   : > { %v1403_v47 = vmax.f32 %v1399_v44, 0.0  ;;  %v2026_v48 = vpop.f32.mrb[10].mxu0 }
 0x4e1   : > { %v1402_v52 = vadd.f32 %v2026_v48, %v1397_v46  ;;  %v1361_v53 = vpop.f32.mrb[11].mxu0 }
 0x4e2   : > { %v2124_v54 = vpack.c.bf16 %v1404_v45, %v1403_v47  ;;  %v1401_v55 = vadd.f32 %v1392_v49, %v1361_v53 }
 0x4e3   : > { %v1406_v56 = vmax.f32 %v1402_v52, 0.0 }
 0x4e4   : > { %v1405_v57 = vmax.f32 %v1401_v55, 0.0  ;;  %2125 = vmatprep.subr.bf16.mxu1 %v2124_v54 }
 0x4e5   : > { %2127 = vmatpush3.bf16.msra.mxu1 %v2124_v54 }
 0x4e6   : > { %v2128_v33 = vpack.c.bf16 %v1406_v56, %v1405_v57 }
 0x4e8   : > { %2129 = vmatprep.subr.bf16.mxu1 %v2128_v33 }
 0x4e9   : > { %2131 = vmatpush3.bf16.msra.mxu1 %v2128_v33 }
 0x4ea   : > { %2132 = vmatprep.subr.bf16.mxu1 %v2314_v60 }
 0x4ec   : > { %2036 = vmatmul.mubr.msk.f32.vlgmr.msra.gmra.mrb[4].mxu1 %vm562_vm1, %v1830_v35 }
 0x4ed   : > { %2038 = vmatprep.mubr.msk.f32.mxu1 %vm562_vm1, %v1831_v40 }
 0x4f0   : > { %2039 = vmatmul.mubr.msk.f32.gmra.mrb[6].mxu1 %vm562_vm1, %v1832_v42 }
 0x4f1   : > { %2049 = vmatprep.mubr.msk.f32.mxu1 %vm2315_vm11, %v2316_v61 }
 0x5bf   : > { %v2037_v63 = vpop.f32.mrb[4].mxu1 }
 0x5c0   : > { %v1510_v1 = vadd.f32 %v2037_v63, %v2579_v50  ;;  %v1490_v2 = vpop.f32.mrb[5].mxu1 }
 0x5c1   : > { %v1509_v3 = vadd.f32 %v1490_v2, %v2581_v51 }
 0x5c2   : > { %v1539_v4 = vadd.f32 %v1526_v62, %v1510_v1 }
 0x5c3   : > { %v1538_v5 = vadd.f32 %v1521_v0, %v1509_v3  ;;  %v2040_v7 = vpop.f32.mrb[6].mxu1 }
 0x5c4   : > { %1543 = vst.msk [vmem:[%s367_s0 + $0x8] sm:$0xff] %vm369_vm0, %v1539_v4  ;;  %v1512_v8 = vadd.f32 %v2040_v7, %v2591_v58  ;;  %v1500_v9 = vpop.f32.mrb[7].mxu1  ;;  %v1546_v58 = vld [vmem:[%s2781_s7] sm:$0xff] }
 0x5c5   : > { %1542 = vst.msk [vmem:[%s367_s0] sm:$0xff] %vm369_vm0, %v1538_v5  ;;  %v2133_v50 = vpack.c.bf16 %v1539_v4, %v1538_v5  ;;  %v1511_v11 = vadd.f32 %v1500_v9, %v2593_v59  ;;  %v1551_v59 = vpop.permute.xlu0 %1550 }
 0x5c6   : > { %v1541_v13 = vadd.f32 %v1536_v10, %v1512_v8 }
 0x5c7   : > { %v1540_v14 = vadd.f32 %v1531_v12, %v1511_v11  ;;  %2134 = vmatpush3.bf16.msra.mxu1 %v2133_v50 }
 0x5c8   : > { %1545 = vst.msk [vmem:[%s367_s0 + $0x18] sm:$0xff] %vm369_vm0, %v1541_v13  ;;  %2135 = vmatprep.subr.bf16.mxu1 %v2314_v60 }
 0x5c9   : > { %1544 = vst.msk [vmem:[%s367_s0 + $0x10] sm:$0xff] %vm369_vm0, %v1540_v14  ;;  %v2136_v51 = vpack.c.bf16 %v1541_v13, %v1540_v14  ;;  %s2317_s0 = smov [#allocation2]  }
 0x5ca   : > { %s2250_s11 = sshll.u32 %s2317_s0, 4  ;;  %s2251_s11 = int_to_ptr.vmem [resolvable:$false] %s2250_s11 }
 0x5cb   : > { %2137 = vmatpush3.bf16.msra.mxu1 %v2136_v51  ;;  %s2252_s25 = scalar_lea.vmem %s2251_s11, 256  ;;  %p2253_p0 = scmp.lt.s32.totalorder %s2733_s12, %s2251_s11 }
 0x5cc   : > { %p2254_p1 = scmp.lt.s32.totalorder %s2252_s25, %s2246_s17 }
 0x5ce   : > { %2050 = vmatmul.mubr.msk.f32.vlgmr.msra.gmra.mrb[8].mxu1 %vm562_vm1, %v1546_v58  ;;  %p2255_p2 = por %p2254_p1, %p2253_p0 }
 0x5d0   : > { %p2256_p3 = pnand %p2255_p2, %p2249_p13 }
 0x6a1   : > { %v1622_v15 = vpop.f32.mrb[8].mxu1 }
 0x6a2   : > { %v1623_v16 = vadd.f32 %v1622_v15, %v1551_v59  ;;  %v2051_v17 = vpop.f32.mrb[9].mxu1 }
 0x6a4   : > { %1626 = vst.msk [vmem:[%s358_s30] sm:$0xff] %vm369_vm0, %v1623_v16 }
 0x6a5   : > { %2259 = shalt.err (!%p2256_p3)
}
 0x6a6   : > { %s2260_s26 = scalar_lea.hbm %s2731_s21, 128  ;;  %s2264_s30 = scalar_lea.hbm %s2784_s10, 256 }
 0x6a7   : > { %p2261_p4 = scmp.ne.s32.totalorder %s2731_s21, %s2260_s26  ;;  %p2265_p9 = scmp.lt.u32.totalorder %s2731_s21, %s2784_s10 }
 0x6a8   : > { %p2266_p10 = scmp.lt.u32.totalorder %s2264_s30, %s2260_s26  ;;  %p2268_p12 = scmp.lt.u32.totalorder %s2260_s26, %s2731_s21 }
 0x6a9   : > { %p2262_p7 = pnand %p2261_p4, %p2411_p5 }
 0x6aa   : > { %p2267_p11 = por %p2266_p10, %p2265_p9 }
 0x6ab   : > { %p2263_p8 = pneg %p2262_p7 }
 0x6ac   : > { %p2269_p13 = por %p2268_p12, %p2267_p11 }
 0x6ae   : > { %p2270_p0 = pnand %p2269_p13, %p2263_p8 }
 0x6b0   : > { %2273 = shalt.err (!%p2270_p0)
}
 0x6b1   : > { %2154 = dma.vmem_to_hbm [thread:$0]  (%p2411_p5), %s2733_s12, 128, %s2731_s21, %s1633_s28  }
 0x6b2 PF: > { %p2160_p1 = scmp.ge.s32.totalorder %s2308_s16, 2  ;;  %s1669_s17 = sand.u32 1, %s2296_s13  }
 0x6b3   : > { %s1670_s0 = scalar_lea.sflag [#allocation3], %s1669_s17 }
 0x6b4   : > { %p2157_p2 = pnand %p2160_p1, %p2415_p6 }
 0x6b6   : > { %2291 = dma.done.wait (!%p2157_p2), %s1670_s0, 128  }
 0x6b7   : > { %2293 = vsyncadd (!%p2157_p2), %s1670_s0, 4294967168  ;;  %p21_p3 = scmp.ge.s32.totalorder %s2398_s19, 4   ;;  %s2796_s13 = smov %s2300_s14 }
 0x6b8   : > { %s2797_s14 = smov %s2304_s15  ;;  %s2798_s15 = smov %s2409_s22 }
 0x6b9   : > { %s2799_s16 = smov %s2398_s19  ;;  %23 = sbr.rel (!%p21_p3) target bundleno = 5 (0x5), region = 111 }
 0x6c0   :  { %1675 = vsyncpa [#allocation3], 1 }
 0x6c1   :  { %1677 = vsyncpa [#allocation3 + $0x1], 1 }

// kernel: mstr_forward.15
= control target key start
LH: loop header
LB: loop body
LE: loop exit
PB: predicated region body
PF: predicated region fallthrough
CT: control target
= control target key end

     0   :  { %s2264_s13 = smov 0   ;;  %s2586_s0 = inlined_call_operand.vmem [shape: f32[2,8,8], index: 0, kind: input, shape index: {}]   ;;  %s2587_s1 = inlined_call_operand.vmem [shape: f32[32,8], index: 1, kind: input, shape index: {}]   ;;  %s2588_s2 = inlined_call_operand.vmem [shape: f32[32,1], index: 2, kind: input, shape index: {}]   ;;  %s2589_s3 = inlined_call_operand.vmem [shape: f32[6,32,32], index: 3, kind: input, shape index: {}]   ;;  %s2590_s4 = inlined_call_operand.vmem [shape: f32[2,32,1], index: 4, kind: input, shape index: {}]   ;;  %s2591_s5 = inlined_call_operand.vmem [shape: f32[2,32,32], index: 5, kind: input, shape index: {}]   ;;  %s2592_s6 = inlined_call_operand.vmem [shape: f32[2,32,1], index: 6, kind: input, shape index: {}]   ;;  %s2593_s7 = inlined_call_operand.vmem [shape: f32[8,32], index: 7, kind: input, shape index: {}]   ;;  %s2594_s8 = inlined_call_operand.vmem [shape: f32[8,1], index: 8, kind: input, shape index: {}]   ;;  %s2595_s9 = inlined_call_operand.vmem [shape: f32[2,32,8], index: 9, kind: output, shape index: {0}]   ;;  %s2596_s10 = inlined_call_operand.vmem [shape: f32[2,8,8], index: 10, kind: output, shape index: {1}]  }
   0x1 LB: > { %s1713_s14 = sadd.s32 4294967295, %s2200_s13   ;;  %p1717_p0 = scmp.ge.s32.totalorder %s2200_s13, 1  ;;  %s2200_s13 = sphi %s2264_s13, %s21_s13  }
   0x2   : > { %p314_p1 = scmp.lt.s32.totalorder %s2200_s13, 3 }
   0x4   : > { %p315_p2 = pnand %p1717_p0, %p314_p1 }
   0x5   : > { %p355_p3 = scmp.lt.s32.totalorder (!%p315_p2), %s1713_s14, 1  ;;  %vm369_vm0 = vcmask (!%p315_p2), 64512   ;;  %v389_v0 = vld [vmem:[%s2587_s1] sm:$0xff] (!%p315_p2)  ;;  %v2202_v1 = vmov (!%p315_p2), 0   ;;  %v395_v3 = vld [vmem:[%s2588_s2 + $0x10] sm:$0xff] (!%p315_p2)  ;;  %v394_v4 = vld [vmem:[%s2588_s2 + $0x8] sm:$0xff] (!%p315_p2) }
   0x6   : > { %318 = sbr.rel (%p315_p2) target bundleno = 1690 (0x69a), region = 56  ;;  %1902 = vmatprep.mubr.msk.f32.mxu0 (!%p315_p2), %vm369_vm0, %v389_v0  ;;  %2148 = vset.pattern.permute.xlu0 (!%p315_p2), %v2202_v1  ;;  %v393_v2 = vld [vmem:[%s2588_s2] sm:$0xff] (!%p315_p2)  ;;  %v396_v5 = vld [vmem:[%s2588_s2 + $0x18] sm:$0xff] (!%p315_p2)  ;;  %v390_v26 = vld [vmem:[%s2587_s1 + $0x8] sm:$0xff] (!%p315_p2)  ;;  %vm562_vm1 = vcmask (!%p315_p2), 261120   ;;  %s2203_s19 = smov (!%p315_p2), 1  }
   0x7   : > { %399 = vperm.xlu0 (!%p315_p2), %2148, %v393_v2   ;;  %2149 = vset.pattern.permute.xlu1 (!%p315_p2), %v2202_v1  ;;  %v391_v27 = vld [vmem:[%s2587_s1 + $0x10] sm:$0xff] (!%p315_p2)  ;;  %v392_v28 = vld [vmem:[%s2587_s1 + $0x18] sm:$0xff] (!%p315_p2)  ;;  %v1730_v36 = vld [vmem:[%s2589_s3 + $0x20] sm:$0xff] (!%p315_p2)  ;;  %s2204_s20 = smov (!%p315_p2), 2   ;;  %vm530_vm2 = vcmask (!%p315_p2), 7168   ;;  %vm547_vm5 = vcmask (!%p315_p2), 15360  }
   0x8   : > { %409 = vperm.xlu1 (!%p315_p2), %2149, %v395_v3   ;;  %1916 = vmatprep.mubr.msk.f32.mxu1 (!%p315_p2), %vm562_vm1, %v1730_v36  ;;  %v862_v44 = vld [vmem:[%s2590_s4] sm:$0xff] (!%p315_p2)  ;;  %v863_v45 = vld [vmem:[%s2590_s4 + $0x8] sm:$0xff] (!%p315_p2)  ;;  %v864_v46 = vld [vmem:[%s2590_s4 + $0x10] sm:$0xff] (!%p315_p2)  ;;  %s2205_s21 = smov (!%p315_p2), 4   ;;  %vm1059_vm8 = vcmask (!%p315_p2), 31744   ;;  %vm2207_vm11 = vmmov (!%p315_p2), 0  }
   0x9   : > { %v865_v47 = vld [vmem:[%s2590_s4 + $0x18] sm:$0xff] (!%p315_p2)  ;;  %v999_v48 = vld [vmem:[%s2592_s6] sm:$0xff] (!%p315_p2)  ;;  %v1000_v49 = vld [vmem:[%s2592_s6 + $0x8] sm:$0xff] (!%p315_p2) }
   0xa   : > { %v1001_v50 = vld [vmem:[%s2592_s6 + $0x10] sm:$0xff] (!%p315_p2)  ;;  %v1002_v51 = vld [vmem:[%s2592_s6 + $0x18] sm:$0xff] (!%p315_p2)  ;;  %vm1734_vm3 = vmneg (!%p315_p2), %vm530_vm2 }
   0xb   : > { %404 = vperm.xlu0 (!%p315_p2), %2148, %v394_v4   ;;  %vm2032_vm4 = vmpackc.low (!%p315_p2), %vm1734_vm3, %vm1734_vm3  ;;  %v1731_v62 = vld [vmem:[%s2589_s3 + $0x28] sm:$0xff] (!%p315_p2)  ;;  %v1732_v63 = vld [vmem:[%s2589_s3 + $0x30] sm:$0xff] (!%p315_p2) }
   0xc   : > { %414 = vperm.xlu1 (!%p315_p2), %2149, %v396_v5   ;;  %vm1750_vm6 = vmneg (!%p315_p2), %vm547_vm5  ;;  %v1733_v4 = vld [vmem:[%s2589_s3 + $0x38] sm:$0xff] (!%p315_p2)  ;;  %v1726_v5 = vld [vmem:[%s2589_s3 + $0x40] sm:$0xff] (!%p315_p2) }
   0xd   : > { %s2602_s14 = smov (!%p355_p3, %s1713_s14), 1  ;;  %vm2370_vm7 = vmpackc.low %vm1750_vm6, %vm1750_vm6 }
   0xe   : > { %s1718_s23 = sshll.u32 %s2602_s14, 3  ;;  %vm1794_vm9 = vmneg %vm1059_vm8  ;;  %s1825_s18 = sshll.u32 %s2602_s14, 5 }
   0xf   : > { %s358_s28 = scalar_lea.vmem %s2586_s0, %s1718_s23  ;;  %vm2503_vm10 = vmpackc.low %vm1794_vm9, %vm1794_vm9  ;;  %s363_s22 = scalar_lea.vmem %s2595_s9, %s1825_s18 }
  0x10   : > { %v368_v6 = vld [vmem:[%s358_s28] sm:$0xff]  ;;  %s367_s28 = scalar_lea.vmem %s2596_s10, %s1718_s23 }
  0x11   : > { %v370_v7 = vsel %vm369_vm0, %v368_v6, -inf }
  0x12   : > { %v371_v8 = vrot.slane %v370_v7, 4 }
  0x14   : > { %v372_v9 = vmax.f32 %v370_v7, %v371_v8 }
  0x16   : > { %v373_v10 = vrot.slane %v372_v9, 2 }
  0x18   : > { %v374_v11 = vmax.f32 %v372_v9, %v373_v10  ;;  %v1727_v10 = vld [vmem:[%s2589_s3 + $0x48] sm:$0xff] }
  0x1a   : > { %v375_v12 = vrot.slane %v374_v11, 1 }
  0x1c   : > { %v376_v13 = vmax.f32 %v374_v11, %v375_v12  ;;  %v1728_v11 = vld [vmem:[%s2589_s3 + $0x50] sm:$0xff] }
  0x1e   : > { %v377_v14 = vsub.f32 %v368_v6, %v376_v13  ;;  %v1729_v13 = vld [vmem:[%s2589_s3 + $0x58] sm:$0xff] }
  0x20   : > { %v378_v15 = vmul.f32 1.442695, %v377_v14  ;;  %v757_v14 = vld [vmem:[%s2589_s3] sm:$0xff] }
  0x22   : > { %2190 = vpow2.f32 %v378_v15  ;;  %v758_v15 = vld [vmem:[%s2589_s3 + $0x8] sm:$0xff] }
  0x2c   : > { %v2191_v16 = vpop.eup %2190 }
  0x2d   : > { %v380_v17 = vsel %vm369_vm0, %v2191_v16, 0.0 }
  0x2e   : > { %v381_v18 = vrot.slane %v380_v17, 4 }
  0x30   : > { %v382_v19 = vadd.f32 %v381_v18, %v380_v17  ;;  %v760_v17 = vld [vmem:[%s2589_s3 + $0x18] sm:$0xff]  ;;  %v894_v18 = vld [vmem:[%s2591_s5] sm:$0xff] }
  0x32   : > { %v383_v20 = vrot.slane %v382_v19, 2 }
  0x34   : > { %v384_v21 = vadd.f32 %v383_v20, %v382_v19 }
  0x36   : > { %v385_v22 = vrot.slane %v384_v21, 1 }
  0x38   : > { %v386_v23 = vadd.f32 %v385_v22, %v384_v21 }
  0x3a   : > { %2192 = vrcp.f32 %v386_v23 }
  0x44   : > { %v2193_v24 = vpop.eup %2192 }
  0x45   : > { %v388_v25 = vmul.f32 %v2193_v24, %v2191_v16  ;;  %v759_v16 = vld [vmem:[%s2589_s3 + $0x10] sm:$0xff] }
  0x47   : > { %1900 = vmatprep.subr.mxu0 %v388_v25 }
  0x48   : > { %1901 = vmatpush3.msra.mxu0 %v388_v25 }
  0x49   : > { %1903 = vmatmul.mubr.msk.f32.vlgmr.msra.gmra.mrb[0].mxu0 %vm369_vm0, %v390_v26 }
  0x4a   : > { %1905 = vmatprep.mubr.msk.f32.mxu0 %vm369_vm0, %v391_v27 }
  0x4d   : > { %1906 = vmatmul.mubr.msk.f32.gmra.mrb[2].mxu0 %vm369_vm0, %v392_v28 }
  0x4e   : > { %1958 = vmatprep.mubr.msk.f32.mxu0 %vm562_vm1, %v894_v18 }
  0x86   : > { %v400_v29 = vpop.permute.xlu0 %399 }
  0x87   : > { %v410_v30 = vpop.permute.xlu1 %409 }
  0x8a   : > { %v405_v31 = vpop.permute.xlu0 %404 }
  0x8b   : > { %v415_v37 = vpop.permute.xlu1 %414 }
 0x11c   : > { %v1904_v32 = vpop.f32.mrb[0].mxu0 }
 0x11d   : > { %v2310_v33 = vadd.f32 %v1904_v32, %v405_v31  ;;  %v495_v34 = vpop.f32.mrb[1].mxu0 }
 0x11e   : > { %v2312_v35 = vadd.f32 %v495_v34, %v400_v29 }
 0x120   : > { %v1907_v38 = vpop.f32.mrb[2].mxu0  ;;  %v2150_v39 = vpack.i.bf16 %v2310_v33, %v2312_v35  ;;  %v2043_v60 = vpack.c.bf16 %v2310_v33, %v2312_v35 }
 0x121   : > { %v2320_v40 = vadd.f32 %v1907_v38, %v415_v37  ;;  %v505_v41 = vpop.f32.mrb[3].mxu0 }
 0x122   : > { %v2322_v42 = vadd.f32 %v505_v41, %v410_v30  ;;  %2151 = vrot.lane.b32.xlu0 %v2150_v39, %s2203_s19  ;;  %v896_v41 = vld [vmem:[%s2591_s5 + $0x10] sm:$0xff] }
 0x124   : > { %v2155_v43 = vpack.i.bf16 %v2320_v40, %v2322_v42  ;;  %v2047_v2 = vpack.c.bf16 %v2320_v40, %v2322_v42 }
 0x126   : > { %2156 = vrot.lane.b32.xlu1 %v2155_v43, %s2203_s19  ;;  %2161 = vrot.lane.b32.xlu0 %v2150_v39, %s2204_s20  ;;  %v895_v39 = vld [vmem:[%s2591_s5 + $0x8] sm:$0xff] }
 0x12a   : > { %2166 = vrot.lane.b32.xlu1 %v2155_v43, %s2204_s20  ;;  %868 = vperm.xlu0 %2148, %v862_v44   ;;  %v897_v43 = vld [vmem:[%s2591_s5 + $0x18] sm:$0xff] }
 0x12e   : > { %873 = vperm.xlu1 %2149, %v863_v45   ;;  %878 = vperm.xlu0 %2148, %v864_v46  }
 0x132   : > { %883 = vperm.xlu1 %2149, %v865_v47   ;;  %1005 = vperm.xlu0 %2148, %v999_v48  }
 0x136   : > { %1010 = vperm.xlu1 %2149, %v1000_v49   ;;  %1015 = vperm.xlu0 %2148, %v1001_v50  }
 0x13a   : > { %1020 = vperm.xlu1 %2149, %v1002_v51  }
 0x194   : > { %v2152_v52 = vpop.permute.xlu0 %2151 }
 0x195   : > { %v2154_v53 = vunpack.i.h.bf16 %v2152_v52  ;;  %v2153_v54 = vunpack.i.l.bf16 %v2152_v52 }
 0x197   : > { %v2031_v55 = vpack.c.bf16 %v2154_v53, %v2153_v54 }
 0x198   : > { %v2157_v56 = vpop.permute.xlu1 %2156  ;;  %v2162_v61 = vpop.permute.xlu0 %2161 }
 0x199   : > { %v2159_v57 = vunpack.i.h.bf16 %v2157_v56  ;;  %v2158_v58 = vunpack.i.l.bf16 %v2157_v56  ;;  %2033 = vmatprep.subr.msk.bf16.mxu1 %vm2032_vm4, %v2031_v55  ;;  %v2164_v0 = vunpack.i.h.bf16 %v2162_v61  ;;  %v2163_v1 = vunpack.i.l.bf16 %v2162_v61  ;;  %v1807_v61 = vld [vmem:[%s2590_s4 + $0x28] sm:$0xff] }
 0x19a   : > { %2036 = vmatpush3.bf16.msk.msra.mxu1 %vm2032_vm4, %v2031_v55  ;;  %v1770_v55 = vld [vmem:[%s2589_s3 + $0x80] sm:$0xff] }
 0x19b   : > { %v2037_v59 = vpack.c.bf16 %v2159_v57, %v2158_v58  ;;  %v2051_v7 = vpack.c.bf16 %v2164_v0, %v2163_v1  ;;  %v1820_v0 = vld [vmem:[%s2592_s6 + $0x30] sm:$0xff]  ;;  %v1819_v1 = vld [vmem:[%s2592_s6 + $0x28] sm:$0xff] }
 0x19c   : > { %v2167_v3 = vpop.permute.xlu1 %2166 }
 0x19d   : > { %2039 = vmatprep.subr.msk.bf16.mxu1 %vm2032_vm4, %v2037_v59  ;;  %v2169_v8 = vunpack.i.h.bf16 %v2167_v3  ;;  %v2168_v9 = vunpack.i.l.bf16 %v2167_v3  ;;  %v1821_v3 = vld [vmem:[%s2592_s6 + $0x38] sm:$0xff] }
 0x19e   : > { %2042 = vmatpush3.bf16.msk.msra.mxu1 %vm2032_vm4, %v2037_v59 }
 0x19f   : > { %2044 = vmatprep.subr.bf16.mxu1 %v2043_v60  ;;  %v2057_v12 = vpack.c.bf16 %v2169_v8, %v2168_v9 }
 0x1a1   : > { %1917 = vmatmul.mubr.msk.f32.vlgmr.msra.gmra.mrb[0].mxu1 %vm562_vm1, %v1731_v62  ;;  %v1818_v62 = vld [vmem:[%s2592_s6 + $0x20] sm:$0xff] }
 0x1a2   : > { %2046 = vmatpush3.bf16.msra.mxu1 %v2043_v60  ;;  %1919 = vmatprep.mubr.msk.f32.mxu1 %vm562_vm1, %v1732_v63  ;;  %v1808_v60 = vld [vmem:[%s2590_s4 + $0x30] sm:$0xff]  ;;  %v1809_v63 = vld [vmem:[%s2590_s4 + $0x38] sm:$0xff] }
 0x1a3   : > { %2048 = vmatprep.subr.bf16.mxu1 %v2047_v2 }
 0x1a5   : > { %1920 = vmatmul.mubr.msk.f32.gmra.mrb[2].mxu1 %vm562_vm1, %v1733_v4 }
 0x1a6   : > { %2050 = vmatpush3.bf16.msra.mxu1 %v2047_v2  ;;  %1930 = vmatprep.mubr.msk.f32.mxu1 %vm562_vm1, %v1726_v5  ;;  %v1547_v2 = vld [vmem:[%s2594_s8] sm:$0xff] }
 0x1a7   : > { %2053 = vmatprep.subr.msk.bf16.mxu1 %vm2370_vm7, %v2051_v7 }
 0x1a9   : > { %1931 = vmatmul.mubr.msk.f32.vlgmr.msra.gmra.mrb[0].mxu1 %vm562_vm1, %v1727_v10  ;;  %v869_v20 = vpop.permute.xlu0 %868 }
 0x1aa   : > { %2056 = vmatpush3.bf16.msk.msra.mxu1 %vm2370_vm7, %v2051_v7  ;;  %1933 = vmatprep.mubr.msk.f32.mxu1 %vm562_vm1, %v1728_v11 }
 0x1ab   : > { %2059 = vmatprep.subr.msk.bf16.mxu1 %vm2370_vm7, %v2057_v12 }
 0x1ad   : > { %1934 = vmatmul.mubr.msk.f32.gmra.mrb[2].mxu1 %vm562_vm1, %v1729_v13  ;;  %v874_v19 = vpop.permute.xlu1 %873  ;;  %v879_v29 = vpop.permute.xlu0 %878 }
 0x1ae   : > { %2062 = vmatpush3.bf16.msk.msra.mxu1 %vm2370_vm7, %v2057_v12  ;;  %1944 = vmatprep.mubr.msk.f32.mxu1 %vm562_vm1, %v757_v14 }
 0x1b1   : > { %1945 = vmatmul.mubr.msk.f32.vlgmr.msra.gmra.mrb[0].mxu1 %vm562_vm1, %v758_v15  ;;  %v884_v26 = vpop.permute.xlu1 %883  ;;  %v1006_v46 = vpop.permute.xlu0 %1005  ;;  %v1771_v15 = vld [vmem:[%s2589_s3 + $0x88] sm:$0xff] }
 0x1b2   : > { %1947 = vmatprep.mubr.msk.f32.mxu1 %vm562_vm1, %v759_v16  ;;  %v1772_v16 = vld [vmem:[%s2589_s3 + $0x90] sm:$0xff] }
 0x1b5   : > { %1948 = vmatmul.mubr.msk.f32.gmra.mrb[2].mxu1 %vm562_vm1, %v760_v17  ;;  %v1011_v44 = vpop.permute.xlu1 %1010 }
 0x1b9   : > { %v1021_v56 = vpop.permute.xlu1 %1020 }
 0x284   : > { %v1946_v21 = vpop.f32.mrb[0].mxu1 }
 0x285   : > { %v887_v22 = vadd.f32 %v1946_v21, %v874_v19  ;;  %v839_v23 = vpop.f32.mrb[1].mxu1  ;;  %v1766_v21 = vld [vmem:[%s2589_s3 + $0xa0] sm:$0xff] }
 0x286   : > { %v886_v24 = vadd.f32 %v869_v20, %v839_v23  ;;  %v1773_v20 = vld [vmem:[%s2589_s3 + $0x98] sm:$0xff] }
 0x287   : > { %v891_v25 = vmax.f32 %v887_v22, 0.0 }
 0x288   : > { %v890_v27 = vmax.f32 %v886_v24, 0.0  ;;  %v1949_v28 = vpop.f32.mrb[2].mxu1 }
 0x289   : > { %v889_v30 = vadd.f32 %v1949_v28, %v884_v26  ;;  %v849_v31 = vpop.f32.mrb[3].mxu1  ;;  %v1767_v26 = vld [vmem:[%s2589_s3 + $0xa8] sm:$0xff] }
 0x28a   : > { %v2063_v32 = vpack.c.bf16 %v891_v25, %v890_v27  ;;  %v888_v34 = vadd.f32 %v879_v29, %v849_v31  ;;  %v1768_v27 = vld [vmem:[%s2589_s3 + $0xb0] sm:$0xff]  ;;  %v1769_v29 = vld [vmem:[%s2589_s3 + $0xb8] sm:$0xff]  ;;  %v1791_v31 = vld [vmem:[%s2589_s3 + $0x68] sm:$0xff] }
 0x28b   : > { %v893_v36 = vmax.f32 %v889_v30, 0.0  ;;  %v1790_v30 = vld [vmem:[%s2589_s3 + $0x60] sm:$0xff] }
 0x28c   : > { %v892_v37 = vmax.f32 %v888_v34, 0.0  ;;  %2064 = vmatprep.subr.bf16.mxu0 %v2063_v32  ;;  %v1793_v34 = vld [vmem:[%s2589_s3 + $0x78] sm:$0xff] }
 0x28d   : > { %2066 = vmatpush3.bf16.msra.mxu0 %v2063_v32  ;;  %v1792_v32 = vld [vmem:[%s2589_s3 + $0x70] sm:$0xff] }
 0x28e   : > { %v2067_v38 = vpack.c.bf16 %v893_v36, %v892_v37  ;;  %v1810_v36 = vld [vmem:[%s2591_s5 + $0x20] sm:$0xff] }
 0x28f   : > { %2014 = vmatprep.mubr.msk.f32.mxu1 %vm562_vm1, %v1810_v36 }
 0x290   : > { %2068 = vmatprep.subr.bf16.mxu0 %v2067_v38 }
 0x291   : > { %2070 = vmatpush3.bf16.msra.mxu0 %v2067_v38 }
 0x294   : > { %1959 = vmatmul.mubr.msk.f32.vlgmr.msra.gmra.mrb[4].mxu0 %vm562_vm1, %v895_v39 }
 0x295   : > { %1961 = vmatprep.mubr.msk.f32.mxu0 %vm562_vm1, %v896_v41 }
 0x298   : > { %1962 = vmatmul.mubr.msk.f32.gmra.mrb[6].mxu0 %vm562_vm1, %v897_v43 }
 0x299   : > { %1972 = vmatprep.mubr.msk.f32.mxu0 %vm562_vm1, %v1770_v55 }
 0x367   : > { %v1960_v45 = vpop.f32.mrb[4].mxu0 }
 0x368   : > { %v996_v47 = vadd.f32 %v1960_v45, %v2310_v33  ;;  %v976_v48 = vpop.f32.mrb[5].mxu0 }
 0x369   : > { %v995_v49 = vadd.f32 %v976_v48, %v2312_v35  ;;  %v1016_v35 = vpop.permute.xlu0 %1015 }
 0x36a   : > { %v2430_v50 = vadd.f32 %v1011_v44, %v996_v47 }
 0x36b   : > { %v2432_v51 = vadd.f32 %v1006_v46, %v995_v49  ;;  %v1963_v52 = vpop.f32.mrb[6].mxu0 }
 0x36c   : > { %v998_v53 = vadd.f32 %v1963_v52, %v2320_v40  ;;  %v986_v54 = vpop.f32.mrb[7].mxu0 }
 0x36d   : > { %v997_v57 = vadd.f32 %v986_v54, %v2322_v42  ;;  %v2170_v33 = vpack.i.bf16 %v2430_v50, %v2432_v51  ;;  %v1806_v42 = vld [vmem:[%s2590_s4 + $0x20] sm:$0xff]  ;;  %v2083_v13 = vpack.c.bf16 %v2430_v50, %v2432_v51 }
 0x36e   : > { %v2442_v58 = vadd.f32 %v1021_v56, %v998_v53 }
 0x36f   : > { %v2444_v59 = vadd.f32 %v1016_v35, %v997_v57  ;;  %2171 = vrot.lane.b32.xlu0 %v2170_v33, %s2204_s20  ;;  %v1811_v35 = vld [vmem:[%s2591_s5 + $0x28] sm:$0xff] }
 0x371   : > { %v2175_v40 = vpack.i.bf16 %v2442_v58, %v2444_v59  ;;  %v2087_v19 = vpack.c.bf16 %v2442_v58, %v2444_v59 }
 0x373   : > { %2181 = vrot.lane.b32.xlu0 %v2170_v33, %s2205_s21  ;;  %2176 = vrot.lane.b32.xlu1 %v2175_v40, %s2204_s20 }
 0x377   : > { %1381 = vperm.xlu0 %2148, %v1806_v42   ;;  %2186 = vrot.lane.b32.xlu1 %v2175_v40, %s2205_s21  ;;  %v1812_v40 = vld [vmem:[%s2591_s5 + $0x30] sm:$0xff]  ;;  %v1813_v42 = vld [vmem:[%s2591_s5 + $0x38] sm:$0xff] }
 0x37b   : > { %1391 = vperm.xlu0 %2148, %v1808_v60   ;;  %1386 = vperm.xlu1 %2149, %v1807_v61   ;;  %v2206_v60 = vmov 0.0|0.0   ;;  %v2208_v61 = vmov 0.0  }
 0x37f   : > { %1520 = vperm.xlu0 %2148, %v1818_v62   ;;  %1396 = vperm.xlu1 %2149, %v1809_v63  }
 0x383   : > { %1530 = vperm.xlu0 %2148, %v1820_v0   ;;  %1525 = vperm.xlu1 %2149, %v1819_v1  }
 0x387   : > { %1550 = vperm.xlu0 %2148, %v1547_v2   ;;  %1535 = vperm.xlu1 %2149, %v1821_v3  }
 0x3e1   : > { %v2172_v4 = vpop.permute.xlu0 %2171 }
 0x3e2   : > { %v2174_v5 = vunpack.i.h.bf16 %v2172_v4  ;;  %v2173_v7 = vunpack.i.l.bf16 %v2172_v4 }
 0x3e4   : > { %v2071_v8 = vpack.c.bf16 %v2174_v5, %v2173_v7 }
 0x3e5   : > { %v2177_v9 = vpop.permute.xlu1 %2176  ;;  %v2182_v14 = vpop.permute.xlu0 %2181 }
 0x3e6   : > { %v2179_v10 = vunpack.i.h.bf16 %v2177_v9  ;;  %v2178_v11 = vunpack.i.l.bf16 %v2177_v9  ;;  %2073 = vmatprep.subr.msk.bf16.mxu0 %vm2370_vm7, %v2071_v8  ;;  %v2184_v17 = vunpack.i.h.bf16 %v2182_v14  ;;  %v2183_v18 = vunpack.i.l.bf16 %v2182_v14 }
 0x3e7   : > { %2076 = vmatpush3.bf16.msk.msra.mxu0 %vm2370_vm7, %v2071_v8 }
 0x3e8   : > { %v2077_v12 = vpack.c.bf16 %v2179_v10, %v2178_v11  ;;  %v2091_v23 = vpack.c.bf16 %v2184_v17, %v2183_v18 }
 0x3e9   : > { %v2187_v6 = vpop.permute.xlu1 %2186 }
 0x3ea   : > { %2079 = vmatprep.subr.msk.bf16.mxu0 %vm2370_vm7, %v2077_v12  ;;  %v2189_v24 = vunpack.i.h.bf16 %v2187_v6  ;;  %v2188_v25 = vunpack.i.l.bf16 %v2187_v6 }
 0x3eb   : > { %2082 = vmatpush3.bf16.msk.msra.mxu0 %vm2370_vm7, %v2077_v12 }
 0x3ec   : > { %2084 = vmatprep.subr.bf16.mxu0 %v2083_v13  ;;  %v2097_v28 = vpack.c.bf16 %v2189_v24, %v2188_v25 }
 0x3ee   : > { %1973 = vmatmul.mubr.msk.f32.vlgmr.msra.gmra.mrb[8].mxu0 %vm562_vm1, %v1771_v15 }
 0x3ef   : > { %2086 = vmatpush3.bf16.msra.mxu0 %v2083_v13  ;;  %1975 = vmatprep.mubr.msk.f32.mxu0 %vm562_vm1, %v1772_v16 }
 0x3f0   : > { %2088 = vmatprep.subr.bf16.mxu0 %v2087_v19 }
 0x3f2   : > { %1976 = vmatmul.mubr.msk.f32.gmra.mrb[10].mxu0 %vm562_vm1, %v1773_v20 }
 0x3f3   : > { %2090 = vmatpush3.bf16.msra.mxu0 %v2087_v19  ;;  %1986 = vmatprep.mubr.msk.f32.mxu0 %vm562_vm1, %v1766_v21 }
 0x3f4   : > { %2093 = vmatprep.subr.msk.bf16.mxu0 %vm2503_vm10, %v2091_v23 }
 0x3f6   : > { %1987 = vmatmul.mubr.msk.f32.vlgmr.msra.gmra.mrb[8].mxu0 %vm562_vm1, %v1767_v26  ;;  %v1382_v38 = vpop.permute.xlu0 %1381 }
 0x3f7   : > { %2096 = vmatpush3.bf16.msk.msra.mxu0 %vm2503_vm10, %v2091_v23  ;;  %1989 = vmatprep.mubr.msk.f32.mxu0 %vm562_vm1, %v1768_v27 }
 0x3f8   : > { %2099 = vmatprep.subr.msk.bf16.mxu0 %vm2503_vm10, %v2097_v28 }
 0x3fa   : > { %1990 = vmatmul.mubr.msk.f32.gmra.mrb[10].mxu0 %vm562_vm1, %v1769_v29  ;;  %v1387_v37 = vpop.permute.xlu1 %1386  ;;  %v1392_v49 = vpop.permute.xlu0 %1391 }
 0x3fb   : > { %2102 = vmatpush3.bf16.msk.msra.mxu0 %vm2503_vm10, %v2097_v28  ;;  %2000 = vmatprep.mubr.msk.f32.mxu0 %vm562_vm1, %v1790_v30 }
 0x3fe   : > { %2001 = vmatmul.mubr.msk.f32.vlgmr.msra.gmra.mrb[8].mxu0 %vm562_vm1, %v1791_v31  ;;  %v1397_v46 = vpop.permute.xlu1 %1396  ;;  %v1521_v0 = vpop.permute.xlu0 %1520 }
 0x3ff   : > { %2003 = vmatprep.mubr.msk.f32.mxu0 %vm562_vm1, %v1792_v32 }
 0x402   : > { %2004 = vmatmul.mubr.msk.f32.gmra.mrb[10].mxu0 %vm562_vm1, %v1793_v34  ;;  %v1526_v62 = vpop.permute.xlu1 %1525  ;;  %v1531_v12 = vpop.permute.xlu0 %1530 }
 0x406   : > { %v1536_v10 = vpop.permute.xlu1 %1535  ;;  %v1551_v15 = vpop.permute.xlu0 %1550 }
 0x4d1   : > { %v2002_v39 = vpop.f32.mrb[8].mxu0 }
 0x4d2   : > { %v1400_v41 = vadd.f32 %v2002_v39, %v1387_v37  ;;  %v1351_v43 = vpop.f32.mrb[9].mxu0 }
 0x4d3   : > { %v1399_v44 = vadd.f32 %v1382_v38, %v1351_v43 }
 0x4d4   : > { %v1404_v45 = vmax.f32 %v1400_v41, 0.0 }
 0x4d5   : > { %v1403_v47 = vmax.f32 %v1399_v44, 0.0  ;;  %v2005_v48 = vpop.f32.mrb[10].mxu0 }
 0x4d6   : > { %v1402_v52 = vadd.f32 %v2005_v48, %v1397_v46  ;;  %v1361_v53 = vpop.f32.mrb[11].mxu0 }
 0x4d7   : > { %v2103_v54 = vpack.c.bf16 %v1404_v45, %v1403_v47  ;;  %v1401_v55 = vadd.f32 %v1392_v49, %v1361_v53 }
 0x4d8   : > { %v1406_v56 = vmax.f32 %v1402_v52, 0.0 }
 0x4d9   : > { %v1405_v57 = vmax.f32 %v1401_v55, 0.0  ;;  %2104 = vmatprep.subr.bf16.mxu1 %v2103_v54 }
 0x4da   : > { %2106 = vmatpush3.bf16.msra.mxu1 %v2103_v54 }
 0x4db   : > { %v2107_v33 = vpack.c.bf16 %v1406_v56, %v1405_v57 }
 0x4dd   : > { %2108 = vmatprep.subr.bf16.mxu1 %v2107_v33 }
 0x4de   : > { %2110 = vmatpush3.bf16.msra.mxu1 %v2107_v33 }
 0x4df   : > { %2111 = vmatprep.subr.bf16.mxu1 %v2206_v60 }
 0x4e1   : > { %2015 = vmatmul.mubr.msk.f32.vlgmr.msra.gmra.mrb[4].mxu1 %vm562_vm1, %v1811_v35 }
 0x4e2   : > { %2017 = vmatprep.mubr.msk.f32.mxu1 %vm562_vm1, %v1812_v40 }
 0x4e5   : > { %2018 = vmatmul.mubr.msk.f32.gmra.mrb[6].mxu1 %vm562_vm1, %v1813_v42 }
 0x4e6   : > { %2028 = vmatprep.mubr.msk.f32.mxu1 %vm2207_vm11, %v2208_v61 }
 0x5b4   : > { %v2016_v63 = vpop.f32.mrb[4].mxu1 }
 0x5b5   : > { %v1510_v1 = vadd.f32 %v2016_v63, %v2430_v50  ;;  %v1490_v2 = vpop.f32.mrb[5].mxu1 }
 0x5b6   : > { %v1509_v3 = vadd.f32 %v1490_v2, %v2432_v51 }
 0x5b7   : > { %v1539_v4 = vadd.f32 %v1526_v62, %v1510_v1 }
 0x5b8   : > { %v1538_v5 = vadd.f32 %v1521_v0, %v1509_v3  ;;  %v2019_v7 = vpop.f32.mrb[6].mxu1 }
 0x5b9   : > { %1543 = vst.msk [vmem:[%s363_s22 + $0x8] sm:$0xff] %vm369_vm0, %v1539_v4  ;;  %v1512_v8 = vadd.f32 %v2019_v7, %v2442_v58  ;;  %v1500_v9 = vpop.f32.mrb[7].mxu1  ;;  %v1546_v58 = vld [vmem:[%s2593_s7] sm:$0xff] }
 0x5ba   : > { %1542 = vst.msk [vmem:[%s363_s22] sm:$0xff] %vm369_vm0, %v1538_v5  ;;  %v2112_v50 = vpack.c.bf16 %v1539_v4, %v1538_v5  ;;  %v1511_v11 = vadd.f32 %v1500_v9, %v2444_v59 }
 0x5bb   : > { %v1541_v13 = vadd.f32 %v1536_v10, %v1512_v8 }
 0x5bc   : > { %v1540_v14 = vadd.f32 %v1531_v12, %v1511_v11  ;;  %2113 = vmatpush3.bf16.msra.mxu1 %v2112_v50 }
 0x5bd   : > { %1545 = vst.msk [vmem:[%s363_s22 + $0x18] sm:$0xff] %vm369_vm0, %v1541_v13  ;;  %2114 = vmatprep.subr.bf16.mxu1 %v2206_v60 }
 0x5be   : > { %1544 = vst.msk [vmem:[%s363_s22 + $0x10] sm:$0xff] %vm369_vm0, %v1540_v14  ;;  %v2115_v51 = vpack.c.bf16 %v1541_v13, %v1540_v14 }
 0x5c0   : > { %2116 = vmatpush3.bf16.msra.mxu1 %v2115_v51 }
 0x5c3   : > { %2029 = vmatmul.mubr.msk.f32.vlgmr.msra.gmra.mrb[8].mxu1 %vm562_vm1, %v1546_v58 }
 0x696   : > { %v1622_v59 = vpop.f32.mrb[8].mxu1 }
 0x697   : > { %v1623_v16 = vadd.f32 %v1622_v59, %v1551_v15  ;;  %v2030_v17 = vpop.f32.mrb[9].mxu1 }
 0x699   : > { %1626 = vst.msk [vmem:[%s367_s28] sm:$0xff] %vm369_vm0, %v1623_v16 }
 0x69a PF: > { %s21_s13 = sadd.s32 1, %s2200_s13  }
 0x69b   : > { %p18_p4 = scmp.ge.s32.totalorder %s21_s13, 4  }
 0x69d   :  { %20 = sbr.rel (!%p18_p4) target bundleno = 1 (0x1), region = 106 }

</bundles_post_ra>
